<compile_context>
chip_gen: v7x
topology: tpu7x:2x2x1
jax: 0.10.0
libtpu: 0.0.40
codegen_flags: <defaults>
</compile_context>

<pallas_src>
import functools

import jax
import jax.numpy as jnp
import numpy as np
from jax import lax
from jax.experimental import pallas as pl
from jax.experimental.pallas import tpu as pltpu


# ------------------------------ Pallas kernel ------------------------------ #

def _inception_kernel(H, W, cin, c1, c2_0, c2_1, c3_0, c3_1, c4,
                      x_ref, ws1_ref, bs1_ref, w22_ref, b22_ref,
                      w32_ref, b32_ref, w42_ref, b42_ref, o_ref,
                      pool_pad, t2_pad, t3_pad):
    HW = H * W
    x = x_ref[0]                                    # (H, W, cin)
    xm = x.reshape(HW, cin)

    # ---- fused 1x1 convs: [b1_1 | b2_1 | b3_1] in one wide matmul + bias + relu ----
    z = jnp.dot(xm, ws1_ref[...], preferred_element_type=jnp.float32)
    z = jnp.maximum(z + bs1_ref[...], 0.0)
    b1 = z[:, :c1]                                  # branch-1 output
    t2 = z[:, c1:c1 + c2_0]                         # branch-2 intermediate
    t3 = z[:, c1 + c2_0:c1 + c2_0 + c3_0]           # branch-3 intermediate

    # ---- branch 4: 3x3 / stride-1 / pad-1 max-pool (-inf pad) fused with 1x1 conv ----
    pool_pad[...] = jnp.full((H + 2, W + 2, cin), -jnp.inf, dtype=jnp.float32)
    pool_pad[1:H + 1, 1:W + 1, :] = x
    pooled = x                                      # center tap
    for dy in range(3):
        for dx in range(3):
            if dy == 1 and dx == 1:
                continue
            pooled = jnp.maximum(pooled, pool_pad[dy:dy + H, dx:dx + W, :])
    b4 = jnp.dot(pooled.reshape(HW, cin), w42_ref[...],
                 preferred_element_type=jnp.float32)
    b4 = jnp.maximum(b4 + b42_ref[...], 0.0)

    # ---- branch 2: 3x3 conv (pad 1) on t2 via per-tap accumulation (no im2col) ----
    t2_pad[...] = jnp.zeros((H + 2, W + 2, c2_0), dtype=jnp.float32)
    t2_pad[1:H + 1, 1:W + 1, :] = t2.reshape(H, W, c2_0)
    acc2 = jnp.broadcast_to(b22_ref[...], (HW, c2_1)).astype(jnp.float32)
    for dy in range(3):
        for dx in range(3):
            k = dy * 3 + dx
            tap = t2_pad[dy:dy + H, dx:dx + W, :].reshape(HW, c2_0)
            acc2 = acc2 + jnp.dot(tap, w22_ref[k],
                                  preferred_element_type=jnp.float32)
    b2 = jnp.maximum(acc2, 0.0)

    # ---- branch 3: 5x5 conv (pad 2) on t3 via per-tap accumulation (no im2col) ----
    t3_pad[...] = jnp.zeros((H + 4, W + 4, c3_0), dtype=jnp.float32)
    t3_pad[2:H + 2, 2:W + 2, :] = t3.reshape(H, W, c3_0)
    acc3 = jnp.broadcast_to(b32_ref[...], (HW, c3_1)).astype(jnp.float32)
    for dy in range(5):
        for dx in range(5):
            k = dy * 5 + dx
            tap = t3_pad[dy:dy + H, dx:dx + W, :].reshape(HW, c3_0)
            acc3 = acc3 + jnp.dot(tap, w32_ref[k],
                                  preferred_element_type=jnp.float32)
    b3 = jnp.maximum(acc3, 0.0)

    # ---- single concatenated, lane-dense store of the final output slab ----
    full = jnp.concatenate([b1, b2, b3, b4], axis=-1)          # (HW, Ctotal)
    o_ref[0] = full.reshape(H, W, c1 + c2_1 + c3_1 + c4)


# ------------------------------ JAX wrapper -------------------------------- #

def inception_forward(x_nchw, params):
    x = jnp.transpose(x_nchw, (0, 2, 3, 1)).astype(jnp.float32)   # NCHW -> NHWC
    n, h, w, cin = x.shape

    w1, bias1 = params["b1_1"]
    w21, bias21 = params["b2_1"]
    w22, bias22 = params["b2_2"]
    w31, bias31 = params["b3_1"]
    w32, bias32 = params["b3_2"]
    w42, bias42 = params["b4_2"]

    c1 = w1.shape[-1]
    c2_0, c2_1 = w22.shape[2], w22.shape[3]
    c3_0, c3_1 = w32.shape[2], w32.shape[3]
    c4 = w42.shape[-1]
    c_s1 = c1 + c2_0 + c3_0
    c_total = c1 + c2_1 + c3_1 + c4

    # Fused stage-1 1x1 weights: (cin, c1 + c2_0 + c3_0).
    ws1 = jnp.concatenate([w1.reshape(cin, c1),
                           w21.reshape(cin, c2_0),
                           w31.reshape(cin, c3_0)], axis=1)
    bs1 = jnp.concatenate([bias1, bias21, bias31]).reshape(1, c_s1)
    w22f = w22.reshape(9, c2_0, c2_1)
    w32f = w32.reshape(25, c3_0, c3_1)
    w42f = w42.reshape(cin, c4)

    kernel = functools.partial(_inception_kernel, h, w, cin,
                               c1, c2_0, c2_1, c3_0, c3_1, c4)

    out_nhwc = pl.pallas_call(
        kernel,
        out_shape=jax.ShapeDtypeStruct((n, h, w, c_total), jnp.float32),
        grid=(n,),
        in_specs=[
            pl.BlockSpec((1, h, w, cin), lambda i: (i, 0, 0, 0)),      # x (one image)
            pl.BlockSpec((cin, c_s1), lambda i: (0, 0)),               # fused 1x1 W
            pl.BlockSpec((1, c_s1), lambda i: (0, 0)),                 # fused 1x1 b
            pl.BlockSpec((9, c2_0, c2_1), lambda i: (0, 0, 0)),        # 3x3 W (per tap)
            pl.BlockSpec((1, c2_1), lambda i: (0, 0)),                 # 3x3 b
            pl.BlockSpec((25, c3_0, c3_1), lambda i: (0, 0, 0)),       # 5x5 W (per tap)
            pl.BlockSpec((1, c3_1), lambda i: (0, 0)),                 # 5x5 b
            pl.BlockSpec((cin, c4), lambda i: (0, 0)),                 # pool-branch 1x1 W
            pl.BlockSpec((1, c4), lambda i: (0, 0)),                   # pool-branch 1x1 b
        ],
        out_specs=pl.BlockSpec((1, h, w, c_total), lambda i: (i, 0, 0, 0)),
        scratch_shapes=[
            pltpu.VMEM((h + 2, w + 2, cin), jnp.float32),    # -inf padded x (pool)
            pltpu.VMEM((h + 2, w + 2, c2_0), jnp.float32),   # zero padded t2 (3x3)
            pltpu.VMEM((h + 4, w + 4, c3_0), jnp.float32),   # zero padded t3 (5x5)
        ],
        compiler_params=pltpu.CompilerParams(
            dimension_semantics=("parallel",),
            vmem_limit_bytes=32 * 1024 * 1024,
        ),
    )(x, ws1, bs1, w22f, bias22.reshape(1, c2_1),
      w32f, bias32.reshape(1, c3_1), w42f, bias42.reshape(1, c4))

    return jnp.transpose(out_nhwc, (0, 3, 1, 2))              # NHWC -> NCHW


# ------------------------------ param init --------------------------------- #

def init_inception_params(key, in_ch, c1, c2, c3, c4):
    def conv_init(k, kh, kw, cin, cout):
        kw_key, kb_key = jax.random.split(k)
        bound = 1.0 / np.sqrt(cin * kh * kw)
        w = jax.random.uniform(kw_key, (kh, kw, cin, cout), jnp.float32,
                               -bound, bound)
        b = jax.random.uniform(kb_key, (cout,), jnp.float32, -bound, bound)
        return w, b

    keys = jax.random.split(key, 6)
    return {
        "b1_1": conv_init(keys[0], 1, 1, in_ch, c1),
        "b2_1": conv_init(keys[1], 1, 1, in_ch, c2[0]),
        "b2_2": conv_init(keys[2], 3, 3, c2[0], c2[1]),
        "b3_1": conv_init(keys[3], 1, 1, in_ch, c3[0]),
        "b3_2": conv_init(keys[4], 5, 5, c3[0], c3[1]),
        "b4_2": conv_init(keys[5], 1, 1, in_ch, c4),
    }


# --------------------------- pure-JAX reference ----------------------------- #

def _ref_conv_relu(x, w, b, pad):
    y = lax.conv_general_dilated(
        x, w, (1, 1), [(pad, pad), (pad, pad)],
        dimension_numbers=("NHWC", "HWIO", "NHWC"))
    return jax.nn.relu(y + b)


def inception_ref(x_nchw, params):
    x = jnp.transpose(x_nchw, (0, 2, 3, 1))
    b1 = _ref_conv_relu(x, *params["b1_1"], pad=0)
    b2 = _ref_conv_relu(_ref_conv_relu(x, *params["b2_1"], pad=0),
                        *params["b2_2"], pad=1)
    b3 = _ref_conv_relu(_ref_conv_relu(x, *params["b3_1"], pad=0),
                        *params["b3_2"], pad=2)
    pooled = lax.reduce_window(x, -jnp.inf, lax.max,
                               (1, 3, 3, 1), (1, 1, 1, 1),
                               [(0, 0), (1, 1), (1, 1), (0, 0)])
    b4 = _ref_conv_relu(pooled, *params["b4_2"], pad=0)
    out = jnp.concatenate([b1, b2, b3, b4], axis=-1)
    return jnp.transpose(out, (0, 3, 1, 2))


# ---------------------------------- main ------------------------------------ #

if __name__ == "__main__":
    key = jax.random.PRNGKey(0)
    kx, kp = jax.random.split(key)

    N, C, H, W = 2, 4, 16, 16
    c1, c2, c3, c4 = 8, (6, 8), (4, 8), 8

    x = jax.random.normal(kx, (N, C, H, W), jnp.float32)
    params = init_inception_params(kp, C, c1, c2, c3, c4)

    out = jax.block_until_ready(inception_forward(x, params))
    ref = jax.block_until_ready(inception_ref(x, params))

    assert out.shape == (N, c1 + c2[1] + c3[1] + c4, H, W), out.shape
    if not np.allclose(np.asarray(out), np.asarray(ref), rtol=1e-4, atol=1e-4):
        raise AssertionError("Pallas Inception result mismatches JAX reference")

    print("KERNEL_OK")
</pallas_src>

<mosaic_0001>
module attributes {stable_mosaic.version = 11 : i64} {
  func.func @_inception_kernel(%arg0: i32, %arg1: memref<1x16x16x4xf32, #tpu.memory_space<vmem>>, %arg2: memref<4x18xf32, #tpu.memory_space<vmem>>, %arg3: memref<1x18xf32, #tpu.memory_space<vmem>>, %arg4: memref<9x6x8xf32, #tpu.memory_space<vmem>>, %arg5: memref<1x8xf32, #tpu.memory_space<vmem>>, %arg6: memref<25x4x8xf32, #tpu.memory_space<vmem>>, %arg7: memref<1x8xf32, #tpu.memory_space<vmem>>, %arg8: memref<4x8xf32, #tpu.memory_space<vmem>>, %arg9: memref<1x8xf32, #tpu.memory_space<vmem>>, %arg10: memref<1x16x16x32xf32, #tpu.memory_space<vmem>>, %arg11: memref<18x18x4xf32, #tpu.memory_space<vmem>>, %arg12: memref<18x18x6xf32, #tpu.memory_space<vmem>>, %arg13: memref<20x20x4xf32, #tpu.memory_space<vmem>>) attributes {dimension_semantics = [#tpu.dimension_semantics<parallel>], iteration_bounds = array<i64: 2>, scalar_prefetch = 0 : i64, scratch_operands = 3 : i64, tpu.core_type = #tpu.core_type<tc>, window_params = [{transform_indices = @transform_0, window_bounds = array<i64: 1, 16, 16, 4>}, {pipeline_mode = #tpu.pipeline_mode<synchronous>, transform_indices = @transform_1, window_bounds = array<i64: 4, 18>}, {pipeline_mode = #tpu.pipeline_mode<synchronous>, transform_indices = @transform_2, window_bounds = array<i64: 1, 18>}, {pipeline_mode = #tpu.pipeline_mode<synchronous>, transform_indices = @transform_3, window_bounds = array<i64: 9, 6, 8>}, {pipeline_mode = #tpu.pipeline_mode<synchronous>, transform_indices = @transform_4, window_bounds = array<i64: 1, 8>}, {pipeline_mode = #tpu.pipeline_mode<synchronous>, transform_indices = @transform_5, window_bounds = array<i64: 25, 4, 8>}, {pipeline_mode = #tpu.pipeline_mode<synchronous>, transform_indices = @transform_6, window_bounds = array<i64: 1, 8>}, {pipeline_mode = #tpu.pipeline_mode<synchronous>, transform_indices = @transform_7, window_bounds = array<i64: 4, 8>}, {pipeline_mode = #tpu.pipeline_mode<synchronous>, transform_indices = @transform_8, window_bounds = array<i64: 1, 8>}, {transform_indices = @transform_9, window_bounds = array<i64: 1, 16, 16, 32>}]} {
    %c0 = arith.constant 0 : index
    %c0_0 = arith.constant 0 : index
    %c0_1 = arith.constant 0 : index
    %c0_2 = arith.constant 0 : index
    %0 = vector.load %arg1[%c0, %c0_0, %c0_1, %c0_2] : memref<1x16x16x4xf32, #tpu.memory_space<vmem>>, vector<1x16x16x4xf32>
    %1 = vector.shape_cast %0 : vector<1x16x16x4xf32> to vector<16x16x4xf32>
    %2 = vector.shape_cast %1 : vector<16x16x4xf32> to vector<256x4xf32>
    %c0_3 = arith.constant 0 : index
    %c0_4 = arith.constant 0 : index
    %3 = vector.load %arg2[%c0_3, %c0_4] : memref<4x18xf32, #tpu.memory_space<vmem>>, vector<4x18xf32>
    %cst = arith.constant dense<0.000000e+00> : vector<256x18xf32>
    %4 = tpu.matmul %2, %3, %cst {dimension_numbers = #tpu.dot_dimension_numbers<[1], [0], [0], [1], [0, 0, 1, 1], [], []>} : vector<256x4xf32>, vector<4x18xf32>, vector<256x18xf32> -> vector<256x18xf32>
    %c0_5 = arith.constant 0 : index
    %c0_6 = arith.constant 0 : index
    %5 = vector.load %arg3[%c0_5, %c0_6] : memref<1x18xf32, #tpu.memory_space<vmem>>, vector<1x18xf32>
    %6 = vector.broadcast %5 : vector<1x18xf32> to vector<256x18xf32>
    %7 = arith.addf %4, %6 : vector<256x18xf32>
    %cst_7 = arith.constant 0.000000e+00 : f32
    %8 = vector.broadcast %cst_7 : f32 to vector<256x18xf32>
    %9 = arith.maximumf %7, %8 : vector<256x18xf32>
    %10 = vector.extract_strided_slice %9 {offsets = [0, 0], sizes = [256, 8], strides = [1, 1]} : vector<256x18xf32> to vector<256x8xf32>
    %11 = vector.extract_strided_slice %9 {offsets = [0, 8], sizes = [256, 6], strides = [1, 1]} : vector<256x18xf32> to vector<256x6xf32>
    %12 = vector.extract_strided_slice %9 {offsets = [0, 14], sizes = [256, 4], strides = [1, 1]} : vector<256x18xf32> to vector<256x4xf32>
    %cst_8 = arith.constant 0xFF800000 : f32
    %13 = vector.broadcast %cst_8 : f32 to vector<18x18x4xf32>
    %c0_9 = arith.constant 0 : index
    %c0_10 = arith.constant 0 : index
    %c0_11 = arith.constant 0 : index
    %14 = vector.load %arg11[%c0_9, %c0_10, %c0_11] : memref<18x18x4xf32, #tpu.memory_space<vmem>>, vector<18x18x4xf32>
    tpu.vector_store %arg11[%c0_9, %c0_10, %c0_11], %13 {strides = array<i32>} : memref<18x18x4xf32, #tpu.memory_space<vmem>>, vector<18x18x4xf32>,
    %c1 = arith.constant 1 : index
    %c1_12 = arith.constant 1 : index
    %c0_13 = arith.constant 0 : index
    %15 = vector.load %arg11[%c1, %c1_12, %c0_13] : memref<18x18x4xf32, #tpu.memory_space<vmem>>, vector<16x16x4xf32>
    tpu.vector_store %arg11[%c1, %c1_12, %c0_13], %1 {strides = array<i32>} : memref<18x18x4xf32, #tpu.memory_space<vmem>>, vector<16x16x4xf32>,
    %c0_14 = arith.constant 0 : index
    %c0_15 = arith.constant 0 : index
    %c0_16 = arith.constant 0 : index
    %16 = vector.load %arg11[%c0_14, %c0_15, %c0_16] : memref<18x18x4xf32, #tpu.memory_space<vmem>>, vector<16x16x4xf32>
    %17 = arith.maximumf %1, %16 : vector<16x16x4xf32>
    %c0_17 = arith.constant 0 : index
    %c1_18 = arith.constant 1 : index
    %c0_19 = arith.constant 0 : index
    %18 = vector.load %arg11[%c0_17, %c1_18, %c0_19] : memref<18x18x4xf32, #tpu.memory_space<vmem>>, vector<16x16x4xf32>
    %19 = arith.maximumf %17, %18 : vector<16x16x4xf32>
    %c0_20 = arith.constant 0 : index
    %c2 = arith.constant 2 : index
    %c0_21 = arith.constant 0 : index
    %20 = vector.load %arg11[%c0_20, %c2, %c0_21] : memref<18x18x4xf32, #tpu.memory_space<vmem>>, vector<16x16x4xf32>
    %21 = arith.maximumf %19, %20 : vector<16x16x4xf32>
    %c1_22 = arith.constant 1 : index
    %c0_23 = arith.constant 0 : index
    %c0_24 = arith.constant 0 : index
    %22 = vector.load %arg11[%c1_22, %c0_23, %c0_24] : memref<18x18x4xf32, #tpu.memory_space<vmem>>, vector<16x16x4xf32>
    %23 = arith.maximumf %21, %22 : vector<16x16x4xf32>
    %c1_25 = arith.constant 1 : index
    %c2_26 = arith.constant 2 : index
    %c0_27 = arith.constant 0 : index
    %24 = vector.load %arg11[%c1_25, %c2_26, %c0_27] : memref<18x18x4xf32, #tpu.memory_space<vmem>>, vector<16x16x4xf32>
    %25 = arith.maximumf %23, %24 : vector<16x16x4xf32>
    %c2_28 = arith.constant 2 : index
    %c0_29 = arith.constant 0 : index
    %c0_30 = arith.constant 0 : index
    %26 = vector.load %arg11[%c2_28, %c0_29, %c0_30] : memref<18x18x4xf32, #tpu.memory_space<vmem>>, vector<16x16x4xf32>
    %27 = arith.maximumf %25, %26 : vector<16x16x4xf32>
    %c2_31 = arith.constant 2 : index
    %c1_32 = arith.constant 1 : index
    %c0_33 = arith.constant 0 : index
    %28 = vector.load %arg11[%c2_31, %c1_32, %c0_33] : memref<18x18x4xf32, #tpu.memory_space<vmem>>, vector<16x16x4xf32>
    %29 = arith.maximumf %27, %28 : vector<16x16x4xf32>
    %c2_34 = arith.constant 2 : index
    %c2_35 = arith.constant 2 : index
    %c0_36 = arith.constant 0 : index
    %30 = vector.load %arg11[%c2_34, %c2_35, %c0_36] : memref<18x18x4xf32, #tpu.memory_space<vmem>>, vector<16x16x4xf32>
    %31 = arith.maximumf %29, %30 : vector<16x16x4xf32>
    %32 = vector.shape_cast %31 : vector<16x16x4xf32> to vector<256x4xf32>
    %c0_37 = arith.constant 0 : index
    %c0_38 = arith.constant 0 : index
    %33 = vector.load %arg8[%c0_37, %c0_38] : memref<4x8xf32, #tpu.memory_space<vmem>>, vector<4x8xf32>
    %cst_39 = arith.constant dense<0.000000e+00> : vector<256x8xf32>
    %34 = tpu.matmul %32, %33, %cst_39 {dimension_numbers = #tpu.dot_dimension_numbers<[1], [0], [0], [1], [0, 0, 1, 1], [], []>} : vector<256x4xf32>, vector<4x8xf32>, vector<256x8xf32> -> vector<256x8xf32>
    %c0_40 = arith.constant 0 : index
    %c0_41 = arith.constant 0 : index
    %35 = vector.load %arg9[%c0_40, %c0_41] : memref<1x8xf32, #tpu.memory_space<vmem>>, vector<1x8xf32>
    %36 = vector.broadcast %35 : vector<1x8xf32> to vector<256x8xf32>
    %37 = arith.addf %34, %36 : vector<256x8xf32>
    %cst_42 = arith.constant 0.000000e+00 : f32
    %38 = vector.broadcast %cst_42 : f32 to vector<256x8xf32>
    %39 = arith.maximumf %37, %38 : vector<256x8xf32>
    %cst_43 = arith.constant 0.000000e+00 : f32
    %40 = vector.broadcast %cst_43 : f32 to vector<18x18x6xf32>
    %c0_44 = arith.constant 0 : index
    %c0_45 = arith.constant 0 : index
    %c0_46 = arith.constant 0 : index
    %41 = vector.load %arg12[%c0_44, %c0_45, %c0_46] : memref<18x18x6xf32, #tpu.memory_space<vmem>>, vector<18x18x6xf32>
    tpu.vector_store %arg12[%c0_44, %c0_45, %c0_46], %40 {strides = array<i32>} : memref<18x18x6xf32, #tpu.memory_space<vmem>>, vector<18x18x6xf32>,
    %42 = vector.shape_cast %11 : vector<256x6xf32> to vector<16x16x6xf32>
    %c1_47 = arith.constant 1 : index
    %c1_48 = arith.constant 1 : index
    %c0_49 = arith.constant 0 : index
    %43 = vector.load %arg12[%c1_47, %c1_48, %c0_49] : memref<18x18x6xf32, #tpu.memory_space<vmem>>, vector<16x16x6xf32>
    tpu.vector_store %arg12[%c1_47, %c1_48, %c0_49], %42 {strides = array<i32>} : memref<18x18x6xf32, #tpu.memory_space<vmem>>, vector<16x16x6xf32>,
    %c0_50 = arith.constant 0 : index
    %c0_51 = arith.constant 0 : index
    %44 = vector.load %arg5[%c0_50, %c0_51] : memref<1x8xf32, #tpu.memory_space<vmem>>, vector<1x8xf32>
    %45 = vector.shape_cast %44 : vector<1x8xf32> to vector<1x8xf32>
    %46 = vector.broadcast %45 : vector<1x8xf32> to vector<256x8xf32>
    %c0_52 = arith.constant 0 : index
    %c0_53 = arith.constant 0 : index
    %c0_54 = arith.constant 0 : index
    %47 = vector.load %arg12[%c0_52, %c0_53, %c0_54] : memref<18x18x6xf32, #tpu.memory_space<vmem>>, vector<16x16x6xf32>
    %48 = vector.shape_cast %47 : vector<16x16x6xf32> to vector<256x6xf32>
    %c0_55 = arith.constant 0 : index
    %c0_56 = arith.constant 0 : index
    %c0_57 = arith.constant 0 : index
    %49 = vector.load %arg4[%c0_55, %c0_56, %c0_57] : memref<9x6x8xf32, #tpu.memory_space<vmem>>, vector<1x6x8xf32>
    %50 = vector.shape_cast %49 : vector<1x6x8xf32> to vector<6x8xf32>
    %cst_58 = arith.constant dense<0.000000e+00> : vector<256x8xf32>
    %51 = tpu.matmul %48, %50, %cst_58 {dimension_numbers = #tpu.dot_dimension_numbers<[1], [0], [0], [1], [0, 0, 1, 1], [], []>} : vector<256x6xf32>, vector<6x8xf32>, vector<256x8xf32> -> vector<256x8xf32>
    %52 = arith.addf %46, %51 : vector<256x8xf32>
    %c0_59 = arith.constant 0 : index
    %c1_60 = arith.constant 1 : index
    %c0_61 = arith.constant 0 : index
    %53 = vector.load %arg12[%c0_59, %c1_60, %c0_61] : memref<18x18x6xf32, #tpu.memory_space<vmem>>, vector<16x16x6xf32>
    %54 = vector.shape_cast %53 : vector<16x16x6xf32> to vector<256x6xf32>
    %c1_62 = arith.constant 1 : index
    %c0_63 = arith.constant 0 : index
    %c0_64 = arith.constant 0 : index
    %55 = vector.load %arg4[%c1_62, %c0_63, %c0_64] : memref<9x6x8xf32, #tpu.memory_space<vmem>>, vector<1x6x8xf32>
    %56 = vector.shape_cast %55 : vector<1x6x8xf32> to vector<6x8xf32>
    %cst_65 = arith.constant dense<0.000000e+00> : vector<256x8xf32>
    %57 = tpu.matmul %54, %56, %cst_65 {dimension_numbers = #tpu.dot_dimension_numbers<[1], [0], [0], [1], [0, 0, 1, 1], [], []>} : vector<256x6xf32>, vector<6x8xf32>, vector<256x8xf32> -> vector<256x8xf32>
    %58 = arith.addf %52, %57 : vector<256x8xf32>
    %c0_66 = arith.constant 0 : index
    %c2_67 = arith.constant 2 : index
    %c0_68 = arith.constant 0 : index
    %59 = vector.load %arg12[%c0_66, %c2_67, %c0_68] : memref<18x18x6xf32, #tpu.memory_space<vmem>>, vector<16x16x6xf32>
    %60 = vector.shape_cast %59 : vector<16x16x6xf32> to vector<256x6xf32>
    %c2_69 = arith.constant 2 : index
    %c0_70 = arith.constant 0 : index
    %c0_71 = arith.constant 0 : index
    %61 = vector.load %arg4[%c2_69, %c0_70, %c0_71] : memref<9x6x8xf32, #tpu.memory_space<vmem>>, vector<1x6x8xf32>
    %62 = vector.shape_cast %61 : vector<1x6x8xf32> to vector<6x8xf32>
    %cst_72 = arith.constant dense<0.000000e+00> : vector<256x8xf32>
    %63 = tpu.matmul %60, %62, %cst_72 {dimension_numbers = #tpu.dot_dimension_numbers<[1], [0], [0], [1], [0, 0, 1, 1], [], []>} : vector<256x6xf32>, vector<6x8xf32>, vector<256x8xf32> -> vector<256x8xf32>
    %64 = arith.addf %58, %63 : vector<256x8xf32>
    %c1_73 = arith.constant 1 : index
    %c0_74 = arith.constant 0 : index
    %c0_75 = arith.constant 0 : index
    %65 = vector.load %arg12[%c1_73, %c0_74, %c0_75] : memref<18x18x6xf32, #tpu.memory_space<vmem>>, vector<16x16x6xf32>
    %66 = vector.shape_cast %65 : vector<16x16x6xf32> to vector<256x6xf32>
    %c3 = arith.constant 3 : index
    %c0_76 = arith.constant 0 : index
    %c0_77 = arith.constant 0 : index
    %67 = vector.load %arg4[%c3, %c0_76, %c0_77] : memref<9x6x8xf32, #tpu.memory_space<vmem>>, vector<1x6x8xf32>
    %68 = vector.shape_cast %67 : vector<1x6x8xf32> to vector<6x8xf32>
    %cst_78 = arith.constant dense<0.000000e+00> : vector<256x8xf32>
    %69 = tpu.matmul %66, %68, %cst_78 {dimension_numbers = #tpu.dot_dimension_numbers<[1], [0], [0], [1], [0, 0, 1, 1], [], []>} : vector<256x6xf32>, vector<6x8xf32>, vector<256x8xf32> -> vector<256x8xf32>
    %70 = arith.addf %64, %69 : vector<256x8xf32>
    %c1_79 = arith.constant 1 : index
    %c1_80 = arith.constant 1 : index
    %c0_81 = arith.constant 0 : index
    %71 = vector.load %arg12[%c1_79, %c1_80, %c0_81] : memref<18x18x6xf32, #tpu.memory_space<vmem>>, vector<16x16x6xf32>
    %72 = vector.shape_cast %71 : vector<16x16x6xf32> to vector<256x6xf32>
    %c4 = arith.constant 4 : index
    %c0_82 = arith.constant 0 : index
    %c0_83 = arith.constant 0 : index
    %73 = vector.load %arg4[%c4, %c0_82, %c0_83] : memref<9x6x8xf32, #tpu.memory_space<vmem>>, vector<1x6x8xf32>
    %74 = vector.shape_cast %73 : vector<1x6x8xf32> to vector<6x8xf32>
    %cst_84 = arith.constant dense<0.000000e+00> : vector<256x8xf32>
    %75 = tpu.matmul %72, %74, %cst_84 {dimension_numbers = #tpu.dot_dimension_numbers<[1], [0], [0], [1], [0, 0, 1, 1], [], []>} : vector<256x6xf32>, vector<6x8xf32>, vector<256x8xf32> -> vector<256x8xf32>
    %76 = arith.addf %70, %75 : vector<256x8xf32>
    %c1_85 = arith.constant 1 : index
    %c2_86 = arith.constant 2 : index
    %c0_87 = arith.constant 0 : index
    %77 = vector.load %arg12[%c1_85, %c2_86, %c0_87] : memref<18x18x6xf32, #tpu.memory_space<vmem>>, vector<16x16x6xf32>
    %78 = vector.shape_cast %77 : vector<16x16x6xf32> to vector<256x6xf32>
    %c5 = arith.constant 5 : index
    %c0_88 = arith.constant 0 : index
    %c0_89 = arith.constant 0 : index
    %79 = vector.load %arg4[%c5, %c0_88, %c0_89] : memref<9x6x8xf32, #tpu.memory_space<vmem>>, vector<1x6x8xf32>
    %80 = vector.shape_cast %79 : vector<1x6x8xf32> to vector<6x8xf32>
    %cst_90 = arith.constant dense<0.000000e+00> : vector<256x8xf32>
    %81 = tpu.matmul %78, %80, %cst_90 {dimension_numbers = #tpu.dot_dimension_numbers<[1], [0], [0], [1], [0, 0, 1, 1], [], []>} : vector<256x6xf32>, vector<6x8xf32>, vector<256x8xf32> -> vector<256x8xf32>
    %82 = arith.addf %76, %81 : vector<256x8xf32>
    %c2_91 = arith.constant 2 : index
    %c0_92 = arith.constant 0 : index
    %c0_93 = arith.constant 0 : index
    %83 = vector.load %arg12[%c2_91, %c0_92, %c0_93] : memref<18x18x6xf32, #tpu.memory_space<vmem>>, vector<16x16x6xf32>
    %84 = vector.shape_cast %83 : vector<16x16x6xf32> to vector<256x6xf32>
    %c6 = arith.constant 6 : index
    %c0_94 = arith.constant 0 : index
    %c0_95 = arith.constant 0 : index
    %85 = vector.load %arg4[%c6, %c0_94, %c0_95] : memref<9x6x8xf32, #tpu.memory_space<vmem>>, vector<1x6x8xf32>
    %86 = vector.shape_cast %85 : vector<1x6x8xf32> to vector<6x8xf32>
    %cst_96 = arith.constant dense<0.000000e+00> : vector<256x8xf32>
    %87 = tpu.matmul %84, %86, %cst_96 {dimension_numbers = #tpu.dot_dimension_numbers<[1], [0], [0], [1], [0, 0, 1, 1], [], []>} : vector<256x6xf32>, vector<6x8xf32>, vector<256x8xf32> -> vector<256x8xf32>
    %88 = arith.addf %82, %87 : vector<256x8xf32>
    %c2_97 = arith.constant 2 : index
    %c1_98 = arith.constant 1 : index
    %c0_99 = arith.constant 0 : index
    %89 = vector.load %arg12[%c2_97, %c1_98, %c0_99] : memref<18x18x6xf32, #tpu.memory_space<vmem>>, vector<16x16x6xf32>
    %90 = vector.shape_cast %89 : vector<16x16x6xf32> to vector<256x6xf32>
    %c7 = arith.constant 7 : index
    %c0_100 = arith.constant 0 : index
    %c0_101 = arith.constant 0 : index
    %91 = vector.load %arg4[%c7, %c0_100, %c0_101] : memref<9x6x8xf32, #tpu.memory_space<vmem>>, vector<1x6x8xf32>
    %92 = vector.shape_cast %91 : vector<1x6x8xf32> to vector<6x8xf32>
    %cst_102 = arith.constant dense<0.000000e+00> : vector<256x8xf32>
    %93 = tpu.matmul %90, %92, %cst_102 {dimension_numbers = #tpu.dot_dimension_numbers<[1], [0], [0], [1], [0, 0, 1, 1], [], []>} : vector<256x6xf32>, vector<6x8xf32>, vector<256x8xf32> -> vector<256x8xf32>
    %94 = arith.addf %88, %93 : vector<256x8xf32>
    %c2_103 = arith.constant 2 : index
    %c2_104 = arith.constant 2 : index
    %c0_105 = arith.constant 0 : index
    %95 = vector.load %arg12[%c2_103, %c2_104, %c0_105] : memref<18x18x6xf32, #tpu.memory_space<vmem>>, vector<16x16x6xf32>
    %96 = vector.shape_cast %95 : vector<16x16x6xf32> to vector<256x6xf32>
    %c8 = arith.constant 8 : index
    %c0_106 = arith.constant 0 : index
    %c0_107 = arith.constant 0 : index
    %97 = vector.load %arg4[%c8, %c0_106, %c0_107] : memref<9x6x8xf32, #tpu.memory_space<vmem>>, vector<1x6x8xf32>
    %98 = vector.shape_cast %97 : vector<1x6x8xf32> to vector<6x8xf32>
    %cst_108 = arith.constant dense<0.000000e+00> : vector<256x8xf32>
    %99 = tpu.matmul %96, %98, %cst_108 {dimension_numbers = #tpu.dot_dimension_numbers<[1], [0], [0], [1], [0, 0, 1, 1], [], []>} : vector<256x6xf32>, vector<6x8xf32>, vector<256x8xf32> -> vector<256x8xf32>
    %100 = arith.addf %94, %99 : vector<256x8xf32>
    %cst_109 = arith.constant 0.000000e+00 : f32
    %101 = vector.broadcast %cst_109 : f32 to vector<256x8xf32>
    %102 = arith.maximumf %100, %101 : vector<256x8xf32>
    %cst_110 = arith.constant 0.000000e+00 : f32
    %103 = vector.broadcast %cst_110 : f32 to vector<20x20x4xf32>
    %c0_111 = arith.constant 0 : index
    %c0_112 = arith.constant 0 : index
    %c0_113 = arith.constant 0 : index
    %104 = vector.load %arg13[%c0_111, %c0_112, %c0_113] : memref<20x20x4xf32, #tpu.memory_space<vmem>>, vector<20x20x4xf32>
    tpu.vector_store %arg13[%c0_111, %c0_112, %c0_113], %103 {strides = array<i32>} : memref<20x20x4xf32, #tpu.memory_space<vmem>>, vector<20x20x4xf32>,
    %105 = vector.shape_cast %12 : vector<256x4xf32> to vector<16x16x4xf32>
    %c2_114 = arith.constant 2 : index
    %c2_115 = arith.constant 2 : index
    %c0_116 = arith.constant 0 : index
    %106 = vector.load %arg13[%c2_114, %c2_115, %c0_116] : memref<20x20x4xf32, #tpu.memory_space<vmem>>, vector<16x16x4xf32>
    tpu.vector_store %arg13[%c2_114, %c2_115, %c0_116], %105 {strides = array<i32>} : memref<20x20x4xf32, #tpu.memory_space<vmem>>, vector<16x16x4xf32>,
    %c0_117 = arith.constant 0 : index
    %c0_118 = arith.constant 0 : index
    %107 = vector.load %arg7[%c0_117, %c0_118] : memref<1x8xf32, #tpu.memory_space<vmem>>, vector<1x8xf32>
    %108 = vector.shape_cast %107 : vector<1x8xf32> to vector<1x8xf32>
    %109 = vector.broadcast %108 : vector<1x8xf32> to vector<256x8xf32>
    %c0_119 = arith.constant 0 : index
    %c0_120 = arith.constant 0 : index
    %c0_121 = arith.constant 0 : index
    %110 = vector.load %arg13[%c0_119, %c0_120, %c0_121] : memref<20x20x4xf32, #tpu.memory_space<vmem>>, vector<16x16x4xf32>
    %111 = vector.shape_cast %110 : vector<16x16x4xf32> to vector<256x4xf32>
    %c0_122 = arith.constant 0 : index
    %c0_123 = arith.constant 0 : index
    %c0_124 = arith.constant 0 : index
    %112 = vector.load %arg6[%c0_122, %c0_123, %c0_124] : memref<25x4x8xf32, #tpu.memory_space<vmem>>, vector<1x4x8xf32>
    %113 = vector.shape_cast %112 : vector<1x4x8xf32> to vector<4x8xf32>
    %cst_125 = arith.constant dense<0.000000e+00> : vector<256x8xf32>
    %114 = tpu.matmul %111, %113, %cst_125 {dimension_numbers = #tpu.dot_dimension_numbers<[1], [0], [0], [1], [0, 0, 1, 1], [], []>} : vector<256x4xf32>, vector<4x8xf32>, vector<256x8xf32> -> vector<256x8xf32>
    %115 = arith.addf %109, %114 : vector<256x8xf32>
    %c0_126 = arith.constant 0 : index
    %c1_127 = arith.constant 1 : index
    %c0_128 = arith.constant 0 : index
    %116 = vector.load %arg13[%c0_126, %c1_127, %c0_128] : memref<20x20x4xf32, #tpu.memory_space<vmem>>, vector<16x16x4xf32>
    %117 = vector.shape_cast %116 : vector<16x16x4xf32> to vector<256x4xf32>
    %c1_129 = arith.constant 1 : index
    %c0_130 = arith.constant 0 : index
    %c0_131 = arith.constant 0 : index
    %118 = vector.load %arg6[%c1_129, %c0_130, %c0_131] : memref<25x4x8xf32, #tpu.memory_space<vmem>>, vector<1x4x8xf32>
    %119 = vector.shape_cast %118 : vector<1x4x8xf32> to vector<4x8xf32>
    %cst_132 = arith.constant dense<0.000000e+00> : vector<256x8xf32>
    %120 = tpu.matmul %117, %119, %cst_132 {dimension_numbers = #tpu.dot_dimension_numbers<[1], [0], [0], [1], [0, 0, 1, 1], [], []>} : vector<256x4xf32>, vector<4x8xf32>, vector<256x8xf32> -> vector<256x8xf32>
    %121 = arith.addf %115, %120 : vector<256x8xf32>
    %c0_133 = arith.constant 0 : index
    %c2_134 = arith.constant 2 : index
    %c0_135 = arith.constant 0 : index
    %122 = vector.load %arg13[%c0_133, %c2_134, %c0_135] : memref<20x20x4xf32, #tpu.memory_space<vmem>>, vector<16x16x4xf32>
    %123 = vector.shape_cast %122 : vector<16x16x4xf32> to vector<256x4xf32>
    %c2_136 = arith.constant 2 : index
    %c0_137 = arith.constant 0 : index
    %c0_138 = arith.constant 0 : index
    %124 = vector.load %arg6[%c2_136, %c0_137, %c0_138] : memref<25x4x8xf32, #tpu.memory_space<vmem>>, vector<1x4x8xf32>
    %125 = vector.shape_cast %124 : vector<1x4x8xf32> to vector<4x8xf32>
    %cst_139 = arith.constant dense<0.000000e+00> : vector<256x8xf32>
    %126 = tpu.matmul %123, %125, %cst_139 {dimension_numbers = #tpu.dot_dimension_numbers<[1], [0], [0], [1], [0, 0, 1, 1], [], []>} : vector<256x4xf32>, vector<4x8xf32>, vector<256x8xf32> -> vector<256x8xf32>
    %127 = arith.addf %121, %126 : vector<256x8xf32>
    %c0_140 = arith.constant 0 : index
    %c3_141 = arith.constant 3 : index
    %c0_142 = arith.constant 0 : index
    %128 = vector.load %arg13[%c0_140, %c3_141, %c0_142] : memref<20x20x4xf32, #tpu.memory_space<vmem>>, vector<16x16x4xf32>
    %129 = vector.shape_cast %128 : vector<16x16x4xf32> to vector<256x4xf32>
    %c3_143 = arith.constant 3 : index
    %c0_144 = arith.constant 0 : index
    %c0_145 = arith.constant 0 : index
    %130 = vector.load %arg6[%c3_143, %c0_144, %c0_145] : memref<25x4x8xf32, #tpu.memory_space<vmem>>, vector<1x4x8xf32>
    %131 = vector.shape_cast %130 : vector<1x4x8xf32> to vector<4x8xf32>
    %cst_146 = arith.constant dense<0.000000e+00> : vector<256x8xf32>
    %132 = tpu.matmul %129, %131, %cst_146 {dimension_numbers = #tpu.dot_dimension_numbers<[1], [0], [0], [1], [0, 0, 1, 1], [], []>} : vector<256x4xf32>, vector<4x8xf32>, vector<256x8xf32> -> vector<256x8xf32>
    %133 = arith.addf %127, %132 : vector<256x8xf32>
    %c0_147 = arith.constant 0 : index
    %c4_148 = arith.constant 4 : index
    %c0_149 = arith.constant 0 : index
    %134 = vector.load %arg13[%c0_147, %c4_148, %c0_149] : memref<20x20x4xf32, #tpu.memory_space<vmem>>, vector<16x16x4xf32>
    %135 = vector.shape_cast %134 : vector<16x16x4xf32> to vector<256x4xf32>
    %c4_150 = arith.constant 4 : index
    %c0_151 = arith.constant 0 : index
    %c0_152 = arith.constant 0 : index
    %136 = vector.load %arg6[%c4_150, %c0_151, %c0_152] : memref<25x4x8xf32, #tpu.memory_space<vmem>>, vector<1x4x8xf32>
    %137 = vector.shape_cast %136 : vector<1x4x8xf32> to vector<4x8xf32>
    %cst_153 = arith.constant dense<0.000000e+00> : vector<256x8xf32>
    %138 = tpu.matmul %135, %137, %cst_153 {dimension_numbers = #tpu.dot_dimension_numbers<[1], [0], [0], [1], [0, 0, 1, 1], [], []>} : vector<256x4xf32>, vector<4x8xf32>, vector<256x8xf32> -> vector<256x8xf32>
    %139 = arith.addf %133, %138 : vector<256x8xf32>
    %c1_154 = arith.constant 1 : index
    %c0_155 = arith.constant 0 : index
    %c0_156 = arith.constant 0 : index
    %140 = vector.load %arg13[%c1_154, %c0_155, %c0_156] : memref<20x20x4xf32, #tpu.memory_space<vmem>>, vector<16x16x4xf32>
    %141 = vector.shape_cast %140 : vector<16x16x4xf32> to vector<256x4xf32>
    %c5_157 = arith.constant 5 : index
    %c0_158 = arith.constant 0 : index
    %c0_159 = arith.constant 0 : index
    %142 = vector.load %arg6[%c5_157, %c0_158, %c0_159] : memref<25x4x8xf32, #tpu.memory_space<vmem>>, vector<1x4x8xf32>
    %143 = vector.shape_cast %142 : vector<1x4x8xf32> to vector<4x8xf32>
    %cst_160 = arith.constant dense<0.000000e+00> : vector<256x8xf32>
    %144 = tpu.matmul %141, %143, %cst_160 {dimension_numbers = #tpu.dot_dimension_numbers<[1], [0], [0], [1], [0, 0, 1, 1], [], []>} : vector<256x4xf32>, vector<4x8xf32>, vector<256x8xf32> -> vector<256x8xf32>
    %145 = arith.addf %139, %144 : vector<256x8xf32>
    %c1_161 = arith.constant 1 : index
    %c1_162 = arith.constant 1 : index
    %c0_163 = arith.constant 0 : index
    %146 = vector.load %arg13[%c1_161, %c1_162, %c0_163] : memref<20x20x4xf32, #tpu.memory_space<vmem>>, vector<16x16x4xf32>
    %147 = vector.shape_cast %146 : vector<16x16x4xf32> to vector<256x4xf32>
    %c6_164 = arith.constant 6 : index
    %c0_165 = arith.constant 0 : index
    %c0_166 = arith.constant 0 : index
    %148 = vector.load %arg6[%c6_164, %c0_165, %c0_166] : memref<25x4x8xf32, #tpu.memory_space<vmem>>, vector<1x4x8xf32>
    %149 = vector.shape_cast %148 : vector<1x4x8xf32> to vector<4x8xf32>
    %cst_167 = arith.constant dense<0.000000e+00> : vector<256x8xf32>
    %150 = tpu.matmul %147, %149, %cst_167 {dimension_numbers = #tpu.dot_dimension_numbers<[1], [0], [0], [1], [0, 0, 1, 1], [], []>} : vector<256x4xf32>, vector<4x8xf32>, vector<256x8xf32> -> vector<256x8xf32>
    %151 = arith.addf %145, %150 : vector<256x8xf32>
    %c1_168 = arith.constant 1 : index
    %c2_169 = arith.constant 2 : index
    %c0_170 = arith.constant 0 : index
    %152 = vector.load %arg13[%c1_168, %c2_169, %c0_170] : memref<20x20x4xf32, #tpu.memory_space<vmem>>, vector<16x16x4xf32>
    %153 = vector.shape_cast %152 : vector<16x16x4xf32> to vector<256x4xf32>
    %c7_171 = arith.constant 7 : index
    %c0_172 = arith.constant 0 : index
    %c0_173 = arith.constant 0 : index
    %154 = vector.load %arg6[%c7_171, %c0_172, %c0_173] : memref<25x4x8xf32, #tpu.memory_space<vmem>>, vector<1x4x8xf32>
    %155 = vector.shape_cast %154 : vector<1x4x8xf32> to vector<4x8xf32>
    %cst_174 = arith.constant dense<0.000000e+00> : vector<256x8xf32>
    %156 = tpu.matmul %153, %155, %cst_174 {dimension_numbers = #tpu.dot_dimension_numbers<[1], [0], [0], [1], [0, 0, 1, 1], [], []>} : vector<256x4xf32>, vector<4x8xf32>, vector<256x8xf32> -> vector<256x8xf32>
    %157 = arith.addf %151, %156 : vector<256x8xf32>
    %c1_175 = arith.constant 1 : index
    %c3_176 = arith.constant 3 : index
    %c0_177 = arith.constant 0 : index
    %158 = vector.load %arg13[%c1_175, %c3_176, %c0_177] : memref<20x20x4xf32, #tpu.memory_space<vmem>>, vector<16x16x4xf32>
    %159 = vector.shape_cast %158 : vector<16x16x4xf32> to vector<256x4xf32>
    %c8_178 = arith.constant 8 : index
    %c0_179 = arith.constant 0 : index
    %c0_180 = arith.constant 0 : index
    %160 = vector.load %arg6[%c8_178, %c0_179, %c0_180] : memref<25x4x8xf32, #tpu.memory_space<vmem>>, vector<1x4x8xf32>
    %161 = vector.shape_cast %160 : vector<1x4x8xf32> to vector<4x8xf32>
    %cst_181 = arith.constant dense<0.000000e+00> : vector<256x8xf32>
    %162 = tpu.matmul %159, %161, %cst_181 {dimension_numbers = #tpu.dot_dimension_numbers<[1], [0], [0], [1], [0, 0, 1, 1], [], []>} : vector<256x4xf32>, vector<4x8xf32>, vector<256x8xf32> -> vector<256x8xf32>
    %163 = arith.addf %157, %162 : vector<256x8xf32>
    %c1_182 = arith.constant 1 : index
    %c4_183 = arith.constant 4 : index
    %c0_184 = arith.constant 0 : index
    %164 = vector.load %arg13[%c1_182, %c4_183, %c0_184] : memref<20x20x4xf32, #tpu.memory_space<vmem>>, vector<16x16x4xf32>
    %165 = vector.shape_cast %164 : vector<16x16x4xf32> to vector<256x4xf32>
    %c9 = arith.constant 9 : index
    %c0_185 = arith.constant 0 : index
    %c0_186 = arith.constant 0 : index
    %166 = vector.load %arg6[%c9, %c0_185, %c0_186] : memref<25x4x8xf32, #tpu.memory_space<vmem>>, vector<1x4x8xf32>
    %167 = vector.shape_cast %166 : vector<1x4x8xf32> to vector<4x8xf32>
    %cst_187 = arith.constant dense<0.000000e+00> : vector<256x8xf32>
    %168 = tpu.matmul %165, %167, %cst_187 {dimension_numbers = #tpu.dot_dimension_numbers<[1], [0], [0], [1], [0, 0, 1, 1], [], []>} : vector<256x4xf32>, vector<4x8xf32>, vector<256x8xf32> -> vector<256x8xf32>
    %169 = arith.addf %163, %168 : vector<256x8xf32>
    %c2_188 = arith.constant 2 : index
    %c0_189 = arith.constant 0 : index
    %c0_190 = arith.constant 0 : index
    %170 = vector.load %arg13[%c2_188, %c0_189, %c0_190] : memref<20x20x4xf32, #tpu.memory_space<vmem>>, vector<16x16x4xf32>
    %171 = vector.shape_cast %170 : vector<16x16x4xf32> to vector<256x4xf32>
    %c10 = arith.constant 10 : index
    %c0_191 = arith.constant 0 : index
    %c0_192 = arith.constant 0 : index
    %172 = vector.load %arg6[%c10, %c0_191, %c0_192] : memref<25x4x8xf32, #tpu.memory_space<vmem>>, vector<1x4x8xf32>
    %173 = vector.shape_cast %172 : vector<1x4x8xf32> to vector<4x8xf32>
    %cst_193 = arith.constant dense<0.000000e+00> : vector<256x8xf32>
    %174 = tpu.matmul %171, %173, %cst_193 {dimension_numbers = #tpu.dot_dimension_numbers<[1], [0], [0], [1], [0, 0, 1, 1], [], []>} : vector<256x4xf32>, vector<4x8xf32>, vector<256x8xf32> -> vector<256x8xf32>
    %175 = arith.addf %169, %174 : vector<256x8xf32>
    %c2_194 = arith.constant 2 : index
    %c1_195 = arith.constant 1 : index
    %c0_196 = arith.constant 0 : index
    %176 = vector.load %arg13[%c2_194, %c1_195, %c0_196] : memref<20x20x4xf32, #tpu.memory_space<vmem>>, vector<16x16x4xf32>
    %177 = vector.shape_cast %176 : vector<16x16x4xf32> to vector<256x4xf32>
    %c11 = arith.constant 11 : index
    %c0_197 = arith.constant 0 : index
    %c0_198 = arith.constant 0 : index
    %178 = vector.load %arg6[%c11, %c0_197, %c0_198] : memref<25x4x8xf32, #tpu.memory_space<vmem>>, vector<1x4x8xf32>
    %179 = vector.shape_cast %178 : vector<1x4x8xf32> to vector<4x8xf32>
    %cst_199 = arith.constant dense<0.000000e+00> : vector<256x8xf32>
    %180 = tpu.matmul %177, %179, %cst_199 {dimension_numbers = #tpu.dot_dimension_numbers<[1], [0], [0], [1], [0, 0, 1, 1], [], []>} : vector<256x4xf32>, vector<4x8xf32>, vector<256x8xf32> -> vector<256x8xf32>
    %181 = arith.addf %175, %180 : vector<256x8xf32>
    %c2_200 = arith.constant 2 : index
    %c2_201 = arith.constant 2 : index
    %c0_202 = arith.constant 0 : index
    %182 = vector.load %arg13[%c2_200, %c2_201, %c0_202] : memref<20x20x4xf32, #tpu.memory_space<vmem>>, vector<16x16x4xf32>
    %183 = vector.shape_cast %182 : vector<16x16x4xf32> to vector<256x4xf32>
    %c12 = arith.constant 12 : index
    %c0_203 = arith.constant 0 : index
    %c0_204 = arith.constant 0 : index
    %184 = vector.load %arg6[%c12, %c0_203, %c0_204] : memref<25x4x8xf32, #tpu.memory_space<vmem>>, vector<1x4x8xf32>
    %185 = vector.shape_cast %184 : vector<1x4x8xf32> to vector<4x8xf32>
    %cst_205 = arith.constant dense<0.000000e+00> : vector<256x8xf32>
    %186 = tpu.matmul %183, %185, %cst_205 {dimension_numbers = #tpu.dot_dimension_numbers<[1], [0], [0], [1], [0, 0, 1, 1], [], []>} : vector<256x4xf32>, vector<4x8xf32>, vector<256x8xf32> -> vector<256x8xf32>
    %187 = arith.addf %181, %186 : vector<256x8xf32>
    %c2_206 = arith.constant 2 : index
    %c3_207 = arith.constant 3 : index
    %c0_208 = arith.constant 0 : index
    %188 = vector.load %arg13[%c2_206, %c3_207, %c0_208] : memref<20x20x4xf32, #tpu.memory_space<vmem>>, vector<16x16x4xf32>
    %189 = vector.shape_cast %188 : vector<16x16x4xf32> to vector<256x4xf32>
    %c13 = arith.constant 13 : index
    %c0_209 = arith.constant 0 : index
    %c0_210 = arith.constant 0 : index
    %190 = vector.load %arg6[%c13, %c0_209, %c0_210] : memref<25x4x8xf32, #tpu.memory_space<vmem>>, vector<1x4x8xf32>
    %191 = vector.shape_cast %190 : vector<1x4x8xf32> to vector<4x8xf32>
    %cst_211 = arith.constant dense<0.000000e+00> : vector<256x8xf32>
    %192 = tpu.matmul %189, %191, %cst_211 {dimension_numbers = #tpu.dot_dimension_numbers<[1], [0], [0], [1], [0, 0, 1, 1], [], []>} : vector<256x4xf32>, vector<4x8xf32>, vector<256x8xf32> -> vector<256x8xf32>
    %193 = arith.addf %187, %192 : vector<256x8xf32>
    %c2_212 = arith.constant 2 : index
    %c4_213 = arith.constant 4 : index
    %c0_214 = arith.constant 0 : index
    %194 = vector.load %arg13[%c2_212, %c4_213, %c0_214] : memref<20x20x4xf32, #tpu.memory_space<vmem>>, vector<16x16x4xf32>
    %195 = vector.shape_cast %194 : vector<16x16x4xf32> to vector<256x4xf32>
    %c14 = arith.constant 14 : index
    %c0_215 = arith.constant 0 : index
    %c0_216 = arith.constant 0 : index
    %196 = vector.load %arg6[%c14, %c0_215, %c0_216] : memref<25x4x8xf32, #tpu.memory_space<vmem>>, vector<1x4x8xf32>
    %197 = vector.shape_cast %196 : vector<1x4x8xf32> to vector<4x8xf32>
    %cst_217 = arith.constant dense<0.000000e+00> : vector<256x8xf32>
    %198 = tpu.matmul %195, %197, %cst_217 {dimension_numbers = #tpu.dot_dimension_numbers<[1], [0], [0], [1], [0, 0, 1, 1], [], []>} : vector<256x4xf32>, vector<4x8xf32>, vector<256x8xf32> -> vector<256x8xf32>
    %199 = arith.addf %193, %198 : vector<256x8xf32>
    %c3_218 = arith.constant 3 : index
    %c0_219 = arith.constant 0 : index
    %c0_220 = arith.constant 0 : index
    %200 = vector.load %arg13[%c3_218, %c0_219, %c0_220] : memref<20x20x4xf32, #tpu.memory_space<vmem>>, vector<16x16x4xf32>
    %201 = vector.shape_cast %200 : vector<16x16x4xf32> to vector<256x4xf32>
    %c15 = arith.constant 15 : index
    %c0_221 = arith.constant 0 : index
    %c0_222 = arith.constant 0 : index
    %202 = vector.load %arg6[%c15, %c0_221, %c0_222] : memref<25x4x8xf32, #tpu.memory_space<vmem>>, vector<1x4x8xf32>
    %203 = vector.shape_cast %202 : vector<1x4x8xf32> to vector<4x8xf32>
    %cst_223 = arith.constant dense<0.000000e+00> : vector<256x8xf32>
    %204 = tpu.matmul %201, %203, %cst_223 {dimension_numbers = #tpu.dot_dimension_numbers<[1], [0], [0], [1], [0, 0, 1, 1], [], []>} : vector<256x4xf32>, vector<4x8xf32>, vector<256x8xf32> -> vector<256x8xf32>
    %205 = arith.addf %199, %204 : vector<256x8xf32>
    %c3_224 = arith.constant 3 : index
    %c1_225 = arith.constant 1 : index
    %c0_226 = arith.constant 0 : index
    %206 = vector.load %arg13[%c3_224, %c1_225, %c0_226] : memref<20x20x4xf32, #tpu.memory_space<vmem>>, vector<16x16x4xf32>
    %207 = vector.shape_cast %206 : vector<16x16x4xf32> to vector<256x4xf32>
    %c16 = arith.constant 16 : index
    %c0_227 = arith.constant 0 : index
    %c0_228 = arith.constant 0 : index
    %208 = vector.load %arg6[%c16, %c0_227, %c0_228] : memref<25x4x8xf32, #tpu.memory_space<vmem>>, vector<1x4x8xf32>
    %209 = vector.shape_cast %208 : vector<1x4x8xf32> to vector<4x8xf32>
    %cst_229 = arith.constant dense<0.000000e+00> : vector<256x8xf32>
    %210 = tpu.matmul %207, %209, %cst_229 {dimension_numbers = #tpu.dot_dimension_numbers<[1], [0], [0], [1], [0, 0, 1, 1], [], []>} : vector<256x4xf32>, vector<4x8xf32>, vector<256x8xf32> -> vector<256x8xf32>
    %211 = arith.addf %205, %210 : vector<256x8xf32>
    %c3_230 = arith.constant 3 : index
    %c2_231 = arith.constant 2 : index
    %c0_232 = arith.constant 0 : index
    %212 = vector.load %arg13[%c3_230, %c2_231, %c0_232] : memref<20x20x4xf32, #tpu.memory_space<vmem>>, vector<16x16x4xf32>
    %213 = vector.shape_cast %212 : vector<16x16x4xf32> to vector<256x4xf32>
    %c17 = arith.constant 17 : index
    %c0_233 = arith.constant 0 : index
    %c0_234 = arith.constant 0 : index
    %214 = vector.load %arg6[%c17, %c0_233, %c0_234] : memref<25x4x8xf32, #tpu.memory_space<vmem>>, vector<1x4x8xf32>
    %215 = vector.shape_cast %214 : vector<1x4x8xf32> to vector<4x8xf32>
    %cst_235 = arith.constant dense<0.000000e+00> : vector<256x8xf32>
    %216 = tpu.matmul %213, %215, %cst_235 {dimension_numbers = #tpu.dot_dimension_numbers<[1], [0], [0], [1], [0, 0, 1, 1], [], []>} : vector<256x4xf32>, vector<4x8xf32>, vector<256x8xf32> -> vector<256x8xf32>
    %217 = arith.addf %211, %216 : vector<256x8xf32>
    %c3_236 = arith.constant 3 : index
    %c3_237 = arith.constant 3 : index
    %c0_238 = arith.constant 0 : index
    %218 = vector.load %arg13[%c3_236, %c3_237, %c0_238] : memref<20x20x4xf32, #tpu.memory_space<vmem>>, vector<16x16x4xf32>
    %219 = vector.shape_cast %218 : vector<16x16x4xf32> to vector<256x4xf32>
    %c18 = arith.constant 18 : index
    %c0_239 = arith.constant 0 : index
    %c0_240 = arith.constant 0 : index
    %220 = vector.load %arg6[%c18, %c0_239, %c0_240] : memref<25x4x8xf32, #tpu.memory_space<vmem>>, vector<1x4x8xf32>
    %221 = vector.shape_cast %220 : vector<1x4x8xf32> to vector<4x8xf32>
    %cst_241 = arith.constant dense<0.000000e+00> : vector<256x8xf32>
    %222 = tpu.matmul %219, %221, %cst_241 {dimension_numbers = #tpu.dot_dimension_numbers<[1], [0], [0], [1], [0, 0, 1, 1], [], []>} : vector<256x4xf32>, vector<4x8xf32>, vector<256x8xf32> -> vector<256x8xf32>
    %223 = arith.addf %217, %222 : vector<256x8xf32>
    %c3_242 = arith.constant 3 : index
    %c4_243 = arith.constant 4 : index
    %c0_244 = arith.constant 0 : index
    %224 = vector.load %arg13[%c3_242, %c4_243, %c0_244] : memref<20x20x4xf32, #tpu.memory_space<vmem>>, vector<16x16x4xf32>
    %225 = vector.shape_cast %224 : vector<16x16x4xf32> to vector<256x4xf32>
    %c19 = arith.constant 19 : index
    %c0_245 = arith.constant 0 : index
    %c0_246 = arith.constant 0 : index
    %226 = vector.load %arg6[%c19, %c0_245, %c0_246] : memref<25x4x8xf32, #tpu.memory_space<vmem>>, vector<1x4x8xf32>
    %227 = vector.shape_cast %226 : vector<1x4x8xf32> to vector<4x8xf32>
    %cst_247 = arith.constant dense<0.000000e+00> : vector<256x8xf32>
    %228 = tpu.matmul %225, %227, %cst_247 {dimension_numbers = #tpu.dot_dimension_numbers<[1], [0], [0], [1], [0, 0, 1, 1], [], []>} : vector<256x4xf32>, vector<4x8xf32>, vector<256x8xf32> -> vector<256x8xf32>
    %229 = arith.addf %223, %228 : vector<256x8xf32>
    %c4_248 = arith.constant 4 : index
    %c0_249 = arith.constant 0 : index
    %c0_250 = arith.constant 0 : index
    %230 = vector.load %arg13[%c4_248, %c0_249, %c0_250] : memref<20x20x4xf32, #tpu.memory_space<vmem>>, vector<16x16x4xf32>
    %231 = vector.shape_cast %230 : vector<16x16x4xf32> to vector<256x4xf32>
    %c20 = arith.constant 20 : index
    %c0_251 = arith.constant 0 : index
    %c0_252 = arith.constant 0 : index
    %232 = vector.load %arg6[%c20, %c0_251, %c0_252] : memref<25x4x8xf32, #tpu.memory_space<vmem>>, vector<1x4x8xf32>
    %233 = vector.shape_cast %232 : vector<1x4x8xf32> to vector<4x8xf32>
    %cst_253 = arith.constant dense<0.000000e+00> : vector<256x8xf32>
    %234 = tpu.matmul %231, %233, %cst_253 {dimension_numbers = #tpu.dot_dimension_numbers<[1], [0], [0], [1], [0, 0, 1, 1], [], []>} : vector<256x4xf32>, vector<4x8xf32>, vector<256x8xf32> -> vector<256x8xf32>
    %235 = arith.addf %229, %234 : vector<256x8xf32>
    %c4_254 = arith.constant 4 : index
    %c1_255 = arith.constant 1 : index
    %c0_256 = arith.constant 0 : index
    %236 = vector.load %arg13[%c4_254, %c1_255, %c0_256] : memref<20x20x4xf32, #tpu.memory_space<vmem>>, vector<16x16x4xf32>
    %237 = vector.shape_cast %236 : vector<16x16x4xf32> to vector<256x4xf32>
    %c21 = arith.constant 21 : index
    %c0_257 = arith.constant 0 : index
    %c0_258 = arith.constant 0 : index
    %238 = vector.load %arg6[%c21, %c0_257, %c0_258] : memref<25x4x8xf32, #tpu.memory_space<vmem>>, vector<1x4x8xf32>
    %239 = vector.shape_cast %238 : vector<1x4x8xf32> to vector<4x8xf32>
    %cst_259 = arith.constant dense<0.000000e+00> : vector<256x8xf32>
    %240 = tpu.matmul %237, %239, %cst_259 {dimension_numbers = #tpu.dot_dimension_numbers<[1], [0], [0], [1], [0, 0, 1, 1], [], []>} : vector<256x4xf32>, vector<4x8xf32>, vector<256x8xf32> -> vector<256x8xf32>
    %241 = arith.addf %235, %240 : vector<256x8xf32>
    %c4_260 = arith.constant 4 : index
    %c2_261 = arith.constant 2 : index
    %c0_262 = arith.constant 0 : index
    %242 = vector.load %arg13[%c4_260, %c2_261, %c0_262] : memref<20x20x4xf32, #tpu.memory_space<vmem>>, vector<16x16x4xf32>
    %243 = vector.shape_cast %242 : vector<16x16x4xf32> to vector<256x4xf32>
    %c22 = arith.constant 22 : index
    %c0_263 = arith.constant 0 : index
    %c0_264 = arith.constant 0 : index
    %244 = vector.load %arg6[%c22, %c0_263, %c0_264] : memref<25x4x8xf32, #tpu.memory_space<vmem>>, vector<1x4x8xf32>
    %245 = vector.shape_cast %244 : vector<1x4x8xf32> to vector<4x8xf32>
    %cst_265 = arith.constant dense<0.000000e+00> : vector<256x8xf32>
    %246 = tpu.matmul %243, %245, %cst_265 {dimension_numbers = #tpu.dot_dimension_numbers<[1], [0], [0], [1], [0, 0, 1, 1], [], []>} : vector<256x4xf32>, vector<4x8xf32>, vector<256x8xf32> -> vector<256x8xf32>
    %247 = arith.addf %241, %246 : vector<256x8xf32>
    %c4_266 = arith.constant 4 : index
    %c3_267 = arith.constant 3 : index
    %c0_268 = arith.constant 0 : index
    %248 = vector.load %arg13[%c4_266, %c3_267, %c0_268] : memref<20x20x4xf32, #tpu.memory_space<vmem>>, vector<16x16x4xf32>
    %249 = vector.shape_cast %248 : vector<16x16x4xf32> to vector<256x4xf32>
    %c23 = arith.constant 23 : index
    %c0_269 = arith.constant 0 : index
    %c0_270 = arith.constant 0 : index
    %250 = vector.load %arg6[%c23, %c0_269, %c0_270] : memref<25x4x8xf32, #tpu.memory_space<vmem>>, vector<1x4x8xf32>
    %251 = vector.shape_cast %250 : vector<1x4x8xf32> to vector<4x8xf32>
    %cst_271 = arith.constant dense<0.000000e+00> : vector<256x8xf32>
    %252 = tpu.matmul %249, %251, %cst_271 {dimension_numbers = #tpu.dot_dimension_numbers<[1], [0], [0], [1], [0, 0, 1, 1], [], []>} : vector<256x4xf32>, vector<4x8xf32>, vector<256x8xf32> -> vector<256x8xf32>
    %253 = arith.addf %247, %252 : vector<256x8xf32>
    %c4_272 = arith.constant 4 : index
    %c4_273 = arith.constant 4 : index
    %c0_274 = arith.constant 0 : index
    %254 = vector.load %arg13[%c4_272, %c4_273, %c0_274] : memref<20x20x4xf32, #tpu.memory_space<vmem>>, vector<16x16x4xf32>
    %255 = vector.shape_cast %254 : vector<16x16x4xf32> to vector<256x4xf32>
    %c24 = arith.constant 24 : index
    %c0_275 = arith.constant 0 : index
    %c0_276 = arith.constant 0 : index
    %256 = vector.load %arg6[%c24, %c0_275, %c0_276] : memref<25x4x8xf32, #tpu.memory_space<vmem>>, vector<1x4x8xf32>
    %257 = vector.shape_cast %256 : vector<1x4x8xf32> to vector<4x8xf32>
    %cst_277 = arith.constant dense<0.000000e+00> : vector<256x8xf32>
    %258 = tpu.matmul %255, %257, %cst_277 {dimension_numbers = #tpu.dot_dimension_numbers<[1], [0], [0], [1], [0, 0, 1, 1], [], []>} : vector<256x4xf32>, vector<4x8xf32>, vector<256x8xf32> -> vector<256x8xf32>
    %259 = arith.addf %253, %258 : vector<256x8xf32>
    %cst_278 = arith.constant 0.000000e+00 : f32
    %260 = vector.broadcast %cst_278 : f32 to vector<256x8xf32>
    %261 = arith.maximumf %259, %260 : vector<256x8xf32>
    %262 = tpu.concatenate %10, %102, %261, %39 in 1 : vector<256x8xf32>, vector<256x8xf32>, vector<256x8xf32>, vector<256x8xf32> -> vector<256x32xf32>
    %263 = vector.shape_cast %262 : vector<256x32xf32> to vector<16x16x32xf32>
    %c0_279 = arith.constant 0 : index
    %c0_280 = arith.constant 0 : index
    %c0_281 = arith.constant 0 : index
    %c0_282 = arith.constant 0 : index
    %264 = vector.load %arg10[%c0_279, %c0_280, %c0_281, %c0_282] : memref<1x16x16x32xf32, #tpu.memory_space<vmem>>, vector<1x16x16x32xf32>
    %265 = vector.shape_cast %264 : vector<1x16x16x32xf32> to vector<16x16x32xf32>
    %266 = vector.shape_cast %263 : vector<16x16x32xf32> to vector<1x16x16x32xf32>
    tpu.vector_store %arg10[%c0_279, %c0_280, %c0_281, %c0_282], %266 {strides = array<i32>} : memref<1x16x16x32xf32, #tpu.memory_space<vmem>>, vector<1x16x16x32xf32>,
    return
  }
  func.func @transform_0(%arg0: i32) -> (i32, i32, i32, i32) {
    %c0_i32 = arith.constant 0 : i32
    %c0_i32_0 = arith.constant 0 : i32
    %c0_i32_1 = arith.constant 0 : i32
    %c0_i32_2 = arith.constant 0 : i32
    return %arg0, %c0_i32, %c0_i32_0, %c0_i32_1 : i32, i32, i32, i32
  }
  func.func @transform_1(%arg0: i32) -> (i32, i32) {
    %c0_i32 = arith.constant 0 : i32
    %c0_i32_0 = arith.constant 0 : i32
    %c0_i32_1 = arith.constant 0 : i32
    return %c0_i32, %c0_i32_0 : i32, i32
  }
  func.func @transform_2(%arg0: i32) -> (i32, i32) {
    %c0_i32 = arith.constant 0 : i32
    %c0_i32_0 = arith.constant 0 : i32
    %c0_i32_1 = arith.constant 0 : i32
    return %c0_i32, %c0_i32_0 : i32, i32
  }
  func.func @transform_3(%arg0: i32) -> (i32, i32, i32) {
    %c0_i32 = arith.constant 0 : i32
    %c0_i32_0 = arith.constant 0 : i32
    %c0_i32_1 = arith.constant 0 : i32
    %c0_i32_2 = arith.constant 0 : i32
    return %c0_i32, %c0_i32_0, %c0_i32_1 : i32, i32, i32
  }
  func.func @transform_4(%arg0: i32) -> (i32, i32) {
    %c0_i32 = arith.constant 0 : i32
    %c0_i32_0 = arith.constant 0 : i32
    %c0_i32_1 = arith.constant 0 : i32
    return %c0_i32, %c0_i32_0 : i32, i32
  }
  func.func @transform_5(%arg0: i32) -> (i32, i32, i32) {
    %c0_i32 = arith.constant 0 : i32
    %c0_i32_0 = arith.constant 0 : i32
    %c0_i32_1 = arith.constant 0 : i32
    %c0_i32_2 = arith.constant 0 : i32
    return %c0_i32, %c0_i32_0, %c0_i32_1 : i32, i32, i32
  }
  func.func @transform_6(%arg0: i32) -> (i32, i32) {
    %c0_i32 = arith.constant 0 : i32
    %c0_i32_0 = arith.constant 0 : i32
    %c0_i32_1 = arith.constant 0 : i32
    return %c0_i32, %c0_i32_0 : i32, i32
  }
  func.func @transform_7(%arg0: i32) -> (i32, i32) {
    %c0_i32 = arith.constant 0 : i32
    %c0_i32_0 = arith.constant 0 : i32
    %c0_i32_1 = arith.constant 0 : i32
    return %c0_i32, %c0_i32_0 : i32, i32
  }
  func.func @transform_8(%arg0: i32) -> (i32, i32) {
    %c0_i32 = arith.constant 0 : i32
    %c0_i32_0 = arith.constant 0 : i32
    %c0_i32_1 = arith.constant 0 : i32
    return %c0_i32, %c0_i32_0 : i32, i32
  }
  func.func @transform_9(%arg0: i32) -> (i32, i32, i32, i32) {
    %c0_i32 = arith.constant 0 : i32
    %c0_i32_0 = arith.constant 0 : i32
    %c0_i32_1 = arith.constant 0 : i32
    %c0_i32_2 = arith.constant 0 : i32
    return %arg0, %c0_i32, %c0_i32_0, %c0_i32_1 : i32, i32, i32, i32
  }
}

</mosaic_0001>

<bundles_post_ra>
// kernel: tpu_custom_call.1
= control target key start
LH: loop header
LB: loop body
LE: loop exit
PB: predicated region body
PF: predicated region fallthrough
CT: control target
= control target key end

     0   :  { %14 = vsyncpa [#allocation6], 0  ;;  %s25922_s0 = inlined_call_operand.vmem [shape: f32[2,16,16,4], index: 0, kind: input, shape index: {}]   ;;  %s25923_s1 = inlined_call_operand.vmem [shape: f32[4,18], index: 1, kind: input, shape index: {}]   ;;  %s25924_s2 = inlined_call_operand.vmem [shape: f32[1,18], index: 2, kind: input, shape index: {}]   ;;  %s25925_s3 = inlined_call_operand.vmem [shape: f32[9,6,8], index: 3, kind: input, shape index: {}]   ;;  %s25926_s4 = inlined_call_operand.vmem [shape: f32[1,8], index: 4, kind: input, shape index: {}]   ;;  %s25927_s5 = inlined_call_operand.vmem [shape: f32[25,4,8], index: 5, kind: input, shape index: {}]   ;;  %s25928_s6 = inlined_call_operand.vmem [shape: f32[1,8], index: 6, kind: input, shape index: {}]   ;;  %s25929_s7 = inlined_call_operand.vmem [shape: f32[4,8], index: 7, kind: input, shape index: {}]   ;;  %s25930_s8 = inlined_call_operand.vmem [shape: f32[1,8], index: 8, kind: input, shape index: {}]   ;;  %s25931_s9 = inlined_call_operand.hbm [shape: f32[2,16,16,32], index: 9, kind: output, shape index: {}]  }
   0x1   :  { %16 = vsyncpa [#allocation6 + $0x1], 0  ;;  %s21542_s30 = smov 0   ;;  %s21544_s10 = smov 0  }
   0x2   :  { %s21546_s11 = smov 0   ;;  %s21548_s12 = smov 0  }
   0x3 LB: > { %s21563_s13 = sadd.s32 4294967295, %s21481_s12   ;;  %s16034_s14 = sadd.s32 4294967294, %s21481_s12   ;;  %s21481_s12 = sphi %s21548_s12, %s26161_s12   ;;  %s21477_s11 = sphi %s21546_s11, %s26160_s11   ;;  %s21473_s10 = sphi %s21544_s10, %s26159_s10   ;;  %s21469_s30 = sphi %s21542_s30, %s26158_s30  }
   0x4   : > { %s21567_s15 = sadd.s32 1, %s21481_s12   ;;  %s223_s16 = sadd.s32 1, %s21477_s11 }
   0x5   : > { %s220_s17 = ssub.s32 %s21481_s12, %s21567_s15  ;;  %p233_p0 = scmp.ne.s32.totalorder %s21477_s11, %s21473_s10 }
   0x6   : > { %p221_p1 = scmp.eq.s32.totalorder %s220_s17, 0  ;;  %p234_p2 = scmp.eq.s32.totalorder %s21563_s13, 1 }
   0x7   : > { %p239_p3 = scmp.ne.s32.totalorder %s21473_s10, %s21469_s30  ;;  %p240_p4 = scmp.eq.s32.totalorder %s16034_s14, 1 }
   0x8   : > { %s21578_s18 = scalar_select %p221_p1, %s21477_s11, %s223_s16  }
   0x9   : > { %p21580_p5 = por %p234_p2, %p233_p0  ;;  %p21584_p6 = por %p240_p4, %p239_p3 }
   0xa   : > { %p16037_p7 = scmp.ge.s32.totalorder %s21481_s12, 1  ;;  %p290_p8 = scmp.lt.s32.totalorder %s21481_s12, 3 }
   0xc   : > { %p291_p9 = pnand %p16037_p7, %p290_p8 }
   0xe   : > { %294 = sbr.rel (%p291_p9) target bundleno = 1869 (0x74d), region = 56 }
  0x15   : > { %v363_v0 = vld [vmem:[%s25923_s1] sm:$0xf]  ;;  %vm468_vm0 = vcmask 1043456   ;;  %p326_p10 = scmp.lt.s32.totalorder %s21563_s13, 1  ;;  %vm371_vm1 = vcmask 31744   ;;  %v21483_v1 = vmov -inf  }
  0x16   : > { %18460 = vmatprep.subr.msk.mxu0 %vm468_vm0, %v363_v0  ;;  %729 = vst.msk [vmem:[#allocation2] sm:$0xff] %vm371_vm1, %v21483_v1  ;;  %730 = vst.msk [vmem:[#allocation2 + $0x8] sm:$0xff] %vm371_vm1, %v21483_v1  ;;  %vm731_vm2 = vcmask 25600   ;;  %vm5463_vm3 = vcmask 27648   ;;  %vm1694_vm4 = vcmask 48128   ;;  %vm1697_vm5 = vcmask 41984  }
  0x17   : > { %733 = vst.msk [vmem:[#allocation2 + $0x18] sm:$0xff] %vm371_vm1, %v21483_v1  ;;  %734 = vst.msk [vmem:[#allocation2 + $0x20] sm:$0xff] %vm371_vm1, %v21483_v1  ;;  %18461 = vmatpush3.msk.msra.mxu0 %vm468_vm0, %v363_v0  ;;  %s327_s23 = scalar_select %p326_p10, %s21563_s13, 1  ;;  %vm2047_vm6 = vcmask 1045504   ;;  %vm15826_vm7 = vcmask 64512   ;;  %vm15859_vm8 = vcmask 130048  }
  0x18   : > { %736 = vst.msk [vmem:[#allocation2 + $0x30] sm:$0xff] %vm371_vm1, %v21483_v1  ;;  %737 = vst.msk [vmem:[#allocation2 + $0x38] sm:$0xff] %vm371_vm1, %v21483_v1  ;;  %s21486_s29 = smov 120   ;;  %s21487_s17 = smov 24   ;;  %vm15892_vm9 = vcmask 195584   ;;  %vm15925_vm10 = vcmask 261120  }
  0x19   : > { %739 = vst.msk [vmem:[#allocation2 + $0x48] sm:$0xff] %vm371_vm1, %v21483_v1  ;;  %740 = vst.msk [vmem:[#allocation2 + $0x50] sm:$0xff] %vm371_vm1, %v21483_v1  ;;  %s17270_s24 = sshll.u32 %s327_s23, 8  ;;  %s21488_s14 = smov 8  }
  0x1a   : > { %742 = vst.msk [vmem:[#allocation2 + $0x60] sm:$0xff] %vm371_vm1, %v21483_v1  ;;  %743 = vst.msk [vmem:[#allocation2 + $0x68] sm:$0xff] %vm371_vm1, %v21483_v1  ;;  %s21656_s27 = scalar_lea.vmem %s25922_s0, %s17270_s24  ;;  %s21485_s24 = smov 114  }
  0x1b   : > { %745 = vst.msk [vmem:[#allocation2 + $0x78] sm:$0xff] %vm371_vm1, %v21483_v1  ;;  %746 = vst.msk [vmem:[#allocation2 + $0x80] sm:$0xff] %vm371_vm1, %v21483_v1  ;;  %v21659_v2 = vld [vmem:[%s21656_s27] sm:$0xff]  ;;  %v21662_v3 = vld [vmem:[%s21656_s27 + $0x8] sm:$0xff]  ;;  %s21489_s22 = smov 16   ;;  %s323_s23 = sand.u32 1, %s21473_s10  }
  0x1c   : > { %748 = vst.msk [vmem:[#allocation2 + $0x90] sm:$0xff] %vm371_vm1, %v21483_v1  ;;  %749 = vst.msk [vmem:[#allocation2 + $0x98] sm:$0xff] %vm371_vm1, %v21483_v1  ;;  %v21665_v4 = vld [vmem:[%s21656_s27 + $0x10] sm:$0xff]  ;;  %18462 = vmatprep.mubr.msk.f32.mxu0 %vm371_vm1, %v21659_v2  ;;  %v21676_v5 = vld [vmem:[%s21656_s27 + $0x18] sm:$0xff]  ;;  %s17271_s25 = sshll.u32 %s21563_s13, 12  ;;  %s25880_s13 = scalar_lea.sflag [#allocation6], %s323_s23 }
  0x1d   : > { %751 = vst.msk [vmem:[#allocation2 + $0xa8] sm:$0xff] %vm371_vm1, %v21483_v1  ;;  %752 = vst.msk [vmem:[#allocation2 + $0xb0] sm:$0xff] %vm371_vm1, %v21483_v1  ;;  %v21679_v6 = vld [vmem:[%s21656_s27 + $0x20] sm:$0xff]  ;;  %v21682_v7 = vld [vmem:[%s21656_s27 + $0x28] sm:$0xff]  ;;  %18463 = vmatmul.mubr.msk.f32.vlgmr.msra.gmra.mrb[0].mxu0 %vm371_vm1, %v21662_v3  ;;  %s21490_s21 = smov [#allocation5]  }
  0x1e   : > { %754 = vst.msk [vmem:[#allocation2 + $0xc0] sm:$0xff] %vm371_vm1, %v21483_v1  ;;  %755 = vst.msk [vmem:[#allocation2 + $0xc8] sm:$0xff] %vm371_vm1, %v21483_v1  ;;  %18465 = vmatprep.mubr.msk.f32.mxu0 %vm371_vm1, %v21665_v4  ;;  %v21695_v8 = vld [vmem:[%s21656_s27 + $0x30] sm:$0xff]  ;;  %v21698_v9 = vld [vmem:[%s21656_s27 + $0x38] sm:$0xff] }
  0x1f   : > { %757 = vst.msk [vmem:[#allocation2 + $0xd8] sm:$0xff] %vm371_vm1, %v21483_v1  ;;  %758 = vst.msk [vmem:[#allocation2 + $0xe0] sm:$0xff] %vm371_vm1, %v21483_v1  ;;  %v21701_v10 = vld [vmem:[%s21656_s27 + $0x40] sm:$0xff]  ;;  %v21710_v11 = vld [vmem:[%s21656_s27 + $0x48] sm:$0xff] }
  0x20   : > { %760 = vst.msk [vmem:[#allocation2 + $0xf0] sm:$0xff] %vm371_vm1, %v21483_v1  ;;  %761 = vst.msk [vmem:[#allocation2 + $0xf8] sm:$0xff] %vm371_vm1, %v21483_v1  ;;  %v21713_v12 = vld [vmem:[%s21656_s27 + $0x50] sm:$0xff]  ;;  %v21716_v13 = vld [vmem:[%s21656_s27 + $0x58] sm:$0xff] }
  0x21   : > { %763 = vst.msk [vmem:[#allocation2 + $0x108] sm:$0xff] %vm371_vm1, %v21483_v1  ;;  %764 = vst.msk [vmem:[#allocation2 + $0x110] sm:$0xff] %vm371_vm1, %v21483_v1  ;;  %18466 = vmatmul.mubr.msk.f32.gmra.mrb[2].mxu0 %vm371_vm1, %v21676_v5  ;;  %v21727_v14 = vld [vmem:[%s21656_s27 + $0x60] sm:$0xff]  ;;  %v21730_v15 = vld [vmem:[%s21656_s27 + $0x68] sm:$0xff] }
  0x22   : > { %766 = vst.msk [vmem:[#allocation2 + $0x120] sm:$0xff] %vm371_vm1, %v21483_v1  ;;  %767 = vst.msk [vmem:[#allocation2 + $0x128] sm:$0xff] %vm371_vm1, %v21483_v1  ;;  %v21733_v16 = vld [vmem:[%s21656_s27 + $0x70] sm:$0xff]  ;;  %18468 = vmatprep.mubr.msk.f32.mxu0 %vm371_vm1, %v21679_v6  ;;  %v21744_v17 = vld [vmem:[%s21656_s27 + $0x78] sm:$0xff] }
  0x23   : > { %769 = vst.msk [vmem:[#allocation2 + $0x138] sm:$0xff] %vm371_vm1, %v21483_v1  ;;  %770 = vst.msk [vmem:[#allocation2 + $0x140] sm:$0xff] %vm371_vm1, %v21483_v1  ;;  %v21747_v18 = vld [vmem:[%s21656_s27 + $0x80] sm:$0xff]  ;;  %v21750_v19 = vld [vmem:[%s21656_s27 + $0x88] sm:$0xff] }
  0x24   : > { %772 = vst.msk [vmem:[#allocation2 + $0x150] sm:$0xff] %vm371_vm1, %v21483_v1  ;;  %773 = vst.msk [vmem:[#allocation2 + $0x158] sm:$0xff] %vm371_vm1, %v21483_v1  ;;  %v21775_v20 = vld [vmem:[%s21656_s27 + $0x90] sm:$0xff]  ;;  %v21780_v21 = vld [vmem:[%s21656_s27 + $0x98] sm:$0xff] }
  0x25   : > { %775 = vst.msk [vmem:[#allocation2 + $0x168] sm:$0xff] %vm371_vm1, %v21483_v1  ;;  %776 = vst.msk [vmem:[#allocation2 + $0x170] sm:$0xff] %vm371_vm1, %v21483_v1  ;;  %18469 = vmatmul.mubr.msk.f32.gmra.mrb[4].mxu0 %vm371_vm1, %v21682_v7  ;;  %v21787_v22 = vld [vmem:[%s21656_s27 + $0xa0] sm:$0xff]  ;;  %v21794_v23 = vld [vmem:[%s21656_s27 + $0xa8] sm:$0xff] }
  0x26   : > { %778 = vst.msk [vmem:[#allocation2 + $0x180] sm:$0xff] %vm371_vm1, %v21483_v1  ;;  %779 = vst.msk [vmem:[#allocation2 + $0x188] sm:$0xff] %vm371_vm1, %v21483_v1  ;;  %18471 = vmatprep.mubr.msk.f32.mxu0 %vm371_vm1, %v21695_v8  ;;  %v21797_v24 = vld [vmem:[%s21656_s27 + $0xb0] sm:$0xff]  ;;  %v21800_v25 = vld [vmem:[%s21656_s27 + $0xb8] sm:$0xff] }
  0x27   : > { %781 = vst.msk [vmem:[#allocation2 + $0x198] sm:$0xff] %vm371_vm1, %v21483_v1  ;;  %782 = vst.msk [vmem:[#allocation2 + $0x1a0] sm:$0xff] %vm371_vm1, %v21483_v1  ;;  %v21809_v26 = vld [vmem:[%s21656_s27 + $0xc0] sm:$0xff]  ;;  %v21812_v27 = vld [vmem:[%s21656_s27 + $0xc8] sm:$0xff] }
  0x28   : > { %732 = vst.msk [vmem:[#allocation2 + $0x10] sm:$0x3] %vm731_vm2, %v21483_v1  ;;  %735 = vst.msk [vmem:[#allocation2 + $0x28] sm:$0x3] %vm731_vm2, %v21483_v1  ;;  %v21815_v28 = vld [vmem:[%s21656_s27 + $0xd0] sm:$0xff]  ;;  %v21824_v29 = vld [vmem:[%s21656_s27 + $0xd8] sm:$0xff] }
  0x29   : > { %738 = vst.msk [vmem:[#allocation2 + $0x40] sm:$0x3] %vm731_vm2, %v21483_v1  ;;  %741 = vst.msk [vmem:[#allocation2 + $0x58] sm:$0x3] %vm731_vm2, %v21483_v1  ;;  %18472 = vmatmul.mubr.msk.f32.gmra.mrb[6].mxu0 %vm371_vm1, %v21698_v9  ;;  %v21827_v30 = vld [vmem:[%s21656_s27 + $0xe0] sm:$0xff]  ;;  %v21830_v31 = vld [vmem:[%s21656_s27 + $0xe8] sm:$0xff] }
  0x2a   : > { %744 = vst.msk [vmem:[#allocation2 + $0x70] sm:$0x3] %vm731_vm2, %v21483_v1  ;;  %747 = vst.msk [vmem:[#allocation2 + $0x88] sm:$0x3] %vm731_vm2, %v21483_v1  ;;  %18474 = vmatprep.mubr.msk.f32.mxu0 %vm371_vm1, %v21701_v10  ;;  %v21869_v32 = vld [vmem:[%s21656_s27 + $0xf0] sm:$0xff]  ;;  %v21876_v33 = vld [vmem:[%s21656_s27 + $0xf8] sm:$0xff] }
  0x2b   : > { %750 = vst.msk [vmem:[#allocation2 + $0xa0] sm:$0x3] %vm731_vm2, %v21483_v1  ;;  %753 = vst.msk [vmem:[#allocation2 + $0xb8] sm:$0x3] %vm731_vm2, %v21483_v1  ;;  %v818_v34 = vld [vmem:[#allocation2 + $0x8] sm:$0xff]  ;;  %v817_v35 = vld [vmem:[#allocation2] sm:$0xff] }
  0x2c   : > { %756 = vst.msk [vmem:[#allocation2 + $0xd0] sm:$0x3] %vm731_vm2, %v21483_v1  ;;  %759 = vst.msk [vmem:[#allocation2 + $0xe8] sm:$0x3] %vm731_vm2, %v21483_v1  ;;  %v850_v36 = vmax.f32 %v21662_v3, %v818_v34  ;;  %v849_v38 = vmax.f32 %v21659_v2, %v817_v35  ;;  %v881_v39 = vld [vmem:[#allocation2 + $0x1] sm:$0xff] }
  0x2d   : > { %762 = vst.msk [vmem:[#allocation2 + $0x100] sm:$0x3] %vm731_vm2, %v21483_v1  ;;  %765 = vst.msk [vmem:[#allocation2 + $0x118] sm:$0x3] %vm731_vm2, %v21483_v1  ;;  %18475 = vmatmul.mubr.msk.f32.gmra.mrb[8].mxu0 %vm371_vm1, %v21710_v11  ;;  %v945_v46 = vld [vmem:[#allocation2 + $0x2] sm:$0xff] }
  0x2e   : > { %768 = vst.msk [vmem:[#allocation2 + $0x130] sm:$0x3] %vm731_vm2, %v21483_v1  ;;  %771 = vst.msk [vmem:[#allocation2 + $0x148] sm:$0x3] %vm731_vm2, %v21483_v1  ;;  %18477 = vmatprep.mubr.msk.f32.mxu0 %vm371_vm1, %v21713_v12  ;;  %v913_v44 = vmax.f32 %v849_v38, %v881_v39 }
  0x2f   : > { %774 = vst.msk [vmem:[#allocation2 + $0x160] sm:$0x3] %vm731_vm2, %v21483_v1  ;;  %777 = vst.msk [vmem:[#allocation2 + $0x178] sm:$0x3] %vm731_vm2, %v21483_v1  ;;  %v882_v37 = vld [vmem:[#allocation2 + $0x9] sm:$0xff] }
  0x30   : > { %780 = vst.msk [vmem:[#allocation2 + $0x190] sm:$0x3] %vm731_vm2, %v21483_v1  ;;  %783 = vst.msk [vmem:[#allocation2 + $0x1a8] sm:$0x3] %vm731_vm2, %v21483_v1  ;;  %v914_v40 = vmax.f32 %v850_v36, %v882_v37  ;;  %v946_v42 = vld [vmem:[#allocation2 + $0xa] sm:$0xff]  ;;  %v977_v54 = vmax.f32 %v913_v44, %v945_v46 }
  0x31   : > { %785 = vst.msk [vmem:[#allocation2 + $0x19] sm:$0xff] %vm371_vm1, %v21659_v2  ;;  %786 = vst.msk [vmem:[#allocation2 + $0x21] sm:$0xff] %vm371_vm1, %v21662_v3  ;;  %18478 = vmatmul.mubr.msk.f32.gmra.mrb[10].mxu0 %vm371_vm1, %v21716_v13 }
  0x32   : > { %787 = vst.msk [vmem:[#allocation2 + $0x31] sm:$0xff] %vm371_vm1, %v21665_v4  ;;  %788 = vst.msk [vmem:[#allocation2 + $0x39] sm:$0xff] %vm371_vm1, %v21676_v5  ;;  %18480 = vmatprep.mubr.msk.f32.mxu0 %vm371_vm1, %v21727_v14  ;;  %v978_v47 = vmax.f32 %v914_v40, %v946_v42 }
  0x33   : > { %789 = vst.msk [vmem:[#allocation2 + $0x49] sm:$0xff] %vm371_vm1, %v21679_v6  ;;  %790 = vst.msk [vmem:[#allocation2 + $0x51] sm:$0xff] %vm371_vm1, %v21682_v7 }
  0x34   : > { %791 = vst.msk [vmem:[#allocation2 + $0x61] sm:$0xff] %vm371_vm1, %v21695_v8  ;;  %792 = vst.msk [vmem:[#allocation2 + $0x69] sm:$0xff] %vm371_vm1, %v21698_v9 }
  0x35   : > { %793 = vst.msk [vmem:[#allocation2 + $0x79] sm:$0xff] %vm371_vm1, %v21701_v10  ;;  %794 = vst.msk [vmem:[#allocation2 + $0x81] sm:$0xff] %vm371_vm1, %v21710_v11  ;;  %18481 = vmatmul.mubr.msk.f32.gmra.mrb[12].mxu0 %vm371_vm1, %v21730_v15 }
  0x36   : > { %795 = vst.msk [vmem:[#allocation2 + $0x91] sm:$0xff] %vm371_vm1, %v21713_v12  ;;  %796 = vst.msk [vmem:[#allocation2 + $0x99] sm:$0xff] %vm371_vm1, %v21716_v13  ;;  %18483 = vmatprep.mubr.msk.f32.mxu0 %vm371_vm1, %v21733_v16 }
  0x37   : > { %797 = vst.msk [vmem:[#allocation2 + $0xa9] sm:$0xff] %vm371_vm1, %v21727_v14  ;;  %798 = vst.msk [vmem:[#allocation2 + $0xb1] sm:$0xff] %vm371_vm1, %v21730_v15 }
  0x38   : > { %799 = vst.msk [vmem:[#allocation2 + $0xc1] sm:$0xff] %vm371_vm1, %v21733_v16  ;;  %800 = vst.msk [vmem:[#allocation2 + $0xc9] sm:$0xff] %vm371_vm1, %v21744_v17  ;;  %v1009_v41 = vld [vmem:[#allocation2 + $0x18] sm:$0xff]  ;;  %v1010_v43 = vld [vmem:[#allocation2 + $0x20] sm:$0xff] }
  0x39   : > { %801 = vst.msk [vmem:[#allocation2 + $0xd9] sm:$0xff] %vm371_vm1, %v21747_v18  ;;  %802 = vst.msk [vmem:[#allocation2 + $0xe1] sm:$0xff] %vm371_vm1, %v21750_v19  ;;  %18484 = vmatmul.mubr.msk.f32.gmra.mrb[14].mxu0 %vm371_vm1, %v21744_v17  ;;  %v21884_v45 = vld [vmem:[#allocation2 + $0x30] sm:$0xff]  ;;  %v851_v48 = vmax.f32 %v21665_v4, %v1009_v41  ;;  %v883_v49 = vld [vmem:[#allocation2 + $0x19] sm:$0xff]  ;;  %v852_v50 = vmax.f32 %v21676_v5, %v1010_v43  ;;  %v21898_v59 = vmax.f32 %v978_v47, %v1010_v43 }
  0x3a   : > { %803 = vst.msk [vmem:[#allocation2 + $0xf1] sm:$0xff] %vm371_vm1, %v21775_v20  ;;  %804 = vst.msk [vmem:[#allocation2 + $0xf9] sm:$0xff] %vm371_vm1, %v21780_v21  ;;  %18486 = vmatprep.mubr.msk.f32.mxu0 %vm371_vm1, %v21747_v18  ;;  %v884_v51 = vld [vmem:[#allocation2 + $0x21] sm:$0xff]  ;;  %v21888_v52 = vld [vmem:[#allocation2 + $0x38] sm:$0xff]  ;;  %v853_v53 = vmax.f32 %v21679_v6, %v21884_v45  ;;  %v21925_v38 = vmax.f32 %v977_v54, %v1009_v41 }
  0x3b   : > { %805 = vst.msk [vmem:[#allocation2 + $0x109] sm:$0xff] %vm371_vm1, %v21787_v22  ;;  %25989 = vst [vmem:[#allocation8_spill] sm:$0xff] %v21797_v24  ;;  %v21892_v55 = vld [vmem:[#allocation2 + $0x22] sm:$0xff]  ;;  %v947_v56 = vld [vmem:[#allocation2 + $0x1a] sm:$0xff]  ;;  %v915_v60 = vmax.f32 %v851_v48, %v883_v49  ;;  %v916_v0 = vmax.f32 %v852_v50, %v884_v51  ;;  %v854_v2 = vmax.f32 %v21682_v7, %v21888_v52 }
  0x3c   : > { %25990 = vst [vmem:[#allocation9_spill] sm:$0xff] %v21800_v25  ;;  %806 = vst.msk [vmem:[#allocation2 + $0x111] sm:$0xff] %vm371_vm1, %v21794_v23  ;;  %v21894_v57 = vld [vmem:[#allocation2 + $0x31] sm:$0xff]  ;;  %v21896_v58 = vld [vmem:[#allocation2 + $0x48] sm:$0xff] }
  0x3d   : > { %807 = vst.msk [vmem:[#allocation2 + $0x121] sm:$0xff] %vm371_vm1, %v21797_v24  ;;  %808 = vst.msk [vmem:[#allocation2 + $0x129] sm:$0xff] %vm371_vm1, %v21800_v25  ;;  %18487 = vmatmul.mubr.msk.f32.gmra.mrb[16].mxu0 %vm371_vm1, %v21750_v19  ;;  %v21900_v61 = vld [vmem:[#allocation2 + $0x50] sm:$0xff]  ;;  %v21902_v62 = vld [vmem:[#allocation2 + $0x60] sm:$0xff]  ;;  %v21917_v6 = vmax.f32 %v853_v53, %v21894_v57  ;;  %v855_v34 = vmax.f32 %v21695_v8, %v21896_v58  ;;  %v979_v46 = vmax.f32 %v915_v60, %v947_v56 }
  0x3e   : > { %25991 = vst [vmem:[#allocation10_spill] sm:$0xff] %v21809_v26  ;;  %25992 = vst [vmem:[#allocation11_spill] sm:$0xff] %v21812_v27  ;;  %18489 = vmatprep.mubr.msk.f32.mxu0 %vm371_vm1, %v21775_v20  ;;  %v21904_v63 = vld [vmem:[#allocation2 + $0x68] sm:$0xff]  ;;  %v21906_v1 = vld [vmem:[#allocation2 + $0x32] sm:$0xff]  ;;  %v856_v7 = vmax.f32 %v21698_v9, %v21900_v61  ;;  %v857_v40 = vmax.f32 %v21701_v10, %v21902_v62 }
  0x3f   : > { %25993 = vst [vmem:[#allocation12_spill] sm:$0xff] %v21815_v28  ;;  %809 = vst.msk [vmem:[#allocation2 + $0x139] sm:$0xff] %vm371_vm1, %v21809_v26  ;;  %v21910_v3 = vld [vmem:[#allocation2 + $0x39] sm:$0xff]  ;;  %v887_v35 = vld [vmem:[#allocation2 + $0x49] sm:$0xff]  ;;  %v858_v42 = vmax.f32 %v21710_v11, %v21904_v63  ;;  %v980_v11 = vmax.f32 %v916_v0, %v21892_v55 }
  0x40   : > { %810 = vst.msk [vmem:[#allocation2 + $0x141] sm:$0xff] %vm371_vm1, %v21812_v27  ;;  %811 = vst.msk [vmem:[#allocation2 + $0x151] sm:$0xff] %vm371_vm1, %v21815_v28  ;;  %v21912_v4 = vld [vmem:[#allocation2 + $0x78] sm:$0xff]  ;;  %v21914_v5 = vld [vmem:[#allocation2 + $0x80] sm:$0xff]  ;;  %v918_v50 = vmax.f32 %v854_v2, %v21910_v3 }
  0x41   : > { %25994 = vst [vmem:[#allocation13_spill] sm:$0xff] %v21824_v29  ;;  %25995 = vst [vmem:[#allocation14_spill] sm:$0xff] %v21827_v30  ;;  %18490 = vmatmul.mubr.msk.f32.gmra.mrb[18].mxu0 %vm371_vm1, %v21780_v21  ;;  %v21921_v36 = vld [vmem:[#allocation2 + $0x90] sm:$0xff]  ;;  %v21923_v37 = vld [vmem:[#allocation2 + $0x98] sm:$0xff]  ;;  %v859_v9 = vmax.f32 %v21713_v12, %v21912_v4  ;;  %v860_v10 = vmax.f32 %v21716_v13, %v21914_v5  ;;  %v981_v12 = vmax.f32 %v21917_v6, %v21906_v1 }
  0x42   : > { %25996 = vst [vmem:[#allocation15_spill] sm:$0xff] %v21830_v31  ;;  %812 = vst.msk [vmem:[#allocation2 + $0x159] sm:$0xff] %vm371_vm1, %v21824_v29  ;;  %18492 = vmatprep.mubr.msk.f32.mxu0 %vm371_vm1, %v21787_v22  ;;  %v888_v39 = vld [vmem:[#allocation2 + $0x51] sm:$0xff]  ;;  %v21933_v43 = vld [vmem:[#allocation2 + $0xa8] sm:$0xff]  ;;  %v861_v56 = vmax.f32 %v21727_v14, %v21921_v36  ;;  %v862_v60 = vmax.f32 %v21730_v15, %v21923_v37  ;;  %v919_v13 = vmax.f32 %v855_v34, %v887_v35 }
  0x43   : > { %813 = vst.msk [vmem:[#allocation2 + $0x169] sm:$0xff] %vm371_vm1, %v21827_v30  ;;  %814 = vst.msk [vmem:[#allocation2 + $0x171] sm:$0xff] %vm371_vm1, %v21830_v31  ;;  %v21935_v8 = vld [vmem:[#allocation2 + $0xb0] sm:$0xff]  ;;  %v21939_v41 = vld [vmem:[#allocation2 + $0x3a] sm:$0xff]  ;;  %v863_v2 = vmax.f32 %v21733_v16, %v21933_v43  ;;  %v21966_v6 = vmax.f32 %v979_v46, %v21884_v45 }
  0x44   : > { %25997 = vst [vmem:[#allocation16_spill] sm:$0xff] %v21869_v32  ;;  %815 = vst.msk [vmem:[#allocation2 + $0x181] sm:$0xff] %vm371_vm1, %v21869_v32  ;;  %v889_v47 = vld [vmem:[#allocation2 + $0x61] sm:$0xff]  ;;  %v890_v48 = vld [vmem:[#allocation2 + $0x69] sm:$0xff] }
  0x45   : > { %18493 = vmatmul.mubr.msk.f32.gmra.mrb[20].mxu0 %vm371_vm1, %v21794_v23  ;;  %25998 = vst [vmem:[#allocation17_spill] sm:$0xff] %v21876_v33  ;;  %816 = vst.msk [vmem:[#allocation2 + $0x189] sm:$0xff] %vm371_vm1, %v21876_v33  ;;  %v21945_v49 = vld [vmem:[#allocation2 + $0xc0] sm:$0xff]  ;;  %v951_v51 = vld [vmem:[#allocation2 + $0x4a] sm:$0xff]  ;;  %v921_v14 = vmax.f32 %v857_v40, %v889_v47 }
  0x46   : > { %18495 = vmatprep.mubr.msk.f32.mxu0 %vm371_vm1, %v21797_v24  ;;  %25999 = vst [vmem:[#allocation18_spill] sm:$0xff] %v21906_v1  ;;  %26000 = vst [vmem:[#allocation19_spill] sm:$0xff] %v21910_v3  ;;  %v891_v53 = vld [vmem:[#allocation2 + $0x79] sm:$0xff]  ;;  %v892_v54 = vld [vmem:[#allocation2 + $0x81] sm:$0xff]  ;;  %v983_v45 = vmax.f32 %v919_v13, %v951_v51 }
  0x47   : > { %26001 = vst [vmem:[#allocation20_spill] sm:$0xff] %v21939_v41  ;;  %v21953_v44 = vld [vmem:[#allocation2 + $0xc8] sm:$0xff]  ;;  %v894_v0 = vld [vmem:[#allocation2 + $0x99] sm:$0xff]  ;;  %v896_v15 = vld [vmem:[#allocation2 + $0xb1] sm:$0xff]  ;;  %v924_v16 = vmax.f32 %v860_v10, %v892_v54 }
  0x48   : > { %v953_v34 = vld [vmem:[#allocation2 + $0x62] sm:$0xff]  ;;  %v954_v35 = vld [vmem:[#allocation2 + $0x6a] sm:$0xff]  ;;  %v955_v40 = vld [vmem:[#allocation2 + $0x7a] sm:$0xff]  ;;  %v926_v47 = vmax.f32 %v862_v60, %v894_v0 }
  0x49   : > { %18496 = vmatmul.mubr.msk.f32.gmra.mrb[22].mxu0 %vm371_vm1, %v21800_v25  ;;  %v923_v25 = vmax.f32 %v859_v9, %v891_v53  ;;  %v897_v1 = vld [vmem:[#allocation2 + $0xc1] sm:$0xff]  ;;  %v957_v46 = vld [vmem:[#allocation2 + $0x92] sm:$0xff]  ;;  %v985_v54 = vmax.f32 %v921_v14, %v953_v34 }
  0x4a   : > { %18498 = vmatprep.mubr.msk.f32.mxu0 %vm371_vm1, %v21809_v26  ;;  %v21963_v26 = vld [vmem:[#allocation2 + $0xd8] sm:$0xff]  ;;  %v1026_v10 = vld [vmem:[#allocation2 + $0xe0] sm:$0xff] }
  0x4b   : > { %v958_v24 = vld [vmem:[#allocation2 + $0x9a] sm:$0xff]  ;;  %v867_v53 = vmax.f32 %v21775_v20, %v21963_v26  ;;  %v961_v60 = vld [vmem:[#allocation2 + $0xc2] sm:$0xff]  ;;  %v962_v20 = vld [vmem:[#allocation2 + $0xca] sm:$0xff] }
  0x4c   : > { %v990_v0 = vmax.f32 %v926_v47, %v958_v24 }
  0x4d   : > { %18499 = vmatmul.mubr.msk.f32.gmra.mrb[24].mxu0 %vm371_vm1, %v21812_v27  ;;  %v865_v27 = vmax.f32 %v21747_v18, %v21945_v49  ;;  %v956_v18 = vld [vmem:[#allocation2 + $0x82] sm:$0xff] }
  0x4e   : > { %18501 = vmatprep.mubr.msk.f32.mxu0 %vm371_vm1, %v21815_v28  ;;  %v895_v28 = vld [vmem:[#allocation2 + $0xa9] sm:$0xff]  ;;  %v988_v51 = vmax.f32 %v924_v16, %v956_v18 }
  0x4f   : > { %v927_v3 = vmax.f32 %v863_v2, %v895_v28  ;;  %v21999_v2 = vld [vmem:[#allocation2 + $0xda] sm:$0xff] }
  0x51   : > { %18502 = vmatmul.mubr.msk.f32.gmra.mrb[26].mxu0 %vm371_vm1, %v21824_v29  ;;  %v922_v29 = vmax.f32 %v858_v42, %v890_v48  ;;  %v898_v48 = vld [vmem:[#allocation2 + $0xc9] sm:$0xff] }
  0x52   : > { %18504 = vmatprep.mubr.msk.f32.mxu0 %vm371_vm1, %v21827_v30  ;;  %v920_v30 = vmax.f32 %v856_v7, %v888_v39  ;;  %v21971_v7 = vmax.f32 %v980_v11, %v21888_v52  ;;  %v982_v39 = vmax.f32 %v918_v50, %v21939_v41  ;;  %v959_v11 = vld [vmem:[#allocation2 + $0xaa] sm:$0xff]  ;;  %v929_v50 = vmax.f32 %v865_v27, %v897_v1  ;;  %v899_v41 = vld [vmem:[#allocation2 + $0xd9] sm:$0xff] }
  0x53   : > { %v986_v52 = vmax.f32 %v922_v29, %v954_v35  ;;  %v21984_v29 = vmax.f32 %v983_v45, %v21902_v62  ;;  %v991_v27 = vmax.f32 %v927_v3, %v959_v11  ;;  %v21986_v1 = vmax.f32 %v867_v53, %v899_v41  ;;  %v1073_v62 = vld [vmem:[#allocation2 + $0x1a] sm:$0xff]  ;;  %v1138_v35 = vld [vmem:[#allocation2 + $0x30] sm:$0xff] }
  0x54   : > { %26002 = vst [vmem:[#allocation21_spill] sm:$0xff] %v21971_v7  ;;  %v960_v7 = vld [vmem:[#allocation2 + $0xb2] sm:$0xff]  ;;  %v21980_v28 = vmax.f32 %v982_v39, %v21900_v61  ;;  %v21994_v61 = vmax.f32 %v985_v54, %v21912_v4  ;;  %v22005_v41 = vmax.f32 %v988_v51, %v21923_v37 }
  0x55   : > { %18505 = vmatmul.mubr.msk.f32.gmra.mrb[28].mxu0 %vm371_vm1, %v21830_v31  ;;  %v864_v31 = vmax.f32 %v21744_v17, %v21935_v8  ;;  %v866_v17 = vmax.f32 %v21750_v19, %v21953_v44  ;;  %v21997_v24 = vmax.f32 %v986_v52, %v21914_v5  ;;  %v22014_v5 = vmax.f32 %v990_v0, %v21935_v8  ;;  %v22050_v45 = vld [vmem:[#allocation2 + $0x110] sm:$0xff]  ;;  %v26004_v54 = vld [vmem:[#allocation19_spill] sm:$0xff] }
  0x56   : > { %18507 = vmatprep.mubr.msk.f32.mxu0 %vm371_vm1, %v21869_v32  ;;  %v893_v32 = vld [vmem:[#allocation2 + $0x91] sm:$0xff]  ;;  %v22021_v37 = vmax.f32 %v991_v27, %v21945_v49 }
  0x57   : > { %v925_v42 = vmax.f32 %v861_v56, %v893_v32  ;;  %v928_v9 = vmax.f32 %v864_v31, %v896_v15  ;;  %v21977_v32 = vmax.f32 %v981_v12, %v21896_v58  ;;  %v987_v56 = vmax.f32 %v923_v25, %v955_v40  ;;  %v21988_v58 = vld [vmem:[#allocation2 + $0xf0] sm:$0xff]  ;;  %v900_v25 = vld [vmem:[#allocation2 + $0xe1] sm:$0xff]  ;;  %v22007_v15 = vld [vmem:[#allocation2 + $0xf8] sm:$0xff] }
  0x58   : > { %v930_v13 = vmax.f32 %v866_v17, %v898_v48  ;;  %v901_v17 = vld [vmem:[#allocation2 + $0xf1] sm:$0xff]  ;;  %v22035_v40 = vld [vmem:[#allocation2 + $0x108] sm:$0xff]  ;;  %v870_v49 = vmax.f32 %v21794_v23, %v22007_v15  ;;  %v22048_v48 = vld [vmem:[#allocation2 + $0xf9] sm:$0xff] }
  0x59   : > { %18508 = vmatmul.mubr.msk.f32.gmra.mrb[30].mxu0 %vm371_vm1, %v21876_v33  ;;  %v952_v33 = vld [vmem:[#allocation2 + $0x52] sm:$0xff]  ;;  %v989_v31 = vmax.f32 %v925_v42, %v957_v46  ;;  %v22002_v3 = vmax.f32 %v987_v56, %v21921_v36  ;;  %v869_v36 = vmax.f32 %v21787_v22, %v21988_v58  ;;  %v1076_v46 = vld [vmem:[#allocation2 + $0x3a] sm:$0xff]  ;;  %v1140_v22 = vld [vmem:[#allocation2 + $0x48] sm:$0xff] }
  0x5a   : > { %v984_v19 = vmax.f32 %v920_v30, %v952_v33  ;;  %v868_v30 = vmax.f32 %v21780_v21, %v1026_v10  ;;  %v992_v33 = vmax.f32 %v928_v9, %v960_v7  ;;  %v993_v21 = vmax.f32 %v929_v50, %v961_v60  ;;  %v1139_v7 = vld [vmem:[#allocation2 + $0x38] sm:$0xff]  ;;  %v26006_v56 = vld [vmem:[#allocation8_spill] sm:$0xff]  ;;  %v903_v60 = vld [vmem:[#allocation2 + $0x109] sm:$0xff] }
  0x5b   : > { %v994_v14 = vmax.f32 %v930_v13, %v962_v20  ;;  %v22011_v4 = vmax.f32 %v989_v31, %v21933_v43  ;;  %v22028_v43 = vld [vmem:[#allocation2 + $0xe2] sm:$0xff]  ;;  %v22044_v42 = vld [vmem:[#allocation2 + $0x32] sm:$0xff]  ;;  %v22196_v50 = vld [vmem:[#allocation2 + $0xfa] sm:$0xff]  ;;  %v871_v51 = vmax.f32 %v26006_v56, %v22035_v40  ;;  %v22208_v27 = vmax.f32 %v870_v49, %v22048_v48 }
  0x5c   : > { %v21991_v12 = vmax.f32 %v984_v19, %v21904_v63  ;;  %v1105_v63 = vmax.f32 %v21925_v38, %v1073_v62  ;;  %v22016_v34 = vmax.f32 %v868_v30, %v900_v25  ;;  %v22024_v16 = vmax.f32 %v992_v33, %v21953_v44  ;;  %v22143_v53 = vld [vmem:[#allocation2 + $0xf2] sm:$0xff]  ;;  %v22145_v19 = vld [vmem:[#allocation2 + $0x120] sm:$0xff]  ;;  %v26008_v33 = vld [vmem:[#allocation9_spill] sm:$0xff] }
  0x5d   : > { %v995_v38 = vmax.f32 %v21986_v1, %v21999_v2  ;;  %v22033_v39 = vmax.f32 %v993_v21, %v21963_v26  ;;  %v26003_v44 = vmax.f32 %v21898_v59, %v21892_v55  ;;  %v22046_v47 = vmax.f32 %v994_v14, %v1026_v10  ;;  %v1330_v13 = vld [vmem:[%s25929_s7] sm:$0xf]  ;;  %v26007_v31 = vld [vmem:[#allocation18_spill] sm:$0xff] }
  0x5e   : > { %v22030_v8 = vmax.f32 %v1105_v63, %v1138_v35  ;;  %v21484_v26 = vmov 0.0   ;;  %v1107_v59 = vmax.f32 %v21966_v6, %v22044_v42  ;;  %v996_v9 = vmax.f32 %v22016_v34, %v22028_v43  ;;  %v26005_v6 = vld [vmem:[#allocation21_spill] sm:$0xff]  ;;  %v1141_v30 = vld [vmem:[#allocation2 + $0x50] sm:$0xff]  ;;  %18510 = vmatprep.subr.msk.mxu0 %vm468_vm0, %v1330_v13  ;;  %v26009_v25 = vld [vmem:[#allocation20_spill] sm:$0xff] }
  0x5f   : > { %v22042_v18 = vmax.f32 %v26003_v44, %v1139_v7  ;;  %5468 = vst.msk [vmem:[#allocation4 + $0x30] sm:$0xff] %vm371_vm1, %v21484_v26  ;;  %5469 = vst.msk [vmem:[#allocation4 + $0x38] sm:$0xff] %vm371_vm1, %v21484_v26  ;;  %v22141_v10 = vmax.f32 %v869_v36, %v901_v17  ;;  %v1108_v52 = vmax.f32 %v26005_v6, %v1076_v46  ;;  %v1204_v2 = vld [vmem:[#allocation2 + $0x49] sm:$0xff]  ;;  %v904_v63 = vld [vmem:[#allocation2 + $0x111] sm:$0xff]  ;;  %18511 = vmatpush3.msk.msra.mxu0 %vm468_vm0, %v1330_v13 }
  0x60   : > { %5461 = vst.msk [vmem:[#allocation4] sm:$0xff] %vm371_vm1, %v21484_v26  ;;  %5462 = vst.msk [vmem:[#allocation4 + $0x8] sm:$0xff] %vm371_vm1, %v21484_v26  ;;  %v1234_v55 = vmax.f32 %v22030_v8, %v21894_v57  ;;  %v22194_v11 = vmax.f32 %v995_v38, %v21988_v58  ;;  %v1172_v20 = vmax.f32 %v1107_v59, %v1140_v22  ;;  %v22212_v58 = vld [vmem:[#allocation2 + $0x128] sm:$0xff]  ;;  %v26010_v34 = vld [vmem:[#allocation10_spill] sm:$0xff] }
  0x61   : > { %5465 = vst.msk [vmem:[#allocation4 + $0x18] sm:$0xff] %vm371_vm1, %v21484_v26  ;;  %5466 = vst.msk [vmem:[#allocation4 + $0x20] sm:$0xff] %vm371_vm1, %v21484_v26  ;;  %v1235_v57 = vmax.f32 %v22042_v18, %v26004_v54  ;;  %v872_v1 = vmax.f32 %v26008_v33, %v22050_v45  ;;  %v1268_v62 = vld [vmem:[#allocation2 + $0x4a] sm:$0xff]  ;;  %v1173_v14 = vmax.f32 %v1108_v52, %v1141_v30  ;;  %v1269_v38 = vld [vmem:[#allocation2 + $0x52] sm:$0xff] }
  0x62   : > { %5471 = vst.msk [vmem:[#allocation4 + $0x48] sm:$0xff] %vm371_vm1, %v21484_v26  ;;  %5472 = vst.msk [vmem:[#allocation4 + $0x50] sm:$0xff] %vm371_vm1, %v21484_v26  ;;  %v1298_v0 = vmax.f32 %v1234_v55, %v26007_v31  ;;  %v873_v36 = vmax.f32 %v26010_v34, %v22145_v19  ;;  %v1236_v23 = vmax.f32 %v1172_v20, %v1204_v2  ;;  %v1205_v35 = vld [vmem:[#allocation2 + $0x51] sm:$0xff]  ;;  %v905_v49 = vld [vmem:[#allocation2 + $0x121] sm:$0xff] }
  0x63   : > { %5474 = vst.msk [vmem:[#allocation4 + $0x60] sm:$0xff] %vm371_vm1, %v21484_v26  ;;  %5475 = vst.msk [vmem:[#allocation4 + $0x68] sm:$0xff] %vm371_vm1, %v21484_v26  ;;  %v1299_v21 = vmax.f32 %v1235_v57, %v26009_v25  ;;  %v1109_v43 = vmax.f32 %v21977_v32, %v1268_v62  ;;  %v22222_v17 = vmax.f32 %v996_v9, %v22007_v15  ;;  %v22226_v7 = vld [vmem:[#allocation2 + $0x10a] sm:$0xff]  ;;  %v22228_v44 = vld [vmem:[#allocation2 + $0x138] sm:$0xff] }
  0x64   : > { %5477 = vst.msk [vmem:[#allocation4 + $0x78] sm:$0xff] %vm371_vm1, %v21484_v26  ;;  %5478 = vst.msk [vmem:[#allocation4 + $0x80] sm:$0xff] %vm371_vm1, %v21484_v26  ;;  %18512 = vmatprep.mubr.msk.f32.mxu0 %vm371_vm1, %v1298_v0  ;;  %v997_v8 = vmax.f32 %v22141_v10, %v22143_v53  ;;  %v1237_v18 = vmax.f32 %v1173_v14, %v1205_v35  ;;  %v1142_v42 = vld [vmem:[#allocation2 + $0x60] sm:$0xff]  ;;  %v1110_v48 = vmax.f32 %v21980_v28, %v1269_v38  ;;  %v26011_v32 = vld [vmem:[#allocation11_spill] sm:$0xff] }
  0x65   : > { %5480 = vst.msk [vmem:[#allocation4 + $0x90] sm:$0xff] %vm371_vm1, %v21484_v26  ;;  %5481 = vst.msk [vmem:[#allocation4 + $0x98] sm:$0xff] %vm371_vm1, %v21484_v26  ;;  %18513 = vmatmul.mubr.msk.f32.vlgmr.msra.gmra.mrb[32].mxu0 %vm371_vm1, %v1299_v21  ;;  %v22232_v55 = vmax.f32 %v871_v51, %v903_v60  ;;  %v874_v15 = vmax.f32 %v26011_v32, %v22212_v58  ;;  %v906_v59 = vld [vmem:[#allocation2 + $0x129] sm:$0xff]  ;;  %v22239_v46 = vld [vmem:[%s25924_s2] ss:$0 sm:$0xff]  ;;  %v1300_v10 = vmax.f32 %v1236_v23, %v1268_v62 }
  0x66   : > { %5483 = vst.msk [vmem:[#allocation4 + $0xa8] sm:$0xff] %vm371_vm1, %v21484_v26  ;;  %5484 = vst.msk [vmem:[#allocation4 + $0xb0] sm:$0xff] %vm371_vm1, %v21484_v26  ;;  %v16653_v9 = vld [vmem:[%s25927_s5 + $0x1c] sm:$0xf]  ;;  %v1174_v53 = vmax.f32 %v1109_v43, %v1142_v42  ;;  %v1143_v54 = vld [vmem:[#allocation2 + $0x68] sm:$0xff]  ;;  %v998_v28 = vmax.f32 %v22208_v27, %v22196_v50  ;;  %v22246_v57 = vmax.f32 %v872_v1, %v904_v63 }
  0x67   : > { %5486 = vst.msk [vmem:[#allocation4 + $0xc0] sm:$0xff] %vm371_vm1, %v21484_v26  ;;  %5487 = vst.msk [vmem:[#allocation4 + $0xc8] sm:$0xff] %vm371_vm1, %v21484_v26  ;;  %19360 = vmatprep.subr.msk.mxu1 %vm468_vm0, %v16653_v9  ;;  %v1301_v6 = vmax.f32 %v1237_v18, %v1269_v38  ;;  %v16687_v52 = vld [vmem:[%s25927_s5 + $0x20] sm:$0xf]  ;;  %v1175_v51 = vmax.f32 %v1110_v48, %v1143_v54  ;;  %v22252_v60 = vmax.f32 %v873_v36, %v905_v49  ;;  %v1207_v30 = vld [vmem:[#allocation2 + $0x69] sm:$0xff] }
  0x68   : > { %5489 = vst.msk [vmem:[#allocation4 + $0xd8] sm:$0xff] %vm371_vm1, %v21484_v26  ;;  %5490 = vst.msk [vmem:[#allocation4 + $0xe0] sm:$0xff] %vm371_vm1, %v21484_v26  ;;  %v8388_v22 = vld [vmem:[#allocation4 + $0x1a] sm:$0xff]  ;;  %18515 = vmatprep.mubr.msk.f32.mxu0 %vm371_vm1, %v1300_v10  ;;  %19361 = vmatpush3.msk.msra.mxu1 %vm468_vm0, %v16653_v9  ;;  %v1270_v20 = vld [vmem:[#allocation2 + $0x62] sm:$0xff]  ;;  %v22259_v27 = vmax.f32 %v997_v8, %v22035_v40  ;;  %v999_v14 = vmax.f32 %v22232_v55, %v22226_v7 }
  0x69   : > { %5492 = vst.msk [vmem:[#allocation4 + $0xf0] sm:$0xff] %vm371_vm1, %v21484_v26  ;;  %5493 = vst.msk [vmem:[#allocation4 + $0xf8] sm:$0xff] %vm371_vm1, %v21484_v26  ;;  %v1206_v56 = vld [vmem:[#allocation2 + $0x61] sm:$0xff]  ;;  %19362 = vmatprep.mubr.msk.f32.mxu1 %vm371_vm1, %v8388_v22  ;;  %18516 = vmatmul.mubr.msk.f32.gmra.mrb[34].mxu0 %vm371_vm1, %v1301_v6  ;;  %v1239_v25 = vmax.f32 %v1175_v51, %v1207_v30  ;;  %v1271_v21 = vld [vmem:[#allocation2 + $0x6a] sm:$0xff]  ;;  %v1111_v2 = vmax.f32 %v21984_v29, %v1270_v20 }
  0x6a   : > { %5495 = vst.msk [vmem:[#allocation4 + $0x108] sm:$0xff] %vm371_vm1, %v21484_v26  ;;  %5496 = vst.msk [vmem:[#allocation4 + $0x110] sm:$0xff] %vm371_vm1, %v21484_v26  ;;  %v26012_v13 = vld [vmem:[#allocation12_spill] sm:$0xff]  ;;  %v1238_v0 = vmax.f32 %v1174_v53, %v1206_v56  ;;  %v1144_v62 = vld [vmem:[#allocation2 + $0x78] sm:$0xff]  ;;  %19410 = vmatprep.subr.msk.mxu1 %vm468_vm0, %v16687_v52  ;;  %v1112_v36 = vmax.f32 %v21991_v12, %v1271_v21  ;;  %v22275_v38 = vmax.f32 %v874_v15, %v906_v59 }
  0x6b   : > { %5498 = vst.msk [vmem:[#allocation4 + $0x120] sm:$0xff] %vm371_vm1, %v21484_v26  ;;  %5499 = vst.msk [vmem:[#allocation4 + $0x128] sm:$0xff] %vm371_vm1, %v21484_v26  ;;  %v875_v31 = vmax.f32 %v26012_v13, %v22228_v44  ;;  %v22261_v33 = vld [vmem:[#allocation2 + $0x140] sm:$0xff]  ;;  %v22268_v63 = vld [vmem:[#allocation2 + $0x112] sm:$0xff]  ;;  %v1303_v43 = vmax.f32 %v1239_v25, %v1271_v21  ;;  %v1176_v8 = vmax.f32 %v1111_v2, %v1144_v62 }
  0x6c   : > { %5501 = vst.msk [vmem:[#allocation4 + $0x138] sm:$0xff] %vm371_vm1, %v21484_v26  ;;  %5502 = vst.msk [vmem:[#allocation4 + $0x140] sm:$0xff] %vm371_vm1, %v21484_v26  ;;  %v1302_v40 = vmax.f32 %v1238_v0, %v1270_v20  ;;  %v1145_v23 = vld [vmem:[#allocation2 + $0x80] sm:$0xff]  ;;  %v26013_v42 = vld [vmem:[#allocation13_spill] sm:$0xff]  ;;  %v22285_v9 = vmax.f32 %v998_v28, %v22050_v45 }
  0x6d   : > { %5504 = vst.msk [vmem:[#allocation4 + $0x150] sm:$0xff] %vm371_vm1, %v21484_v26  ;;  %5505 = vst.msk [vmem:[#allocation4 + $0x158] sm:$0xff] %vm371_vm1, %v21484_v26  ;;  %v22273_v35 = vld [vmem:[#allocation2 + $0x122] sm:$0xff]  ;;  %v1208_v7 = vld [vmem:[#allocation2 + $0x79] sm:$0xff]  ;;  %v876_v48 = vmax.f32 %v26013_v42, %v22261_v33  ;;  %v1177_v12 = vmax.f32 %v1112_v36, %v1145_v23 }
  0x6e   : > { %5507 = vst.msk [vmem:[#allocation4 + $0x168] sm:$0xff] %vm371_vm1, %v21484_v26  ;;  %5508 = vst.msk [vmem:[#allocation4 + $0x170] sm:$0xff] %vm371_vm1, %v21484_v26  ;;  %v1272_v49 = vld [vmem:[#allocation2 + $0x7a] sm:$0xff]  ;;  %18518 = vmatprep.mubr.msk.f32.mxu0 %vm371_vm1, %v1302_v40  ;;  %v1273_v15 = vld [vmem:[#allocation2 + $0x82] sm:$0xff]  ;;  %v1240_v54 = vmax.f32 %v1176_v8, %v1208_v7  ;;  %v1001_v56 = vmax.f32 %v22252_v60, %v22273_v35  ;;  %v22311_v8 = vmax.f32 %v999_v14, %v22145_v19 }
  0x6f   : > { %5510 = vst.msk [vmem:[#allocation4 + $0x180] sm:$0xff] %vm371_vm1, %v21484_v26  ;;  %5511 = vst.msk [vmem:[#allocation4 + $0x188] sm:$0xff] %vm371_vm1, %v21484_v26  ;;  %v907_v18 = vld [vmem:[#allocation2 + $0x139] sm:$0xff]  ;;  %v1209_v32 = vld [vmem:[#allocation2 + $0x81] sm:$0xff]  ;;  %v1113_v59 = vmax.f32 %v21994_v61, %v1272_v49  ;;  %18519 = vmatmul.mubr.msk.f32.gmra.mrb[36].mxu0 %vm371_vm1, %v1303_v43  ;;  %v1114_v6 = vmax.f32 %v21997_v24, %v1273_v15 }
  0x70   : > { %5513 = vst.msk [vmem:[#allocation4 + $0x198] sm:$0xff] %vm371_vm1, %v21484_v26  ;;  %5514 = vst.msk [vmem:[#allocation4 + $0x1a0] sm:$0xff] %vm371_vm1, %v21484_v26  ;;  %v1146_v22 = vld [vmem:[#allocation2 + $0x90] sm:$0xff]  ;;  %v1241_v61 = vmax.f32 %v1177_v12, %v1209_v32  ;;  %v1147_v45 = vld [vmem:[#allocation2 + $0x98] sm:$0xff]  ;;  %v1304_v24 = vmax.f32 %v1240_v54, %v1272_v49 }
  0x71   : > { %5516 = vst.msk [vmem:[#allocation4 + $0x1b0] sm:$0xff] %vm371_vm1, %v21484_v26  ;;  %5517 = vst.msk [vmem:[#allocation4 + $0x1b8] sm:$0xff] %vm371_vm1, %v21484_v26  ;;  %v1178_v13 = vmax.f32 %v1113_v59, %v1146_v22  ;;  %v22295_v28 = vld [vmem:[#allocation2 + $0x12a] sm:$0xff]  ;;  %v1179_v30 = vmax.f32 %v1114_v6, %v1147_v45  ;;  %v1211_v2 = vld [vmem:[#allocation2 + $0x99] sm:$0xff] }
  0x72   : > { %5519 = vst.msk [vmem:[#allocation4 + $0x1c8] sm:$0xff] %vm371_vm1, %v21484_v26  ;;  %5520 = vst.msk [vmem:[#allocation4 + $0x1d0] sm:$0xff] %vm371_vm1, %v21484_v26  ;;  %v1210_v20 = vld [vmem:[#allocation2 + $0x91] sm:$0xff]  ;;  %v1305_v25 = vmax.f32 %v1241_v61, %v1273_v15  ;;  %v1275_v62 = vld [vmem:[#allocation2 + $0x9a] sm:$0xff]  ;;  %18521 = vmatprep.mubr.msk.f32.mxu0 %vm371_vm1, %v1304_v24  ;;  %v1002_v7 = vmax.f32 %v22275_v38, %v22295_v28 }
  0x73   : > { %5470 = vst.msk [vmem:[#allocation4 + $0x40] sm:$0xf] %vm5463_vm3, %v21484_v26  ;;  %5464 = vst.msk [vmem:[#allocation4 + $0x10] sm:$0xf] %vm5463_vm3, %v21484_v26  ;;  %v1242_v21 = vmax.f32 %v1178_v13, %v1210_v20  ;;  %v1243_v23 = vmax.f32 %v1179_v30, %v1211_v2  ;;  %v1116_v43 = vmax.f32 %v22005_v41, %v1275_v62  ;;  %v1149_v42 = vld [vmem:[#allocation2 + $0xb0] sm:$0xff]  ;;  %v22336_v20 = vld [vmem:[#allocation2 + $0x13a] sm:$0xff] }
  0x74   : > { %5467 = vst.msk [vmem:[#allocation4 + $0x28] sm:$0xf] %vm5463_vm3, %v21484_v26  ;;  %5473 = vst.msk [vmem:[#allocation4 + $0x58] sm:$0xf] %vm5463_vm3, %v21484_v26  ;;  %18522 = vmatmul.mubr.msk.f32.gmra.mrb[38].mxu0 %vm371_vm1, %v1305_v25  ;;  %v1212_v19 = vld [vmem:[#allocation2 + $0xa9] sm:$0xff]  ;;  %v1213_v54 = vld [vmem:[#allocation2 + $0xb1] sm:$0xff] }
  0x75   : > { %5476 = vst.msk [vmem:[#allocation4 + $0x70] sm:$0xf] %vm5463_vm3, %v21484_v26  ;;  %5479 = vst.msk [vmem:[#allocation4 + $0x88] sm:$0xf] %vm5463_vm3, %v21484_v26  ;;  %v1307_v41 = vmax.f32 %v1243_v23, %v1275_v62  ;;  %v1276_v14 = vld [vmem:[#allocation2 + $0xaa] sm:$0xff]  ;;  %v1181_v32 = vmax.f32 %v1116_v43, %v1149_v42  ;;  %v1277_v22 = vld [vmem:[#allocation2 + $0xb2] sm:$0xff] }
  0x76   : > { %5482 = vst.msk [vmem:[#allocation4 + $0xa0] sm:$0xf] %vm5463_vm3, %v21484_v26  ;;  %5485 = vst.msk [vmem:[#allocation4 + $0xb8] sm:$0xf] %vm5463_vm3, %v21484_v26  ;;  %v1117_v6 = vmax.f32 %v22011_v4, %v1276_v14  ;;  %v1118_v24 = vmax.f32 %v22014_v5, %v1277_v22  ;;  %v1151_v2 = vld [vmem:[#allocation2 + $0xc8] sm:$0xff]  ;;  %v22341_v62 = vld [vmem:[#allocation2 + $0x158] sm:$0xff] }
  0x77   : > { %5488 = vst.msk [vmem:[#allocation4 + $0xd0] sm:$0xf] %vm5463_vm3, %v21484_v26  ;;  %5491 = vst.msk [vmem:[#allocation4 + $0xe8] sm:$0xf] %vm5463_vm3, %v21484_v26  ;;  %v1245_v45 = vmax.f32 %v1181_v32, %v1213_v54  ;;  %v1279_v43 = vld [vmem:[#allocation2 + $0xca] sm:$0xff]  ;;  %v972_v35 = vld [vmem:[#allocation2 + $0x142] sm:$0xff] }
  0x78   : > { %5494 = vst.msk [vmem:[#allocation4 + $0x100] sm:$0xf] %vm5463_vm3, %v21484_v26  ;;  %5497 = vst.msk [vmem:[#allocation4 + $0x118] sm:$0xf] %vm5463_vm3, %v21484_v26  ;;  %v1120_v60 = vmax.f32 %v22024_v16, %v1279_v43 }
  0x79   : > { %5500 = vst.msk [vmem:[#allocation4 + $0x130] sm:$0xf] %vm5463_vm3, %v21484_v26  ;;  %5503 = vst.msk [vmem:[#allocation4 + $0x148] sm:$0xf] %vm5463_vm3, %v21484_v26  ;;  %v1309_v5 = vmax.f32 %v1245_v45, %v1277_v22  ;;  %v1280_v22 = vld [vmem:[#allocation2 + $0xda] sm:$0xff] }
  0x7a   : > { %5506 = vst.msk [vmem:[#allocation4 + $0x160] sm:$0xf] %vm5463_vm3, %v21484_v26  ;;  %5509 = vst.msk [vmem:[#allocation4 + $0x178] sm:$0xf] %vm5463_vm3, %v21484_v26 }
  0x7b   : > { %5512 = vst.msk [vmem:[#allocation4 + $0x190] sm:$0xf] %vm5463_vm3, %v21484_v26  ;;  %5515 = vst.msk [vmem:[#allocation4 + $0x1a8] sm:$0xf] %vm5463_vm3, %v21484_v26  ;;  %v8389_v50 = vld [vmem:[#allocation4 + $0x22] sm:$0xff] }
  0x7c   : > { %5518 = vst.msk [vmem:[#allocation4 + $0x1c0] sm:$0xf] %vm5463_vm3, %v21484_v26  ;;  %5521 = vst.msk [vmem:[#allocation4 + $0x1d8] sm:$0xf] %vm5463_vm3, %v21484_v26  ;;  %19363 = vmatmul.mubr.msk.f32.vlgmr.msra.gmra.mrb[0].mxu1 %vm371_vm1, %v8389_v50  ;;  %v22297_v50 = vmax.f32 %v875_v31, %v907_v18  ;;  %v908_v31 = vld [vmem:[#allocation2 + $0x141] sm:$0xff] }
  0x7d   : > { %19411 = vmatpush3.msk.msra.mxu1 %vm468_vm0, %v16687_v52  ;;  %v1000_v52 = vmax.f32 %v22246_v57, %v22268_v63  ;;  %v1274_v57 = vld [vmem:[#allocation2 + $0x92] sm:$0xff]  ;;  %v22323_v15 = vmax.f32 %v876_v48, %v908_v31  ;;  %v1183_v31 = vmax.f32 %v1118_v24, %v1151_v2  ;;  %v1217_v24 = vld [vmem:[#allocation2 + $0xe1] sm:$0xff]  ;;  %1699 = vst.msk [vmem:[#allocation3 + $0x18] sm:$0xff] %vm1694_vm4, %v21484_v26  ;;  %1700 = vst.msk [vmem:[#allocation3 + $0x20] sm:$0xff] %vm1694_vm4, %v21484_v26 }
  0x7e   : > { %v1115_v63 = vmax.f32 %v22002_v3, %v1274_v57  ;;  %v1306_v3 = vmax.f32 %v1242_v21, %v1274_v57  ;;  %v26019_v57 = vld [vmem:[#allocation14_spill] sm:$0xff]  ;;  %1695 = vst.msk [vmem:[#allocation3] sm:$0xff] %vm1694_vm4, %v21484_v26  ;;  %1696 = vst.msk [vmem:[#allocation3 + $0x8] sm:$0xff] %vm1694_vm4, %v21484_v26 }
  0x7f   : > { %v22334_v48 = vmax.f32 %v1000_v52, %v22212_v58  ;;  %v1214_v58 = vld [vmem:[#allocation2 + $0xc1] sm:$0xff]  ;;  %1702 = vst.msk [vmem:[#allocation3 + $0x30] sm:$0xff] %vm1694_vm4, %v21484_v26  ;;  %1703 = vst.msk [vmem:[#allocation3 + $0x38] sm:$0xff] %vm1694_vm4, %v21484_v26 }
  0x80   : > { %18524 = vmatprep.mubr.msk.f32.mxu0 %vm371_vm1, %v1306_v3  ;;  %v1278_v52 = vld [vmem:[#allocation2 + $0xc2] sm:$0xff]  ;;  %1705 = vst.msk [vmem:[#allocation3 + $0x48] sm:$0xff] %vm1694_vm4, %v21484_v26  ;;  %1706 = vst.msk [vmem:[#allocation3 + $0x50] sm:$0xff] %vm1694_vm4, %v21484_v26 }
  0x81   : > { %18525 = vmatmul.mubr.msk.f32.gmra.mrb[40].mxu0 %vm371_vm1, %v1307_v41  ;;  %v1152_v41 = vld [vmem:[#allocation2 + $0xd8] sm:$0xff]  ;;  %1708 = vst.msk [vmem:[#allocation3 + $0x60] sm:$0xff] %vm1694_vm4, %v21484_v26  ;;  %1709 = vst.msk [vmem:[#allocation3 + $0x68] sm:$0xff] %vm1694_vm4, %v21484_v26 }
  0x82   : > { %1711 = vst.msk [vmem:[#allocation3 + $0x78] sm:$0xff] %vm1694_vm4, %v21484_v26  ;;  %1712 = vst.msk [vmem:[#allocation3 + $0x80] sm:$0xff] %vm1694_vm4, %v21484_v26 }
  0x83   : > { %1714 = vst.msk [vmem:[#allocation3 + $0x90] sm:$0xff] %vm1694_vm4, %v21484_v26  ;;  %1715 = vst.msk [vmem:[#allocation3 + $0x98] sm:$0xff] %vm1694_vm4, %v21484_v26 }
  0x84   : > { %1717 = vst.msk [vmem:[#allocation3 + $0xa8] sm:$0xff] %vm1694_vm4, %v21484_v26  ;;  %1718 = vst.msk [vmem:[#allocation3 + $0xb0] sm:$0xff] %vm1694_vm4, %v21484_v26 }
  0x85   : > { %1720 = vst.msk [vmem:[#allocation3 + $0xc0] sm:$0xff] %vm1694_vm4, %v21484_v26  ;;  %1721 = vst.msk [vmem:[#allocation3 + $0xc8] sm:$0xff] %vm1694_vm4, %v21484_v26 }
  0x86   : > { %1723 = vst.msk [vmem:[#allocation3 + $0xd8] sm:$0xff] %vm1694_vm4, %v21484_v26  ;;  %1724 = vst.msk [vmem:[#allocation3 + $0xe0] sm:$0xff] %vm1694_vm4, %v21484_v26 }
  0x87   : > { %1726 = vst.msk [vmem:[#allocation3 + $0xf0] sm:$0xff] %vm1694_vm4, %v21484_v26  ;;  %1727 = vst.msk [vmem:[#allocation3 + $0xf8] sm:$0xff] %vm1694_vm4, %v21484_v26 }
  0x88   : > { %1729 = vst.msk [vmem:[#allocation3 + $0x108] sm:$0xff] %vm1694_vm4, %v21484_v26  ;;  %1730 = vst.msk [vmem:[#allocation3 + $0x110] sm:$0xff] %vm1694_vm4, %v21484_v26 }
  0x89   : > { %1732 = vst.msk [vmem:[#allocation3 + $0x120] sm:$0xff] %vm1694_vm4, %v21484_v26  ;;  %1733 = vst.msk [vmem:[#allocation3 + $0x128] sm:$0xff] %vm1694_vm4, %v21484_v26 }
  0x8a   : > { %1735 = vst.msk [vmem:[#allocation3 + $0x138] sm:$0xff] %vm1694_vm4, %v21484_v26  ;;  %1736 = vst.msk [vmem:[#allocation3 + $0x140] sm:$0xff] %vm1694_vm4, %v21484_v26 }
  0x8b   : > { %1738 = vst.msk [vmem:[#allocation3 + $0x150] sm:$0xff] %vm1694_vm4, %v21484_v26  ;;  %1739 = vst.msk [vmem:[#allocation3 + $0x158] sm:$0xff] %vm1694_vm4, %v21484_v26 }
  0x8c   : > { %1741 = vst.msk [vmem:[#allocation3 + $0x168] sm:$0xff] %vm1694_vm4, %v21484_v26  ;;  %1742 = vst.msk [vmem:[#allocation3 + $0x170] sm:$0xff] %vm1694_vm4, %v21484_v26 }
  0x8d   : > { %1744 = vst.msk [vmem:[#allocation3 + $0x180] sm:$0xff] %vm1694_vm4, %v21484_v26  ;;  %1745 = vst.msk [vmem:[#allocation3 + $0x188] sm:$0xff] %vm1694_vm4, %v21484_v26 }
  0x8e   : > { %1747 = vst.msk [vmem:[#allocation3 + $0x198] sm:$0xff] %vm1694_vm4, %v21484_v26  ;;  %1748 = vst.msk [vmem:[#allocation3 + $0x1a0] sm:$0xff] %vm1694_vm4, %v21484_v26 }
  0x8f   : > { %1701 = vst.msk [vmem:[#allocation3 + $0x28] sm:$0x3] %vm1697_vm5, %v21484_v26  ;;  %1698 = vst.msk [vmem:[#allocation3 + $0x10] sm:$0x3] %vm1697_vm5, %v21484_v26 }
  0x90   : > { %1704 = vst.msk [vmem:[#allocation3 + $0x40] sm:$0x3] %vm1697_vm5, %v21484_v26  ;;  %1707 = vst.msk [vmem:[#allocation3 + $0x58] sm:$0x3] %vm1697_vm5, %v21484_v26 }
  0x91   : > { %1710 = vst.msk [vmem:[#allocation3 + $0x70] sm:$0x3] %vm1697_vm5, %v21484_v26  ;;  %1713 = vst.msk [vmem:[#allocation3 + $0x88] sm:$0x3] %vm1697_vm5, %v21484_v26 }
  0x92   : > { %1716 = vst.msk [vmem:[#allocation3 + $0xa0] sm:$0x3] %vm1697_vm5, %v21484_v26  ;;  %1719 = vst.msk [vmem:[#allocation3 + $0xb8] sm:$0x3] %vm1697_vm5, %v21484_v26 }
  0x93   : > { %1722 = vst.msk [vmem:[#allocation3 + $0xd0] sm:$0x3] %vm1697_vm5, %v21484_v26  ;;  %1725 = vst.msk [vmem:[#allocation3 + $0xe8] sm:$0x3] %vm1697_vm5, %v21484_v26 }
  0x94   : > { %1728 = vst.msk [vmem:[#allocation3 + $0x100] sm:$0x3] %vm1697_vm5, %v21484_v26  ;;  %1731 = vst.msk [vmem:[#allocation3 + $0x118] sm:$0x3] %vm1697_vm5, %v21484_v26 }
  0x95   : > { %1734 = vst.msk [vmem:[#allocation3 + $0x130] sm:$0x3] %vm1697_vm5, %v21484_v26  ;;  %1737 = vst.msk [vmem:[#allocation3 + $0x148] sm:$0x3] %vm1697_vm5, %v21484_v26 }
  0x96   : > { %1740 = vst.msk [vmem:[#allocation3 + $0x160] sm:$0x3] %vm1697_vm5, %v21484_v26  ;;  %1743 = vst.msk [vmem:[#allocation3 + $0x178] sm:$0x3] %vm1697_vm5, %v21484_v26 }
  0x97   : > { %1746 = vst.msk [vmem:[#allocation3 + $0x190] sm:$0x3] %vm1697_vm5, %v21484_v26  ;;  %1749 = vst.msk [vmem:[#allocation3 + $0x1a8] sm:$0x3] %vm1697_vm5, %v21484_v26  ;;  %v1918_v26 = vld [vmem:[#allocation3] sm:$0xff] }
  0xf0   : > { %v18464_v1 = vpop.f32.mrb[0].mxu0 }
  0xf1   : > { %v538_v34 = vpop.f32.mrb[1].mxu0  ;;  %v544_v55 = vadd.f32 %v18464_v1, %v22239_v46 }
  0xf2   : > { %v539_v29 = vadd.f32 %v22239_v46, %v538_v34 }
  0xf3   : > { %v22302_v1 = vmax.f32 %v544_v55, 0.0  ;;  %v22316_v55 = vld [vmem:[#allocation2 + $0x150] sm:$0xff] }
  0xf4   : > { %v22287_v10 = vmax.f32 %v539_v29, 0.0  ;;  %v18467_v53 = vpop.f32.mrb[2].mxu0  ;;  %v1148_v29 = vld [vmem:[#allocation2 + $0xa8] sm:$0xff]  ;;  %v877_v30 = vmax.f32 %v26019_v57, %v22316_v55  ;;  %v1121_v57 = vmax.f32 %v22033_v39, %v1280_v22  ;;  %v910_v39 = vld [vmem:[#allocation2 + $0x159] sm:$0xff] }
  0xf5   : > { %v548_v51 = vpop.f32.mrb[3].mxu0  ;;  %26015 = vst [vmem:[#allocation21_spill] sm:$0xff] %v22302_v1  ;;  %v554_v34 = vadd.f32 %v18467_v53, %v22239_v46  ;;  %v1180_v18 = vmax.f32 %v1115_v63, %v1148_v29  ;;  %v1215_v29 = vld [vmem:[#allocation2 + $0xc9] sm:$0xff] }
  0xf6   : > { %26014 = vst [vmem:[#allocation19_spill] sm:$0xff] %v22287_v10  ;;  %v549_v0 = vadd.f32 %v22239_v46, %v548_v51  ;;  %5522 = vrot.lane.b32.xlu0 %v22287_v10, %s21485_s24 }
  0xf7   : > { %v1244_v53 = vmax.f32 %v1180_v18, %v1212_v19  ;;  %v22328_v51 = vmax.f32 %v554_v34, 0.0  ;;  %v22352_v34 = vmax.f32 %v1001_v56, %v22228_v44  ;;  %v1003_v44 = vmax.f32 %v22297_v50, %v22336_v20  ;;  %v26022_v56 = vld [vmem:[#allocation15_spill] sm:$0xff]  ;;  %v1281_v20 = vld [vmem:[#allocation2 + $0xe2] sm:$0xff] }
  0xf8   : > { %v22306_v40 = vmax.f32 %v549_v0, 0.0  ;;  %v18470_v36 = vpop.f32.mrb[4].mxu0  ;;  %v1150_v0 = vld [vmem:[#allocation2 + $0xc0] sm:$0xff]  ;;  %v878_v19 = vmax.f32 %v26022_v56, %v22341_v62  ;;  %v1122_v38 = vmax.f32 %v22046_v47, %v1281_v20 }
  0xf9   : > { %v558_v49 = vpop.f32.mrb[5].mxu0  ;;  %v564_v59 = vadd.f32 %v18470_v36, %v22239_v46  ;;  %26017 = vst [vmem:[#allocation18_spill] sm:$0xff] %v22328_v51  ;;  %v1308_v4 = vmax.f32 %v1244_v53, %v1276_v14  ;;  %v1182_v21 = vmax.f32 %v1117_v6, %v1150_v0  ;;  %v909_v53 = vld [vmem:[#allocation2 + $0x151] sm:$0xff]  ;;  %v1216_v50 = vld [vmem:[#allocation2 + $0xd9] sm:$0xff] }
  0xfa   : > { %26016 = vst [vmem:[#allocation8_spill] sm:$0xff] %v22306_v40  ;;  %v559_v12 = vadd.f32 %v22239_v46, %v558_v49  ;;  %5526 = vrot.lane.b32.xlu1 %v22306_v40, %s21485_s24  ;;  %5524 = vrot.lane.b32.xlu0 %v22302_v1, %s21485_s24  ;;  %v1119_v49 = vmax.f32 %v22021_v37, %v1278_v52 }
  0xfb   : > { %v22354_v36 = vmax.f32 %v564_v59, 0.0  ;;  %18527 = vmatprep.mubr.msk.f32.mxu0 %vm371_vm1, %v1308_v4  ;;  %v1246_v23 = vmax.f32 %v1182_v21, %v1214_v58  ;;  %v1153_v59 = vld [vmem:[#allocation2 + $0xe0] sm:$0xff]  ;;  %v22387_v28 = vmax.f32 %v877_v30, %v909_v53 }
  0xfc   : > { %v22330_v61 = vmax.f32 %v559_v12, 0.0  ;;  %v18473_v13 = vpop.f32.mrb[6].mxu0  ;;  %v1247_v12 = vmax.f32 %v1183_v31, %v1215_v29  ;;  %18528 = vmatmul.mubr.msk.f32.gmra.mrb[42].mxu0 %vm371_vm1, %v1309_v5  ;;  %v1184_v32 = vmax.f32 %v1119_v49, %v1152_v41  ;;  %v1185_v6 = vmax.f32 %v1120_v60, %v1153_v59  ;;  %v22402_v41 = vld [vmem:[#allocation2 + $0x152] sm:$0xff] }
  0xfd   : > { %v568_v25 = vpop.f32.mrb[7].mxu0  ;;  %26020 = vst [vmem:[#allocation20_spill] sm:$0xff] %v22354_v36  ;;  %v574_v3 = vadd.f32 %v18473_v13, %v22239_v46  ;;  %v1310_v37 = vmax.f32 %v1246_v23, %v1278_v52  ;;  %v22376_v13 = vmax.f32 %v1002_v7, %v22261_v33  ;;  %v1004_v33 = vmax.f32 %v22323_v15, %v972_v35  ;;  %v1155_v52 = vld [vmem:[#allocation2 + $0xf8] sm:$0xff] }
  0xfe   : > { %26018 = vst [vmem:[#allocation9_spill] sm:$0xff] %v22330_v61  ;;  %v569_v63 = vadd.f32 %v22239_v46, %v568_v25  ;;  %5528 = vrot.lane.b32.xlu1 %v22328_v51, %s21485_s24  ;;  %5530 = vrot.lane.b32.xlu0 %v22330_v61, %s21485_s24  ;;  %v1311_v16 = vmax.f32 %v1247_v12, %v1279_v43  ;;  %v1218_v23 = vld [vmem:[#allocation2 + $0xf1] sm:$0xff] }
  0xff   : > { %18530 = vmatprep.mubr.msk.f32.mxu0 %vm371_vm1, %v1310_v37  ;;  %v1248_v0 = vmax.f32 %v1184_v32, %v1216_v50  ;;  %v22381_v25 = vmax.f32 %v574_v3, 0.0  ;;  %v1249_v2 = vmax.f32 %v1185_v6, %v1217_v24  ;;  %v1282_v15 = vld [vmem:[#allocation2 + $0xf2] sm:$0xff]  ;;  %v1187_v30 = vmax.f32 %v1122_v38, %v1155_v52  ;;  %v1156_v37 = vld [vmem:[#allocation2 + $0x108] sm:$0xff]  ;;  %v22414_v50 = vld [vmem:[#allocation2 + $0x15a] sm:$0xff] }
 0x100   : > { %v22359_v18 = vmax.f32 %v569_v63, 0.0  ;;  %v18476_v42 = vpop.f32.mrb[8].mxu0  ;;  %v1154_v63 = vld [vmem:[#allocation2 + $0xf0] sm:$0xff]  ;;  %18531 = vmatmul.mubr.msk.f32.gmra.mrb[44].mxu0 %vm371_vm1, %v1311_v16  ;;  %v22396_v29 = vmax.f32 %v1003_v44, %v22316_v55  ;;  %v1219_v3 = vld [vmem:[#allocation2 + $0xf9] sm:$0xff]  ;;  %v1123_v12 = vmax.f32 %v22194_v11, %v1282_v15  ;;  %v22409_v44 = vmax.f32 %v1004_v33, %v22341_v62  ;;  %v1037_v32 = vld [vmem:[#allocation2 + $0x168] sm:$0xff] }
 0x101   : > { %v578_v14 = vpop.f32.mrb[9].mxu0  ;;  %v584_v45 = vadd.f32 %v18476_v42, %v22239_v46  ;;  %26023 = vst [vmem:[#allocation11_spill] sm:$0xff] %v22381_v25  ;;  %v1312_v5 = vmax.f32 %v1248_v0, %v1280_v22  ;;  %v1186_v58 = vmax.f32 %v1121_v57, %v1154_v63  ;;  %v1313_v47 = vmax.f32 %v1249_v2, %v1281_v20  ;;  %v1283_v42 = vld [vmem:[#allocation2 + $0xfa] sm:$0xff]  ;;  %v1157_v16 = vld [vmem:[#allocation2 + $0x110] sm:$0xff] }
 0x102   : > { %26021 = vst [vmem:[#allocation10_spill] sm:$0xff] %v22359_v18  ;;  %v579_v54 = vadd.f32 %v22239_v46, %v578_v14  ;;  %5532 = vrot.lane.b32.xlu1 %v22354_v36, %s21485_s24  ;;  %5534 = vrot.lane.b32.xlu0 %v22359_v18, %s21485_s24  ;;  %v1251_v14 = vmax.f32 %v1187_v30, %v1219_v3  ;;  %v1220_v62 = vld [vmem:[#allocation2 + $0x109] sm:$0xff]  ;;  %v1221_v20 = vld [vmem:[#allocation2 + $0x111] sm:$0xff] }
 0x103   : > { %v22398_v43 = vmax.f32 %v584_v45, 0.0  ;;  %18533 = vmatprep.mubr.msk.f32.mxu0 %vm371_vm1, %v1312_v5  ;;  %v1250_v49 = vmax.f32 %v1186_v58, %v1218_v23  ;;  %v1124_v55 = vmax.f32 %v22222_v17, %v1283_v42  ;;  %v22411_v59 = vmax.f32 %v878_v19, %v910_v39  ;;  %v1284_v19 = vld [vmem:[#allocation2 + $0x10a] sm:$0xff]  ;;  %v1285_v57 = vld [vmem:[#allocation2 + $0x112] sm:$0xff]  ;;  %v1158_v5 = vld [vmem:[#allocation2 + $0x120] sm:$0xff] }
 0x104   : > { %v22383_v4 = vmax.f32 %v579_v54, 0.0  ;;  %v18479_v21 = vpop.f32.mrb[10].mxu0  ;;  %18534 = vmatmul.mubr.msk.f32.gmra.mrb[46].mxu0 %vm371_vm1, %v1313_v47  ;;  %v1188_v54 = vmax.f32 %v1123_v12, %v1156_v37  ;;  %v1315_v17 = vmax.f32 %v1251_v14, %v1283_v42  ;;  %v1005_v45 = vmax.f32 %v22387_v28, %v22402_v41  ;;  %v22426_v2 = vld [vmem:[#allocation2 + $0x170] sm:$0xff]  ;;  %v26029_v39 = vld [vmem:[#allocation16_spill] sm:$0xff]  ;;  %v1159_v23 = vld [vmem:[#allocation2 + $0x128] sm:$0xff] }
 0x105   : > { %v588_v7 = vpop.f32.mrb[11].mxu0  ;;  %26025 = vst [vmem:[#allocation13_spill] sm:$0xff] %v22398_v43  ;;  %v594_v60 = vadd.f32 %v18479_v21, %v22239_v46  ;;  %v1314_v11 = vmax.f32 %v1250_v49, %v1282_v15  ;;  %v1189_v6 = vmax.f32 %v1124_v55, %v1157_v16  ;;  %v1125_v21 = vmax.f32 %v22259_v27, %v1284_v19  ;;  %v1222_v49 = vld [vmem:[#allocation2 + $0x121] sm:$0xff]  ;;  %v1223_v14 = vld [vmem:[#allocation2 + $0x129] sm:$0xff] }
 0x106   : > { %26024 = vst [vmem:[#allocation12_spill] sm:$0xff] %v22383_v4  ;;  %v589_v31 = vadd.f32 %v22239_v46, %v588_v7  ;;  %5536 = vrot.lane.b32.xlu1 %v22381_v25, %s21485_s24  ;;  %5538 = vrot.lane.b32.xlu0 %v22383_v4, %s21485_s24  ;;  %v1252_v24 = vmax.f32 %v1188_v54, %v1220_v62  ;;  %v1286_v3 = vld [vmem:[#allocation2 + $0x122] sm:$0xff]  ;;  %v1287_v37 = vld [vmem:[#allocation2 + $0x12a] sm:$0xff] }
 0x107   : > { %18536 = vmatprep.mubr.msk.f32.mxu0 %vm371_vm1, %v1314_v11  ;;  %v22428_v63 = vmax.f32 %v594_v60, 0.0  ;;  %v1253_v7 = vmax.f32 %v1189_v6, %v1221_v20  ;;  %v1126_v28 = vmax.f32 %v22285_v9, %v1285_v57  ;;  %v1006_v58 = vmax.f32 %v22411_v59, %v22414_v50  ;;  %v22442_v9 = vld [vmem:[#allocation2 + $0x169] sm:$0xff]  ;;  %v22453_v54 = vld [vmem:[#allocation2 + $0x171] sm:$0xff] }
 0x108   : > { %v22405_v35 = vmax.f32 %v589_v31, 0.0  ;;  %v18482_v56 = vpop.f32.mrb[12].mxu0  ;;  %v879_v31 = vmax.f32 %v26029_v39, %v1037_v32  ;;  %18537 = vmatmul.mubr.msk.f32.gmra.mrb[48].mxu0 %vm371_vm1, %v1315_v17  ;;  %v1316_v27 = vmax.f32 %v1252_v24, %v1284_v19  ;;  %v1190_v47 = vmax.f32 %v1125_v21, %v1158_v5  ;;  %v26031_v41 = vld [vmem:[#allocation17_spill] sm:$0xff]  ;;  %v1160_v50 = vld [vmem:[#allocation2 + $0x138] sm:$0xff] }
 0x109   : > { %v598_v53 = vpop.f32.mrb[13].mxu0  ;;  %v604_v0 = vadd.f32 %v18482_v56, %v22239_v46  ;;  %26027 = vst [vmem:[#allocation15_spill] sm:$0xff] %v22428_v63  ;;  %v1317_v30 = vmax.f32 %v1253_v7, %v1285_v57  ;;  %v1191_v42 = vmax.f32 %v1126_v28, %v1159_v23  ;;  %v880_v60 = vmax.f32 %v26031_v41, %v22426_v2  ;;  %v22461_v20 = vld [vmem:[#allocation2 + $0x16a] sm:$0xff]  ;;  %v1225_v5 = vld [vmem:[#allocation2 + $0x141] sm:$0xff] }
 0x10a   : > { %26026 = vst [vmem:[#allocation14_spill] sm:$0xff] %v22405_v35  ;;  %v599_v22 = vadd.f32 %v22239_v46, %v598_v53  ;;  %5540 = vrot.lane.b32.xlu1 %v22398_v43, %s21485_s24  ;;  %5542 = vrot.lane.b32.xlu0 %v22405_v35, %s21485_s24  ;;  %v1254_v56 = vmax.f32 %v1190_v47, %v1222_v49  ;;  %v1289_v28 = vld [vmem:[#allocation2 + $0x142] sm:$0xff] }
 0x10b   : > { %v22444_v12 = vmax.f32 %v604_v0, 0.0  ;;  %18539 = vmatprep.mubr.msk.f32.mxu0 %vm371_vm1, %v1316_v27  ;;  %v1127_v55 = vmax.f32 %v22311_v8, %v1286_v3  ;;  %v1255_v16 = vmax.f32 %v1191_v42, %v1223_v14  ;;  %v22456_v17 = vmax.f32 %v1005_v45, %v1037_v32  ;;  %v1161_v0 = vld [vmem:[#allocation2 + $0x140] sm:$0xff]  ;;  %v22475_v27 = vld [vmem:[#allocation2 + $0x172] sm:$0xff] }
 0x10c   : > { %v22430_v38 = vmax.f32 %v599_v22, 0.0  ;;  %v18485_v33 = vpop.f32.mrb[14].mxu0  ;;  %v1128_v22 = vmax.f32 %v22334_v48, %v1287_v37  ;;  %v943_v19 = vmax.f32 %v879_v31, %v22442_v9  ;;  %18540 = vmatmul.mubr.msk.f32.gmra.mrb[50].mxu0 %vm371_vm1, %v1317_v30  ;;  %v1318_v6 = vmax.f32 %v1254_v56, %v1286_v3  ;;  %v1224_v32 = vld [vmem:[#allocation2 + $0x139] sm:$0xff] }
 0x10d   : > { %v608_v52 = vpop.f32.mrb[15].mxu0  ;;  %26030 = vst [vmem:[#allocation16_spill] sm:$0xff] %v22444_v12  ;;  %v614_v59 = vadd.f32 %v18485_v33, %v22239_v46  ;;  %v1192_v8 = vmax.f32 %v1127_v55, %v1160_v50  ;;  %v1319_v48 = vmax.f32 %v1255_v16, %v1287_v37  ;;  %v1288_v45 = vld [vmem:[#allocation2 + $0x13a] sm:$0xff]  ;;  %v944_v33 = vmax.f32 %v880_v60, %v22453_v54 }
 0x10e   : > { %26028 = vst [vmem:[#allocation22_spill] sm:$0xff] %v22430_v38  ;;  %v609_v15 = vadd.f32 %v22239_v46, %v608_v52  ;;  %5544 = vrot.lane.b32.xlu1 %v22428_v63, %s21485_s24  ;;  %5546 = vrot.lane.b32.xlu0 %v22430_v38, %s21485_s24  ;;  %v1193_v57 = vmax.f32 %v1128_v22, %v1161_v0  ;;  %v1163_v60 = vld [vmem:[#allocation2 + $0x158] sm:$0xff]  ;;  %v1039_v56 = vld [vmem:[#allocation2 + $0x180] sm:$0xff] }
 0x10f   : > { %18542 = vmatprep.mubr.msk.f32.mxu0 %vm371_vm1, %v1318_v6  ;;  %v1256_v7 = vmax.f32 %v1192_v8, %v1224_v32  ;;  %v1129_v52 = vmax.f32 %v22352_v34, %v1288_v45  ;;  %v22471_v39 = vmax.f32 %v614_v59, 0.0  ;;  %v1130_v30 = vmax.f32 %v22376_v13, %v1289_v28  ;;  %v1227_v16 = vld [vmem:[#allocation2 + $0x159] sm:$0xff] }
 0x110   : > { %v22451_v53 = vmax.f32 %v609_v15, 0.0  ;;  %v18488_v11 = vpop.f32.mrb[16].mxu0  ;;  %v1257_v23 = vmax.f32 %v1193_v57, %v1225_v5  ;;  %v1162_v15 = vld [vmem:[#allocation2 + $0x150] sm:$0xff]  ;;  %v22479_v49 = vmax.f32 %v1006_v58, %v22426_v2  ;;  %v1007_v3 = vmax.f32 %v943_v19, %v22461_v20  ;;  %18543 = vmatmul.mubr.msk.f32.gmra.mrb[52].mxu0 %vm371_vm1, %v1319_v48  ;;  %v1291_v50 = vld [vmem:[#allocation2 + $0x15a] sm:$0xff] }
 0x111   : > { %v618_v62 = vpop.f32.mrb[17].mxu0  ;;  %v624_v21 = vadd.f32 %v18488_v11, %v22239_v46  ;;  %26033 = vst [vmem:[#allocation23_spill] sm:$0xff] %v22471_v39  ;;  %v1320_v34 = vmax.f32 %v1256_v7, %v1288_v45  ;;  %v1194_v41 = vmax.f32 %v1129_v52, %v1162_v15  ;;  %v1226_v2 = vld [vmem:[#allocation2 + $0x151] sm:$0xff]  ;;  %v1195_v37 = vmax.f32 %v1130_v30, %v1163_v60 }
 0x112   : > { %26032 = vst [vmem:[#allocation17_spill] sm:$0xff] %v22451_v53  ;;  %v619_v24 = vadd.f32 %v22239_v46, %v618_v62  ;;  %5548 = vrot.lane.b32.xlu1 %v22444_v12, %s21485_s24  ;;  %5550 = vrot.lane.b32.xlu0 %v22451_v53, %s21485_s24  ;;  %v1321_v13 = vmax.f32 %v1257_v23, %v1289_v28  ;;  %v1290_v58 = vld [vmem:[#allocation2 + $0x152] sm:$0xff]  ;;  %v1040_v62 = vld [vmem:[#allocation2 + $0x188] sm:$0xff] }
 0x113   : > { %v22488_v55 = vmax.f32 %v624_v21, 0.0  ;;  %v1008_v59 = vmax.f32 %v944_v33, %v22475_v27  ;;  %18545 = vmatprep.mubr.msk.f32.mxu0 %vm371_vm1, %v1320_v34  ;;  %v1258_v11 = vmax.f32 %v1194_v41, %v1226_v2  ;;  %v1131_v22 = vmax.f32 %v22396_v29, %v1290_v58  ;;  %v1165_v33 = vld [vmem:[#allocation2 + $0x170] sm:$0xff]  ;;  %v1166_v41 = vld [vmem:[#allocation2 + $0x180] sm:$0xff] }
 0x114   : > { %v22473_v31 = vmax.f32 %v619_v24, 0.0  ;;  %v18491_v47 = vpop.f32.mrb[18].mxu0  ;;  %v1259_v0 = vmax.f32 %v1195_v37, %v1227_v16  ;;  %v1164_v24 = vld [vmem:[#allocation2 + $0x168] sm:$0xff]  ;;  %v1132_v48 = vmax.f32 %v22409_v44, %v1291_v50  ;;  %v1071_v32 = vmax.f32 %v1007_v3, %v1039_v56  ;;  %18546 = vmatmul.mubr.msk.f32.gmra.mrb[54].mxu0 %vm371_vm1, %v1321_v13  ;;  %v1102_v15 = vld [vmem:[#allocation2 + $0x172] sm:$0xff] }
 0x115   : > { %v628_v42 = vpop.f32.mrb[19].mxu0  ;;  %26035 = vst [vmem:[#allocation25_spill] sm:$0xff] %v22488_v55  ;;  %v634_v19 = vadd.f32 %v18491_v47, %v22239_v46  ;;  %v1322_v57 = vmax.f32 %v1258_v11, %v1290_v58  ;;  %v1196_v21 = vmax.f32 %v1131_v22, %v1164_v24  ;;  %v1101_v28 = vld [vmem:[#allocation2 + $0x16a] sm:$0xff]  ;;  %v1072_v52 = vmax.f32 %v1008_v59, %v1040_v62  ;;  %v1230_v2 = vld [vmem:[#allocation2 + $0x181] sm:$0xff] }
 0x116   : > { %26034 = vst [vmem:[#allocation24_spill] sm:$0xff] %v22473_v31  ;;  %v629_v14 = vadd.f32 %v22239_v46, %v628_v42  ;;  %5552 = vrot.lane.b32.xlu1 %v22471_v39, %s21485_s24  ;;  %5554 = vrot.lane.b32.xlu0 %v22473_v31, %s21485_s24  ;;  %v1323_v29 = vmax.f32 %v1259_v0, %v1291_v50  ;;  %v1294_v58 = vld [vmem:[#allocation2 + $0x182] sm:$0xff]  ;;  %v1295_v11 = vld [vmem:[#allocation2 + $0x18a] sm:$0xff] }
 0x117   : > { %v1197_v5 = vmax.f32 %v1132_v48, %v1165_v33  ;;  %18548 = vmatprep.mubr.msk.f32.mxu0 %vm371_vm1, %v1322_v57  ;;  %v1260_v47 = vmax.f32 %v1196_v21, %v22442_v9  ;;  %v1133_v23 = vmax.f32 %v22456_v17, %v1101_v28  ;;  %v22507_v30 = vmax.f32 %v634_v19, 0.0  ;;  %v1167_v9 = vld [vmem:[#allocation2 + $0x188] sm:$0xff]  ;;  %v1232_v21 = vld [vmem:[#allocation2 + $0x199] sm:$0xff] }
 0x118   : > { %v22494_v6 = vmax.f32 %v629_v14, 0.0  ;;  %v18494_v8 = vpop.f32.mrb[20].mxu0  ;;  %v1134_v60 = vmax.f32 %v22479_v49, %v1102_v15  ;;  %18549 = vmatmul.mubr.msk.f32.gmra.mrb[56].mxu0 %vm371_vm1, %v1323_v29  ;;  %v1231_v59 = vld [vmem:[#allocation2 + $0x189] sm:$0xff]  ;;  %v1135_v16 = vmax.f32 %v1071_v32, %v1294_v58  ;;  %v1136_v0 = vmax.f32 %v1072_v52, %v1295_v11  ;;  %v1233_v29 = vld [vmem:[#allocation2 + $0x1a1] sm:$0xff] }
 0x119   : > { %v638_v45 = vpop.f32.mrb[21].mxu0  ;;  %v644_v44 = vadd.f32 %v18494_v8, %v22239_v46  ;;  %26037 = vst [vmem:[#allocation27_spill] sm:$0xff] %v22507_v30  ;;  %v1261_v34 = vmax.f32 %v1197_v5, %v22453_v54  ;;  %v1324_v14 = vmax.f32 %v1260_v47, %v22461_v20  ;;  %v1198_v13 = vmax.f32 %v1133_v23, %v1166_v41  ;;  %v1168_v8 = vld [vmem:[#allocation2 + $0x198] sm:$0xff] }
 0x11a   : > { %26036 = vst [vmem:[#allocation26_spill] sm:$0xff] %v22494_v6  ;;  %v639_v7 = vadd.f32 %v22239_v46, %v638_v45  ;;  %5556 = vrot.lane.b32.xlu1 %v22488_v55, %s21485_s24  ;;  %5558 = vrot.lane.b32.xlu0 %v22494_v6, %s21485_s24  ;;  %v1199_v49 = vmax.f32 %v1134_v60, %v1167_v9  ;;  %v1169_v45 = vld [vmem:[#allocation2 + $0x1a0] sm:$0xff] }
 0x11b   : > { %v1325_v54 = vmax.f32 %v1261_v34, %v22475_v27  ;;  %v22521_v37 = vmax.f32 %v644_v44, 0.0  ;;  %18551 = vmatprep.mubr.msk.f32.mxu0 %vm371_vm1, %v1324_v14  ;;  %v1262_v20 = vmax.f32 %v1198_v13, %v1230_v2  ;;  %v1200_v48 = vmax.f32 %v1135_v16, %v1168_v8  ;;  %v1296_v47 = vld [vmem:[#allocation2 + $0x19a] sm:$0xff]  ;;  %v1297_v34 = vld [vmem:[#allocation2 + $0x1a2] sm:$0xff] }
 0x11c   : > { %v22509_v3 = vmax.f32 %v639_v7, 0.0  ;;  %v18497_v42 = vpop.f32.mrb[22].mxu0  ;;  %v1263_v19 = vmax.f32 %v1199_v49, %v1231_v59  ;;  %v1201_v33 = vmax.f32 %v1136_v0, %v1169_v45 }
 0x11d   : > { %v648_v56 = vpop.f32.mrb[23].mxu0  ;;  %26039 = vst [vmem:[#allocation29_spill] sm:$0xff] %v22521_v37  ;;  %v654_v50 = vadd.f32 %v18497_v42, %v22239_v46  ;;  %18552 = vmatmul.mubr.msk.f32.gmra.mrb[58].mxu0 %vm371_vm1, %v1325_v54  ;;  %v1326_v24 = vmax.f32 %v1262_v20, %v1294_v58  ;;  %v1264_v7 = vmax.f32 %v1200_v48, %v1232_v21  ;;  %v1950_v54 = vld [vmem:[%s25925_s3] sm:$0x3f]  ;;  %v1919_v58 = vld [vmem:[#allocation3 + $0x8] sm:$0xff] }
 0x11e   : > { %26038 = vst [vmem:[#allocation28_spill] sm:$0xff] %v22509_v3  ;;  %v649_v17 = vadd.f32 %v22239_v46, %v648_v56  ;;  %5560 = vrot.lane.b32.xlu1 %v22507_v30, %s21485_s24  ;;  %5562 = vrot.lane.b32.xlu0 %v22509_v3, %s21485_s24  ;;  %v1327_v32 = vmax.f32 %v1263_v19, %v1295_v11  ;;  %v22680_v11 = vld [vmem:[%s25927_s5 + $0x24] sm:$0xf]  ;;  %v21395_v19 = vld [vmem:[%s25924_s2] ss:$0 sm:$0xff] }
 0x11f   : > { %18554 = vmatprep.mubr.msk.f32.mxu0 %vm371_vm1, %v1326_v24  ;;  %v22606_v5 = vmax.f32 %v654_v50, 0.0  ;;  %v1265_v23 = vmax.f32 %v1201_v33, %v1233_v29  ;;  %v1328_v42 = vmax.f32 %v1264_v7, %v1296_v47  ;;  %18560 = vmatprep.subr.msk.mxu0 %vm2047_vm6, %v1950_v54  ;;  %v16143_v24 = vld [vmem:[%s25925_s3 + $0x8] sm:$0x3f] }
 0x120   : > { %v22525_v22 = vmax.f32 %v649_v17, 0.0  ;;  %v18500_v62 = vpop.f32.mrb[24].mxu0  ;;  %18561 = vmatpush3.msk.msra.mxu0 %vm2047_vm6, %v1950_v54  ;;  %19460 = vmatprep.subr.msk.mxu1 %vm468_vm0, %v22680_v11 }
 0x121   : > { %v658_v27 = vpop.f32.mrb[25].mxu0  ;;  %26041 = vst [vmem:[#allocation31_spill] sm:$0xff] %v22606_v5  ;;  %v664_v28 = vadd.f32 %v18500_v62, %v22239_v46  ;;  %18555 = vmatmul.mubr.msk.f32.gmra.mrb[60].mxu0 %vm371_vm1, %v1327_v32  ;;  %v1329_v60 = vmax.f32 %v1265_v23, %v1297_v34  ;;  %18610 = vmatprep.subr.msk.mxu0 %vm2047_vm6, %v16143_v24 }
 0x122   : > { %26040 = vst [vmem:[#allocation30_spill] sm:$0xff] %v22525_v22  ;;  %v659_v57 = vadd.f32 %v22239_v46, %v658_v27  ;;  %5564 = vrot.lane.b32.xlu1 %v22521_v37, %s21485_s24  ;;  %5566 = vrot.lane.b32.xlu0 %v22525_v22, %s21485_s24 }
 0x123   : > { %18557 = vmatprep.mubr.msk.f32.mxu0 %vm371_vm1, %v1328_v42  ;;  %v22654_v56 = vmax.f32 %v664_v28, 0.0 }
 0x124   : > { %v22609_v52 = vmax.f32 %v659_v57, 0.0  ;;  %v18503_v44 = vpop.f32.mrb[26].mxu0 }
 0x125   : > { %v668_v15 = vpop.f32.mrb[27].mxu0  ;;  %26043 = vst [vmem:[#allocation33_spill] sm:$0xff] %v22654_v56  ;;  %v674_v14 = vadd.f32 %v18503_v44, %v22239_v46  ;;  %18558 = vmatmul.mubr.msk.f32.gmra.mrb[62].mxu0 %vm371_vm1, %v1329_v60 }
 0x126   : > { %26042 = vst [vmem:[#allocation32_spill] sm:$0xff] %v22609_v52  ;;  %v669_v41 = vadd.f32 %v22239_v46, %v668_v15  ;;  %5568 = vrot.lane.b32.xlu1 %v22606_v5, %s21485_s24  ;;  %5570 = vrot.lane.b32.xlu0 %v22609_v52, %s21485_s24 }
 0x127   : > { %18562 = vmatprep.mubr.msk.f32.mxu0 %vm1694_vm4, %v1918_v26  ;;  %v22670_v49 = vmax.f32 %v674_v14, 0.0 }
 0x128   : > { %v22657_v13 = vmax.f32 %v669_v41, 0.0  ;;  %v18506_v9 = vpop.f32.mrb[28].mxu0 }
 0x129   : > { %v678_v17 = vpop.f32.mrb[29].mxu0  ;;  %26045 = vst [vmem:[#allocation35_spill] sm:$0xff] %v22670_v49  ;;  %v684_v20 = vadd.f32 %v18506_v9, %v22239_v46  ;;  %18563 = vmatmul.mubr.msk.f32.vlgmr.msra.gmra.mrb[64].mxu0 %vm1694_vm4, %v1919_v58 }
 0x12a   : > { %26044 = vst [vmem:[#allocation34_spill] sm:$0xff] %v22657_v13  ;;  %v679_v2 = vadd.f32 %v22239_v46, %v678_v17  ;;  %5572 = vrot.lane.b32.xlu1 %v22654_v56, %s21485_s24  ;;  %5574 = vrot.lane.b32.xlu0 %v22657_v13, %s21485_s24 }
 0x12b   : > { %v22688_v46 = vmax.f32 %v684_v20, 0.0  ;;  %18611 = vmatpush3.msk.msra.mxu0 %vm2047_vm6, %v16143_v24 }
 0x12c   : > { %v22673_v59 = vmax.f32 %v679_v2, 0.0  ;;  %v18509_v16 = vpop.f32.mrb[30].mxu0 }
 0x12d   : > { %26047 = vst [vmem:[#allocation37_spill] sm:$0xff] %v22688_v46  ;;  %v688_v50 = vpop.f32.mrb[31].mxu0  ;;  %v694_v0 = vadd.f32 %v21395_v19, %v18509_v16 }
 0x12e   : > { %26046 = vst [vmem:[#allocation36_spill] sm:$0xff] %v22673_v59  ;;  %5576 = vrot.lane.b32.xlu1 %v22670_v49, %s21485_s24  ;;  %5578 = vrot.lane.b32.xlu0 %v22673_v59, %s21485_s24  ;;  %v689_v8 = vadd.f32 %v21395_v19, %v688_v50 }
 0x12f   : > { %v22765_v57 = vmax.f32 %v694_v0, 0.0 }
 0x130   : > { %v22754_v27 = vmax.f32 %v689_v8, 0.0 }
 0x131   : > { %26049 = vst [vmem:[#allocation39_spill] sm:$0xff] %v22765_v57 }
 0x132   : > { %5580 = vrot.lane.b32.xlu1 %v22688_v46, %s21485_s24  ;;  %1782 = vrot.lane.b32.xlu0 %v22287_v10, %s21486_s29  ;;  %26048 = vst [vmem:[#allocation38_spill] sm:$0xff] %v22754_v27 }
 0x136   : > { %1784 = vrot.lane.b32.xlu1 %v22302_v1, %s21486_s29  ;;  %1786 = vrot.lane.b32.xlu0 %v22306_v40, %s21486_s29 }
 0x13a   : > { %1788 = vrot.lane.b32.xlu1 %v22328_v51, %s21486_s29  ;;  %1790 = vrot.lane.b32.xlu0 %v22330_v61, %s21486_s29 }
 0x13e   : > { %1792 = vrot.lane.b32.xlu1 %v22354_v36, %s21486_s29  ;;  %1794 = vrot.lane.b32.xlu0 %v22359_v18, %s21486_s29 }
 0x142   : > { %1796 = vrot.lane.b32.xlu1 %v22381_v25, %s21486_s29  ;;  %1798 = vrot.lane.b32.xlu0 %v22383_v4, %s21486_s29 }
 0x146   : > { %1800 = vrot.lane.b32.xlu1 %v22398_v43, %s21486_s29  ;;  %1802 = vrot.lane.b32.xlu0 %v22405_v35, %s21486_s29 }
 0x14a   : > { %1804 = vrot.lane.b32.xlu1 %v22428_v63, %s21486_s29  ;;  %1806 = vrot.lane.b32.xlu0 %v22430_v38, %s21486_s29 }
 0x14e   : > { %1808 = vrot.lane.b32.xlu1 %v22444_v12, %s21486_s29  ;;  %1810 = vrot.lane.b32.xlu0 %v22451_v53, %s21486_s29 }
 0x152   : > { %1812 = vrot.lane.b32.xlu1 %v22471_v39, %s21486_s29  ;;  %1814 = vrot.lane.b32.xlu0 %v22473_v31, %s21486_s29 }
 0x156   : > { %1816 = vrot.lane.b32.xlu1 %v22488_v55, %s21486_s29  ;;  %1818 = vrot.lane.b32.xlu0 %v22494_v6, %s21486_s29 }
 0x15a   : > { %1820 = vrot.lane.b32.xlu1 %v22507_v30, %s21486_s29  ;;  %1822 = vrot.lane.b32.xlu0 %v22509_v3, %s21486_s29 }
 0x15e   : > { %1824 = vrot.lane.b32.xlu1 %v22521_v37, %s21486_s29  ;;  %1826 = vrot.lane.b32.xlu0 %v22525_v22, %s21486_s29 }
 0x162   : > { %1828 = vrot.lane.b32.xlu1 %v22606_v5, %s21486_s29  ;;  %1830 = vrot.lane.b32.xlu0 %v22609_v52, %s21486_s29 }
 0x166   : > { %1832 = vrot.lane.b32.xlu1 %v22654_v56, %s21486_s29  ;;  %1834 = vrot.lane.b32.xlu0 %v22657_v13, %s21486_s29  ;;  %v23487_v56 = vld [vmem:[%s25925_s3 + $0x38] sm:$0x3f] }
 0x168   : > { %v5523_v62 = vpop.permute.xlu0 %5522 }
 0x169   : > { %5619 = vst.msk [vmem:[#allocation4 + $0x32] sm:$0xff] %vm371_vm1, %v5523_v62 }
 0x16a   : > { %1836 = vrot.lane.b32.xlu1 %v22670_v49, %s21486_s29  ;;  %1838 = vrot.lane.b32.xlu0 %v22673_v59, %s21486_s29 }
 0x16c   : > { %v5527_v48 = vpop.permute.xlu1 %5526  ;;  %v5525_v45 = vpop.permute.xlu0 %5524 }
 0x16d   : > { %5621 = vst.msk [vmem:[#allocation4 + $0x4a] sm:$0xff] %vm371_vm1, %v5527_v48  ;;  %5620 = vst.msk [vmem:[#allocation4 + $0x3a] sm:$0xff] %vm371_vm1, %v5525_v45 }
 0x16e   : > { %1840 = vrot.lane.b32.xlu1 %v22688_v46, %s21486_s29  ;;  %5582 = vrot.lane.b32.xlu0 %v22754_v27, %s21485_s24 }
 0x170   : > { %v5529_v32 = vpop.permute.xlu1 %5528  ;;  %v5531_v21 = vpop.permute.xlu0 %5530  ;;  %v8390_v33 = vld [vmem:[#allocation4 + $0x32] sm:$0xff] }
 0x171   : > { %5622 = vst.msk [vmem:[#allocation4 + $0x52] sm:$0xff] %vm371_vm1, %v5529_v32  ;;  %5623 = vst.msk [vmem:[#allocation4 + $0x62] sm:$0xff] %vm371_vm1, %v5531_v21  ;;  %19365 = vmatprep.mubr.msk.f32.mxu1 %vm371_vm1, %v8390_v33 }
 0x172   : > { %5584 = vrot.lane.b32.xlu1 %v22765_v57, %s21485_s24  ;;  %1842 = vrot.lane.b32.xlu0 %v22754_v27, %s21486_s29  ;;  %s16038_s24 = sshll.u32 %s323_s23, 8 }
 0x174   : > { %v5533_v7 = vpop.permute.xlu1 %5532  ;;  %v5535_v29 = vpop.permute.xlu0 %5534  ;;  %v8391_v28 = vld [vmem:[#allocation4 + $0x3a] sm:$0xff]  ;;  %v8392_v44 = vld [vmem:[#allocation4 + $0x4a] sm:$0xff] }
 0x175   : > { %5624 = vst.msk [vmem:[#allocation4 + $0x6a] sm:$0xff] %vm371_vm1, %v5533_v7  ;;  %5625 = vst.msk [vmem:[#allocation4 + $0x7a] sm:$0xff] %vm371_vm1, %v5535_v29  ;;  %19366 = vmatmul.mubr.msk.f32.gmra.mrb[2].mxu1 %vm371_vm1, %v8391_v28  ;;  %v10728_v52 = vld [vmem:[#allocation4 + $0x33] sm:$0xff] }
 0x176   : > { %19368 = vmatprep.mubr.msk.f32.mxu1 %vm371_vm1, %v8392_v44  ;;  %1844 = vrot.lane.b32.xlu1 %v22765_v57, %s21486_s29  ;;  %s25868_s29 = scalar_lea.hbm %s25931_s9, %s17271_s25 }
 0x178   : > { %v5537_v47 = vpop.permute.xlu1 %5536  ;;  %v5539_v23 = vpop.permute.xlu0 %5538  ;;  %v8393_v15 = vld [vmem:[#allocation4 + $0x52] sm:$0xff]  ;;  %v8394_v42 = vld [vmem:[#allocation4 + $0x62] sm:$0xff] }
 0x179   : > { %5626 = vst.msk [vmem:[#allocation4 + $0x82] sm:$0xff] %vm371_vm1, %v5537_v47  ;;  %5627 = vst.msk [vmem:[#allocation4 + $0x92] sm:$0xff] %vm371_vm1, %v5539_v23  ;;  %19369 = vmatmul.mubr.msk.f32.gmra.mrb[4].mxu1 %vm371_vm1, %v8393_v15 }
 0x17a   : > { %19371 = vmatprep.mubr.msk.f32.mxu1 %vm371_vm1, %v8394_v42 }
 0x17c   : > { %v5541_v34 = vpop.permute.xlu1 %5540  ;;  %v5543_v41 = vpop.permute.xlu0 %5542  ;;  %v8395_v60 = vld [vmem:[#allocation4 + $0x6a] sm:$0xff]  ;;  %v8396_v14 = vld [vmem:[#allocation4 + $0x7a] sm:$0xff] }
 0x17d   : > { %5628 = vst.msk [vmem:[#allocation4 + $0x9a] sm:$0xff] %vm371_vm1, %v5541_v34  ;;  %5629 = vst.msk [vmem:[#allocation4 + $0xaa] sm:$0xff] %vm371_vm1, %v5543_v41  ;;  %19372 = vmatmul.mubr.msk.f32.gmra.mrb[6].mxu1 %vm371_vm1, %v8395_v60  ;;  %v10733_v22 = vld [vmem:[#allocation4 + $0x6b] sm:$0xff] }
 0x17e   : > { %19374 = vmatprep.mubr.msk.f32.mxu1 %vm371_vm1, %v8396_v14 }
 0x180   : > { %v5545_v9 = vpop.permute.xlu1 %5544  ;;  %v5547_v17 = vpop.permute.xlu0 %5546  ;;  %v8397_v54 = vld [vmem:[#allocation4 + $0x82] sm:$0xff]  ;;  %v8398_v2 = vld [vmem:[#allocation4 + $0x92] sm:$0xff] }
 0x181   : > { %5630 = vst.msk [vmem:[#allocation4 + $0xb2] sm:$0xff] %vm371_vm1, %v5545_v9  ;;  %5631 = vst.msk [vmem:[#allocation4 + $0xc2] sm:$0xff] %vm371_vm1, %v5547_v17  ;;  %19375 = vmatmul.mubr.msk.f32.gmra.mrb[8].mxu1 %vm371_vm1, %v8397_v54  ;;  %v10734_v3 = vld [vmem:[#allocation4 + $0x7b] sm:$0xff]  ;;  %v10735_v37 = vld [vmem:[#allocation4 + $0x83] sm:$0xff] }
 0x182   : > { %19377 = vmatprep.mubr.msk.f32.mxu1 %vm371_vm1, %v8398_v2 }
 0x184   : > { %v5549_v26 = vpop.permute.xlu1 %5548  ;;  %v5551_v58 = vpop.permute.xlu0 %5550  ;;  %v8399_v20 = vld [vmem:[#allocation4 + $0x9a] sm:$0xff]  ;;  %v8400_v16 = vld [vmem:[#allocation4 + $0xaa] sm:$0xff] }
 0x185   : > { %5632 = vst.msk [vmem:[#allocation4 + $0xca] sm:$0xff] %vm371_vm1, %v5549_v26  ;;  %5633 = vst.msk [vmem:[#allocation4 + $0xda] sm:$0xff] %vm371_vm1, %v5551_v58  ;;  %19378 = vmatmul.mubr.msk.f32.gmra.mrb[10].mxu1 %vm371_vm1, %v8399_v20  ;;  %v10736_v6 = vld [vmem:[#allocation4 + $0x93] sm:$0xff]  ;;  %v10737_v30 = vld [vmem:[#allocation4 + $0x9b] sm:$0xff] }
 0x186   : > { %19380 = vmatprep.mubr.msk.f32.mxu1 %vm371_vm1, %v8400_v16 }
 0x188   : > { %v5553_v50 = vpop.permute.xlu1 %5552  ;;  %v5555_v62 = vpop.permute.xlu0 %5554  ;;  %v8401_v19 = vld [vmem:[#allocation4 + $0xb2] sm:$0xff]  ;;  %v8402_v8 = vld [vmem:[#allocation4 + $0xc2] sm:$0xff] }
 0x189   : > { %5634 = vst.msk [vmem:[#allocation4 + $0xe2] sm:$0xff] %vm371_vm1, %v5553_v50  ;;  %5635 = vst.msk [vmem:[#allocation4 + $0xf2] sm:$0xff] %vm371_vm1, %v5555_v62  ;;  %19381 = vmatmul.mubr.msk.f32.gmra.mrb[12].mxu1 %vm371_vm1, %v8401_v19  ;;  %v10738_v31 = vld [vmem:[#allocation4 + $0xab] sm:$0xff]  ;;  %v10739_v55 = vld [vmem:[#allocation4 + $0xb3] sm:$0xff] }
 0x18a   : > { %19383 = vmatprep.mubr.msk.f32.mxu1 %vm371_vm1, %v8402_v8 }
 0x18c   : > { %v5557_v0 = vpop.permute.xlu1 %5556  ;;  %v5559_v24 = vpop.permute.xlu0 %5558  ;;  %v8403_v48 = vld [vmem:[#allocation4 + $0xca] sm:$0xff]  ;;  %v8404_v45 = vld [vmem:[#allocation4 + $0xda] sm:$0xff] }
 0x18d   : > { %5636 = vst.msk [vmem:[#allocation4 + $0xfa] sm:$0xff] %vm371_vm1, %v5557_v0  ;;  %5637 = vst.msk [vmem:[#allocation4 + $0x10a] sm:$0xff] %vm371_vm1, %v5559_v24  ;;  %19384 = vmatmul.mubr.msk.f32.gmra.mrb[14].mxu1 %vm371_vm1, %v8403_v48  ;;  %v22837_v24 = vld [vmem:[%s25925_s3 + $0x10] sm:$0x3f]  ;;  %v8778_v48 = vld [vmem:[#allocation4 + $0x1b] sm:$0xff] }
 0x18e   : > { %19386 = vmatprep.mubr.msk.f32.mxu1 %vm371_vm1, %v8404_v45  ;;  %18660 = vmatprep.subr.msk.mxu0 %vm2047_vm6, %v22837_v24  ;;  %v10740_v53 = vld [vmem:[#allocation4 + $0xc3] sm:$0xff]  ;;  %v10741_v39 = vld [vmem:[#allocation4 + $0xcb] sm:$0xff] }
 0x190   : > { %v5561_v32 = vpop.permute.xlu1 %5560  ;;  %v5563_v21 = vpop.permute.xlu0 %5562  ;;  %v8405_v33 = vld [vmem:[#allocation4 + $0xe2] sm:$0xff]  ;;  %v8406_v7 = vld [vmem:[#allocation4 + $0xf2] sm:$0xff] }
 0x191   : > { %5638 = vst.msk [vmem:[#allocation4 + $0x112] sm:$0xff] %vm371_vm1, %v5561_v32  ;;  %5639 = vst.msk [vmem:[#allocation4 + $0x122] sm:$0xff] %vm371_vm1, %v5563_v21  ;;  %19387 = vmatmul.mubr.msk.f32.gmra.mrb[16].mxu1 %vm371_vm1, %v8405_v33  ;;  %v10742_v38 = vld [vmem:[#allocation4 + $0xdb] sm:$0xff]  ;;  %v10743_v12 = vld [vmem:[#allocation4 + $0xe3] sm:$0xff] }
 0x192   : > { %19389 = vmatprep.mubr.msk.f32.mxu1 %vm371_vm1, %v8406_v7  ;;  %v8779_v7 = vld [vmem:[#allocation4 + $0x23] sm:$0xff] }
 0x194   : > { %v5565_v29 = vpop.permute.xlu1 %5564  ;;  %v5567_v28 = vpop.permute.xlu0 %5566  ;;  %v8407_v44 = vld [vmem:[#allocation4 + $0xfa] sm:$0xff]  ;;  %v8408_v47 = vld [vmem:[#allocation4 + $0x10a] sm:$0xff] }
 0x195   : > { %5640 = vst.msk [vmem:[#allocation4 + $0x12a] sm:$0xff] %vm371_vm1, %v5565_v29  ;;  %5641 = vst.msk [vmem:[#allocation4 + $0x13a] sm:$0xff] %vm371_vm1, %v5567_v28  ;;  %19390 = vmatmul.mubr.msk.f32.gmra.mrb[18].mxu1 %vm371_vm1, %v8407_v44  ;;  %v10744_v35 = vld [vmem:[#allocation4 + $0xf3] sm:$0xff]  ;;  %v10745_v63 = vld [vmem:[#allocation4 + $0xfb] sm:$0xff] }
 0x196   : > { %19392 = vmatprep.mubr.msk.f32.mxu1 %vm371_vm1, %v8408_v47 }
 0x198   : > { %v5569_v23 = vpop.permute.xlu1 %5568  ;;  %v5571_v15 = vpop.permute.xlu0 %5570  ;;  %v8409_v42 = vld [vmem:[#allocation4 + $0x112] sm:$0xff]  ;;  %v8410_v34 = vld [vmem:[#allocation4 + $0x122] sm:$0xff] }
 0x199   : > { %5642 = vst.msk [vmem:[#allocation4 + $0x142] sm:$0xff] %vm371_vm1, %v5569_v23  ;;  %5643 = vst.msk [vmem:[#allocation4 + $0x152] sm:$0xff] %vm371_vm1, %v5571_v15  ;;  %19393 = vmatmul.mubr.msk.f32.gmra.mrb[20].mxu1 %vm371_vm1, %v8409_v42  ;;  %v22849_v23 = vld [vmem:[%s25927_s5 + $0x28] sm:$0xf]  ;;  %v8780_v15 = vld [vmem:[#allocation4 + $0x33] sm:$0xff] }
 0x19a   : > { %19395 = vmatprep.mubr.msk.f32.mxu1 %vm371_vm1, %v8410_v34  ;;  %v10746_v4 = vld [vmem:[#allocation4 + $0x10b] sm:$0xff]  ;;  %v10747_v43 = vld [vmem:[#allocation4 + $0x113] sm:$0xff] }
 0x19c   : > { %v5573_v41 = vpop.permute.xlu1 %5572  ;;  %v5575_v60 = vpop.permute.xlu0 %5574  ;;  %v8411_v14 = vld [vmem:[#allocation4 + $0x12a] sm:$0xff]  ;;  %v8412_v9 = vld [vmem:[#allocation4 + $0x13a] sm:$0xff] }
 0x19d   : > { %5644 = vst.msk [vmem:[#allocation4 + $0x15a] sm:$0xff] %vm371_vm1, %v5573_v41  ;;  %5645 = vst.msk [vmem:[#allocation4 + $0x16a] sm:$0xff] %vm371_vm1, %v5575_v60  ;;  %19396 = vmatmul.mubr.msk.f32.gmra.mrb[22].mxu1 %vm371_vm1, %v8411_v14  ;;  %v8781_v60 = vld [vmem:[#allocation4 + $0x3b] sm:$0xff]  ;;  %v10748_v18 = vld [vmem:[#allocation4 + $0x123] sm:$0xff] }
 0x19e   : > { %19398 = vmatprep.mubr.msk.f32.mxu1 %vm371_vm1, %v8412_v9  ;;  %v10749_v25 = vld [vmem:[#allocation4 + $0x12b] sm:$0xff] }
 0x1a0   : > { %v5577_v17 = vpop.permute.xlu1 %5576  ;;  %v5579_v54 = vpop.permute.xlu0 %5578  ;;  %v8413_v2 = vld [vmem:[#allocation4 + $0x142] sm:$0xff]  ;;  %v8414_v26 = vld [vmem:[#allocation4 + $0x152] sm:$0xff] }
 0x1a1   : > { %5646 = vst.msk [vmem:[#allocation4 + $0x172] sm:$0xff] %vm371_vm1, %v5577_v17  ;;  %5647 = vst.msk [vmem:[#allocation4 + $0x182] sm:$0xff] %vm371_vm1, %v5579_v54  ;;  %19399 = vmatmul.mubr.msk.f32.gmra.mrb[24].mxu1 %vm371_vm1, %v8413_v2  ;;  %v8783_v2 = vld [vmem:[#allocation4 + $0x53] sm:$0xff]  ;;  %v10750_v61 = vld [vmem:[#allocation4 + $0x13b] sm:$0xff] }
 0x1a2   : > { %19401 = vmatprep.mubr.msk.f32.mxu1 %vm371_vm1, %v8414_v26  ;;  %v10751_v36 = vld [vmem:[#allocation4 + $0x143] sm:$0xff] }
 0x1a4   : > { %v5581_v58 = vpop.permute.xlu1 %5580  ;;  %v1783_v20 = vpop.permute.xlu0 %1782  ;;  %v8415_v16 = vld [vmem:[#allocation4 + $0x15a] sm:$0xff]  ;;  %v8416_v50 = vld [vmem:[#allocation4 + $0x16a] sm:$0xff] }
 0x1a5   : > { %5648 = vst.msk [vmem:[#allocation4 + $0x18a] sm:$0xff] %vm371_vm1, %v5581_v58  ;;  %19402 = vmatmul.mubr.msk.f32.gmra.mrb[26].mxu1 %vm371_vm1, %v8415_v16  ;;  %v8784_v58 = vld [vmem:[#allocation4 + $0x63] sm:$0xff]  ;;  %v10752_v40 = vld [vmem:[#allocation4 + $0x153] sm:$0xff]  ;;  %v10753_v51 = vld [vmem:[#allocation4 + $0x15b] sm:$0xff] }
 0x1a6   : > { %1879 = vst.msk [vmem:[#allocation3 + $0x19] sm:$0xff] %vm1694_vm4, %v1783_v20  ;;  %19404 = vmatprep.mubr.msk.f32.mxu1 %vm371_vm1, %v8416_v50 }
 0x1a8   : > { %v1785_v62 = vpop.permute.xlu1 %1784  ;;  %v1787_v19 = vpop.permute.xlu0 %1786  ;;  %v8417_v8 = vld [vmem:[#allocation4 + $0x172] sm:$0xff]  ;;  %v8418_v0 = vld [vmem:[#allocation4 + $0x182] sm:$0xff] }
 0x1a9   : > { %1880 = vst.msk [vmem:[#allocation3 + $0x21] sm:$0xff] %vm1694_vm4, %v1785_v62  ;;  %1881 = vst.msk [vmem:[#allocation3 + $0x31] sm:$0xff] %vm1694_vm4, %v1787_v19  ;;  %19405 = vmatmul.mubr.msk.f32.gmra.mrb[28].mxu1 %vm371_vm1, %v8417_v8  ;;  %v8785_v62 = vld [vmem:[#allocation4 + $0x6b] sm:$0xff]  ;;  %v8786_v8 = vld [vmem:[#allocation4 + $0x7b] sm:$0xff] }
 0x1aa   : > { %19407 = vmatprep.mubr.msk.f32.mxu1 %vm371_vm1, %v8418_v0  ;;  %v10366_v59 = vld [vmem:[#allocation4 + $0x182] sm:$0xff]  ;;  %v10754_v10 = vld [vmem:[#allocation4 + $0x16b] sm:$0xff]  ;;  %v10755_v1 = vld [vmem:[#allocation4 + $0x173] sm:$0xff] }
 0x1ac   : > { %v1789_v45 = vpop.permute.xlu1 %1788  ;;  %v1791_v32 = vpop.permute.xlu0 %1790  ;;  %v8419_v33 = vld [vmem:[#allocation4 + $0x18a] sm:$0xff] }
 0x1ad   : > { %v1920_v21 = vld [vmem:[#allocation3 + $0x18] sm:$0xff]  ;;  %1882 = vst.msk [vmem:[#allocation3 + $0x39] sm:$0xff] %vm1694_vm4, %v1789_v45  ;;  %1883 = vst.msk [vmem:[#allocation3 + $0x49] sm:$0xff] %vm1694_vm4, %v1791_v32  ;;  %19408 = vmatmul.mubr.msk.f32.gmra.mrb[30].mxu1 %vm371_vm1, %v8419_v33  ;;  %v8788_v33 = vld [vmem:[#allocation4 + $0x93] sm:$0xff] }
 0x1ae   : > { %18565 = vmatprep.mubr.msk.f32.mxu0 %vm1694_vm4, %v1920_v21  ;;  %19412 = vmatprep.mubr.msk.f32.mxu1 %vm371_vm1, %v8778_v48  ;;  %v8787_v32 = vld [vmem:[#allocation4 + $0x83] sm:$0xff] }
 0x1af   : > { %v10367_v46 = vld [vmem:[#allocation4 + $0x18a] sm:$0xff] }
 0x1b0   : > { %v1793_v29 = vpop.permute.xlu1 %1792  ;;  %v1795_v28 = vpop.permute.xlu0 %1794  ;;  %v1921_v44 = vld [vmem:[#allocation3 + $0x20] sm:$0xff]  ;;  %v1922_v47 = vld [vmem:[#allocation3 + $0x30] sm:$0xff] }
 0x1b1   : > { %1884 = vst.msk [vmem:[#allocation3 + $0x51] sm:$0xff] %vm1694_vm4, %v1793_v29  ;;  %1885 = vst.msk [vmem:[#allocation3 + $0x61] sm:$0xff] %vm1694_vm4, %v1795_v28  ;;  %18566 = vmatmul.mubr.msk.f32.gmra.mrb[66].mxu0 %vm1694_vm4, %v1921_v44  ;;  %19413 = vmatmul.mubr.msk.f32.vlgmr.msra.gmra.mrb[0].mxu1 %vm371_vm1, %v8779_v7  ;;  %v8789_v44 = vld [vmem:[#allocation4 + $0x9b] sm:$0xff] }
 0x1b2   : > { %19461 = vmatpush3.msk.msra.mxu1 %vm468_vm0, %v22680_v11  ;;  %18568 = vmatprep.mubr.msk.f32.mxu0 %vm1694_vm4, %v1922_v47  ;;  %v8782_v11 = vld [vmem:[#allocation4 + $0x4b] sm:$0xff] }
 0x1b3   : > { %19415 = vmatprep.mubr.msk.f32.mxu1 %vm371_vm1, %v8780_v15  ;;  %19510 = vmatprep.subr.msk.mxu1 %vm468_vm0, %v22849_v23  ;;  %v8790_v15 = vld [vmem:[#allocation4 + $0xab] sm:$0xff] }
 0x1b4   : > { %v1797_v42 = vpop.permute.xlu1 %1796  ;;  %v1799_v34 = vpop.permute.xlu0 %1798  ;;  %v1923_v41 = vld [vmem:[#allocation3 + $0x38] sm:$0xff]  ;;  %v1924_v14 = vld [vmem:[#allocation3 + $0x48] sm:$0xff] }
 0x1b5   : > { %1886 = vst.msk [vmem:[#allocation3 + $0x69] sm:$0xff] %vm1694_vm4, %v1797_v42  ;;  %1887 = vst.msk [vmem:[#allocation3 + $0x79] sm:$0xff] %vm1694_vm4, %v1799_v34  ;;  %18569 = vmatmul.mubr.msk.f32.gmra.mrb[68].mxu0 %vm1694_vm4, %v1923_v41  ;;  %19416 = vmatmul.mubr.msk.f32.gmra.mrb[2].mxu1 %vm371_vm1, %v8781_v60  ;;  %v8791_v60 = vld [vmem:[#allocation4 + $0xb3] sm:$0xff] }
 0x1b6   : > { %18571 = vmatprep.mubr.msk.f32.mxu0 %vm1694_vm4, %v1924_v14  ;;  %19418 = vmatprep.mubr.msk.f32.mxu1 %vm371_vm1, %v8782_v11  ;;  %v8792_v11 = vld [vmem:[#allocation4 + $0xc3] sm:$0xff] }
 0x1b8   : > { %v1801_v9 = vpop.permute.xlu1 %1800  ;;  %v1803_v17 = vpop.permute.xlu0 %1802  ;;  %v1925_v54 = vld [vmem:[#allocation3 + $0x50] sm:$0xff]  ;;  %v1926_v26 = vld [vmem:[#allocation3 + $0x60] sm:$0xff] }
 0x1b9   : > { %1888 = vst.msk [vmem:[#allocation3 + $0x81] sm:$0xff] %vm1694_vm4, %v1801_v9  ;;  %1889 = vst.msk [vmem:[#allocation3 + $0x91] sm:$0xff] %vm1694_vm4, %v1803_v17  ;;  %18572 = vmatmul.mubr.msk.f32.gmra.mrb[70].mxu0 %vm1694_vm4, %v1925_v54  ;;  %19419 = vmatmul.mubr.msk.f32.gmra.mrb[4].mxu1 %vm371_vm1, %v8783_v2  ;;  %v8793_v2 = vld [vmem:[#allocation4 + $0xcb] sm:$0xff] }
 0x1ba   : > { %18574 = vmatprep.mubr.msk.f32.mxu0 %vm1694_vm4, %v1926_v26  ;;  %19421 = vmatprep.mubr.msk.f32.mxu1 %vm371_vm1, %v8784_v58  ;;  %v8794_v58 = vld [vmem:[#allocation4 + $0xdb] sm:$0xff] }
 0x1bc   : > { %v1805_v20 = vpop.permute.xlu1 %1804  ;;  %v1807_v16 = vpop.permute.xlu0 %1806  ;;  %v1927_v50 = vld [vmem:[#allocation3 + $0x68] sm:$0xff]  ;;  %v1928_v19 = vld [vmem:[#allocation3 + $0x78] sm:$0xff] }
 0x1bd   : > { %1890 = vst.msk [vmem:[#allocation3 + $0x99] sm:$0xff] %vm1694_vm4, %v1805_v20  ;;  %1891 = vst.msk [vmem:[#allocation3 + $0xa9] sm:$0xff] %vm1694_vm4, %v1807_v16  ;;  %18575 = vmatmul.mubr.msk.f32.gmra.mrb[72].mxu0 %vm1694_vm4, %v1927_v50  ;;  %19422 = vmatmul.mubr.msk.f32.gmra.mrb[6].mxu1 %vm371_vm1, %v8785_v62  ;;  %v8795_v62 = vld [vmem:[#allocation4 + $0xe3] sm:$0xff] }
 0x1be   : > { %18577 = vmatprep.mubr.msk.f32.mxu0 %vm1694_vm4, %v1928_v19  ;;  %19424 = vmatprep.mubr.msk.f32.mxu1 %vm371_vm1, %v8786_v8  ;;  %v8796_v8 = vld [vmem:[#allocation4 + $0xf3] sm:$0xff] }
 0x1c0   : > { %v1809_v0 = vpop.permute.xlu1 %1808  ;;  %v1811_v48 = vpop.permute.xlu0 %1810  ;;  %v1929_v45 = vld [vmem:[#allocation3 + $0x80] sm:$0xff]  ;;  %v1930_v21 = vld [vmem:[#allocation3 + $0x90] sm:$0xff] }
 0x1c1   : > { %1892 = vst.msk [vmem:[#allocation3 + $0xb1] sm:$0xff] %vm1694_vm4, %v1809_v0  ;;  %1893 = vst.msk [vmem:[#allocation3 + $0xc1] sm:$0xff] %vm1694_vm4, %v1811_v48  ;;  %18578 = vmatmul.mubr.msk.f32.gmra.mrb[74].mxu0 %vm1694_vm4, %v1929_v45  ;;  %19425 = vmatmul.mubr.msk.f32.gmra.mrb[8].mxu1 %vm371_vm1, %v8787_v32  ;;  %v8797_v32 = vld [vmem:[#allocation4 + $0xfb] sm:$0xff]  ;;  %v23530_v5 = vld [vmem:[#allocation3 + $0x7a] sm:$0xff] }
 0x1c2   : > { %18580 = vmatprep.mubr.msk.f32.mxu0 %vm1694_vm4, %v1930_v21  ;;  %19427 = vmatprep.mubr.msk.f32.mxu1 %vm371_vm1, %v8788_v33  ;;  %v8798_v33 = vld [vmem:[#allocation4 + $0x10b] sm:$0xff] }
 0x1c4   : > { %v1813_v7 = vpop.permute.xlu1 %1812  ;;  %v1815_v29 = vpop.permute.xlu0 %1814  ;;  %v1931_v28 = vld [vmem:[#allocation3 + $0x98] sm:$0xff]  ;;  %v1932_v47 = vld [vmem:[#allocation3 + $0xa8] sm:$0xff] }
 0x1c5   : > { %1894 = vst.msk [vmem:[#allocation3 + $0xc9] sm:$0xff] %vm1694_vm4, %v1813_v7  ;;  %1895 = vst.msk [vmem:[#allocation3 + $0xd9] sm:$0xff] %vm1694_vm4, %v1815_v29  ;;  %18581 = vmatmul.mubr.msk.f32.gmra.mrb[76].mxu0 %vm1694_vm4, %v1931_v28  ;;  %19428 = vmatmul.mubr.msk.f32.gmra.mrb[10].mxu1 %vm371_vm1, %v8789_v44  ;;  %v8799_v44 = vld [vmem:[#allocation4 + $0x113] sm:$0xff] }
 0x1c6   : > { %18583 = vmatprep.mubr.msk.f32.mxu0 %vm1694_vm4, %v1932_v47  ;;  %19430 = vmatprep.mubr.msk.f32.mxu1 %vm371_vm1, %v8790_v15  ;;  %v8800_v15 = vld [vmem:[#allocation4 + $0x123] sm:$0xff] }
 0x1c8   : > { %v1817_v42 = vpop.permute.xlu1 %1816  ;;  %v1819_v34 = vpop.permute.xlu0 %1818  ;;  %v1933_v41 = vld [vmem:[#allocation3 + $0xb0] sm:$0xff]  ;;  %v1934_v14 = vld [vmem:[#allocation3 + $0xc0] sm:$0xff] }
 0x1c9   : > { %1896 = vst.msk [vmem:[#allocation3 + $0xe1] sm:$0xff] %vm1694_vm4, %v1817_v42  ;;  %1897 = vst.msk [vmem:[#allocation3 + $0xf1] sm:$0xff] %vm1694_vm4, %v1819_v34  ;;  %18584 = vmatmul.mubr.msk.f32.gmra.mrb[78].mxu0 %vm1694_vm4, %v1933_v41  ;;  %19431 = vmatmul.mubr.msk.f32.gmra.mrb[12].mxu1 %vm371_vm1, %v8791_v60  ;;  %v8801_v60 = vld [vmem:[#allocation4 + $0x12b] sm:$0xff] }
 0x1ca   : > { %18586 = vmatprep.mubr.msk.f32.mxu0 %vm1694_vm4, %v1934_v14  ;;  %19433 = vmatprep.mubr.msk.f32.mxu1 %vm371_vm1, %v8792_v11  ;;  %v8802_v11 = vld [vmem:[#allocation4 + $0x13b] sm:$0xff] }
 0x1cc   : > { %v1821_v9 = vpop.permute.xlu1 %1820  ;;  %v1823_v17 = vpop.permute.xlu0 %1822  ;;  %v1935_v54 = vld [vmem:[#allocation3 + $0xc8] sm:$0xff]  ;;  %v1936_v26 = vld [vmem:[#allocation3 + $0xd8] sm:$0xff] }
 0x1cd   : > { %1898 = vst.msk [vmem:[#allocation3 + $0xf9] sm:$0xff] %vm1694_vm4, %v1821_v9  ;;  %1899 = vst.msk [vmem:[#allocation3 + $0x109] sm:$0xff] %vm1694_vm4, %v1823_v17  ;;  %18587 = vmatmul.mubr.msk.f32.gmra.mrb[80].mxu0 %vm1694_vm4, %v1935_v54  ;;  %19434 = vmatmul.mubr.msk.f32.gmra.mrb[14].mxu1 %vm371_vm1, %v8793_v2  ;;  %v8803_v54 = vld [vmem:[#allocation4 + $0x143] sm:$0xff] }
 0x1ce   : > { %18589 = vmatprep.mubr.msk.f32.mxu0 %vm1694_vm4, %v1936_v26  ;;  %19436 = vmatprep.mubr.msk.f32.mxu1 %vm371_vm1, %v8794_v58  ;;  %v8804_v58 = vld [vmem:[#allocation4 + $0x153] sm:$0xff] }
 0x1d0   : > { %v1825_v20 = vpop.permute.xlu1 %1824  ;;  %v1827_v16 = vpop.permute.xlu0 %1826  ;;  %v1937_v50 = vld [vmem:[#allocation3 + $0xe0] sm:$0xff]  ;;  %v1938_v19 = vld [vmem:[#allocation3 + $0xf0] sm:$0xff] }
 0x1d1   : > { %1900 = vst.msk [vmem:[#allocation3 + $0x111] sm:$0xff] %vm1694_vm4, %v1825_v20  ;;  %1901 = vst.msk [vmem:[#allocation3 + $0x121] sm:$0xff] %vm1694_vm4, %v1827_v16  ;;  %18590 = vmatmul.mubr.msk.f32.gmra.mrb[82].mxu0 %vm1694_vm4, %v1937_v50  ;;  %19437 = vmatmul.mubr.msk.f32.gmra.mrb[16].mxu1 %vm371_vm1, %v8795_v62  ;;  %v8805_v16 = vld [vmem:[#allocation4 + $0x15b] sm:$0xff] }
 0x1d2   : > { %18592 = vmatprep.mubr.msk.f32.mxu0 %vm1694_vm4, %v1938_v19  ;;  %19439 = vmatprep.mubr.msk.f32.mxu1 %vm371_vm1, %v8796_v8  ;;  %v8806_v8 = vld [vmem:[#allocation4 + $0x16b] sm:$0xff] }
 0x1d4   : > { %v1829_v0 = vpop.permute.xlu1 %1828  ;;  %v1831_v48 = vpop.permute.xlu0 %1830  ;;  %v1939_v45 = vld [vmem:[#allocation3 + $0xf8] sm:$0xff]  ;;  %v1940_v21 = vld [vmem:[#allocation3 + $0x108] sm:$0xff] }
 0x1d5   : > { %1902 = vst.msk [vmem:[#allocation3 + $0x129] sm:$0xff] %vm1694_vm4, %v1829_v0  ;;  %1903 = vst.msk [vmem:[#allocation3 + $0x139] sm:$0xff] %vm1694_vm4, %v1831_v48  ;;  %18593 = vmatmul.mubr.msk.f32.gmra.mrb[84].mxu0 %vm1694_vm4, %v1939_v45  ;;  %19440 = vmatmul.mubr.msk.f32.gmra.mrb[18].mxu1 %vm371_vm1, %v8797_v32  ;;  %v2308_v0 = vld [vmem:[#allocation3 + $0x1] sm:$0xff] }
 0x1d6   : > { %18595 = vmatprep.mubr.msk.f32.mxu0 %vm1694_vm4, %v1940_v21  ;;  %19442 = vmatprep.mubr.msk.f32.mxu1 %vm371_vm1, %v8798_v33  ;;  %v8807_v45 = vld [vmem:[#allocation4 + $0x173] sm:$0xff]  ;;  %v8808_v21 = vld [vmem:[#allocation4 + $0x183] sm:$0xff] }
 0x1d7   : > { %v2309_v33 = vld [vmem:[#allocation3 + $0x9] sm:$0xff] }
 0x1d8   : > { %v1833_v7 = vpop.permute.xlu1 %1832  ;;  %v1835_v29 = vpop.permute.xlu0 %1834  ;;  %v1941_v28 = vld [vmem:[#allocation3 + $0x110] sm:$0xff]  ;;  %v1942_v47 = vld [vmem:[#allocation3 + $0x120] sm:$0xff] }
 0x1d9   : > { %1904 = vst.msk [vmem:[#allocation3 + $0x141] sm:$0xff] %vm1694_vm4, %v1833_v7  ;;  %1905 = vst.msk [vmem:[#allocation3 + $0x151] sm:$0xff] %vm1694_vm4, %v1835_v29  ;;  %18596 = vmatmul.mubr.msk.f32.gmra.mrb[86].mxu0 %vm1694_vm4, %v1941_v28  ;;  %19443 = vmatmul.mubr.msk.f32.gmra.mrb[20].mxu1 %vm371_vm1, %v8799_v44  ;;  %v9168_v7 = vld [vmem:[#allocation4 + $0x1c] sm:$0xff]  ;;  %v8809_v29 = vld [vmem:[#allocation4 + $0x18b] sm:$0xff] }
 0x1da   : > { %18598 = vmatprep.mubr.msk.f32.mxu0 %vm1694_vm4, %v1942_v47  ;;  %19445 = vmatprep.mubr.msk.f32.mxu1 %vm371_vm1, %v8800_v15  ;;  %v22967_v28 = vld [vmem:[#allocation3 + $0x19] sm:$0xff]  ;;  %v22972_v44 = vld [vmem:[%s25925_s3 + $0x18] sm:$0x3f] }
 0x1db   : > { %v9169_v47 = vld [vmem:[#allocation4 + $0x24] sm:$0xff]  ;;  %v22979_v15 = vld [vmem:[#allocation3 + $0x21] sm:$0xff] }
 0x1dc   : > { %v1837_v42 = vpop.permute.xlu1 %1836  ;;  %v1839_v34 = vpop.permute.xlu0 %1838  ;;  %v22921_v41 = vld [vmem:[#allocation3 + $0x128] sm:$0xff]  ;;  %v22923_v14 = vld [vmem:[#allocation3 + $0x138] sm:$0xff] }
 0x1dd   : > { %1906 = vst.msk [vmem:[#allocation3 + $0x159] sm:$0xff] %vm1694_vm4, %v1837_v42  ;;  %1907 = vst.msk [vmem:[#allocation3 + $0x169] sm:$0xff] %vm1694_vm4, %v1839_v34  ;;  %18599 = vmatmul.mubr.msk.f32.gmra.mrb[88].mxu0 %vm1694_vm4, %v22921_v41  ;;  %19446 = vmatmul.mubr.msk.f32.gmra.mrb[22].mxu1 %vm371_vm1, %v8801_v60  ;;  %v22984_v42 = vld [vmem:[%s25927_s5 + $0x2c] sm:$0xf]  ;;  %v22991_v34 = vld [vmem:[#allocation3 + $0x31] sm:$0xff] }
 0x1de   : > { %18601 = vmatprep.mubr.msk.f32.mxu0 %vm1694_vm4, %v22923_v14  ;;  %19448 = vmatprep.mubr.msk.f32.mxu1 %vm371_vm1, %v8802_v11  ;;  %v23000_v60 = vld [vmem:[#allocation3 + $0x39] sm:$0xff]  ;;  %v9171_v11 = vld [vmem:[#allocation4 + $0x3c] sm:$0xff] }
 0x1e0   : > { %v1841_v9 = vpop.permute.xlu1 %1840  ;;  %v22933_v17 = vld [vmem:[#allocation3 + $0x140] sm:$0xff]  ;;  %v22935_v2 = vld [vmem:[#allocation3 + $0x150] sm:$0xff]  ;;  %v5583_v26 = vpop.permute.xlu0 %5582 }
 0x1e1   : > { %1908 = vst.msk [vmem:[#allocation3 + $0x171] sm:$0xff] %vm1694_vm4, %v1841_v9  ;;  %18602 = vmatmul.mubr.msk.f32.gmra.mrb[90].mxu0 %vm1694_vm4, %v22933_v17  ;;  %19449 = vmatmul.mubr.msk.f32.gmra.mrb[24].mxu1 %vm371_vm1, %v8803_v54  ;;  %v23005_v9 = vld [vmem:[#allocation3 + $0x49] sm:$0xff]  ;;  %v23010_v54 = vld [vmem:[#allocation3 + $0x51] sm:$0xff] }
 0x1e2   : > { %5649 = vst.msk [vmem:[#allocation4 + $0x19a] sm:$0xff] %vm371_vm1, %v5583_v26  ;;  %18604 = vmatprep.mubr.msk.f32.mxu0 %vm1694_vm4, %v22935_v2  ;;  %19451 = vmatprep.mubr.msk.f32.mxu1 %vm371_vm1, %v8804_v58  ;;  %v9173_v26 = vld [vmem:[#allocation4 + $0x54] sm:$0xff] }
 0x1e3   : > { %v23015_v58 = vld [vmem:[#allocation3 + $0x61] sm:$0xff] }
 0x1e4   : > { %v22945_v20 = vld [vmem:[#allocation3 + $0x158] sm:$0xff]  ;;  %v22947_v50 = vld [vmem:[#allocation3 + $0x168] sm:$0xff]  ;;  %v5585_v62 = vpop.permute.xlu1 %5584  ;;  %v1843_v19 = vpop.permute.xlu0 %1842 }
 0x1e5   : > { %18605 = vmatmul.mubr.msk.f32.gmra.mrb[92].mxu0 %vm1694_vm4, %v22945_v20  ;;  %19452 = vmatmul.mubr.msk.f32.gmra.mrb[26].mxu1 %vm371_vm1, %v8805_v16  ;;  %5650 = vst.msk [vmem:[#allocation4 + $0x1a2] sm:$0xff] %vm371_vm1, %v5585_v62  ;;  %v9174_v16 = vld [vmem:[#allocation4 + $0x64] sm:$0xff]  ;;  %v2317_v62 = vld [vmem:[#allocation3 + $0x69] sm:$0xff] }
 0x1e6   : > { %1909 = vst.msk [vmem:[#allocation3 + $0x181] sm:$0xff] %vm1694_vm4, %v1843_v19  ;;  %18607 = vmatprep.mubr.msk.f32.mxu0 %vm1694_vm4, %v22947_v50  ;;  %19454 = vmatprep.mubr.msk.f32.mxu1 %vm371_vm1, %v8806_v8  ;;  %v9175_v19 = vld [vmem:[#allocation4 + $0x6c] sm:$0xff] }
 0x1e7   : > { %v2318_v8 = vld [vmem:[#allocation3 + $0x79] sm:$0xff] }
 0x1e8   : > { %v22957_v48 = vld [vmem:[#allocation3 + $0x170] sm:$0xff]  ;;  %v1845_v32 = vpop.permute.xlu1 %1844 }
 0x1e9   : > { %18608 = vmatmul.mubr.msk.f32.gmra.mrb[94].mxu0 %vm1694_vm4, %v22957_v48  ;;  %19455 = vmatmul.mubr.msk.f32.gmra.mrb[28].mxu1 %vm371_vm1, %v8807_v45  ;;  %1910 = vst.msk [vmem:[#allocation3 + $0x189] sm:$0xff] %vm1694_vm4, %v1845_v32  ;;  %v18514_v45 = vpop.f32.mrb[32].mxu0  ;;  %v23027_v32 = vld [vmem:[%s25930_s8] ss:$0 sm:$0xff] }
 0x1ea   : > { %19457 = vmatprep.mubr.msk.f32.mxu1 %vm371_vm1, %v8808_v21  ;;  %18612 = vmatprep.mubr.msk.f32.mxu0 %vm1694_vm4, %v2308_v0  ;;  %v9176_v0 = vld [vmem:[#allocation4 + $0x7c] sm:$0xff]  ;;  %v1509_v21 = vadd.f32 %v18514_v45, %v23027_v32  ;;  %v9180_v45 = vld [vmem:[#allocation4 + $0xac] sm:$0xff] }
 0x1eb   : > { %v10368_v13 = vld [vmem:[#allocation4 + $0x19a] sm:$0xff] }
 0x1ec   : > { %v10369_v49 = vld [vmem:[#allocation4 + $0x1a2] sm:$0xff] }
 0x1ed   : > { %18613 = vmatmul.mubr.msk.f32.vlgmr.msra.gmra.mrb[64].mxu0 %vm1694_vm4, %v2309_v33  ;;  %19458 = vmatmul.mubr.msk.f32.gmra.mrb[30].mxu1 %vm371_vm1, %v8809_v29  ;;  %v2319_v33 = vld [vmem:[#allocation3 + $0x81] sm:$0xff]  ;;  %v2320_v29 = vld [vmem:[#allocation3 + $0x91] sm:$0xff] }
 0x1ee   : > { %18615 = vmatprep.mubr.msk.f32.mxu0 %vm1694_vm4, %v22967_v28  ;;  %19462 = vmatprep.mubr.msk.f32.mxu1 %vm371_vm1, %v9168_v7  ;;  %v9177_v7 = vld [vmem:[#allocation4 + $0x84] sm:$0xff]  ;;  %v10758_v27 = vld [vmem:[#allocation4 + $0x19b] sm:$0xff] }
 0x1ef   : > { %18661 = vmatpush3.msk.msra.mxu0 %vm2047_vm6, %v22837_v24  ;;  %v9170_v24 = vld [vmem:[#allocation4 + $0x34] sm:$0xff] }
 0x1f0   : > { %18710 = vmatprep.subr.msk.mxu0 %vm2047_vm6, %v22972_v44 }
 0x1f1   : > { %18616 = vmatmul.mubr.msk.f32.gmra.mrb[66].mxu0 %vm1694_vm4, %v22979_v15  ;;  %19463 = vmatmul.mubr.msk.f32.vlgmr.msra.gmra.mrb[0].mxu1 %vm371_vm1, %v9169_v47  ;;  %v9178_v47 = vld [vmem:[#allocation4 + $0x94] sm:$0xff] }
 0x1f2   : > { %19511 = vmatpush3.msk.msra.mxu1 %vm468_vm0, %v22849_v23  ;;  %18618 = vmatprep.mubr.msk.f32.mxu0 %vm1694_vm4, %v22991_v34  ;;  %v9172_v23 = vld [vmem:[#allocation4 + $0x4c] sm:$0xff] }
 0x1f3   : > { %19465 = vmatprep.mubr.msk.f32.mxu1 %vm371_vm1, %v9170_v24  ;;  %19560 = vmatprep.subr.msk.mxu1 %vm468_vm0, %v22984_v42  ;;  %v1503_v24 = vpop.f32.mrb[33].mxu0 }
 0x1f5   : > { %18619 = vmatmul.mubr.msk.f32.gmra.mrb[68].mxu0 %vm1694_vm4, %v23000_v60  ;;  %19466 = vmatmul.mubr.msk.f32.gmra.mrb[2].mxu1 %vm371_vm1, %v9171_v11  ;;  %v1504_v11 = vadd.f32 %v23027_v32, %v1503_v24  ;;  %v2323_v24 = vld [vmem:[#allocation3 + $0xb1] sm:$0xff] }
 0x1f6   : > { %18621 = vmatprep.mubr.msk.f32.mxu0 %vm1694_vm4, %v23005_v9  ;;  %19468 = vmatprep.mubr.msk.f32.mxu1 %vm371_vm1, %v9172_v23  ;;  %v18517_v23 = vpop.f32.mrb[34].mxu0 }
 0x1f9   : > { %18622 = vmatmul.mubr.msk.f32.gmra.mrb[70].mxu0 %vm1694_vm4, %v23010_v54  ;;  %19469 = vmatmul.mubr.msk.f32.gmra.mrb[4].mxu1 %vm371_vm1, %v9173_v26  ;;  %v1663_v26 = vmax.f32 %v1509_v21, 0.0 }
 0x1fa   : > { %18624 = vmatprep.mubr.msk.f32.mxu0 %vm1694_vm4, %v23015_v58  ;;  %19471 = vmatprep.mubr.msk.f32.mxu1 %vm371_vm1, %v9174_v16  ;;  %v1519_v16 = vadd.f32 %v18517_v23, %v23027_v32 }
 0x1fb   : > { %15732 = vrot.lane.b32.xlu1 %v1663_v26, %s21487_s17 }
 0x1fc   : > { %v1665_v21 = vmax.f32 %v1519_v16, 0.0 }
 0x1fd   : > { %18625 = vmatmul.mubr.msk.f32.gmra.mrb[72].mxu0 %vm1694_vm4, %v2317_v62  ;;  %19472 = vmatmul.mubr.msk.f32.gmra.mrb[6].mxu1 %vm371_vm1, %v9175_v19  ;;  %v2321_v62 = vld [vmem:[#allocation3 + $0x99] sm:$0xff]  ;;  %v9179_v19 = vld [vmem:[#allocation4 + $0x9c] sm:$0xff] }
 0x1fe   : > { %18627 = vmatprep.mubr.msk.f32.mxu0 %vm1694_vm4, %v2318_v8  ;;  %19474 = vmatprep.mubr.msk.f32.mxu1 %vm371_vm1, %v9176_v0  ;;  %v1662_v8 = vmax.f32 %v1504_v11, 0.0  ;;  %v2322_v0 = vld [vmem:[#allocation3 + $0xa9] sm:$0xff] }
 0x1ff   : > { %v9181_v11 = vld [vmem:[#allocation4 + $0xb4] sm:$0xff]  ;;  %15736 = vrot.lane.b32.xlu1 %v1665_v21, %s21487_s17 }
 0x200   : > { %15730 = vrot.lane.b32.xlu0 %v1662_v8, %s21487_s17 }
 0x201   : > { %18628 = vmatmul.mubr.msk.f32.gmra.mrb[74].mxu0 %vm1694_vm4, %v2319_v33  ;;  %19475 = vmatmul.mubr.msk.f32.gmra.mrb[8].mxu1 %vm371_vm1, %v9177_v7  ;;  %v1513_v33 = vpop.f32.mrb[35].mxu0 }
 0x202   : > { %18630 = vmatprep.mubr.msk.f32.mxu0 %vm1694_vm4, %v2320_v29  ;;  %19477 = vmatprep.mubr.msk.f32.mxu1 %vm371_vm1, %v9178_v47  ;;  %v1514_v7 = vadd.f32 %v23027_v32, %v1513_v33  ;;  %v18520_v29 = vpop.f32.mrb[36].mxu0  ;;  %v2325_v33 = vld [vmem:[#allocation3 + $0xc9] sm:$0xff] }
 0x203   : > { %v1529_v47 = vadd.f32 %v18520_v29, %v23027_v32 }
 0x204   : > { %v1664_v23 = vmax.f32 %v1514_v7, 0.0  ;;  %v9183_v7 = vld [vmem:[#allocation4 + $0xcc] sm:$0xff] }
 0x205   : > { %18631 = vmatmul.mubr.msk.f32.gmra.mrb[76].mxu0 %vm1694_vm4, %v2321_v62  ;;  %19478 = vmatmul.mubr.msk.f32.gmra.mrb[10].mxu1 %vm371_vm1, %v9179_v19  ;;  %v2324_v62 = vld [vmem:[#allocation3 + $0xc1] sm:$0xff]  ;;  %v9182_v19 = vld [vmem:[#allocation4 + $0xc4] sm:$0xff]  ;;  %v1667_v8 = vmax.f32 %v1529_v47, 0.0 }
 0x206   : > { %18633 = vmatprep.mubr.msk.f32.mxu0 %vm1694_vm4, %v2322_v0  ;;  %19480 = vmatprep.mubr.msk.f32.mxu1 %vm371_vm1, %v9180_v45  ;;  %v1523_v0 = vpop.f32.mrb[37].mxu0 }
 0x207   : > { %v1524_v26 = vadd.f32 %v23027_v32, %v1523_v0  ;;  %v18523_v16 = vpop.f32.mrb[38].mxu0  ;;  %15734 = vrot.lane.b32.xlu0 %v1664_v23, %s21487_s17  ;;  %15740 = vrot.lane.b32.xlu1 %v1667_v8, %s21487_s17  ;;  %v2327_v0 = vld [vmem:[#allocation3 + $0xe1] sm:$0xff] }
 0x208   : > { %v1539_v45 = vadd.f32 %v18523_v16, %v23027_v32 }
 0x209   : > { %18634 = vmatmul.mubr.msk.f32.gmra.mrb[78].mxu0 %vm1694_vm4, %v2323_v24  ;;  %19481 = vmatmul.mubr.msk.f32.gmra.mrb[12].mxu1 %vm371_vm1, %v9181_v11  ;;  %v1666_v29 = vmax.f32 %v1524_v26, 0.0  ;;  %v2326_v24 = vld [vmem:[#allocation3 + $0xd9] sm:$0xff]  ;;  %v9184_v11 = vld [vmem:[#allocation4 + $0xdc] sm:$0xff] }
 0x20a   : > { %18636 = vmatprep.mubr.msk.f32.mxu0 %vm1694_vm4, %v2324_v62  ;;  %19483 = vmatprep.mubr.msk.f32.mxu1 %vm371_vm1, %v9182_v19  ;;  %v1533_v62 = vpop.f32.mrb[39].mxu0  ;;  %v1669_v23 = vmax.f32 %v1539_v45, 0.0  ;;  %v9185_v26 = vld [vmem:[#allocation4 + $0xe4] sm:$0xff] }
 0x20b   : > { %v1534_v21 = vadd.f32 %v23027_v32, %v1533_v62  ;;  %v18526_v47 = vpop.f32.mrb[40].mxu0  ;;  %15738 = vrot.lane.b32.xlu0 %v1666_v29, %s21487_s17  ;;  %v2329_v62 = vld [vmem:[#allocation3 + $0xf9] sm:$0xff] }
 0x20c   : > { %v1549_v19 = vadd.f32 %v18526_v47, %v23027_v32  ;;  %15744 = vrot.lane.b32.xlu1 %v1669_v23, %s21487_s17 }
 0x20d   : > { %18637 = vmatmul.mubr.msk.f32.gmra.mrb[80].mxu0 %vm1694_vm4, %v2325_v33  ;;  %19484 = vmatmul.mubr.msk.f32.gmra.mrb[14].mxu1 %vm371_vm1, %v9183_v7  ;;  %v1668_v16 = vmax.f32 %v1534_v21, 0.0  ;;  %v2328_v33 = vld [vmem:[#allocation3 + $0xf1] sm:$0xff]  ;;  %v9186_v7 = vld [vmem:[#allocation4 + $0xf4] sm:$0xff] }
 0x20e   : > { %18639 = vmatprep.mubr.msk.f32.mxu0 %vm1694_vm4, %v2326_v24  ;;  %19486 = vmatprep.mubr.msk.f32.mxu1 %vm371_vm1, %v9184_v11  ;;  %v1543_v24 = vpop.f32.mrb[41].mxu0  ;;  %v1671_v29 = vmax.f32 %v1549_v19, 0.0  ;;  %v9187_v21 = vld [vmem:[#allocation4 + $0xfc] sm:$0xff] }
 0x20f   : > { %v1544_v8 = vadd.f32 %v23027_v32, %v1543_v24  ;;  %v18529_v45 = vpop.f32.mrb[42].mxu0  ;;  %15742 = vrot.lane.b32.xlu0 %v1668_v16, %s21487_s17  ;;  %v2331_v24 = vld [vmem:[#allocation3 + $0x111] sm:$0xff] }
 0x210   : > { %v1559_v11 = vadd.f32 %v18529_v45, %v23027_v32  ;;  %15748 = vrot.lane.b32.xlu1 %v1671_v29, %s21487_s17 }
 0x211   : > { %18640 = vmatmul.mubr.msk.f32.gmra.mrb[82].mxu0 %vm1694_vm4, %v2327_v0  ;;  %19487 = vmatmul.mubr.msk.f32.gmra.mrb[16].mxu1 %vm371_vm1, %v9185_v26  ;;  %v1670_v47 = vmax.f32 %v1544_v8, 0.0  ;;  %v2330_v0 = vld [vmem:[#allocation3 + $0x109] sm:$0xff]  ;;  %v9188_v26 = vld [vmem:[#allocation4 + $0x10c] sm:$0xff] }
 0x212   : > { %18642 = vmatprep.mubr.msk.f32.mxu0 %vm1694_vm4, %v2328_v33  ;;  %19489 = vmatprep.mubr.msk.f32.mxu1 %vm371_vm1, %v9186_v7  ;;  %v1553_v33 = vpop.f32.mrb[43].mxu0  ;;  %v1673_v16 = vmax.f32 %v1559_v11, 0.0  ;;  %v9189_v8 = vld [vmem:[#allocation4 + $0x114] sm:$0xff] }
 0x213   : > { %v1554_v23 = vadd.f32 %v23027_v32, %v1553_v33  ;;  %v18532_v19 = vpop.f32.mrb[44].mxu0  ;;  %15746 = vrot.lane.b32.xlu0 %v1670_v47, %s21487_s17  ;;  %v2333_v33 = vld [vmem:[#allocation3 + $0x129] sm:$0xff] }
 0x214   : > { %v1569_v7 = vadd.f32 %v18532_v19, %v23027_v32  ;;  %15752 = vrot.lane.b32.xlu1 %v1673_v16, %s21487_s17 }
 0x215   : > { %18643 = vmatmul.mubr.msk.f32.gmra.mrb[84].mxu0 %vm1694_vm4, %v2329_v62  ;;  %19490 = vmatmul.mubr.msk.f32.gmra.mrb[18].mxu1 %vm371_vm1, %v9187_v21  ;;  %v1672_v45 = vmax.f32 %v1554_v23, 0.0  ;;  %v2332_v62 = vld [vmem:[#allocation3 + $0x121] sm:$0xff]  ;;  %v9190_v21 = vld [vmem:[#allocation4 + $0x124] sm:$0xff] }
 0x216   : > { %18645 = vmatprep.mubr.msk.f32.mxu0 %vm1694_vm4, %v2330_v0  ;;  %19492 = vmatprep.mubr.msk.f32.mxu1 %vm371_vm1, %v9188_v26  ;;  %v1563_v0 = vpop.f32.mrb[45].mxu0  ;;  %v1675_v47 = vmax.f32 %v1569_v7, 0.0  ;;  %v9191_v23 = vld [vmem:[#allocation4 + $0x12c] sm:$0xff] }
 0x217   : > { %v1564_v29 = vadd.f32 %v23027_v32, %v1563_v0  ;;  %v18535_v11 = vpop.f32.mrb[46].mxu0  ;;  %15750 = vrot.lane.b32.xlu0 %v1672_v45, %s21487_s17  ;;  %v2335_v0 = vld [vmem:[#allocation3 + $0x141] sm:$0xff] }
 0x218   : > { %v1579_v26 = vadd.f32 %v18535_v11, %v23027_v32  ;;  %15756 = vrot.lane.b32.xlu1 %v1675_v47, %s21487_s17 }
 0x219   : > { %18646 = vmatmul.mubr.msk.f32.gmra.mrb[86].mxu0 %vm1694_vm4, %v2331_v24  ;;  %19493 = vmatmul.mubr.msk.f32.gmra.mrb[20].mxu1 %vm371_vm1, %v9189_v8  ;;  %v1674_v19 = vmax.f32 %v1564_v29, 0.0  ;;  %v2334_v24 = vld [vmem:[#allocation3 + $0x139] sm:$0xff]  ;;  %v9192_v8 = vld [vmem:[#allocation4 + $0x13c] sm:$0xff] }
 0x21a   : > { %18648 = vmatprep.mubr.msk.f32.mxu0 %vm1694_vm4, %v2332_v62  ;;  %19495 = vmatprep.mubr.msk.f32.mxu1 %vm371_vm1, %v9190_v21  ;;  %v1573_v62 = vpop.f32.mrb[47].mxu0  ;;  %v1677_v45 = vmax.f32 %v1579_v26, 0.0  ;;  %v9193_v29 = vld [vmem:[#allocation4 + $0x144] sm:$0xff] }
 0x21b   : > { %v1574_v16 = vadd.f32 %v23027_v32, %v1573_v62  ;;  %v18538_v7 = vpop.f32.mrb[48].mxu0  ;;  %15754 = vrot.lane.b32.xlu0 %v1674_v19, %s21487_s17  ;;  %v2337_v62 = vld [vmem:[#allocation3 + $0x159] sm:$0xff] }
 0x21c   : > { %v1589_v21 = vadd.f32 %v18538_v7, %v23027_v32  ;;  %15760 = vrot.lane.b32.xlu1 %v1677_v45, %s21487_s17 }
 0x21d   : > { %18649 = vmatmul.mubr.msk.f32.gmra.mrb[88].mxu0 %vm1694_vm4, %v2333_v33  ;;  %19496 = vmatmul.mubr.msk.f32.gmra.mrb[22].mxu1 %vm371_vm1, %v9191_v23  ;;  %v1676_v11 = vmax.f32 %v1574_v16, 0.0  ;;  %v2336_v33 = vld [vmem:[#allocation3 + $0x151] sm:$0xff]  ;;  %v9194_v23 = vld [vmem:[#allocation4 + $0x154] sm:$0xff] }
 0x21e   : > { %18651 = vmatprep.mubr.msk.f32.mxu0 %vm1694_vm4, %v2334_v24  ;;  %19498 = vmatprep.mubr.msk.f32.mxu1 %vm371_vm1, %v9192_v8  ;;  %v1583_v24 = vpop.f32.mrb[49].mxu0  ;;  %v1679_v19 = vmax.f32 %v1589_v21, 0.0  ;;  %v9195_v16 = vld [vmem:[#allocation4 + $0x15c] sm:$0xff] }
 0x21f   : > { %v1584_v47 = vadd.f32 %v23027_v32, %v1583_v24  ;;  %v18541_v26 = vpop.f32.mrb[50].mxu0  ;;  %15758 = vrot.lane.b32.xlu0 %v1676_v11, %s21487_s17  ;;  %v2698_v11 = vld [vmem:[#allocation3 + $0x2] sm:$0xff] }
 0x220   : > { %v1599_v8 = vadd.f32 %v18541_v26, %v23027_v32  ;;  %15764 = vrot.lane.b32.xlu1 %v1679_v19, %s21487_s17  ;;  %v9197_v26 = vld [vmem:[#allocation4 + $0x174] sm:$0xff] }
 0x221   : > { %18652 = vmatmul.mubr.msk.f32.gmra.mrb[90].mxu0 %vm1694_vm4, %v2335_v0  ;;  %19499 = vmatmul.mubr.msk.f32.gmra.mrb[24].mxu1 %vm371_vm1, %v9193_v29  ;;  %v1678_v7 = vmax.f32 %v1584_v47, 0.0  ;;  %v2338_v0 = vld [vmem:[#allocation3 + $0x169] sm:$0xff]  ;;  %v9196_v29 = vld [vmem:[#allocation4 + $0x16c] sm:$0xff]  ;;  %v2339_v47 = vld [vmem:[#allocation3 + $0x171] sm:$0xff] }
 0x222   : > { %18654 = vmatprep.mubr.msk.f32.mxu0 %vm1694_vm4, %v2336_v33  ;;  %19501 = vmatprep.mubr.msk.f32.mxu1 %vm371_vm1, %v9194_v23  ;;  %v1593_v33 = vpop.f32.mrb[51].mxu0  ;;  %v1681_v23 = vmax.f32 %v1599_v8, 0.0  ;;  %v2699_v8 = vld [vmem:[#allocation3 + $0xa] sm:$0xff] }
 0x223   : > { %v1594_v45 = vadd.f32 %v23027_v32, %v1593_v33  ;;  %v18544_v21 = vpop.f32.mrb[52].mxu0  ;;  %15762 = vrot.lane.b32.xlu0 %v1678_v7, %s21487_s17  ;;  %v9199_v33 = vld [vmem:[#allocation4 + $0x18c] sm:$0xff] }
 0x224   : > { %v1609_v24 = vadd.f32 %v18544_v21, %v23027_v32  ;;  %15768 = vrot.lane.b32.xlu1 %v1681_v23, %s21487_s17 }
 0x225   : > { %18655 = vmatmul.mubr.msk.f32.gmra.mrb[92].mxu0 %vm1694_vm4, %v2337_v62  ;;  %19502 = vmatmul.mubr.msk.f32.gmra.mrb[26].mxu1 %vm371_vm1, %v9195_v16  ;;  %v1680_v62 = vmax.f32 %v1594_v45, 0.0  ;;  %v9198_v16 = vld [vmem:[#allocation4 + $0x184] sm:$0xff] }
 0x226   : > { %18657 = vmatprep.mubr.msk.f32.mxu0 %vm1694_vm4, %v2338_v0  ;;  %19504 = vmatprep.mubr.msk.f32.mxu1 %vm371_vm1, %v9196_v29  ;;  %v1603_v0 = vpop.f32.mrb[53].mxu0  ;;  %v1683_v7 = vmax.f32 %v1609_v24, 0.0 }
 0x227   : > { %v1604_v19 = vadd.f32 %v23027_v32, %v1603_v0  ;;  %v18547_v29 = vpop.f32.mrb[54].mxu0  ;;  %15766 = vrot.lane.b32.xlu0 %v1680_v62, %s21487_s17  ;;  %v9559_v0 = vld [vmem:[#allocation4 + $0x38] sm:$0xff] }
 0x228   : > { %v1619_v21 = vadd.f32 %v18547_v29, %v23027_v32  ;;  %v1613_v24 = vpop.f32.mrb[55].mxu0  ;;  %15772 = vrot.lane.b32.xlu1 %v1683_v7, %s21487_s17  ;;  %v9560_v7 = vld [vmem:[#allocation4 + $0x48] sm:$0xff] }
 0x229   : > { %18658 = vmatmul.mubr.msk.f32.gmra.mrb[94].mxu0 %vm1694_vm4, %v2339_v47  ;;  %19505 = vmatmul.mubr.msk.f32.gmra.mrb[28].mxu1 %vm371_vm1, %v9197_v26  ;;  %v1682_v45 = vmax.f32 %v1604_v19, 0.0  ;;  %v2700_v47 = vld [vmem:[#allocation3 + $0x1a] sm:$0xff]  ;;  %v1614_v23 = vadd.f32 %v23027_v32, %v1613_v24  ;;  %v18550_v62 = vpop.f32.mrb[56].mxu0 }
 0x22a   : > { %19507 = vmatprep.mubr.msk.f32.mxu1 %vm371_vm1, %v9198_v16  ;;  %18662 = vmatprep.mubr.msk.f32.mxu0 %vm1694_vm4, %v2698_v11  ;;  %v9558_v26 = vld [vmem:[#allocation4 + $0x30] sm:$0xff]  ;;  %v23121_v11 = vld [vmem:[%s25925_s3 + $0x20] sm:$0x3f]  ;;  %v1685_v19 = vmax.f32 %v1619_v21, 0.0 }
 0x22b   : > { %v2701_v16 = vld [vmem:[#allocation3 + $0x22] sm:$0xff]  ;;  %v1684_v29 = vmax.f32 %v1614_v23, 0.0  ;;  %15770 = vrot.lane.b32.xlu0 %v1682_v45, %s21487_s17 }
 0x22c   : > { %v9561_v24 = vld [vmem:[#allocation4 + $0x50] sm:$0xff]  ;;  %15776 = vrot.lane.b32.xlu1 %v1685_v19, %s21487_s17  ;;  %v2705_v19 = vld [vmem:[#allocation3 + $0x52] sm:$0xff] }
 0x22d   : > { %18663 = vmatmul.mubr.msk.f32.vlgmr.msra.gmra.mrb[64].mxu0 %vm1694_vm4, %v2699_v8  ;;  %19508 = vmatmul.mubr.msk.f32.gmra.mrb[30].mxu1 %vm371_vm1, %v9199_v33  ;;  %v23132_v8 = vld [vmem:[%s25927_s5 + $0x30] sm:$0xf]  ;;  %v1629_v33 = vadd.f32 %v18550_v62, %v23027_v32  ;;  %v2704_v62 = vld [vmem:[#allocation3 + $0x4a] sm:$0xff] }
 0x22e   : > { %18665 = vmatprep.mubr.msk.f32.mxu0 %vm1694_vm4, %v2700_v47  ;;  %19512 = vmatprep.mubr.msk.f32.mxu1 %vm371_vm1, %v9558_v26  ;;  %v1623_v47 = vpop.f32.mrb[57].mxu0  ;;  %v2703_v26 = vld [vmem:[#allocation3 + $0x3a] sm:$0xff] }
 0x22f   : > { %18711 = vmatpush3.msk.msra.mxu0 %vm2047_vm6, %v22972_v44  ;;  %v2702_v44 = vld [vmem:[#allocation3 + $0x32] sm:$0xff]  ;;  %v1624_v45 = vadd.f32 %v23027_v32, %v1623_v47  ;;  %v18553_v21 = vpop.f32.mrb[58].mxu0  ;;  %v1687_v23 = vmax.f32 %v1629_v33, 0.0  ;;  %15774 = vrot.lane.b32.xlu0 %v1684_v29, %s21487_s17 }
 0x230   : > { %18760 = vmatprep.subr.msk.mxu0 %vm2047_vm6, %v23121_v11  ;;  %v9563_v47 = vld [vmem:[#allocation4 + $0x68] sm:$0xff] }
 0x231   : > { %18666 = vmatmul.mubr.msk.f32.gmra.mrb[66].mxu0 %vm1694_vm4, %v2701_v16  ;;  %19513 = vmatmul.mubr.msk.f32.vlgmr.msra.gmra.mrb[0].mxu1 %vm371_vm1, %v9559_v0  ;;  %v9562_v16 = vld [vmem:[#allocation4 + $0x60] sm:$0xff]  ;;  %v1686_v0 = vmax.f32 %v1624_v45, 0.0  ;;  %v2706_v45 = vld [vmem:[#allocation3 + $0x62] sm:$0xff] }
 0x232   : > { %19561 = vmatpush3.msk.msra.mxu1 %vm468_vm0, %v22984_v42  ;;  %18668 = vmatprep.mubr.msk.f32.mxu0 %vm1694_vm4, %v2702_v44  ;;  %v1639_v42 = vadd.f32 %v18553_v21, %v23027_v32  ;;  %v1633_v44 = vpop.f32.mrb[59].mxu0 }
 0x233   : > { %19515 = vmatprep.mubr.msk.f32.mxu1 %vm371_vm1, %v9560_v7  ;;  %19610 = vmatprep.subr.msk.mxu1 %vm468_vm0, %v23132_v8  ;;  %v1634_v33 = vadd.f32 %v23027_v32, %v1633_v44  ;;  %v18556_v7 = vpop.f32.mrb[60].mxu0 }
 0x234   : > { %v1689_v29 = vmax.f32 %v1639_v42, 0.0  ;;  %15780 = vrot.lane.b32.xlu1 %v1687_v23, %s21487_s17  ;;  %15778 = vrot.lane.b32.xlu0 %v1686_v0, %s21487_s17  ;;  %v1649_v21 = vadd.f32 %v18556_v7, %v23027_v32  ;;  %v9565_v0 = vld [vmem:[#allocation4 + $0x80] sm:$0xff]  ;;  %v2708_v7 = vld [vmem:[#allocation3 + $0x7a] sm:$0xff] }
 0x235   : > { %18669 = vmatmul.mubr.msk.f32.gmra.mrb[68].mxu0 %vm1694_vm4, %v2703_v26  ;;  %19516 = vmatmul.mubr.msk.f32.gmra.mrb[2].mxu1 %vm371_vm1, %v9561_v24  ;;  %v1688_v57 = vmax.f32 %v1634_v33, 0.0  ;;  %v9564_v26 = vld [vmem:[#allocation4 + $0x78] sm:$0xff]  ;;  %v1643_v24 = vpop.f32.mrb[61].mxu0 }
 0x236   : > { %18671 = vmatprep.mubr.msk.f32.mxu0 %vm1694_vm4, %v2704_v62  ;;  %19518 = vmatprep.mubr.msk.f32.mxu1 %vm371_vm1, %v9562_v16  ;;  %v1644_v42 = vadd.f32 %v23027_v32, %v1643_v24  ;;  %v18559_v62 = vpop.f32.mrb[62].mxu0  ;;  %v2707_v16 = vld [vmem:[#allocation3 + $0x6a] sm:$0xff]  ;;  %v1691_v44 = vmax.f32 %v1649_v21, 0.0  ;;  %v2709_v21 = vld [vmem:[#allocation3 + $0x82] sm:$0xff]  ;;  %v2711_v24 = vld [vmem:[#allocation3 + $0x9a] sm:$0xff] }
 0x237   : > { %v23164_v23 = vadd.f32 %v18559_v62, %v23027_v32  ;;  %v9570_v62 = vld [vmem:[#allocation4 + $0xc0] sm:$0xff] }
 0x238   : > { %v1690_v33 = vmax.f32 %v1644_v42, 0.0  ;;  %15784 = vrot.lane.b32.xlu1 %v1689_v29, %s21487_s17  ;;  %15782 = vrot.lane.b32.xlu0 %v1688_v57, %s21487_s17  ;;  %v2710_v57 = vld [vmem:[#allocation3 + $0x92] sm:$0xff]  ;;  %v9569_v42 = vld [vmem:[#allocation4 + $0xb0] sm:$0xff] }
 0x239   : > { %18672 = vmatmul.mubr.msk.f32.gmra.mrb[70].mxu0 %vm1694_vm4, %v2705_v19  ;;  %19519 = vmatmul.mubr.msk.f32.gmra.mrb[4].mxu1 %vm371_vm1, %v9563_v47  ;;  %26050 = vst [vmem:[#allocation40_spill] sm:$0xff] %v23164_v23  ;;  %v9566_v19 = vld [vmem:[#allocation4 + $0x90] sm:$0xff]  ;;  %v1653_v47 = vpop.f32.mrb[63].mxu0  ;;  %v9568_v29 = vld [vmem:[#allocation4 + $0xa8] sm:$0xff] }
 0x23a   : > { %18674 = vmatprep.mubr.msk.f32.mxu0 %vm1694_vm4, %v2706_v45  ;;  %19521 = vmatprep.mubr.msk.f32.mxu1 %vm371_vm1, %v9564_v26  ;;  %v23173_v45 = vadd.f32 %v23027_v32, %v1653_v47  ;;  %v9567_v26 = vld [vmem:[#allocation4 + $0x98] sm:$0xff]  ;;  %v2716_v47 = vld [vmem:[#allocation3 + $0xda] sm:$0xff] }
 0x23b   : > { %v2712_v32 = vld [vmem:[#allocation3 + $0xaa] sm:$0xff]  ;;  %v10757_v23 = vld [vmem:[#allocation4 + $0x18b] sm:$0xff] }
 0x23c   : > { %26051 = vst [vmem:[#allocation41_spill] sm:$0xff] %v23173_v45  ;;  %15788 = vrot.lane.b32.xlu1 %v1691_v44, %s21487_s17  ;;  %15786 = vrot.lane.b32.xlu0 %v1690_v33, %s21487_s17  ;;  %v2714_v44 = vld [vmem:[#allocation3 + $0xc2] sm:$0xff]  ;;  %v10756_v45 = vld [vmem:[#allocation4 + $0x183] sm:$0xff] }
 0x23d   : > { %18675 = vmatmul.mubr.msk.f32.gmra.mrb[72].mxu0 %vm1694_vm4, %v2707_v16  ;;  %19522 = vmatmul.mubr.msk.f32.gmra.mrb[6].mxu1 %vm371_vm1, %v9565_v0  ;;  %v2713_v16 = vld [vmem:[#allocation3 + $0xb2] sm:$0xff]  ;;  %v9572_v33 = vld [vmem:[#allocation4 + $0xd8] sm:$0xff] }
 0x23e   : > { %18677 = vmatprep.mubr.msk.f32.mxu0 %vm1694_vm4, %v2708_v7  ;;  %19524 = vmatprep.mubr.msk.f32.mxu1 %vm371_vm1, %v9566_v19  ;;  %v9571_v0 = vld [vmem:[#allocation4 + $0xc8] sm:$0xff]  ;;  %v2715_v7 = vld [vmem:[#allocation3 + $0xca] sm:$0xff] }
 0x23f   : > { %v9573_v19 = vld [vmem:[#allocation4 + $0xe0] sm:$0xff] }
 0x241   : > { %18678 = vmatmul.mubr.msk.f32.gmra.mrb[74].mxu0 %vm1694_vm4, %v2709_v21  ;;  %19525 = vmatmul.mubr.msk.f32.gmra.mrb[8].mxu1 %vm371_vm1, %v9567_v26  ;;  %v9574_v21 = vld [vmem:[#allocation4 + $0xf0] sm:$0xff] }
 0x242   : > { %18680 = vmatprep.mubr.msk.f32.mxu0 %vm1694_vm4, %v2710_v57  ;;  %19527 = vmatprep.mubr.msk.f32.mxu1 %vm371_vm1, %v9568_v29  ;;  %v2717_v26 = vld [vmem:[#allocation3 + $0xe2] sm:$0xff]  ;;  %v2718_v29 = vld [vmem:[#allocation3 + $0xf2] sm:$0xff] }
 0x243   : > { %v9575_v57 = vld [vmem:[#allocation4 + $0xf8] sm:$0xff] }
 0x245   : > { %18681 = vmatmul.mubr.msk.f32.gmra.mrb[76].mxu0 %vm1694_vm4, %v2711_v24  ;;  %19528 = vmatmul.mubr.msk.f32.gmra.mrb[10].mxu1 %vm371_vm1, %v9569_v42  ;;  %v9576_v24 = vld [vmem:[#allocation4 + $0x108] sm:$0xff] }
 0x246   : > { %18683 = vmatprep.mubr.msk.f32.mxu0 %vm1694_vm4, %v2712_v32  ;;  %19530 = vmatprep.mubr.msk.f32.mxu1 %vm371_vm1, %v9570_v62  ;;  %v2719_v42 = vld [vmem:[#allocation3 + $0xfa] sm:$0xff]  ;;  %v2720_v62 = vld [vmem:[#allocation3 + $0x10a] sm:$0xff] }
 0x247   : > { %v9577_v32 = vld [vmem:[#allocation4 + $0x110] sm:$0xff] }
 0x249   : > { %18684 = vmatmul.mubr.msk.f32.gmra.mrb[78].mxu0 %vm1694_vm4, %v2713_v16  ;;  %19531 = vmatmul.mubr.msk.f32.gmra.mrb[12].mxu1 %vm371_vm1, %v9571_v0  ;;  %v9578_v16 = vld [vmem:[#allocation4 + $0x120] sm:$0xff] }
 0x24a   : > { %18686 = vmatprep.mubr.msk.f32.mxu0 %vm1694_vm4, %v2714_v44  ;;  %19533 = vmatprep.mubr.msk.f32.mxu1 %vm371_vm1, %v9572_v33  ;;  %v2721_v0 = vld [vmem:[#allocation3 + $0x112] sm:$0xff]  ;;  %v2722_v33 = vld [vmem:[#allocation3 + $0x122] sm:$0xff] }
 0x24b   : > { %v9579_v44 = vld [vmem:[#allocation4 + $0x128] sm:$0xff] }
 0x24d   : > { %18687 = vmatmul.mubr.msk.f32.gmra.mrb[80].mxu0 %vm1694_vm4, %v2715_v7  ;;  %19534 = vmatmul.mubr.msk.f32.gmra.mrb[14].mxu1 %vm371_vm1, %v9573_v19  ;;  %v9580_v7 = vld [vmem:[#allocation4 + $0x138] sm:$0xff] }
 0x24e   : > { %18689 = vmatprep.mubr.msk.f32.mxu0 %vm1694_vm4, %v2716_v47  ;;  %19536 = vmatprep.mubr.msk.f32.mxu1 %vm371_vm1, %v9574_v21  ;;  %v2723_v19 = vld [vmem:[#allocation3 + $0x12a] sm:$0xff]  ;;  %v2724_v21 = vld [vmem:[#allocation3 + $0x13a] sm:$0xff] }
 0x24f   : > { %v9581_v47 = vld [vmem:[#allocation4 + $0x140] sm:$0xff] }
 0x251   : > { %18690 = vmatmul.mubr.msk.f32.gmra.mrb[82].mxu0 %vm1694_vm4, %v2717_v26  ;;  %19537 = vmatmul.mubr.msk.f32.gmra.mrb[16].mxu1 %vm371_vm1, %v9575_v57  ;;  %v9582_v26 = vld [vmem:[#allocation4 + $0x150] sm:$0xff] }
 0x252   : > { %18692 = vmatprep.mubr.msk.f32.mxu0 %vm1694_vm4, %v2718_v29  ;;  %19539 = vmatprep.mubr.msk.f32.mxu1 %vm371_vm1, %v9576_v24  ;;  %v2725_v57 = vld [vmem:[#allocation3 + $0x142] sm:$0xff]  ;;  %v2726_v24 = vld [vmem:[#allocation3 + $0x152] sm:$0xff] }
 0x253   : > { %v9583_v29 = vld [vmem:[#allocation4 + $0x158] sm:$0xff] }
 0x255   : > { %18693 = vmatmul.mubr.msk.f32.gmra.mrb[84].mxu0 %vm1694_vm4, %v2719_v42  ;;  %19540 = vmatmul.mubr.msk.f32.gmra.mrb[18].mxu1 %vm371_vm1, %v9577_v32  ;;  %v9584_v42 = vld [vmem:[#allocation4 + $0x168] sm:$0xff] }
 0x256   : > { %18695 = vmatprep.mubr.msk.f32.mxu0 %vm1694_vm4, %v2720_v62  ;;  %19542 = vmatprep.mubr.msk.f32.mxu1 %vm371_vm1, %v9578_v16  ;;  %v2727_v32 = vld [vmem:[#allocation3 + $0x15a] sm:$0xff]  ;;  %v2728_v16 = vld [vmem:[#allocation3 + $0x16a] sm:$0xff] }
 0x257   : > { %v9585_v62 = vld [vmem:[#allocation4 + $0x170] sm:$0xff] }
 0x259   : > { %18696 = vmatmul.mubr.msk.f32.gmra.mrb[86].mxu0 %vm1694_vm4, %v2721_v0  ;;  %19543 = vmatmul.mubr.msk.f32.gmra.mrb[20].mxu1 %vm371_vm1, %v9579_v44  ;;  %v9586_v0 = vld [vmem:[#allocation4 + $0x180] sm:$0xff]  ;;  %v9588_v44 = vld [vmem:[#allocation4 + $0x198] sm:$0xff] }
 0x25a   : > { %18698 = vmatprep.mubr.msk.f32.mxu0 %vm1694_vm4, %v2722_v33  ;;  %19545 = vmatprep.mubr.msk.f32.mxu1 %vm371_vm1, %v9580_v7  ;;  %v2729_v33 = vld [vmem:[#allocation3 + $0x172] sm:$0xff] }
 0x25b   : > { %v9587_v7 = vld [vmem:[#allocation4 + $0x188] sm:$0xff] }
 0x25d   : > { %18699 = vmatmul.mubr.msk.f32.gmra.mrb[88].mxu0 %vm1694_vm4, %v2723_v19  ;;  %19546 = vmatmul.mubr.msk.f32.gmra.mrb[22].mxu1 %vm371_vm1, %v9581_v47  ;;  %v21396_v19 = vld [vmem:[#allocation3 + $0x18] sm:$0xff]  ;;  %v9589_v47 = vld [vmem:[#allocation4 + $0x1a0] sm:$0xff] }
 0x25e   : > { %18701 = vmatprep.mubr.msk.f32.mxu0 %vm1694_vm4, %v2724_v21  ;;  %19548 = vmatprep.mubr.msk.f32.mxu1 %vm371_vm1, %v9582_v26  ;;  %v21397_v21 = vld [vmem:[#allocation3 + $0x20] sm:$0xff] }
 0x25f   : > { %v9948_v26 = vld [vmem:[#allocation4 + $0x31] sm:$0xff] }
 0x261   : > { %18702 = vmatmul.mubr.msk.f32.gmra.mrb[90].mxu0 %vm1694_vm4, %v2725_v57  ;;  %19549 = vmatmul.mubr.msk.f32.gmra.mrb[24].mxu1 %vm371_vm1, %v9583_v29  ;;  %v23226_v57 = vld [vmem:[%s25925_s3 + $0x28] sm:$0x3f]  ;;  %v21398_v29 = vld [vmem:[#allocation3 + $0x30] sm:$0xff] }
 0x262   : > { %18704 = vmatprep.mubr.msk.f32.mxu0 %vm1694_vm4, %v2726_v24  ;;  %19551 = vmatprep.mubr.msk.f32.mxu1 %vm371_vm1, %v9584_v42  ;;  %v9949_v24 = vld [vmem:[#allocation4 + $0x39] sm:$0xff]  ;;  %v23235_v42 = vld [vmem:[%s25927_s5 + $0x34] sm:$0xf] }
 0x265   : > { %18705 = vmatmul.mubr.msk.f32.gmra.mrb[92].mxu0 %vm1694_vm4, %v2727_v32  ;;  %19552 = vmatmul.mubr.msk.f32.gmra.mrb[26].mxu1 %vm371_vm1, %v9585_v62  ;;  %v21399_v32 = vld [vmem:[#allocation3 + $0x38] sm:$0xff]  ;;  %v21400_v62 = vld [vmem:[#allocation3 + $0x48] sm:$0xff] }
 0x266   : > { %18707 = vmatprep.mubr.msk.f32.mxu0 %vm1694_vm4, %v2728_v16  ;;  %19554 = vmatprep.mubr.msk.f32.mxu1 %vm371_vm1, %v9586_v0  ;;  %v9951_v16 = vld [vmem:[#allocation4 + $0x51] sm:$0xff]  ;;  %v21401_v0 = vld [vmem:[#allocation3 + $0x50] sm:$0xff] }
 0x269   : > { %18708 = vmatmul.mubr.msk.f32.gmra.mrb[94].mxu0 %vm1694_vm4, %v2729_v33  ;;  %19555 = vmatmul.mubr.msk.f32.gmra.mrb[28].mxu1 %vm371_vm1, %v9587_v7  ;;  %v21402_v33 = vld [vmem:[#allocation3 + $0x60] sm:$0xff]  ;;  %v21403_v7 = vld [vmem:[#allocation3 + $0x68] sm:$0xff] }
 0x26a   : > { %18712 = vmatprep.mubr.msk.f32.mxu0 %vm1694_vm4, %v21396_v19  ;;  %19557 = vmatprep.mubr.msk.f32.mxu1 %vm371_vm1, %v9588_v44  ;;  %v9952_v44 = vld [vmem:[#allocation4 + $0x61] sm:$0xff]  ;;  %v9954_v19 = vld [vmem:[#allocation4 + $0x79] sm:$0xff] }
 0x26d   : > { %18713 = vmatmul.mubr.msk.f32.vlgmr.msra.gmra.mrb[64].mxu0 %vm1694_vm4, %v21397_v21  ;;  %19558 = vmatmul.mubr.msk.f32.gmra.mrb[30].mxu1 %vm371_vm1, %v9589_v47  ;;  %v21404_v47 = vld [vmem:[#allocation3 + $0x78] sm:$0xff] }
 0x26e   : > { %18715 = vmatprep.mubr.msk.f32.mxu0 %vm1694_vm4, %v21398_v29  ;;  %19562 = vmatprep.mubr.msk.f32.mxu1 %vm371_vm1, %v9948_v26  ;;  %v9955_v21 = vld [vmem:[#allocation4 + $0x81] sm:$0xff]  ;;  %v21405_v26 = vld [vmem:[#allocation3 + $0x80] sm:$0xff] }
 0x26f   : > { %18761 = vmatpush3.msk.msra.mxu0 %vm2047_vm6, %v23121_v11  ;;  %v9950_v11 = vld [vmem:[#allocation4 + $0x49] sm:$0xff]  ;;  %v9956_v29 = vld [vmem:[#allocation4 + $0x91] sm:$0xff] }
 0x270   : > { %18810 = vmatprep.subr.msk.mxu0 %vm2047_vm6, %v23226_v57 }
 0x271   : > { %18716 = vmatmul.mubr.msk.f32.gmra.mrb[66].mxu0 %vm1694_vm4, %v21399_v32  ;;  %19563 = vmatmul.mubr.msk.f32.vlgmr.msra.gmra.mrb[0].mxu1 %vm371_vm1, %v9949_v24  ;;  %v21406_v24 = vld [vmem:[#allocation3 + $0x90] sm:$0xff] }
 0x272   : > { %19611 = vmatpush3.msk.msra.mxu1 %vm468_vm0, %v23132_v8  ;;  %18718 = vmatprep.mubr.msk.f32.mxu0 %vm1694_vm4, %v21400_v62  ;;  %v9953_v8 = vld [vmem:[#allocation4 + $0x69] sm:$0xff]  ;;  %v9957_v32 = vld [vmem:[#allocation4 + $0x99] sm:$0xff] }
 0x273   : > { %19565 = vmatprep.mubr.msk.f32.mxu1 %vm371_vm1, %v9950_v11  ;;  %19660 = vmatprep.subr.msk.mxu1 %vm468_vm0, %v23235_v42  ;;  %v21407_v62 = vld [vmem:[#allocation3 + $0x98] sm:$0xff] }
 0x274   : > { %v9958_v11 = vld [vmem:[#allocation4 + $0xa9] sm:$0xff] }
 0x275   : > { %18719 = vmatmul.mubr.msk.f32.gmra.mrb[68].mxu0 %vm1694_vm4, %v21401_v0  ;;  %19566 = vmatmul.mubr.msk.f32.gmra.mrb[2].mxu1 %vm371_vm1, %v9951_v16  ;;  %v21408_v16 = vld [vmem:[#allocation3 + $0xa8] sm:$0xff] }
 0x276   : > { %18721 = vmatprep.mubr.msk.f32.mxu0 %vm1694_vm4, %v21402_v33  ;;  %19568 = vmatprep.mubr.msk.f32.mxu1 %vm371_vm1, %v9952_v44  ;;  %v9959_v0 = vld [vmem:[#allocation4 + $0xb1] sm:$0xff]  ;;  %v21409_v44 = vld [vmem:[#allocation3 + $0xb0] sm:$0xff] }
 0x277   : > { %v9960_v33 = vld [vmem:[#allocation4 + $0xc1] sm:$0xff] }
 0x279   : > { %18722 = vmatmul.mubr.msk.f32.gmra.mrb[70].mxu0 %vm1694_vm4, %v21403_v7  ;;  %19569 = vmatmul.mubr.msk.f32.gmra.mrb[4].mxu1 %vm371_vm1, %v9953_v8  ;;  %v21410_v8 = vld [vmem:[#allocation3 + $0xc0] sm:$0xff] }
 0x27a   : > { %18724 = vmatprep.mubr.msk.f32.mxu0 %vm1694_vm4, %v21404_v47  ;;  %19571 = vmatprep.mubr.msk.f32.mxu1 %vm371_vm1, %v9954_v19  ;;  %v9961_v7 = vld [vmem:[#allocation4 + $0xc9] sm:$0xff]  ;;  %v21411_v19 = vld [vmem:[#allocation3 + $0xc8] sm:$0xff] }
 0x27b   : > { %v9962_v47 = vld [vmem:[#allocation4 + $0xd9] sm:$0xff] }
 0x27d   : > { %18725 = vmatmul.mubr.msk.f32.gmra.mrb[72].mxu0 %vm1694_vm4, %v21405_v26  ;;  %19572 = vmatmul.mubr.msk.f32.gmra.mrb[6].mxu1 %vm371_vm1, %v9955_v21  ;;  %v21412_v21 = vld [vmem:[#allocation3 + $0xd8] sm:$0xff] }
 0x27e   : > { %18727 = vmatprep.mubr.msk.f32.mxu0 %vm1694_vm4, %v21406_v24  ;;  %19574 = vmatprep.mubr.msk.f32.mxu1 %vm371_vm1, %v9956_v29  ;;  %v9963_v26 = vld [vmem:[#allocation4 + $0xe1] sm:$0xff]  ;;  %v21413_v29 = vld [vmem:[#allocation3 + $0xe0] sm:$0xff] }
 0x27f   : > { %v9964_v24 = vld [vmem:[#allocation4 + $0xf1] sm:$0xff] }
 0x281   : > { %18728 = vmatmul.mubr.msk.f32.gmra.mrb[74].mxu0 %vm1694_vm4, %v21407_v62  ;;  %19575 = vmatmul.mubr.msk.f32.gmra.mrb[8].mxu1 %vm371_vm1, %v9957_v32  ;;  %v21414_v32 = vld [vmem:[#allocation3 + $0xf0] sm:$0xff] }
 0x282   : > { %18730 = vmatprep.mubr.msk.f32.mxu0 %vm1694_vm4, %v21408_v16  ;;  %19577 = vmatprep.mubr.msk.f32.mxu1 %vm371_vm1, %v9958_v11  ;;  %v9965_v62 = vld [vmem:[#allocation4 + $0xf9] sm:$0xff]  ;;  %v21415_v11 = vld [vmem:[#allocation3 + $0xf8] sm:$0xff] }
 0x283   : > { %v9966_v16 = vld [vmem:[#allocation4 + $0x109] sm:$0xff] }
 0x285   : > { %18731 = vmatmul.mubr.msk.f32.gmra.mrb[76].mxu0 %vm1694_vm4, %v21409_v44  ;;  %19578 = vmatmul.mubr.msk.f32.gmra.mrb[10].mxu1 %vm371_vm1, %v9959_v0  ;;  %v21416_v0 = vld [vmem:[#allocation3 + $0x108] sm:$0xff] }
 0x286   : > { %18733 = vmatprep.mubr.msk.f32.mxu0 %vm1694_vm4, %v21410_v8  ;;  %19580 = vmatprep.mubr.msk.f32.mxu1 %vm371_vm1, %v9960_v33  ;;  %v9967_v44 = vld [vmem:[#allocation4 + $0x111] sm:$0xff]  ;;  %v21417_v33 = vld [vmem:[#allocation3 + $0x110] sm:$0xff] }
 0x287   : > { %v9968_v8 = vld [vmem:[#allocation4 + $0x121] sm:$0xff] }
 0x289   : > { %18734 = vmatmul.mubr.msk.f32.gmra.mrb[78].mxu0 %vm1694_vm4, %v21411_v19  ;;  %19581 = vmatmul.mubr.msk.f32.gmra.mrb[12].mxu1 %vm371_vm1, %v9961_v7  ;;  %v21418_v7 = vld [vmem:[#allocation3 + $0x120] sm:$0xff] }
 0x28a   : > { %18736 = vmatprep.mubr.msk.f32.mxu0 %vm1694_vm4, %v21412_v21  ;;  %19583 = vmatprep.mubr.msk.f32.mxu1 %vm371_vm1, %v9962_v47  ;;  %v9969_v19 = vld [vmem:[#allocation4 + $0x129] sm:$0xff]  ;;  %v9970_v47 = vld [vmem:[#allocation4 + $0x139] sm:$0xff]  ;;  %v9971_v21 = vld [vmem:[#allocation4 + $0x141] sm:$0xff] }
 0x28d   : > { %18737 = vmatmul.mubr.msk.f32.gmra.mrb[80].mxu0 %vm1694_vm4, %v21413_v29  ;;  %19584 = vmatmul.mubr.msk.f32.gmra.mrb[14].mxu1 %vm371_vm1, %v9963_v26  ;;  %v9972_v26 = vld [vmem:[#allocation4 + $0x151] sm:$0xff]  ;;  %v9976_v29 = vld [vmem:[#allocation4 + $0x181] sm:$0xff] }
 0x28e   : > { %18739 = vmatprep.mubr.msk.f32.mxu0 %vm1694_vm4, %v21414_v32  ;;  %19586 = vmatprep.mubr.msk.f32.mxu1 %vm371_vm1, %v9964_v24  ;;  %v9977_v24 = vld [vmem:[#allocation4 + $0x189] sm:$0xff]  ;;  %v10338_v32 = vld [vmem:[#allocation4 + $0x32] sm:$0xff] }
 0x291   : > { %18740 = vmatmul.mubr.msk.f32.gmra.mrb[82].mxu0 %vm1694_vm4, %v21415_v11  ;;  %19587 = vmatmul.mubr.msk.f32.gmra.mrb[16].mxu1 %vm371_vm1, %v9965_v62  ;;  %v23323_v62 = vld [vmem:[%s25925_s3 + $0x30] sm:$0x3f] }
 0x292   : > { %18742 = vmatprep.mubr.msk.f32.mxu0 %vm1694_vm4, %v21416_v0  ;;  %19589 = vmatprep.mubr.msk.f32.mxu1 %vm371_vm1, %v9966_v16  ;;  %v23358_v11 = vld [vmem:[#allocation3 + $0x79] sm:$0xff]  ;;  %v10344_v16 = vld [vmem:[#allocation4 + $0x7a] sm:$0xff] }
 0x293   : > { %v23368_v0 = vld [vmem:[#allocation3 + $0x91] sm:$0xff] }
 0x295   : > { %18743 = vmatmul.mubr.msk.f32.gmra.mrb[84].mxu0 %vm1694_vm4, %v21417_v33  ;;  %19590 = vmatmul.mubr.msk.f32.gmra.mrb[18].mxu1 %vm371_vm1, %v9967_v44  ;;  %v10346_v44 = vld [vmem:[#allocation4 + $0x92] sm:$0xff]  ;;  %v23373_v33 = vld [vmem:[#allocation3 + $0x99] sm:$0xff] }
 0x296   : > { %18745 = vmatprep.mubr.msk.f32.mxu0 %vm1694_vm4, %v21418_v7  ;;  %19592 = vmatprep.mubr.msk.f32.mxu1 %vm371_vm1, %v9968_v8  ;;  %v10347_v8 = vld [vmem:[#allocation4 + $0x9a] sm:$0xff] }
 0x297   : > { %v23378_v7 = vld [vmem:[#allocation3 + $0xa9] sm:$0xff] }
 0x299   : > { %18746 = vmatmul.mubr.msk.f32.gmra.mrb[86].mxu0 %vm1694_vm4, %v22921_v41  ;;  %19593 = vmatmul.mubr.msk.f32.gmra.mrb[20].mxu1 %vm371_vm1, %v9969_v19  ;;  %v9973_v41 = vld [vmem:[#allocation4 + $0x159] sm:$0xff]  ;;  %v10348_v19 = vld [vmem:[#allocation4 + $0xaa] sm:$0xff] }
 0x29a   : > { %18748 = vmatprep.mubr.msk.f32.mxu0 %vm1694_vm4, %v22923_v14  ;;  %19595 = vmatprep.mubr.msk.f32.mxu1 %vm371_vm1, %v9970_v47  ;;  %v9974_v14 = vld [vmem:[#allocation4 + $0x169] sm:$0xff]  ;;  %v23383_v47 = vld [vmem:[#allocation3 + $0xb1] sm:$0xff] }
 0x29d   : > { %18749 = vmatmul.mubr.msk.f32.gmra.mrb[88].mxu0 %vm1694_vm4, %v22933_v17  ;;  %19596 = vmatmul.mubr.msk.f32.gmra.mrb[22].mxu1 %vm371_vm1, %v9971_v21  ;;  %v9975_v17 = vld [vmem:[#allocation4 + $0x171] sm:$0xff] }
 0x29e   : > { %18751 = vmatprep.mubr.msk.f32.mxu0 %vm1694_vm4, %v22935_v2  ;;  %19598 = vmatprep.mubr.msk.f32.mxu1 %vm371_vm1, %v9972_v26  ;;  %v23304_v2 = vld [vmem:[#allocation3 + $0x180] sm:$0xff] }
 0x29f   : > { %v10349_v21 = vld [vmem:[#allocation4 + $0xb2] sm:$0xff] }
 0x2a0   : > { %v23388_v26 = vld [vmem:[#allocation3 + $0xc1] sm:$0xff] }
 0x2a1   : > { %18752 = vmatmul.mubr.msk.f32.gmra.mrb[90].mxu0 %vm1694_vm4, %v22945_v20  ;;  %19599 = vmatmul.mubr.msk.f32.gmra.mrb[24].mxu1 %vm371_vm1, %v9973_v41  ;;  %v23309_v20 = vld [vmem:[#allocation3 + $0x188] sm:$0xff]  ;;  %v10350_v41 = vld [vmem:[#allocation4 + $0xc2] sm:$0xff] }
 0x2a2   : > { %18754 = vmatprep.mubr.msk.f32.mxu0 %vm1694_vm4, %v22947_v50  ;;  %19601 = vmatprep.mubr.msk.f32.mxu1 %vm371_vm1, %v9974_v14  ;;  %v9978_v50 = vld [vmem:[#allocation4 + $0x199] sm:$0xff] }
 0x2a3   : > { %v23393_v14 = vld [vmem:[#allocation3 + $0xc9] sm:$0xff] }
 0x2a5   : > { %18755 = vmatmul.mubr.msk.f32.gmra.mrb[92].mxu0 %vm1694_vm4, %v22957_v48  ;;  %19602 = vmatmul.mubr.msk.f32.gmra.mrb[26].mxu1 %vm371_vm1, %v9975_v17  ;;  %v9979_v48 = vld [vmem:[#allocation4 + $0x1a1] sm:$0xff]  ;;  %v10351_v17 = vld [vmem:[#allocation4 + $0xca] sm:$0xff] }
 0x2a6   : > { %18757 = vmatprep.mubr.msk.f32.mxu0 %vm1694_vm4, %v23304_v2  ;;  %19604 = vmatprep.mubr.msk.f32.mxu1 %vm371_vm1, %v9976_v29  ;;  %v23398_v29 = vld [vmem:[#allocation3 + $0xd9] sm:$0xff] }
 0x2a9   : > { %18758 = vmatmul.mubr.msk.f32.gmra.mrb[94].mxu0 %vm1694_vm4, %v23309_v20  ;;  %19605 = vmatmul.mubr.msk.f32.gmra.mrb[28].mxu1 %vm371_vm1, %v9977_v24  ;;  %v10352_v24 = vld [vmem:[#allocation4 + $0xda] sm:$0xff] }
 0x2aa   : > { %18762 = vmatprep.mubr.msk.f32.mxu0 %vm1694_vm4, %v22967_v28  ;;  %19607 = vmatprep.mubr.msk.f32.mxu1 %vm371_vm1, %v9978_v50  ;;  %v10339_v28 = vld [vmem:[#allocation4 + $0x3a] sm:$0xff]  ;;  %v23403_v50 = vld [vmem:[#allocation3 + $0xe1] sm:$0xff] }
 0x2ad   : > { %18763 = vmatmul.mubr.msk.f32.vlgmr.msra.gmra.mrb[64].mxu0 %vm1694_vm4, %v22979_v15  ;;  %19608 = vmatmul.mubr.msk.f32.gmra.mrb[30].mxu1 %vm371_vm1, %v9979_v48  ;;  %v23333_v15 = vld [vmem:[%s25927_s5 + $0x38] sm:$0xf]  ;;  %v10353_v48 = vld [vmem:[#allocation4 + $0xe2] sm:$0xff] }
 0x2ae   : > { %18765 = vmatprep.mubr.msk.f32.mxu0 %vm1694_vm4, %v22991_v34  ;;  %19612 = vmatprep.mubr.msk.f32.mxu1 %vm371_vm1, %v10338_v32  ;;  %v10340_v34 = vld [vmem:[#allocation4 + $0x4a] sm:$0xff]  ;;  %v23408_v32 = vld [vmem:[#allocation3 + $0xf1] sm:$0xff] }
 0x2af   : > { %18811 = vmatpush3.msk.msra.mxu0 %vm2047_vm6, %v23226_v57  ;;  %v10341_v57 = vld [vmem:[#allocation4 + $0x52] sm:$0xff] }
 0x2b0   : > { %18860 = vmatprep.subr.msk.mxu0 %vm2047_vm6, %v23323_v62 }
 0x2b1   : > { %18766 = vmatmul.mubr.msk.f32.gmra.mrb[66].mxu0 %vm1694_vm4, %v23000_v60  ;;  %19613 = vmatmul.mubr.msk.f32.vlgmr.msra.gmra.mrb[0].mxu1 %vm371_vm1, %v10339_v28  ;;  %v10342_v60 = vld [vmem:[#allocation4 + $0x62] sm:$0xff]  ;;  %v10354_v28 = vld [vmem:[#allocation4 + $0xf2] sm:$0xff] }
 0x2b2   : > { %19661 = vmatpush3.msk.msra.mxu1 %vm468_vm0, %v23235_v42  ;;  %18768 = vmatprep.mubr.msk.f32.mxu0 %vm1694_vm4, %v23005_v9  ;;  %v23353_v42 = vld [vmem:[#allocation3 + $0x69] sm:$0xff]  ;;  %v10343_v9 = vld [vmem:[#allocation4 + $0x6a] sm:$0xff] }
 0x2b3   : > { %19615 = vmatprep.mubr.msk.f32.mxu1 %vm371_vm1, %v10340_v34  ;;  %19710 = vmatprep.subr.msk.mxu1 %vm468_vm0, %v23333_v15  ;;  %v23413_v34 = vld [vmem:[#allocation3 + $0xf9] sm:$0xff] }
 0x2b5   : > { %18769 = vmatmul.mubr.msk.f32.gmra.mrb[68].mxu0 %vm1694_vm4, %v23010_v54  ;;  %19616 = vmatmul.mubr.msk.f32.gmra.mrb[2].mxu1 %vm371_vm1, %v10341_v57  ;;  %v23363_v54 = vld [vmem:[#allocation3 + $0x81] sm:$0xff]  ;;  %v10355_v57 = vld [vmem:[#allocation4 + $0xfa] sm:$0xff] }
 0x2b6   : > { %18771 = vmatprep.mubr.msk.f32.mxu0 %vm1694_vm4, %v23015_v58  ;;  %19618 = vmatprep.mubr.msk.f32.mxu1 %vm371_vm1, %v10342_v60  ;;  %v10345_v58 = vld [vmem:[#allocation4 + $0x82] sm:$0xff]  ;;  %v23418_v60 = vld [vmem:[#allocation3 + $0x109] sm:$0xff] }
 0x2b9   : > { %18772 = vmatmul.mubr.msk.f32.gmra.mrb[70].mxu0 %vm1694_vm4, %v23353_v42  ;;  %19619 = vmatmul.mubr.msk.f32.gmra.mrb[4].mxu1 %vm371_vm1, %v10343_v9  ;;  %v10356_v9 = vld [vmem:[#allocation4 + $0x10a] sm:$0xff] }
 0x2ba   : > { %18774 = vmatprep.mubr.msk.f32.mxu0 %vm1694_vm4, %v23358_v11  ;;  %19621 = vmatprep.mubr.msk.f32.mxu1 %vm371_vm1, %v10344_v16  ;;  %v23423_v16 = vld [vmem:[#allocation3 + $0x111] sm:$0xff] }
 0x2bd   : > { %18775 = vmatmul.mubr.msk.f32.gmra.mrb[72].mxu0 %vm1694_vm4, %v23363_v54  ;;  %19622 = vmatmul.mubr.msk.f32.gmra.mrb[6].mxu1 %vm371_vm1, %v10345_v58  ;;  %v10357_v58 = vld [vmem:[#allocation4 + $0x112] sm:$0xff] }
 0x2be   : > { %18777 = vmatprep.mubr.msk.f32.mxu0 %vm1694_vm4, %v23368_v0  ;;  %19624 = vmatprep.mubr.msk.f32.mxu1 %vm371_vm1, %v10346_v44  ;;  %v23428_v44 = vld [vmem:[#allocation3 + $0x121] sm:$0xff] }
 0x2c1   : > { %18778 = vmatmul.mubr.msk.f32.gmra.mrb[74].mxu0 %vm1694_vm4, %v23373_v33  ;;  %19625 = vmatmul.mubr.msk.f32.gmra.mrb[8].mxu1 %vm371_vm1, %v10347_v8  ;;  %v10358_v8 = vld [vmem:[#allocation4 + $0x122] sm:$0xff] }
 0x2c2   : > { %18780 = vmatprep.mubr.msk.f32.mxu0 %vm1694_vm4, %v23378_v7  ;;  %19627 = vmatprep.mubr.msk.f32.mxu1 %vm371_vm1, %v10348_v19  ;;  %v23433_v19 = vld [vmem:[#allocation3 + $0x129] sm:$0xff] }
 0x2c5   : > { %18781 = vmatmul.mubr.msk.f32.gmra.mrb[76].mxu0 %vm1694_vm4, %v23383_v47  ;;  %19628 = vmatmul.mubr.msk.f32.gmra.mrb[10].mxu1 %vm371_vm1, %v10349_v21  ;;  %v10359_v21 = vld [vmem:[#allocation4 + $0x12a] sm:$0xff] }
 0x2c6   : > { %18783 = vmatprep.mubr.msk.f32.mxu0 %vm1694_vm4, %v23388_v26  ;;  %19630 = vmatprep.mubr.msk.f32.mxu1 %vm371_vm1, %v10350_v41  ;;  %v23438_v41 = vld [vmem:[#allocation3 + $0x139] sm:$0xff] }
 0x2c9   : > { %18784 = vmatmul.mubr.msk.f32.gmra.mrb[78].mxu0 %vm1694_vm4, %v23393_v14  ;;  %19631 = vmatmul.mubr.msk.f32.gmra.mrb[12].mxu1 %vm371_vm1, %v10351_v17  ;;  %v10360_v17 = vld [vmem:[#allocation4 + $0x13a] sm:$0xff] }
 0x2ca   : > { %18786 = vmatprep.mubr.msk.f32.mxu0 %vm1694_vm4, %v23398_v29  ;;  %19633 = vmatprep.mubr.msk.f32.mxu1 %vm371_vm1, %v10352_v24  ;;  %v23443_v24 = vld [vmem:[#allocation3 + $0x141] sm:$0xff] }
 0x2cd   : > { %18787 = vmatmul.mubr.msk.f32.gmra.mrb[80].mxu0 %vm1694_vm4, %v23403_v50  ;;  %19634 = vmatmul.mubr.msk.f32.gmra.mrb[14].mxu1 %vm371_vm1, %v10353_v48  ;;  %v10361_v48 = vld [vmem:[#allocation4 + $0x142] sm:$0xff] }
 0x2ce   : > { %18789 = vmatprep.mubr.msk.f32.mxu0 %vm1694_vm4, %v23408_v32  ;;  %19636 = vmatprep.mubr.msk.f32.mxu1 %vm371_vm1, %v10354_v28  ;;  %v23448_v28 = vld [vmem:[#allocation3 + $0x151] sm:$0xff] }
 0x2d1   : > { %18790 = vmatmul.mubr.msk.f32.gmra.mrb[82].mxu0 %vm1694_vm4, %v23413_v34  ;;  %19637 = vmatmul.mubr.msk.f32.gmra.mrb[16].mxu1 %vm371_vm1, %v10355_v57  ;;  %v10362_v57 = vld [vmem:[#allocation4 + $0x152] sm:$0xff] }
 0x2d2   : > { %18792 = vmatprep.mubr.msk.f32.mxu0 %vm1694_vm4, %v23418_v60  ;;  %19639 = vmatprep.mubr.msk.f32.mxu1 %vm371_vm1, %v10356_v9  ;;  %v23453_v9 = vld [vmem:[#allocation3 + $0x159] sm:$0xff] }
 0x2d5   : > { %18793 = vmatmul.mubr.msk.f32.gmra.mrb[84].mxu0 %vm1694_vm4, %v23423_v16  ;;  %19640 = vmatmul.mubr.msk.f32.gmra.mrb[18].mxu1 %vm371_vm1, %v10357_v58  ;;  %v10363_v58 = vld [vmem:[#allocation4 + $0x15a] sm:$0xff] }
 0x2d6   : > { %18795 = vmatprep.mubr.msk.f32.mxu0 %vm1694_vm4, %v23428_v44  ;;  %19642 = vmatprep.mubr.msk.f32.mxu1 %vm371_vm1, %v10358_v8  ;;  %v23458_v8 = vld [vmem:[#allocation3 + $0x169] sm:$0xff] }
 0x2d9   : > { %18796 = vmatmul.mubr.msk.f32.gmra.mrb[86].mxu0 %vm1694_vm4, %v23433_v19  ;;  %19643 = vmatmul.mubr.msk.f32.gmra.mrb[20].mxu1 %vm371_vm1, %v10359_v21  ;;  %v10364_v21 = vld [vmem:[#allocation4 + $0x16a] sm:$0xff] }
 0x2da   : > { %18798 = vmatprep.mubr.msk.f32.mxu0 %vm1694_vm4, %v23438_v41  ;;  %19645 = vmatprep.mubr.msk.f32.mxu1 %vm371_vm1, %v10360_v17  ;;  %v23463_v17 = vld [vmem:[#allocation3 + $0x171] sm:$0xff] }
 0x2dd   : > { %18799 = vmatmul.mubr.msk.f32.gmra.mrb[88].mxu0 %vm1694_vm4, %v23443_v24  ;;  %19646 = vmatmul.mubr.msk.f32.gmra.mrb[22].mxu1 %vm371_vm1, %v10361_v48  ;;  %v10365_v48 = vld [vmem:[#allocation4 + $0x172] sm:$0xff] }
 0x2de   : > { %18801 = vmatprep.mubr.msk.f32.mxu0 %vm1694_vm4, %v23448_v28  ;;  %19648 = vmatprep.mubr.msk.f32.mxu1 %vm371_vm1, %v10362_v57  ;;  %v23468_v57 = vld [vmem:[#allocation3 + $0x181] sm:$0xff] }
 0x2e1   : > { %18802 = vmatmul.mubr.msk.f32.gmra.mrb[90].mxu0 %vm1694_vm4, %v23453_v9  ;;  %19649 = vmatmul.mubr.msk.f32.gmra.mrb[24].mxu1 %vm371_vm1, %v10363_v58  ;;  %v23473_v58 = vld [vmem:[#allocation3 + $0x189] sm:$0xff] }
 0x2e2   : > { %18804 = vmatprep.mubr.msk.f32.mxu0 %vm1694_vm4, %v23458_v8  ;;  %19651 = vmatprep.mubr.msk.f32.mxu1 %vm371_vm1, %v10364_v21  ;;  %v3868_v21 = vld [vmem:[#allocation3 + $0x1a] sm:$0xff] }
 0x2e5   : > { %18805 = vmatmul.mubr.msk.f32.gmra.mrb[92].mxu0 %vm1694_vm4, %v23463_v17  ;;  %19652 = vmatmul.mubr.msk.f32.gmra.mrb[26].mxu1 %vm371_vm1, %v10365_v48  ;;  %v3869_v48 = vld [vmem:[#allocation3 + $0x22] sm:$0xff] }
 0x2e6   : > { %18807 = vmatprep.mubr.msk.f32.mxu0 %vm1694_vm4, %v23468_v57  ;;  %19654 = vmatprep.mubr.msk.f32.mxu1 %vm371_vm1, %v10366_v59  ;;  %v23482_v59 = vld [vmem:[#allocation3 + $0x32] sm:$0xff] }
 0x2e9   : > { %18808 = vmatmul.mubr.msk.f32.gmra.mrb[94].mxu0 %vm1694_vm4, %v23473_v58  ;;  %19655 = vmatmul.mubr.msk.f32.gmra.mrb[28].mxu1 %vm371_vm1, %v10367_v46  ;;  %v10729_v46 = vld [vmem:[#allocation4 + $0x3b] sm:$0xff] }
 0x2ea   : > { %18812 = vmatprep.mubr.msk.f32.mxu0 %vm1694_vm4, %v3868_v21  ;;  %19657 = vmatprep.mubr.msk.f32.mxu1 %vm371_vm1, %v10368_v13  ;;  %v23494_v13 = vld [vmem:[#allocation3 + $0x3a] sm:$0xff]  ;;  %v23515_v21 = vld [vmem:[#allocation3 + $0x52] sm:$0xff] }
 0x2ed   : > { %18813 = vmatmul.mubr.msk.f32.vlgmr.msra.gmra.mrb[64].mxu0 %vm1694_vm4, %v3869_v48  ;;  %19658 = vmatmul.mubr.msk.f32.gmra.mrb[30].mxu1 %vm371_vm1, %v10369_v49  ;;  %v23499_v49 = vld [vmem:[%s25927_s5 + $0x3c] sm:$0xf]  ;;  %v10731_v48 = vld [vmem:[#allocation4 + $0x53] sm:$0xff] }
 0x2ee   : > { %18815 = vmatprep.mubr.msk.f32.mxu0 %vm1694_vm4, %v23482_v59  ;;  %19662 = vmatprep.mubr.msk.f32.mxu1 %vm371_vm1, %v10728_v52  ;;  %v23506_v52 = vld [vmem:[#allocation3 + $0x4a] sm:$0xff] }
 0x2ef   : > { %18861 = vmatpush3.msk.msra.mxu0 %vm2047_vm6, %v23323_v62  ;;  %v10730_v62 = vld [vmem:[#allocation4 + $0x4b] sm:$0xff] }
 0x2f0   : > { %18910 = vmatprep.subr.msk.mxu0 %vm2047_vm6, %v23487_v56 }
 0x2f1   : > { %18816 = vmatmul.mubr.msk.f32.gmra.mrb[66].mxu0 %vm1694_vm4, %v23494_v13  ;;  %19663 = vmatmul.mubr.msk.f32.vlgmr.msra.gmra.mrb[0].mxu1 %vm371_vm1, %v10729_v46  ;;  %v23520_v46 = vld [vmem:[#allocation3 + $0x62] sm:$0xff] }
 0x2f2   : > { %19711 = vmatpush3.msk.msra.mxu1 %vm468_vm0, %v23333_v15  ;;  %18818 = vmatprep.mubr.msk.f32.mxu0 %vm1694_vm4, %v23506_v52  ;;  %v10732_v15 = vld [vmem:[#allocation4 + $0x63] sm:$0xff] }
 0x2f3   : > { %19665 = vmatprep.mubr.msk.f32.mxu1 %vm371_vm1, %v10730_v62  ;;  %19760 = vmatprep.subr.msk.mxu1 %vm468_vm0, %v23499_v49  ;;  %v23525_v62 = vld [vmem:[#allocation3 + $0x6a] sm:$0xff] }
 0x2f5   : > { %18819 = vmatmul.mubr.msk.f32.gmra.mrb[68].mxu0 %vm1694_vm4, %v23515_v21  ;;  %19666 = vmatmul.mubr.msk.f32.gmra.mrb[2].mxu1 %vm371_vm1, %v10731_v48  ;;  %v23535_v48 = vld [vmem:[#allocation3 + $0x82] sm:$0xff] }
 0x2f6   : > { %18821 = vmatprep.mubr.msk.f32.mxu0 %vm1694_vm4, %v23520_v46  ;;  %19668 = vmatprep.mubr.msk.f32.mxu1 %vm371_vm1, %v10732_v15  ;;  %v23540_v15 = vld [vmem:[#allocation3 + $0x92] sm:$0xff] }
 0x2f9   : > { %18822 = vmatmul.mubr.msk.f32.gmra.mrb[70].mxu0 %vm1694_vm4, %v23525_v62  ;;  %19669 = vmatmul.mubr.msk.f32.gmra.mrb[4].mxu1 %vm371_vm1, %v10733_v22  ;;  %v23545_v22 = vld [vmem:[#allocation3 + $0x9a] sm:$0xff] }
 0x2fa   : > { %18824 = vmatprep.mubr.msk.f32.mxu0 %vm1694_vm4, %v23530_v5  ;;  %19671 = vmatprep.mubr.msk.f32.mxu1 %vm371_vm1, %v10734_v3  ;;  %v23550_v3 = vld [vmem:[#allocation3 + $0xaa] sm:$0xff] }
 0x2fd   : > { %18825 = vmatmul.mubr.msk.f32.gmra.mrb[72].mxu0 %vm1694_vm4, %v23535_v48  ;;  %19672 = vmatmul.mubr.msk.f32.gmra.mrb[6].mxu1 %vm371_vm1, %v10735_v37  ;;  %v23555_v37 = vld [vmem:[#allocation3 + $0xb2] sm:$0xff] }
 0x2fe   : > { %18827 = vmatprep.mubr.msk.f32.mxu0 %vm1694_vm4, %v23540_v15  ;;  %19674 = vmatprep.mubr.msk.f32.mxu1 %vm371_vm1, %v10736_v6  ;;  %v23560_v6 = vld [vmem:[#allocation3 + $0xc2] sm:$0xff] }
 0x301   : > { %18828 = vmatmul.mubr.msk.f32.gmra.mrb[74].mxu0 %vm1694_vm4, %v23545_v22  ;;  %19675 = vmatmul.mubr.msk.f32.gmra.mrb[8].mxu1 %vm371_vm1, %v10737_v30  ;;  %v23565_v30 = vld [vmem:[#allocation3 + $0xca] sm:$0xff] }
 0x302   : > { %18830 = vmatprep.mubr.msk.f32.mxu0 %vm1694_vm4, %v23550_v3  ;;  %19677 = vmatprep.mubr.msk.f32.mxu1 %vm371_vm1, %v10738_v31  ;;  %v23570_v31 = vld [vmem:[#allocation3 + $0xda] sm:$0xff] }
 0x305   : > { %18831 = vmatmul.mubr.msk.f32.gmra.mrb[76].mxu0 %vm1694_vm4, %v23555_v37  ;;  %19678 = vmatmul.mubr.msk.f32.gmra.mrb[10].mxu1 %vm371_vm1, %v10739_v55  ;;  %v23575_v55 = vld [vmem:[#allocation3 + $0xe2] sm:$0xff] }
 0x306   : > { %18833 = vmatprep.mubr.msk.f32.mxu0 %vm1694_vm4, %v23560_v6  ;;  %19680 = vmatprep.mubr.msk.f32.mxu1 %vm371_vm1, %v10740_v53  ;;  %v23580_v53 = vld [vmem:[#allocation3 + $0xf2] sm:$0xff] }
 0x309   : > { %18834 = vmatmul.mubr.msk.f32.gmra.mrb[78].mxu0 %vm1694_vm4, %v23565_v30  ;;  %19681 = vmatmul.mubr.msk.f32.gmra.mrb[12].mxu1 %vm371_vm1, %v10741_v39  ;;  %v23585_v39 = vld [vmem:[#allocation3 + $0xfa] sm:$0xff] }
 0x30a   : > { %18836 = vmatprep.mubr.msk.f32.mxu0 %vm1694_vm4, %v23570_v31  ;;  %19683 = vmatprep.mubr.msk.f32.mxu1 %vm371_vm1, %v10742_v38  ;;  %v23590_v38 = vld [vmem:[#allocation3 + $0x10a] sm:$0xff] }
 0x30d   : > { %18837 = vmatmul.mubr.msk.f32.gmra.mrb[80].mxu0 %vm1694_vm4, %v23575_v55  ;;  %19684 = vmatmul.mubr.msk.f32.gmra.mrb[14].mxu1 %vm371_vm1, %v10743_v12  ;;  %v23595_v12 = vld [vmem:[#allocation3 + $0x112] sm:$0xff] }
 0x30e   : > { %18839 = vmatprep.mubr.msk.f32.mxu0 %vm1694_vm4, %v23580_v53  ;;  %19686 = vmatprep.mubr.msk.f32.mxu1 %vm371_vm1, %v10744_v35  ;;  %v23600_v35 = vld [vmem:[#allocation3 + $0x122] sm:$0xff] }
 0x311   : > { %18840 = vmatmul.mubr.msk.f32.gmra.mrb[82].mxu0 %vm1694_vm4, %v23585_v39  ;;  %19687 = vmatmul.mubr.msk.f32.gmra.mrb[16].mxu1 %vm371_vm1, %v10745_v63  ;;  %v23605_v63 = vld [vmem:[#allocation3 + $0x12a] sm:$0xff] }
 0x312   : > { %18842 = vmatprep.mubr.msk.f32.mxu0 %vm1694_vm4, %v23590_v38  ;;  %19689 = vmatprep.mubr.msk.f32.mxu1 %vm371_vm1, %v10746_v4  ;;  %v23610_v4 = vld [vmem:[#allocation3 + $0x13a] sm:$0xff] }
 0x315   : > { %18843 = vmatmul.mubr.msk.f32.gmra.mrb[84].mxu0 %vm1694_vm4, %v23595_v12  ;;  %19690 = vmatmul.mubr.msk.f32.gmra.mrb[18].mxu1 %vm371_vm1, %v10747_v43  ;;  %v23615_v43 = vld [vmem:[#allocation3 + $0x142] sm:$0xff] }
 0x316   : > { %18845 = vmatprep.mubr.msk.f32.mxu0 %vm1694_vm4, %v23600_v35  ;;  %19692 = vmatprep.mubr.msk.f32.mxu1 %vm371_vm1, %v10748_v18  ;;  %v23620_v18 = vld [vmem:[#allocation3 + $0x152] sm:$0xff] }
 0x319   : > { %18846 = vmatmul.mubr.msk.f32.gmra.mrb[86].mxu0 %vm1694_vm4, %v23605_v63  ;;  %19693 = vmatmul.mubr.msk.f32.gmra.mrb[20].mxu1 %vm371_vm1, %v10749_v25  ;;  %v23625_v25 = vld [vmem:[#allocation3 + $0x15a] sm:$0xff] }
 0x31a   : > { %18848 = vmatprep.mubr.msk.f32.mxu0 %vm1694_vm4, %v23610_v4  ;;  %19695 = vmatprep.mubr.msk.f32.mxu1 %vm371_vm1, %v10750_v61  ;;  %v23630_v61 = vld [vmem:[#allocation3 + $0x16a] sm:$0xff] }
 0x31d   : > { %18849 = vmatmul.mubr.msk.f32.gmra.mrb[88].mxu0 %vm1694_vm4, %v23615_v43  ;;  %19696 = vmatmul.mubr.msk.f32.gmra.mrb[22].mxu1 %vm371_vm1, %v10751_v36  ;;  %v23635_v36 = vld [vmem:[#allocation3 + $0x172] sm:$0xff] }
 0x31e   : > { %18851 = vmatprep.mubr.msk.f32.mxu0 %vm1694_vm4, %v23620_v18  ;;  %19698 = vmatprep.mubr.msk.f32.mxu1 %vm371_vm1, %v10752_v40  ;;  %26052 = vst [vmem:[#allocation42_spill] sm:$0xff] %v23635_v36  ;;  %v23640_v40 = vld [vmem:[#allocation3 + $0x182] sm:$0xff] }
 0x31f   : > { %26053 = vst [vmem:[#allocation43_spill] sm:$0xff] %v23640_v40 }
 0x321   : > { %18852 = vmatmul.mubr.msk.f32.gmra.mrb[90].mxu0 %vm1694_vm4, %v23625_v25  ;;  %19699 = vmatmul.mubr.msk.f32.gmra.mrb[24].mxu1 %vm371_vm1, %v10753_v51  ;;  %v23645_v51 = vld [vmem:[#allocation3 + $0x18a] sm:$0xff] }
 0x322   : > { %18854 = vmatprep.mubr.msk.f32.mxu0 %vm1694_vm4, %v23630_v61  ;;  %19701 = vmatprep.mubr.msk.f32.mxu1 %vm371_vm1, %v10754_v10  ;;  %26054 = vst [vmem:[#allocation44_spill] sm:$0xff] %v23645_v51  ;;  %v4259_v10 = vld [vmem:[#allocation3 + $0x30] sm:$0xff] }
 0x325   : > { %18855 = vmatmul.mubr.msk.f32.gmra.mrb[92].mxu0 %vm1694_vm4, %v23635_v36  ;;  %19702 = vmatmul.mubr.msk.f32.gmra.mrb[26].mxu1 %vm371_vm1, %v10755_v1  ;;  %v4260_v1 = vld [vmem:[#allocation3 + $0x38] sm:$0xff] }
 0x326   : > { %18857 = vmatprep.mubr.msk.f32.mxu0 %vm1694_vm4, %v23640_v40  ;;  %19704 = vmatprep.mubr.msk.f32.mxu1 %vm371_vm1, %v10756_v45  ;;  %v10759_v36 = vld [vmem:[#allocation4 + $0x1a3] sm:$0xff]  ;;  %v4261_v45 = vld [vmem:[#allocation3 + $0x48] sm:$0xff] }
 0x327   : > { %v11118_v40 = vld [vmem:[#allocation4 + $0x34] sm:$0xff] }
 0x329   : > { %18858 = vmatmul.mubr.msk.f32.gmra.mrb[94].mxu0 %vm1694_vm4, %v23645_v51  ;;  %19705 = vmatmul.mubr.msk.f32.gmra.mrb[28].mxu1 %vm371_vm1, %v10757_v23  ;;  %v23657_v51 = vld [vmem:[%s25925_s3 + $0x40] sm:$0x3f] }
 0x32a   : > { %18862 = vmatprep.mubr.msk.f32.mxu0 %vm1694_vm4, %v4259_v10  ;;  %19707 = vmatprep.mubr.msk.f32.mxu1 %vm371_vm1, %v10758_v27  ;;  %v4262_v27 = vld [vmem:[#allocation3 + $0x50] sm:$0xff]  ;;  %v4263_v10 = vld [vmem:[#allocation3 + $0x60] sm:$0xff] }
 0x32b   : > { %v11119_v23 = vld [vmem:[#allocation4 + $0x3c] sm:$0xff] }
 0x32d   : > { %18863 = vmatmul.mubr.msk.f32.vlgmr.msra.gmra.mrb[64].mxu0 %vm1694_vm4, %v4260_v1  ;;  %19708 = vmatmul.mubr.msk.f32.gmra.mrb[30].mxu1 %vm371_vm1, %v10759_v36  ;;  %v23666_v36 = vld [vmem:[%s25927_s5 + $0x40] sm:$0xf]  ;;  %v11121_v1 = vld [vmem:[#allocation4 + $0x54] sm:$0xff] }
 0x32e   : > { %18865 = vmatprep.mubr.msk.f32.mxu0 %vm1694_vm4, %v4261_v45  ;;  %19712 = vmatprep.mubr.msk.f32.mxu1 %vm371_vm1, %v11118_v40  ;;  %v4264_v40 = vld [vmem:[#allocation3 + $0x68] sm:$0xff]  ;;  %v4265_v45 = vld [vmem:[#allocation3 + $0x78] sm:$0xff] }
 0x32f   : > { %18911 = vmatpush3.msk.msra.mxu0 %vm2047_vm6, %v23487_v56  ;;  %v11120_v56 = vld [vmem:[#allocation4 + $0x4c] sm:$0xff] }
 0x330   : > { %18960 = vmatprep.subr.msk.mxu0 %vm2047_vm6, %v23657_v51 }
 0x331   : > { %18866 = vmatmul.mubr.msk.f32.gmra.mrb[66].mxu0 %vm1694_vm4, %v4262_v27  ;;  %19713 = vmatmul.mubr.msk.f32.vlgmr.msra.gmra.mrb[0].mxu1 %vm371_vm1, %v11119_v23  ;;  %v11122_v27 = vld [vmem:[#allocation4 + $0x64] sm:$0xff]  ;;  %v11123_v23 = vld [vmem:[#allocation4 + $0x6c] sm:$0xff] }
 0x332   : > { %19761 = vmatpush3.msk.msra.mxu1 %vm468_vm0, %v23499_v49  ;;  %18868 = vmatprep.mubr.msk.f32.mxu0 %vm1694_vm4, %v4263_v10  ;;  %v4266_v49 = vld [vmem:[#allocation3 + $0x80] sm:$0xff]  ;;  %v4267_v10 = vld [vmem:[#allocation3 + $0x90] sm:$0xff] }
 0x333   : > { %19715 = vmatprep.mubr.msk.f32.mxu1 %vm371_vm1, %v11120_v56  ;;  %19810 = vmatprep.subr.msk.mxu1 %vm468_vm0, %v23666_v36  ;;  %v11124_v56 = vld [vmem:[#allocation4 + $0x7c] sm:$0xff] }
 0x335   : > { %18869 = vmatmul.mubr.msk.f32.gmra.mrb[68].mxu0 %vm1694_vm4, %v4264_v40  ;;  %19716 = vmatmul.mubr.msk.f32.gmra.mrb[2].mxu1 %vm371_vm1, %v11121_v1  ;;  %v4268_v40 = vld [vmem:[#allocation3 + $0x98] sm:$0xff] }
 0x336   : > { %18871 = vmatprep.mubr.msk.f32.mxu0 %vm1694_vm4, %v4265_v45  ;;  %19718 = vmatprep.mubr.msk.f32.mxu1 %vm371_vm1, %v11122_v27  ;;  %v11125_v1 = vld [vmem:[#allocation4 + $0x84] sm:$0xff]  ;;  %v4269_v45 = vld [vmem:[#allocation3 + $0xa8] sm:$0xff] }
 0x337   : > { %v11126_v27 = vld [vmem:[#allocation4 + $0x94] sm:$0xff] }
 0x339   : > { %18872 = vmatmul.mubr.msk.f32.gmra.mrb[70].mxu0 %vm1694_vm4, %v4266_v49  ;;  %19719 = vmatmul.mubr.msk.f32.gmra.mrb[4].mxu1 %vm371_vm1, %v11123_v23  ;;  %v4270_v49 = vld [vmem:[#allocation3 + $0xb0] sm:$0xff] }
 0x33a   : > { %18874 = vmatprep.mubr.msk.f32.mxu0 %vm1694_vm4, %v4267_v10  ;;  %19721 = vmatprep.mubr.msk.f32.mxu1 %vm371_vm1, %v11124_v56  ;;  %v11127_v23 = vld [vmem:[#allocation4 + $0x9c] sm:$0xff]  ;;  %v4271_v10 = vld [vmem:[#allocation3 + $0xc0] sm:$0xff] }
 0x33b   : > { %v11128_v56 = vld [vmem:[#allocation4 + $0xac] sm:$0xff] }
 0x33d   : > { %18875 = vmatmul.mubr.msk.f32.gmra.mrb[72].mxu0 %vm1694_vm4, %v4268_v40  ;;  %19722 = vmatmul.mubr.msk.f32.gmra.mrb[6].mxu1 %vm371_vm1, %v11125_v1  ;;  %v4272_v40 = vld [vmem:[#allocation3 + $0xc8] sm:$0xff] }
 0x33e   : > { %18877 = vmatprep.mubr.msk.f32.mxu0 %vm1694_vm4, %v4269_v45  ;;  %19724 = vmatprep.mubr.msk.f32.mxu1 %vm371_vm1, %v11126_v27  ;;  %v11129_v1 = vld [vmem:[#allocation4 + $0xb4] sm:$0xff]  ;;  %v4273_v45 = vld [vmem:[#allocation3 + $0xd8] sm:$0xff] }
 0x33f   : > { %v11130_v27 = vld [vmem:[#allocation4 + $0xc4] sm:$0xff] }
 0x341   : > { %18878 = vmatmul.mubr.msk.f32.gmra.mrb[74].mxu0 %vm1694_vm4, %v4270_v49  ;;  %19725 = vmatmul.mubr.msk.f32.gmra.mrb[8].mxu1 %vm371_vm1, %v11127_v23  ;;  %v4274_v49 = vld [vmem:[#allocation3 + $0xe0] sm:$0xff] }
 0x342   : > { %18880 = vmatprep.mubr.msk.f32.mxu0 %vm1694_vm4, %v4271_v10  ;;  %19727 = vmatprep.mubr.msk.f32.mxu1 %vm371_vm1, %v11128_v56  ;;  %v11131_v23 = vld [vmem:[#allocation4 + $0xcc] sm:$0xff]  ;;  %v4275_v10 = vld [vmem:[#allocation3 + $0xf0] sm:$0xff] }
 0x343   : > { %v11132_v56 = vld [vmem:[#allocation4 + $0xdc] sm:$0xff] }
 0x345   : > { %18881 = vmatmul.mubr.msk.f32.gmra.mrb[76].mxu0 %vm1694_vm4, %v4272_v40  ;;  %19728 = vmatmul.mubr.msk.f32.gmra.mrb[10].mxu1 %vm371_vm1, %v11129_v1  ;;  %v4276_v40 = vld [vmem:[#allocation3 + $0xf8] sm:$0xff] }
 0x346   : > { %18883 = vmatprep.mubr.msk.f32.mxu0 %vm1694_vm4, %v4273_v45  ;;  %19730 = vmatprep.mubr.msk.f32.mxu1 %vm371_vm1, %v11130_v27  ;;  %v11133_v1 = vld [vmem:[#allocation4 + $0xe4] sm:$0xff]  ;;  %v4277_v45 = vld [vmem:[#allocation3 + $0x108] sm:$0xff] }
 0x347   : > { %v11134_v27 = vld [vmem:[#allocation4 + $0xf4] sm:$0xff] }
 0x349   : > { %18884 = vmatmul.mubr.msk.f32.gmra.mrb[78].mxu0 %vm1694_vm4, %v4274_v49  ;;  %19731 = vmatmul.mubr.msk.f32.gmra.mrb[12].mxu1 %vm371_vm1, %v11131_v23  ;;  %v4278_v49 = vld [vmem:[#allocation3 + $0x110] sm:$0xff] }
 0x34a   : > { %18886 = vmatprep.mubr.msk.f32.mxu0 %vm1694_vm4, %v4275_v10  ;;  %19733 = vmatprep.mubr.msk.f32.mxu1 %vm371_vm1, %v11132_v56  ;;  %v11135_v23 = vld [vmem:[#allocation4 + $0xfc] sm:$0xff]  ;;  %v4279_v10 = vld [vmem:[#allocation3 + $0x120] sm:$0xff] }
 0x34b   : > { %v11136_v56 = vld [vmem:[#allocation4 + $0x10c] sm:$0xff] }
 0x34d   : > { %18887 = vmatmul.mubr.msk.f32.gmra.mrb[80].mxu0 %vm1694_vm4, %v4276_v40  ;;  %19734 = vmatmul.mubr.msk.f32.gmra.mrb[14].mxu1 %vm371_vm1, %v11133_v1  ;;  %v4280_v40 = vld [vmem:[#allocation3 + $0x128] sm:$0xff] }
 0x34e   : > { %18889 = vmatprep.mubr.msk.f32.mxu0 %vm1694_vm4, %v4277_v45  ;;  %19736 = vmatprep.mubr.msk.f32.mxu1 %vm371_vm1, %v11134_v27  ;;  %v11137_v1 = vld [vmem:[#allocation4 + $0x114] sm:$0xff]  ;;  %v4281_v45 = vld [vmem:[#allocation3 + $0x138] sm:$0xff] }
 0x34f   : > { %v11138_v27 = vld [vmem:[#allocation4 + $0x124] sm:$0xff] }
 0x351   : > { %18890 = vmatmul.mubr.msk.f32.gmra.mrb[82].mxu0 %vm1694_vm4, %v4278_v49  ;;  %19737 = vmatmul.mubr.msk.f32.gmra.mrb[16].mxu1 %vm371_vm1, %v11135_v23  ;;  %v4282_v49 = vld [vmem:[#allocation3 + $0x140] sm:$0xff] }
 0x352   : > { %18892 = vmatprep.mubr.msk.f32.mxu0 %vm1694_vm4, %v4279_v10  ;;  %19739 = vmatprep.mubr.msk.f32.mxu1 %vm371_vm1, %v11136_v56  ;;  %v11139_v23 = vld [vmem:[#allocation4 + $0x12c] sm:$0xff]  ;;  %v4283_v10 = vld [vmem:[#allocation3 + $0x150] sm:$0xff] }
 0x353   : > { %v11140_v56 = vld [vmem:[#allocation4 + $0x13c] sm:$0xff] }
 0x355   : > { %18893 = vmatmul.mubr.msk.f32.gmra.mrb[84].mxu0 %vm1694_vm4, %v4280_v40  ;;  %19740 = vmatmul.mubr.msk.f32.gmra.mrb[18].mxu1 %vm371_vm1, %v11137_v1  ;;  %v4284_v40 = vld [vmem:[#allocation3 + $0x158] sm:$0xff] }
 0x356   : > { %18895 = vmatprep.mubr.msk.f32.mxu0 %vm1694_vm4, %v4281_v45  ;;  %19742 = vmatprep.mubr.msk.f32.mxu1 %vm371_vm1, %v11138_v27  ;;  %v11141_v1 = vld [vmem:[#allocation4 + $0x144] sm:$0xff]  ;;  %v4285_v45 = vld [vmem:[#allocation3 + $0x168] sm:$0xff] }
 0x357   : > { %v11142_v27 = vld [vmem:[#allocation4 + $0x154] sm:$0xff] }
 0x359   : > { %18896 = vmatmul.mubr.msk.f32.gmra.mrb[86].mxu0 %vm1694_vm4, %v4282_v49  ;;  %19743 = vmatmul.mubr.msk.f32.gmra.mrb[20].mxu1 %vm371_vm1, %v11139_v23  ;;  %v4286_v49 = vld [vmem:[#allocation3 + $0x170] sm:$0xff] }
 0x35a   : > { %18898 = vmatprep.mubr.msk.f32.mxu0 %vm1694_vm4, %v4283_v10  ;;  %19745 = vmatprep.mubr.msk.f32.mxu1 %vm371_vm1, %v11140_v56  ;;  %v11143_v23 = vld [vmem:[#allocation4 + $0x15c] sm:$0xff]  ;;  %v11144_v10 = vld [vmem:[#allocation4 + $0x16c] sm:$0xff] }
 0x35b   : > { %v4289_v56 = vld [vmem:[#allocation3 + $0x198] sm:$0xff] }
 0x35d   : > { %18899 = vmatmul.mubr.msk.f32.gmra.mrb[88].mxu0 %vm1694_vm4, %v4284_v40  ;;  %19746 = vmatmul.mubr.msk.f32.gmra.mrb[22].mxu1 %vm371_vm1, %v11141_v1  ;;  %v11145_v40 = vld [vmem:[#allocation4 + $0x174] sm:$0xff]  ;;  %v11146_v1 = vld [vmem:[#allocation4 + $0x184] sm:$0xff] }
 0x35e   : > { %18901 = vmatprep.mubr.msk.f32.mxu0 %vm1694_vm4, %v4285_v45  ;;  %19748 = vmatprep.mubr.msk.f32.mxu1 %vm371_vm1, %v11142_v27  ;;  %v4290_v45 = vld [vmem:[#allocation3 + $0x1a0] sm:$0xff] }
 0x35f   : > { %v11147_v27 = vld [vmem:[#allocation4 + $0x18c] sm:$0xff] }
 0x361   : > { %18902 = vmatmul.mubr.msk.f32.gmra.mrb[90].mxu0 %vm1694_vm4, %v4286_v49  ;;  %19749 = vmatmul.mubr.msk.f32.gmra.mrb[24].mxu1 %vm371_vm1, %v11143_v23  ;;  %v11148_v49 = vld [vmem:[#allocation4 + $0x19c] sm:$0xff]  ;;  %v11149_v23 = vld [vmem:[#allocation4 + $0x1a4] sm:$0xff] }
 0x362   : > { %18904 = vmatprep.mubr.msk.f32.mxu0 %vm1694_vm4, %v23304_v2  ;;  %19751 = vmatprep.mubr.msk.f32.mxu1 %vm371_vm1, %v11144_v10  ;;  %v4649_v2 = vld [vmem:[#allocation3 + $0x31] sm:$0xff]  ;;  %v4651_v10 = vld [vmem:[#allocation3 + $0x49] sm:$0xff] }
 0x365   : > { %18905 = vmatmul.mubr.msk.f32.gmra.mrb[92].mxu0 %vm1694_vm4, %v23309_v20  ;;  %19752 = vmatmul.mubr.msk.f32.gmra.mrb[26].mxu1 %vm371_vm1, %v11145_v40  ;;  %v4650_v20 = vld [vmem:[#allocation3 + $0x39] sm:$0xff]  ;;  %v23743_v40 = vld [vmem:[%s25927_s5] sm:$0xf] }
 0x366   : > { %19754 = vmatprep.mubr.msk.f32.mxu1 %vm371_vm1, %v11146_v1  ;;  %18907 = vmatprep.mubr.msk.f32.mxu0 %vm1694_vm4, %v4289_v56  ;;  %v23738_v56 = vld [vmem:[#allocation4 + $0x48] sm:$0xff] }
 0x367   : > { %v4652_v1 = vld [vmem:[#allocation3 + $0x51] sm:$0xff] }
 0x369   : > { %18908 = vmatmul.mubr.msk.f32.gmra.mrb[94].mxu0 %vm1694_vm4, %v4290_v45  ;;  %19755 = vmatmul.mubr.msk.f32.gmra.mrb[28].mxu1 %vm371_vm1, %v11147_v27  ;;  %v23750_v45 = vld [vmem:[#allocation4 + $0x50] sm:$0xff]  ;;  %v23755_v27 = vld [vmem:[%s25927_s5 + $0x44] sm:$0xf] }
 0x36a   : > { %18912 = vmatprep.mubr.msk.f32.mxu0 %vm1694_vm4, %v4649_v2  ;;  %19757 = vmatprep.mubr.msk.f32.mxu1 %vm371_vm1, %v11148_v49  ;;  %v4653_v2 = vld [vmem:[#allocation3 + $0x61] sm:$0xff]  ;;  %v23771_v49 = vld [vmem:[#allocation4 + $0x68] sm:$0xff] }
 0x36d   : > { %18913 = vmatmul.mubr.msk.f32.vlgmr.msra.gmra.mrb[64].mxu0 %vm1694_vm4, %v4650_v20  ;;  %19758 = vmatmul.mubr.msk.f32.gmra.mrb[30].mxu1 %vm371_vm1, %v11149_v23  ;;  %v23777_v20 = vld [vmem:[#allocation4 + $0x78] sm:$0xff]  ;;  %v4679_v23 = vld [vmem:[#allocation3 + $0x199] sm:$0xff] }
 0x36e   : > { %18915 = vmatprep.mubr.msk.f32.mxu0 %vm1694_vm4, %v4651_v10  ;;  %19762 = vmatprep.mubr.msk.f32.mxu1 %vm371_vm1, %v23738_v56  ;;  %v11536_v10 = vld [vmem:[#allocation4 + $0x188] sm:$0xff] }
 0x36f   : > { %18961 = vmatpush3.msk.msra.mxu0 %vm2047_vm6, %v23657_v51  ;;  %v23765_v51 = vld [vmem:[#allocation4 + $0x60] sm:$0xff] }
 0x370   : > { %19010 = vmatprep.subr.msk.mxu0 %vm468_vm0, %v23743_v40 }
 0x371   : > { %18916 = vmatmul.mubr.msk.f32.gmra.mrb[66].mxu0 %vm1694_vm4, %v4652_v1  ;;  %19763 = vmatmul.mubr.msk.f32.vlgmr.msra.gmra.mrb[0].mxu1 %vm371_vm1, %v23750_v45  ;;  %v11539_v1 = vld [vmem:[#allocation4 + $0x1b0] sm:$0xff] }
 0x372   : > { %19811 = vmatpush3.msk.msra.mxu1 %vm468_vm0, %v23666_v36  ;;  %18918 = vmatprep.mubr.msk.f32.mxu0 %vm1694_vm4, %v4653_v2  ;;  %v23783_v36 = vld [vmem:[#allocation4 + $0x80] sm:$0xff] }
 0x373   : > { %19765 = vmatprep.mubr.msk.f32.mxu1 %vm371_vm1, %v23765_v51  ;;  %19860 = vmatprep.subr.msk.mxu1 %vm468_vm0, %v23755_v27  ;;  %v11538_v2 = vld [vmem:[#allocation4 + $0x1a0] sm:$0xff] }
 0x375   : > { %18919 = vmatmul.mubr.msk.f32.gmra.mrb[68].mxu0 %vm1694_vm4, %v23353_v42  ;;  %19766 = vmatmul.mubr.msk.f32.gmra.mrb[2].mxu1 %vm371_vm1, %v23771_v49  ;;  %v23789_v42 = vld [vmem:[#allocation4 + $0x90] sm:$0xff] }
 0x376   : > { %18921 = vmatprep.mubr.msk.f32.mxu0 %vm1694_vm4, %v23358_v11  ;;  %19768 = vmatprep.mubr.msk.f32.mxu1 %vm371_vm1, %v23777_v20  ;;  %v23795_v11 = vld [vmem:[#allocation4 + $0x98] sm:$0xff] }
 0x379   : > { %18922 = vmatmul.mubr.msk.f32.gmra.mrb[70].mxu0 %vm1694_vm4, %v23363_v54  ;;  %19769 = vmatmul.mubr.msk.f32.gmra.mrb[4].mxu1 %vm371_vm1, %v23783_v36  ;;  %v23801_v54 = vld [vmem:[#allocation4 + $0xa8] sm:$0xff] }
 0x37a   : > { %18924 = vmatprep.mubr.msk.f32.mxu0 %vm1694_vm4, %v23368_v0  ;;  %19771 = vmatprep.mubr.msk.f32.mxu1 %vm371_vm1, %v23789_v42  ;;  %v23807_v0 = vld [vmem:[#allocation4 + $0xb0] sm:$0xff] }
 0x37d   : > { %18925 = vmatmul.mubr.msk.f32.gmra.mrb[72].mxu0 %vm1694_vm4, %v23373_v33  ;;  %19772 = vmatmul.mubr.msk.f32.gmra.mrb[6].mxu1 %vm371_vm1, %v23795_v11  ;;  %v23813_v33 = vld [vmem:[#allocation4 + $0xc0] sm:$0xff] }
 0x37e   : > { %18927 = vmatprep.mubr.msk.f32.mxu0 %vm1694_vm4, %v23378_v7  ;;  %19774 = vmatprep.mubr.msk.f32.mxu1 %vm371_vm1, %v23801_v54  ;;  %v23819_v7 = vld [vmem:[#allocation4 + $0xc8] sm:$0xff] }
 0x381   : > { %18928 = vmatmul.mubr.msk.f32.gmra.mrb[74].mxu0 %vm1694_vm4, %v23383_v47  ;;  %19775 = vmatmul.mubr.msk.f32.gmra.mrb[8].mxu1 %vm371_vm1, %v23807_v0  ;;  %v23825_v47 = vld [vmem:[#allocation4 + $0xd8] sm:$0xff] }
 0x382   : > { %18930 = vmatprep.mubr.msk.f32.mxu0 %vm1694_vm4, %v23388_v26  ;;  %19777 = vmatprep.mubr.msk.f32.mxu1 %vm371_vm1, %v23813_v33  ;;  %v23831_v26 = vld [vmem:[#allocation4 + $0xe0] sm:$0xff] }
 0x385   : > { %18931 = vmatmul.mubr.msk.f32.gmra.mrb[76].mxu0 %vm1694_vm4, %v23393_v14  ;;  %19778 = vmatmul.mubr.msk.f32.gmra.mrb[10].mxu1 %vm371_vm1, %v23819_v7  ;;  %v23837_v14 = vld [vmem:[#allocation4 + $0xf0] sm:$0xff] }
 0x386   : > { %18933 = vmatprep.mubr.msk.f32.mxu0 %vm1694_vm4, %v23398_v29  ;;  %19780 = vmatprep.mubr.msk.f32.mxu1 %vm371_vm1, %v23825_v47  ;;  %v23843_v29 = vld [vmem:[#allocation4 + $0xf8] sm:$0xff] }
 0x389   : > { %18934 = vmatmul.mubr.msk.f32.gmra.mrb[78].mxu0 %vm1694_vm4, %v23403_v50  ;;  %19781 = vmatmul.mubr.msk.f32.gmra.mrb[12].mxu1 %vm371_vm1, %v23831_v26  ;;  %v23849_v50 = vld [vmem:[#allocation4 + $0x108] sm:$0xff] }
 0x38a   : > { %18936 = vmatprep.mubr.msk.f32.mxu0 %vm1694_vm4, %v23408_v32  ;;  %19783 = vmatprep.mubr.msk.f32.mxu1 %vm371_vm1, %v23837_v14  ;;  %v23855_v32 = vld [vmem:[#allocation4 + $0x110] sm:$0xff] }
 0x38d   : > { %18937 = vmatmul.mubr.msk.f32.gmra.mrb[80].mxu0 %vm1694_vm4, %v23413_v34  ;;  %19784 = vmatmul.mubr.msk.f32.gmra.mrb[14].mxu1 %vm371_vm1, %v23843_v29  ;;  %v23861_v34 = vld [vmem:[#allocation4 + $0x120] sm:$0xff] }
 0x38e   : > { %18939 = vmatprep.mubr.msk.f32.mxu0 %vm1694_vm4, %v23418_v60  ;;  %19786 = vmatprep.mubr.msk.f32.mxu1 %vm371_vm1, %v23849_v50  ;;  %v23867_v60 = vld [vmem:[#allocation4 + $0x128] sm:$0xff] }
 0x391   : > { %18940 = vmatmul.mubr.msk.f32.gmra.mrb[82].mxu0 %vm1694_vm4, %v23423_v16  ;;  %19787 = vmatmul.mubr.msk.f32.gmra.mrb[16].mxu1 %vm371_vm1, %v23855_v32  ;;  %v23873_v16 = vld [vmem:[#allocation4 + $0x138] sm:$0xff] }
 0x392   : > { %18942 = vmatprep.mubr.msk.f32.mxu0 %vm1694_vm4, %v23428_v44  ;;  %19789 = vmatprep.mubr.msk.f32.mxu1 %vm371_vm1, %v23861_v34  ;;  %v23879_v44 = vld [vmem:[#allocation4 + $0x140] sm:$0xff] }
 0x395   : > { %18943 = vmatmul.mubr.msk.f32.gmra.mrb[84].mxu0 %vm1694_vm4, %v23433_v19  ;;  %19790 = vmatmul.mubr.msk.f32.gmra.mrb[18].mxu1 %vm371_vm1, %v23867_v60  ;;  %v23885_v19 = vld [vmem:[#allocation4 + $0x150] sm:$0xff] }
 0x396   : > { %18945 = vmatprep.mubr.msk.f32.mxu0 %vm1694_vm4, %v23438_v41  ;;  %19792 = vmatprep.mubr.msk.f32.mxu1 %vm371_vm1, %v23873_v16  ;;  %v23891_v41 = vld [vmem:[#allocation4 + $0x158] sm:$0xff] }
 0x399   : > { %18946 = vmatmul.mubr.msk.f32.gmra.mrb[86].mxu0 %vm1694_vm4, %v23443_v24  ;;  %19793 = vmatmul.mubr.msk.f32.gmra.mrb[20].mxu1 %vm371_vm1, %v23879_v44  ;;  %v23897_v24 = vld [vmem:[#allocation4 + $0x168] sm:$0xff] }
 0x39a   : > { %18948 = vmatprep.mubr.msk.f32.mxu0 %vm1694_vm4, %v23448_v28  ;;  %19795 = vmatprep.mubr.msk.f32.mxu1 %vm371_vm1, %v23885_v19  ;;  %v23903_v28 = vld [vmem:[#allocation4 + $0x170] sm:$0xff] }
 0x39d   : > { %18949 = vmatmul.mubr.msk.f32.gmra.mrb[88].mxu0 %vm1694_vm4, %v23453_v9  ;;  %19796 = vmatmul.mubr.msk.f32.gmra.mrb[22].mxu1 %vm371_vm1, %v23891_v41  ;;  %v11535_v9 = vld [vmem:[#allocation4 + $0x180] sm:$0xff] }
 0x39e   : > { %18951 = vmatprep.mubr.msk.f32.mxu0 %vm1694_vm4, %v23458_v8  ;;  %19798 = vmatprep.mubr.msk.f32.mxu1 %vm371_vm1, %v23897_v24  ;;  %v11537_v8 = vld [vmem:[#allocation4 + $0x198] sm:$0xff] }
 0x3a1   : > { %18952 = vmatmul.mubr.msk.f32.gmra.mrb[90].mxu0 %vm1694_vm4, %v23463_v17  ;;  %19799 = vmatmul.mubr.msk.f32.gmra.mrb[24].mxu1 %vm371_vm1, %v23903_v28  ;;  %v4680_v17 = vld [vmem:[#allocation3 + $0x1a1] sm:$0xff] }
 0x3a2   : > { %18954 = vmatprep.mubr.msk.f32.mxu0 %vm1694_vm4, %v23468_v57  ;;  %19801 = vmatprep.mubr.msk.f32.mxu1 %vm371_vm1, %v11535_v9  ;;  %v11540_v57 = vld [vmem:[#allocation4 + $0x1b8] sm:$0xff]  ;;  %v23930_v9 = vld [vmem:[%s25927_s5 + $0x4] sm:$0xf] }
 0x3a5   : > { %18955 = vmatmul.mubr.msk.f32.gmra.mrb[92].mxu0 %vm1694_vm4, %v23473_v58  ;;  %19802 = vmatmul.mubr.msk.f32.gmra.mrb[26].mxu1 %vm371_vm1, %v11536_v10  ;;  %v23925_v58 = vld [vmem:[#allocation4 + $0x49] sm:$0xff] }
 0x3a6   : > { %19804 = vmatprep.mubr.msk.f32.mxu1 %vm371_vm1, %v11537_v8  ;;  %18957 = vmatprep.mubr.msk.f32.mxu0 %vm1694_vm4, %v4679_v23  ;;  %v26056_v23 = vld [vmem:[#allocation43_spill] sm:$0xff]  ;;  %v5069_v10 = vld [vmem:[#allocation3 + $0x19a] sm:$0xff] }
 0x3a7   : > { %v11926_v8 = vld [vmem:[#allocation4 + $0x189] sm:$0xff] }
 0x3a9   : > { %18958 = vmatmul.mubr.msk.f32.gmra.mrb[94].mxu0 %vm1694_vm4, %v4680_v17  ;;  %19805 = vmatmul.mubr.msk.f32.gmra.mrb[28].mxu1 %vm371_vm1, %v11538_v2  ;;  %v11927_v17 = vld [vmem:[#allocation4 + $0x199] sm:$0xff] }
 0x3aa   : > { %18962 = vmatprep.mubr.msk.f32.mxu0 %vm1694_vm4, %v23482_v59  ;;  %19807 = vmatprep.mubr.msk.f32.mxu1 %vm371_vm1, %v11539_v1  ;;  %v23938_v59 = vld [vmem:[#allocation4 + $0x51] sm:$0xff]  ;;  %v5658_v2 = vld [vmem:[#allocation4] sm:$0xff] }
 0x3ab   : > { %v5070_v1 = vld [vmem:[#allocation3 + $0x1a2] sm:$0xff] }
 0x3ad   : > { %18963 = vmatmul.mubr.msk.f32.vlgmr.msra.gmra.mrb[64].mxu0 %vm1694_vm4, %v23494_v13  ;;  %19808 = vmatmul.mubr.msk.f32.gmra.mrb[30].mxu1 %vm371_vm1, %v11540_v57  ;;  %v23943_v13 = vld [vmem:[%s25927_s5 + $0x48] sm:$0xf]  ;;  %v11929_v57 = vld [vmem:[#allocation4 + $0x1b1] sm:$0xff] }
 0x3ae   : > { %18965 = vmatprep.mubr.msk.f32.mxu0 %vm1694_vm4, %v23506_v52  ;;  %19812 = vmatprep.mubr.msk.f32.mxu1 %vm371_vm1, %v23925_v58  ;;  %v23955_v52 = vld [vmem:[#allocation4 + $0x61] sm:$0xff] }
 0x3af   : > { %19011 = vmatpush3.msk.msra.mxu0 %vm468_vm0, %v23743_v40  ;;  %v23961_v40 = vld [vmem:[#allocation4 + $0x69] sm:$0xff] }
 0x3b0   : > { %19060 = vmatprep.subr.msk.mxu0 %vm468_vm0, %v23930_v9 }
 0x3b1   : > { %18966 = vmatmul.mubr.msk.f32.gmra.mrb[66].mxu0 %vm1694_vm4, %v23515_v21  ;;  %19813 = vmatmul.mubr.msk.f32.vlgmr.msra.gmra.mrb[0].mxu1 %vm371_vm1, %v23938_v59  ;;  %v23967_v21 = vld [vmem:[#allocation4 + $0x79] sm:$0xff] }
 0x3b2   : > { %19861 = vmatpush3.msk.msra.mxu1 %vm468_vm0, %v23755_v27  ;;  %18968 = vmatprep.mubr.msk.f32.mxu0 %vm1694_vm4, %v23520_v46  ;;  %v23973_v46 = vld [vmem:[#allocation4 + $0x81] sm:$0xff]  ;;  %v26055_v27 = vld [vmem:[#allocation42_spill] sm:$0xff] }
 0x3b3   : > { %19815 = vmatprep.mubr.msk.f32.mxu1 %vm371_vm1, %v23955_v52  ;;  %19910 = vmatprep.subr.msk.mxu1 %vm468_vm0, %v23943_v13 }
 0x3b5   : > { %18969 = vmatmul.mubr.msk.f32.gmra.mrb[68].mxu0 %vm1694_vm4, %v23525_v62  ;;  %19816 = vmatmul.mubr.msk.f32.gmra.mrb[2].mxu1 %vm371_vm1, %v23961_v40  ;;  %v23979_v62 = vld [vmem:[#allocation4 + $0x91] sm:$0xff] }
 0x3b6   : > { %18971 = vmatprep.mubr.msk.f32.mxu0 %vm1694_vm4, %v23530_v5  ;;  %19818 = vmatprep.mubr.msk.f32.mxu1 %vm371_vm1, %v23967_v21  ;;  %v23985_v5 = vld [vmem:[#allocation4 + $0x99] sm:$0xff] }
 0x3b9   : > { %18972 = vmatmul.mubr.msk.f32.gmra.mrb[70].mxu0 %vm1694_vm4, %v23535_v48  ;;  %19819 = vmatmul.mubr.msk.f32.gmra.mrb[4].mxu1 %vm371_vm1, %v23973_v46  ;;  %v23991_v48 = vld [vmem:[#allocation4 + $0xa9] sm:$0xff] }
 0x3ba   : > { %18974 = vmatprep.mubr.msk.f32.mxu0 %vm1694_vm4, %v23540_v15  ;;  %19821 = vmatprep.mubr.msk.f32.mxu1 %vm371_vm1, %v23979_v62  ;;  %v23997_v15 = vld [vmem:[#allocation4 + $0xb1] sm:$0xff] }
 0x3bd   : > { %18975 = vmatmul.mubr.msk.f32.gmra.mrb[72].mxu0 %vm1694_vm4, %v23545_v22  ;;  %19822 = vmatmul.mubr.msk.f32.gmra.mrb[6].mxu1 %vm371_vm1, %v23985_v5  ;;  %v24003_v22 = vld [vmem:[#allocation4 + $0xc1] sm:$0xff] }
 0x3be   : > { %18977 = vmatprep.mubr.msk.f32.mxu0 %vm1694_vm4, %v23550_v3  ;;  %19824 = vmatprep.mubr.msk.f32.mxu1 %vm371_vm1, %v23991_v48  ;;  %v24009_v3 = vld [vmem:[#allocation4 + $0xc9] sm:$0xff] }
 0x3c1   : > { %18978 = vmatmul.mubr.msk.f32.gmra.mrb[74].mxu0 %vm1694_vm4, %v23555_v37  ;;  %19825 = vmatmul.mubr.msk.f32.gmra.mrb[8].mxu1 %vm371_vm1, %v23997_v15  ;;  %v24015_v37 = vld [vmem:[#allocation4 + $0xd9] sm:$0xff] }
 0x3c2   : > { %18980 = vmatprep.mubr.msk.f32.mxu0 %vm1694_vm4, %v23560_v6  ;;  %19827 = vmatprep.mubr.msk.f32.mxu1 %vm371_vm1, %v24003_v22  ;;  %v24021_v6 = vld [vmem:[#allocation4 + $0xe1] sm:$0xff] }
 0x3c5   : > { %18981 = vmatmul.mubr.msk.f32.gmra.mrb[76].mxu0 %vm1694_vm4, %v23565_v30  ;;  %19828 = vmatmul.mubr.msk.f32.gmra.mrb[10].mxu1 %vm371_vm1, %v24009_v3  ;;  %v24027_v30 = vld [vmem:[#allocation4 + $0xf1] sm:$0xff] }
 0x3c6   : > { %18983 = vmatprep.mubr.msk.f32.mxu0 %vm1694_vm4, %v23570_v31  ;;  %19830 = vmatprep.mubr.msk.f32.mxu1 %vm371_vm1, %v24015_v37  ;;  %v24033_v31 = vld [vmem:[#allocation4 + $0xf9] sm:$0xff] }
 0x3c9   : > { %18984 = vmatmul.mubr.msk.f32.gmra.mrb[78].mxu0 %vm1694_vm4, %v23575_v55  ;;  %19831 = vmatmul.mubr.msk.f32.gmra.mrb[12].mxu1 %vm371_vm1, %v24021_v6  ;;  %v24039_v55 = vld [vmem:[#allocation4 + $0x109] sm:$0xff] }
 0x3ca   : > { %18986 = vmatprep.mubr.msk.f32.mxu0 %vm1694_vm4, %v23580_v53  ;;  %19833 = vmatprep.mubr.msk.f32.mxu1 %vm371_vm1, %v24027_v30  ;;  %v24045_v53 = vld [vmem:[#allocation4 + $0x111] sm:$0xff] }
 0x3cd   : > { %18987 = vmatmul.mubr.msk.f32.gmra.mrb[80].mxu0 %vm1694_vm4, %v23585_v39  ;;  %19834 = vmatmul.mubr.msk.f32.gmra.mrb[14].mxu1 %vm371_vm1, %v24033_v31  ;;  %v24051_v39 = vld [vmem:[#allocation4 + $0x121] sm:$0xff] }
 0x3ce   : > { %18989 = vmatprep.mubr.msk.f32.mxu0 %vm1694_vm4, %v23590_v38  ;;  %19836 = vmatprep.mubr.msk.f32.mxu1 %vm371_vm1, %v24039_v55  ;;  %v24057_v38 = vld [vmem:[#allocation4 + $0x129] sm:$0xff] }
 0x3d1   : > { %18990 = vmatmul.mubr.msk.f32.gmra.mrb[82].mxu0 %vm1694_vm4, %v23595_v12  ;;  %19837 = vmatmul.mubr.msk.f32.gmra.mrb[16].mxu1 %vm371_vm1, %v24045_v53  ;;  %v24063_v12 = vld [vmem:[#allocation4 + $0x139] sm:$0xff] }
 0x3d2   : > { %18992 = vmatprep.mubr.msk.f32.mxu0 %vm1694_vm4, %v23600_v35  ;;  %19839 = vmatprep.mubr.msk.f32.mxu1 %vm371_vm1, %v24051_v39  ;;  %v24069_v35 = vld [vmem:[#allocation4 + $0x141] sm:$0xff] }
 0x3d5   : > { %18993 = vmatmul.mubr.msk.f32.gmra.mrb[84].mxu0 %vm1694_vm4, %v23605_v63  ;;  %19840 = vmatmul.mubr.msk.f32.gmra.mrb[18].mxu1 %vm371_vm1, %v24057_v38  ;;  %v24075_v63 = vld [vmem:[#allocation4 + $0x151] sm:$0xff] }
 0x3d6   : > { %18995 = vmatprep.mubr.msk.f32.mxu0 %vm1694_vm4, %v23610_v4  ;;  %19842 = vmatprep.mubr.msk.f32.mxu1 %vm371_vm1, %v24063_v12  ;;  %v24081_v4 = vld [vmem:[#allocation4 + $0x159] sm:$0xff] }
 0x3d9   : > { %18996 = vmatmul.mubr.msk.f32.gmra.mrb[86].mxu0 %vm1694_vm4, %v23615_v43  ;;  %19843 = vmatmul.mubr.msk.f32.gmra.mrb[20].mxu1 %vm371_vm1, %v24069_v35  ;;  %v24087_v43 = vld [vmem:[#allocation4 + $0x169] sm:$0xff] }
 0x3da   : > { %18998 = vmatprep.mubr.msk.f32.mxu0 %vm1694_vm4, %v23620_v18  ;;  %19845 = vmatprep.mubr.msk.f32.mxu1 %vm371_vm1, %v24075_v63  ;;  %v24093_v18 = vld [vmem:[#allocation4 + $0x171] sm:$0xff] }
 0x3dd   : > { %18999 = vmatmul.mubr.msk.f32.gmra.mrb[88].mxu0 %vm1694_vm4, %v23625_v25  ;;  %19846 = vmatmul.mubr.msk.f32.gmra.mrb[22].mxu1 %vm371_vm1, %v24081_v4  ;;  %v11925_v25 = vld [vmem:[#allocation4 + $0x181] sm:$0xff] }
 0x3de   : > { %19001 = vmatprep.mubr.msk.f32.mxu0 %vm1694_vm4, %v23630_v61  ;;  %19848 = vmatprep.mubr.msk.f32.mxu1 %vm371_vm1, %v24087_v43  ;;  %v26057_v61 = vld [vmem:[#allocation44_spill] sm:$0xff] }
 0x3e1   : > { %19002 = vmatmul.mubr.msk.f32.gmra.mrb[90].mxu0 %vm1694_vm4, %v26055_v27  ;;  %19849 = vmatmul.mubr.msk.f32.gmra.mrb[24].mxu1 %vm371_vm1, %v24093_v18  ;;  %v11928_v27 = vld [vmem:[#allocation4 + $0x1a1] sm:$0xff] }
 0x3e2   : > { %19004 = vmatprep.mubr.msk.f32.mxu0 %vm1694_vm4, %v26056_v23  ;;  %19851 = vmatprep.mubr.msk.f32.mxu1 %vm371_vm1, %v11925_v25  ;;  %v5659_v25 = vld [vmem:[#allocation4 + $0x8] sm:$0xff]  ;;  %v11930_v23 = vld [vmem:[#allocation4 + $0x1b9] sm:$0xff] }
 0x3e5   : > { %19005 = vmatmul.mubr.msk.f32.gmra.mrb[92].mxu0 %vm1694_vm4, %v26057_v61  ;;  %19852 = vmatmul.mubr.msk.f32.gmra.mrb[26].mxu1 %vm371_vm1, %v11926_v8  ;;  %v5660_v8 = vld [vmem:[#allocation4 + $0x18] sm:$0xff]  ;;  %v24118_v61 = vld [vmem:[%s25927_s5 + $0x8] sm:$0xf] }
 0x3e6   : > { %19854 = vmatprep.mubr.msk.f32.mxu1 %vm371_vm1, %v11927_v17  ;;  %19007 = vmatprep.mubr.msk.f32.mxu0 %vm1694_vm4, %v5069_v10  ;;  %v24113_v10 = vld [vmem:[#allocation4 + $0x4a] sm:$0xff]  ;;  %v5661_v17 = vld [vmem:[#allocation4 + $0x20] sm:$0xff] }
 0x3e9   : > { %19008 = vmatmul.mubr.msk.f32.gmra.mrb[94].mxu0 %vm1694_vm4, %v5070_v1  ;;  %19855 = vmatmul.mubr.msk.f32.gmra.mrb[28].mxu1 %vm371_vm1, %v11928_v27  ;;  %v24125_v1 = vld [vmem:[#allocation4 + $0x52] sm:$0xff] }
 0x3ea   : > { %19012 = vmatprep.mubr.msk.f32.mxu0 %vm371_vm1, %v5658_v2  ;;  %19857 = vmatprep.mubr.msk.f32.mxu1 %vm371_vm1, %v11929_v57  ;;  %v24130_v2 = vld [vmem:[%s25927_s5 + $0x4c] sm:$0xf]  ;;  %v5662_v57 = vld [vmem:[#allocation4 + $0x30] sm:$0xff]  ;;  %v5663_v27 = vld [vmem:[#allocation4 + $0x38] sm:$0xff] }
 0x3ed   : > { %19013 = vmatmul.mubr.msk.f32.vlgmr.msra.gmra.mrb[96].mxu0 %vm371_vm1, %v5659_v25  ;;  %19858 = vmatmul.mubr.msk.f32.gmra.mrb[30].mxu1 %vm371_vm1, %v11930_v23  ;;  %v24146_v25 = vld [vmem:[#allocation4 + $0x6a] sm:$0xff]  ;;  %v24151_v23 = vld [vmem:[#allocation4 + $0x7a] sm:$0xff] }
 0x3ee   : > { %19862 = vmatprep.mubr.msk.f32.mxu1 %vm371_vm1, %v24113_v10  ;;  %19015 = vmatprep.mubr.msk.f32.mxu0 %vm371_vm1, %v5660_v8  ;;  %v24163_v8 = vld [vmem:[#allocation4 + $0x92] sm:$0xff] }
 0x3ef   : > { %19061 = vmatpush3.msk.msra.mxu0 %vm468_vm0, %v23930_v9  ;;  %v24140_v9 = vld [vmem:[#allocation4 + $0x62] sm:$0xff] }
 0x3f0   : > { %19110 = vmatprep.subr.msk.mxu0 %vm468_vm0, %v24118_v61 }
 0x3f1   : > { %19016 = vmatmul.mubr.msk.f32.gmra.mrb[98].mxu0 %vm371_vm1, %v5661_v17  ;;  %19863 = vmatmul.mubr.msk.f32.vlgmr.msra.gmra.mrb[0].mxu1 %vm371_vm1, %v24125_v1  ;;  %v12316_v17 = vld [vmem:[#allocation4 + $0x18a] sm:$0xff] }
 0x3f2   : > { %19911 = vmatpush3.msk.msra.mxu1 %vm468_vm0, %v23943_v13  ;;  %19018 = vmatprep.mubr.msk.f32.mxu0 %vm371_vm1, %v5662_v57  ;;  %v24157_v13 = vld [vmem:[#allocation4 + $0x82] sm:$0xff]  ;;  %v12319_v57 = vld [vmem:[#allocation4 + $0x1b2] sm:$0xff] }
 0x3f3   : > { %19865 = vmatprep.mubr.msk.f32.mxu1 %vm371_vm1, %v24140_v9  ;;  %19960 = vmatprep.subr.msk.mxu1 %vm468_vm0, %v24130_v2 }
 0x3f5   : > { %19019 = vmatmul.mubr.msk.f32.gmra.mrb[100].mxu0 %vm371_vm1, %v5663_v27  ;;  %19866 = vmatmul.mubr.msk.f32.gmra.mrb[2].mxu1 %vm371_vm1, %v24146_v25  ;;  %v12318_v27 = vld [vmem:[#allocation4 + $0x1a2] sm:$0xff] }
 0x3f6   : > { %19021 = vmatprep.mubr.msk.f32.mxu0 %vm371_vm1, %v23738_v56  ;;  %19868 = vmatprep.mubr.msk.f32.mxu1 %vm371_vm1, %v24151_v23  ;;  %v24169_v56 = vld [vmem:[#allocation4 + $0x9a] sm:$0xff] }
 0x3f9   : > { %19022 = vmatmul.mubr.msk.f32.gmra.mrb[102].mxu0 %vm371_vm1, %v23750_v45  ;;  %19869 = vmatmul.mubr.msk.f32.gmra.mrb[4].mxu1 %vm371_vm1, %v24157_v13  ;;  %v24175_v45 = vld [vmem:[#allocation4 + $0xaa] sm:$0xff] }
 0x3fa   : > { %19024 = vmatprep.mubr.msk.f32.mxu0 %vm371_vm1, %v23765_v51  ;;  %19871 = vmatprep.mubr.msk.f32.mxu1 %vm371_vm1, %v24163_v8  ;;  %v24181_v51 = vld [vmem:[#allocation4 + $0xb2] sm:$0xff] }
 0x3fd   : > { %19025 = vmatmul.mubr.msk.f32.gmra.mrb[104].mxu0 %vm371_vm1, %v23771_v49  ;;  %19872 = vmatmul.mubr.msk.f32.gmra.mrb[6].mxu1 %vm371_vm1, %v24169_v56  ;;  %v24187_v49 = vld [vmem:[#allocation4 + $0xc2] sm:$0xff] }
 0x3fe   : > { %19027 = vmatprep.mubr.msk.f32.mxu0 %vm371_vm1, %v23777_v20  ;;  %19874 = vmatprep.mubr.msk.f32.mxu1 %vm371_vm1, %v24175_v45  ;;  %v24193_v20 = vld [vmem:[#allocation4 + $0xca] sm:$0xff] }
 0x401   : > { %19028 = vmatmul.mubr.msk.f32.gmra.mrb[106].mxu0 %vm371_vm1, %v23783_v36  ;;  %19875 = vmatmul.mubr.msk.f32.gmra.mrb[8].mxu1 %vm371_vm1, %v24181_v51  ;;  %v24199_v36 = vld [vmem:[#allocation4 + $0xda] sm:$0xff] }
 0x402   : > { %19030 = vmatprep.mubr.msk.f32.mxu0 %vm371_vm1, %v23789_v42  ;;  %19877 = vmatprep.mubr.msk.f32.mxu1 %vm371_vm1, %v24187_v49  ;;  %v24205_v42 = vld [vmem:[#allocation4 + $0xe2] sm:$0xff] }
 0x405   : > { %19031 = vmatmul.mubr.msk.f32.gmra.mrb[108].mxu0 %vm371_vm1, %v23795_v11  ;;  %19878 = vmatmul.mubr.msk.f32.gmra.mrb[10].mxu1 %vm371_vm1, %v24193_v20  ;;  %v24211_v11 = vld [vmem:[#allocation4 + $0xf2] sm:$0xff] }
 0x406   : > { %19033 = vmatprep.mubr.msk.f32.mxu0 %vm371_vm1, %v23801_v54  ;;  %19880 = vmatprep.mubr.msk.f32.mxu1 %vm371_vm1, %v24199_v36  ;;  %v24217_v54 = vld [vmem:[#allocation4 + $0xfa] sm:$0xff] }
 0x409   : > { %19034 = vmatmul.mubr.msk.f32.gmra.mrb[110].mxu0 %vm371_vm1, %v23807_v0  ;;  %19881 = vmatmul.mubr.msk.f32.gmra.mrb[12].mxu1 %vm371_vm1, %v24205_v42  ;;  %v24223_v0 = vld [vmem:[#allocation4 + $0x10a] sm:$0xff] }
 0x40a   : > { %19036 = vmatprep.mubr.msk.f32.mxu0 %vm371_vm1, %v23813_v33  ;;  %19883 = vmatprep.mubr.msk.f32.mxu1 %vm371_vm1, %v24211_v11  ;;  %v24229_v33 = vld [vmem:[#allocation4 + $0x112] sm:$0xff] }
 0x40d   : > { %19037 = vmatmul.mubr.msk.f32.gmra.mrb[112].mxu0 %vm371_vm1, %v23819_v7  ;;  %19884 = vmatmul.mubr.msk.f32.gmra.mrb[14].mxu1 %vm371_vm1, %v24217_v54  ;;  %v24235_v7 = vld [vmem:[#allocation4 + $0x122] sm:$0xff] }
 0x40e   : > { %19039 = vmatprep.mubr.msk.f32.mxu0 %vm371_vm1, %v23825_v47  ;;  %19886 = vmatprep.mubr.msk.f32.mxu1 %vm371_vm1, %v24223_v0  ;;  %v24241_v47 = vld [vmem:[#allocation4 + $0x12a] sm:$0xff] }
 0x411   : > { %19040 = vmatmul.mubr.msk.f32.gmra.mrb[114].mxu0 %vm371_vm1, %v23831_v26  ;;  %19887 = vmatmul.mubr.msk.f32.gmra.mrb[16].mxu1 %vm371_vm1, %v24229_v33  ;;  %v24247_v26 = vld [vmem:[#allocation4 + $0x13a] sm:$0xff] }
 0x412   : > { %19042 = vmatprep.mubr.msk.f32.mxu0 %vm371_vm1, %v23837_v14  ;;  %19889 = vmatprep.mubr.msk.f32.mxu1 %vm371_vm1, %v24235_v7  ;;  %v24253_v14 = vld [vmem:[#allocation4 + $0x142] sm:$0xff] }
 0x415   : > { %19043 = vmatmul.mubr.msk.f32.gmra.mrb[116].mxu0 %vm371_vm1, %v23843_v29  ;;  %19890 = vmatmul.mubr.msk.f32.gmra.mrb[18].mxu1 %vm371_vm1, %v24241_v47  ;;  %v24259_v29 = vld [vmem:[#allocation4 + $0x152] sm:$0xff] }
 0x416   : > { %19045 = vmatprep.mubr.msk.f32.mxu0 %vm371_vm1, %v23849_v50  ;;  %19892 = vmatprep.mubr.msk.f32.mxu1 %vm371_vm1, %v24247_v26  ;;  %v24265_v50 = vld [vmem:[#allocation4 + $0x15a] sm:$0xff] }
 0x419   : > { %19046 = vmatmul.mubr.msk.f32.gmra.mrb[118].mxu0 %vm371_vm1, %v23855_v32  ;;  %19893 = vmatmul.mubr.msk.f32.gmra.mrb[20].mxu1 %vm371_vm1, %v24253_v14  ;;  %v24271_v32 = vld [vmem:[#allocation4 + $0x16a] sm:$0xff] }
 0x41a   : > { %19048 = vmatprep.mubr.msk.f32.mxu0 %vm371_vm1, %v23861_v34  ;;  %19895 = vmatprep.mubr.msk.f32.mxu1 %vm371_vm1, %v24259_v29  ;;  %v24277_v34 = vld [vmem:[#allocation4 + $0x172] sm:$0xff] }
 0x41d   : > { %19049 = vmatmul.mubr.msk.f32.gmra.mrb[120].mxu0 %vm371_vm1, %v23867_v60  ;;  %19896 = vmatmul.mubr.msk.f32.gmra.mrb[22].mxu1 %vm371_vm1, %v24265_v50  ;;  %v12315_v60 = vld [vmem:[#allocation4 + $0x182] sm:$0xff] }
 0x41e   : > { %19051 = vmatprep.mubr.msk.f32.mxu0 %vm371_vm1, %v23873_v16  ;;  %19898 = vmatprep.mubr.msk.f32.mxu1 %vm371_vm1, %v24271_v32  ;;  %v12317_v16 = vld [vmem:[#allocation4 + $0x19a] sm:$0xff] }
 0x421   : > { %19052 = vmatmul.mubr.msk.f32.gmra.mrb[122].mxu0 %vm371_vm1, %v23879_v44  ;;  %19899 = vmatmul.mubr.msk.f32.gmra.mrb[24].mxu1 %vm371_vm1, %v24277_v34  ;;  %v6047_v44 = vld [vmem:[#allocation4 + $0x1] sm:$0xff] }
 0x422   : > { %19054 = vmatprep.mubr.msk.f32.mxu0 %vm371_vm1, %v23885_v19  ;;  %19901 = vmatprep.mubr.msk.f32.mxu1 %vm371_vm1, %v12315_v60  ;;  %v6048_v19 = vld [vmem:[#allocation4 + $0x9] sm:$0xff]  ;;  %v6049_v60 = vld [vmem:[#allocation4 + $0x19] sm:$0xff] }
 0x425   : > { %19055 = vmatmul.mubr.msk.f32.gmra.mrb[124].mxu0 %vm371_vm1, %v23891_v41  ;;  %19902 = vmatmul.mubr.msk.f32.gmra.mrb[26].mxu1 %vm371_vm1, %v12316_v17  ;;  %v12320_v41 = vld [vmem:[#allocation4 + $0x1ba] sm:$0xff]  ;;  %v24304_v17 = vld [vmem:[%s25927_s5 + $0xc] sm:$0xf] }
 0x426   : > { %19057 = vmatprep.mubr.msk.f32.mxu0 %vm371_vm1, %v23897_v24  ;;  %19904 = vmatprep.mubr.msk.f32.mxu1 %vm371_vm1, %v12317_v16  ;;  %v24299_v24 = vld [vmem:[#allocation4 + $0x4b] sm:$0xff]  ;;  %v24311_v16 = vld [vmem:[#allocation4 + $0x53] sm:$0xff] }
 0x429   : > { %19058 = vmatmul.mubr.msk.f32.gmra.mrb[126].mxu0 %vm371_vm1, %v23903_v28  ;;  %19905 = vmatmul.mubr.msk.f32.gmra.mrb[28].mxu1 %vm371_vm1, %v12318_v27  ;;  %v6050_v28 = vld [vmem:[#allocation4 + $0x21] sm:$0xff]  ;;  %v6052_v27 = vld [vmem:[#allocation4 + $0x39] sm:$0xff] }
 0x42a   : > { %19062 = vmatprep.mubr.msk.f32.mxu0 %vm371_vm1, %v6047_v44  ;;  %19907 = vmatprep.mubr.msk.f32.mxu1 %vm371_vm1, %v12319_v57  ;;  %v24316_v44 = vld [vmem:[%s25927_s5 + $0x50] sm:$0xf] }
 0x42b   : > { %v6051_v57 = vld [vmem:[#allocation4 + $0x31] sm:$0xff] }
 0x42d   : > { %19063 = vmatmul.mubr.msk.f32.vlgmr.msra.gmra.mrb[96].mxu0 %vm371_vm1, %v6048_v19  ;;  %19908 = vmatmul.mubr.msk.f32.gmra.mrb[30].mxu1 %vm371_vm1, %v12320_v41  ;;  %v24332_v19 = vld [vmem:[#allocation4 + $0x6b] sm:$0xff]  ;;  %v24337_v41 = vld [vmem:[#allocation4 + $0x7b] sm:$0xff] }
 0x42e   : > { %19912 = vmatprep.mubr.msk.f32.mxu1 %vm371_vm1, %v24299_v24  ;;  %19065 = vmatprep.mubr.msk.f32.mxu0 %vm371_vm1, %v6049_v60  ;;  %v24349_v60 = vld [vmem:[#allocation4 + $0x93] sm:$0xff] }
 0x42f   : > { %19111 = vmatpush3.msk.msra.mxu0 %vm468_vm0, %v24118_v61  ;;  %v24326_v61 = vld [vmem:[#allocation4 + $0x63] sm:$0xff] }
 0x430   : > { %19160 = vmatprep.subr.msk.mxu0 %vm468_vm0, %v24304_v17 }
 0x431   : > { %19066 = vmatmul.mubr.msk.f32.gmra.mrb[98].mxu0 %vm371_vm1, %v6050_v28  ;;  %19913 = vmatmul.mubr.msk.f32.vlgmr.msra.gmra.mrb[0].mxu1 %vm371_vm1, %v24311_v16  ;;  %v12706_v28 = vld [vmem:[#allocation4 + $0x18b] sm:$0xff] }
 0x432   : > { %19961 = vmatpush3.msk.msra.mxu1 %vm468_vm0, %v24130_v2  ;;  %19068 = vmatprep.mubr.msk.f32.mxu0 %vm371_vm1, %v6051_v57  ;;  %v24343_v2 = vld [vmem:[#allocation4 + $0x83] sm:$0xff]  ;;  %v12709_v57 = vld [vmem:[#allocation4 + $0x1b3] sm:$0xff] }
 0x433   : > { %19915 = vmatprep.mubr.msk.f32.mxu1 %vm371_vm1, %v24326_v61  ;;  %20010 = vmatprep.subr.msk.mxu1 %vm468_vm0, %v24316_v44 }
 0x435   : > { %19069 = vmatmul.mubr.msk.f32.gmra.mrb[100].mxu0 %vm371_vm1, %v6052_v27  ;;  %19916 = vmatmul.mubr.msk.f32.gmra.mrb[2].mxu1 %vm371_vm1, %v24332_v19  ;;  %v12708_v27 = vld [vmem:[#allocation4 + $0x1a3] sm:$0xff] }
 0x436   : > { %19071 = vmatprep.mubr.msk.f32.mxu0 %vm371_vm1, %v23925_v58  ;;  %19918 = vmatprep.mubr.msk.f32.mxu1 %vm371_vm1, %v24337_v41  ;;  %v24355_v58 = vld [vmem:[#allocation4 + $0x9b] sm:$0xff] }
 0x439   : > { %19072 = vmatmul.mubr.msk.f32.gmra.mrb[102].mxu0 %vm371_vm1, %v23938_v59  ;;  %19919 = vmatmul.mubr.msk.f32.gmra.mrb[4].mxu1 %vm371_vm1, %v24343_v2  ;;  %v24361_v59 = vld [vmem:[#allocation4 + $0xab] sm:$0xff] }
 0x43a   : > { %19074 = vmatprep.mubr.msk.f32.mxu0 %vm371_vm1, %v23955_v52  ;;  %19921 = vmatprep.mubr.msk.f32.mxu1 %vm371_vm1, %v24349_v60  ;;  %v24367_v52 = vld [vmem:[#allocation4 + $0xb3] sm:$0xff] }
 0x43d   : > { %19075 = vmatmul.mubr.msk.f32.gmra.mrb[104].mxu0 %vm371_vm1, %v23961_v40  ;;  %19922 = vmatmul.mubr.msk.f32.gmra.mrb[6].mxu1 %vm371_vm1, %v24355_v58  ;;  %v24373_v40 = vld [vmem:[#allocation4 + $0xc3] sm:$0xff] }
 0x43e   : > { %19077 = vmatprep.mubr.msk.f32.mxu0 %vm371_vm1, %v23967_v21  ;;  %19924 = vmatprep.mubr.msk.f32.mxu1 %vm371_vm1, %v24361_v59  ;;  %v24379_v21 = vld [vmem:[#allocation4 + $0xcb] sm:$0xff] }
 0x441   : > { %19078 = vmatmul.mubr.msk.f32.gmra.mrb[106].mxu0 %vm371_vm1, %v23973_v46  ;;  %19925 = vmatmul.mubr.msk.f32.gmra.mrb[8].mxu1 %vm371_vm1, %v24367_v52  ;;  %v24385_v46 = vld [vmem:[#allocation4 + $0xdb] sm:$0xff] }
 0x442   : > { %19080 = vmatprep.mubr.msk.f32.mxu0 %vm371_vm1, %v23979_v62  ;;  %19927 = vmatprep.mubr.msk.f32.mxu1 %vm371_vm1, %v24373_v40  ;;  %v24391_v62 = vld [vmem:[#allocation4 + $0xe3] sm:$0xff] }
 0x445   : > { %19081 = vmatmul.mubr.msk.f32.gmra.mrb[108].mxu0 %vm371_vm1, %v23985_v5  ;;  %19928 = vmatmul.mubr.msk.f32.gmra.mrb[10].mxu1 %vm371_vm1, %v24379_v21  ;;  %v24397_v5 = vld [vmem:[#allocation4 + $0xf3] sm:$0xff] }
 0x446   : > { %19083 = vmatprep.mubr.msk.f32.mxu0 %vm371_vm1, %v23991_v48  ;;  %19930 = vmatprep.mubr.msk.f32.mxu1 %vm371_vm1, %v24385_v46  ;;  %v24403_v48 = vld [vmem:[#allocation4 + $0xfb] sm:$0xff] }
 0x449   : > { %19084 = vmatmul.mubr.msk.f32.gmra.mrb[110].mxu0 %vm371_vm1, %v23997_v15  ;;  %19931 = vmatmul.mubr.msk.f32.gmra.mrb[12].mxu1 %vm371_vm1, %v24391_v62  ;;  %v24409_v15 = vld [vmem:[#allocation4 + $0x10b] sm:$0xff] }
 0x44a   : > { %19086 = vmatprep.mubr.msk.f32.mxu0 %vm371_vm1, %v24003_v22  ;;  %19933 = vmatprep.mubr.msk.f32.mxu1 %vm371_vm1, %v24397_v5  ;;  %v24415_v22 = vld [vmem:[#allocation4 + $0x113] sm:$0xff] }
 0x44d   : > { %19087 = vmatmul.mubr.msk.f32.gmra.mrb[112].mxu0 %vm371_vm1, %v24009_v3  ;;  %19934 = vmatmul.mubr.msk.f32.gmra.mrb[14].mxu1 %vm371_vm1, %v24403_v48  ;;  %v24421_v3 = vld [vmem:[#allocation4 + $0x123] sm:$0xff] }
 0x44e   : > { %19089 = vmatprep.mubr.msk.f32.mxu0 %vm371_vm1, %v24015_v37  ;;  %19936 = vmatprep.mubr.msk.f32.mxu1 %vm371_vm1, %v24409_v15  ;;  %v24427_v37 = vld [vmem:[#allocation4 + $0x12b] sm:$0xff] }
 0x451   : > { %19090 = vmatmul.mubr.msk.f32.gmra.mrb[114].mxu0 %vm371_vm1, %v24021_v6  ;;  %19937 = vmatmul.mubr.msk.f32.gmra.mrb[16].mxu1 %vm371_vm1, %v24415_v22  ;;  %v24433_v6 = vld [vmem:[#allocation4 + $0x13b] sm:$0xff] }
 0x452   : > { %19092 = vmatprep.mubr.msk.f32.mxu0 %vm371_vm1, %v24027_v30  ;;  %19939 = vmatprep.mubr.msk.f32.mxu1 %vm371_vm1, %v24421_v3  ;;  %v24439_v30 = vld [vmem:[#allocation4 + $0x143] sm:$0xff] }
 0x455   : > { %19093 = vmatmul.mubr.msk.f32.gmra.mrb[116].mxu0 %vm371_vm1, %v24033_v31  ;;  %19940 = vmatmul.mubr.msk.f32.gmra.mrb[18].mxu1 %vm371_vm1, %v24427_v37  ;;  %v24445_v31 = vld [vmem:[#allocation4 + $0x153] sm:$0xff] }
 0x456   : > { %19095 = vmatprep.mubr.msk.f32.mxu0 %vm371_vm1, %v24039_v55  ;;  %19942 = vmatprep.mubr.msk.f32.mxu1 %vm371_vm1, %v24433_v6  ;;  %v24451_v55 = vld [vmem:[#allocation4 + $0x15b] sm:$0xff] }
 0x459   : > { %19096 = vmatmul.mubr.msk.f32.gmra.mrb[118].mxu0 %vm371_vm1, %v24045_v53  ;;  %19943 = vmatmul.mubr.msk.f32.gmra.mrb[20].mxu1 %vm371_vm1, %v24439_v30  ;;  %v24457_v53 = vld [vmem:[#allocation4 + $0x16b] sm:$0xff] }
 0x45a   : > { %19098 = vmatprep.mubr.msk.f32.mxu0 %vm371_vm1, %v24051_v39  ;;  %19945 = vmatprep.mubr.msk.f32.mxu1 %vm371_vm1, %v24445_v31  ;;  %v24463_v39 = vld [vmem:[#allocation4 + $0x173] sm:$0xff] }
 0x45d   : > { %19099 = vmatmul.mubr.msk.f32.gmra.mrb[120].mxu0 %vm371_vm1, %v24057_v38  ;;  %19946 = vmatmul.mubr.msk.f32.gmra.mrb[22].mxu1 %vm371_vm1, %v24451_v55  ;;  %v12705_v38 = vld [vmem:[#allocation4 + $0x183] sm:$0xff] }
 0x45e   : > { %19101 = vmatprep.mubr.msk.f32.mxu0 %vm371_vm1, %v24063_v12  ;;  %19948 = vmatprep.mubr.msk.f32.mxu1 %vm371_vm1, %v24457_v53  ;;  %v12707_v12 = vld [vmem:[#allocation4 + $0x19b] sm:$0xff] }
 0x461   : > { %19102 = vmatmul.mubr.msk.f32.gmra.mrb[122].mxu0 %vm371_vm1, %v24069_v35  ;;  %19949 = vmatmul.mubr.msk.f32.gmra.mrb[24].mxu1 %vm371_vm1, %v24463_v39  ;;  %v6437_v35 = vld [vmem:[#allocation4 + $0x2] sm:$0xff] }
 0x462   : > { %19104 = vmatprep.mubr.msk.f32.mxu0 %vm371_vm1, %v24075_v63  ;;  %19951 = vmatprep.mubr.msk.f32.mxu1 %vm371_vm1, %v12705_v38  ;;  %v6438_v63 = vld [vmem:[#allocation4 + $0xa] sm:$0xff]  ;;  %v6439_v38 = vld [vmem:[#allocation4 + $0x1a] sm:$0xff] }
 0x465   : > { %19105 = vmatmul.mubr.msk.f32.gmra.mrb[124].mxu0 %vm371_vm1, %v24081_v4  ;;  %19952 = vmatmul.mubr.msk.f32.gmra.mrb[26].mxu1 %vm371_vm1, %v12706_v28  ;;  %v12710_v4 = vld [vmem:[#allocation4 + $0x1bb] sm:$0xff]  ;;  %v24490_v28 = vld [vmem:[%s25927_s5 + $0x10] sm:$0xf] }
 0x466   : > { %19107 = vmatprep.mubr.msk.f32.mxu0 %vm371_vm1, %v24087_v43  ;;  %19954 = vmatprep.mubr.msk.f32.mxu1 %vm371_vm1, %v12707_v12  ;;  %v24485_v43 = vld [vmem:[#allocation4 + $0x4c] sm:$0xff]  ;;  %v24497_v12 = vld [vmem:[#allocation4 + $0x54] sm:$0xff] }
 0x469   : > { %19108 = vmatmul.mubr.msk.f32.gmra.mrb[126].mxu0 %vm371_vm1, %v24093_v18  ;;  %19955 = vmatmul.mubr.msk.f32.gmra.mrb[28].mxu1 %vm371_vm1, %v12708_v27  ;;  %v6440_v18 = vld [vmem:[#allocation4 + $0x22] sm:$0xff]  ;;  %v6442_v27 = vld [vmem:[#allocation4 + $0x3a] sm:$0xff] }
 0x46a   : > { %19112 = vmatprep.mubr.msk.f32.mxu0 %vm371_vm1, %v6437_v35  ;;  %19957 = vmatprep.mubr.msk.f32.mxu1 %vm371_vm1, %v12709_v57  ;;  %v24502_v35 = vld [vmem:[%s25927_s5 + $0x54] sm:$0xf] }
 0x46b   : > { %v6441_v57 = vld [vmem:[#allocation4 + $0x32] sm:$0xff] }
 0x46d   : > { %19113 = vmatmul.mubr.msk.f32.vlgmr.msra.gmra.mrb[96].mxu0 %vm371_vm1, %v6438_v63  ;;  %19958 = vmatmul.mubr.msk.f32.gmra.mrb[30].mxu1 %vm371_vm1, %v12710_v4  ;;  %v24518_v63 = vld [vmem:[#allocation4 + $0x6c] sm:$0xff]  ;;  %v24523_v4 = vld [vmem:[#allocation4 + $0x7c] sm:$0xff] }
 0x46e   : > { %19962 = vmatprep.mubr.msk.f32.mxu1 %vm371_vm1, %v24485_v43  ;;  %19115 = vmatprep.mubr.msk.f32.mxu0 %vm371_vm1, %v6439_v38  ;;  %v24535_v38 = vld [vmem:[#allocation4 + $0x94] sm:$0xff] }
 0x46f   : > { %19161 = vmatpush3.msk.msra.mxu0 %vm468_vm0, %v24304_v17  ;;  %v24512_v17 = vld [vmem:[#allocation4 + $0x64] sm:$0xff]  ;;  %26059 = vst [vmem:[#allocation43_spill] sm:$0xff] %v24535_v38 }
 0x470   : > { %19210 = vmatprep.subr.msk.mxu0 %vm468_vm0, %v24490_v28 }
 0x471   : > { %19116 = vmatmul.mubr.msk.f32.gmra.mrb[98].mxu0 %vm371_vm1, %v6440_v18  ;;  %19963 = vmatmul.mubr.msk.f32.vlgmr.msra.gmra.mrb[0].mxu1 %vm371_vm1, %v24497_v12 }
 0x472   : > { %20011 = vmatpush3.msk.msra.mxu1 %vm468_vm0, %v24316_v44  ;;  %19118 = vmatprep.mubr.msk.f32.mxu0 %vm371_vm1, %v6441_v57  ;;  %v24529_v44 = vld [vmem:[#allocation4 + $0x84] sm:$0xff]  ;;  %v24558_v57 = vld [vmem:[#allocation4 + $0xb4] sm:$0xff] }
 0x473   : > { %19965 = vmatprep.mubr.msk.f32.mxu1 %vm371_vm1, %v24512_v17  ;;  %20060 = vmatprep.subr.msk.mxu1 %vm468_vm0, %v24502_v35  ;;  %26058 = vst [vmem:[#allocation42_spill] sm:$0xff] %v24529_v44 }
 0x475   : > { %19119 = vmatmul.mubr.msk.f32.gmra.mrb[100].mxu0 %vm371_vm1, %v6442_v27  ;;  %19966 = vmatmul.mubr.msk.f32.gmra.mrb[2].mxu1 %vm371_vm1, %v24518_v63 }
 0x476   : > { %19121 = vmatprep.mubr.msk.f32.mxu0 %vm371_vm1, %v24113_v10  ;;  %19968 = vmatprep.mubr.msk.f32.mxu1 %vm371_vm1, %v24523_v4  ;;  %v24541_v10 = vld [vmem:[#allocation4 + $0x9c] sm:$0xff] }
 0x477   : > { %26060 = vst [vmem:[#allocation44_spill] sm:$0xff] %v24541_v10 }
 0x479   : > { %19122 = vmatmul.mubr.msk.f32.gmra.mrb[102].mxu0 %vm371_vm1, %v24125_v1  ;;  %19969 = vmatmul.mubr.msk.f32.gmra.mrb[4].mxu1 %vm371_vm1, %v24529_v44  ;;  %v24547_v1 = vld [vmem:[#allocation4 + $0xac] sm:$0xff] }
 0x47a   : > { %19124 = vmatprep.mubr.msk.f32.mxu0 %vm371_vm1, %v24140_v9  ;;  %19971 = vmatprep.mubr.msk.f32.mxu1 %vm371_vm1, %v24535_v38  ;;  %26061 = vst [vmem:[#allocation45_spill] sm:$0xff] %v24547_v1  ;;  %v24556_v9 = vld [vmem:[%s25926_s4] ss:$0 sm:$0xff]  ;;  %v24572_v44 = vld [vmem:[#allocation4 + $0xcc] sm:$0xff] }
 0x47b   : > { %26063 = vst [vmem:[#allocation47_spill] sm:$0xff] %v24572_v44 }
 0x47d   : > { %19125 = vmatmul.mubr.msk.f32.gmra.mrb[104].mxu0 %vm371_vm1, %v24146_v25  ;;  %19972 = vmatmul.mubr.msk.f32.gmra.mrb[6].mxu1 %vm371_vm1, %v24541_v10 }
 0x47e   : > { %19127 = vmatprep.mubr.msk.f32.mxu0 %vm371_vm1, %v24151_v23  ;;  %19974 = vmatprep.mubr.msk.f32.mxu1 %vm371_vm1, %v24547_v1  ;;  %v24565_v23 = vld [vmem:[#allocation4 + $0xc4] sm:$0xff] }
 0x47f   : > { %26062 = vst [vmem:[#allocation46_spill] sm:$0xff] %v24565_v23 }
 0x480   : > { %v18964_v18 = vpop.f32.mrb[64].mxu0 }
 0x481   : > { %v20260_v25 = vadd.f32 %v18964_v18, %v24556_v9  ;;  %v5238_v27 = vpop.f32.mrb[65].mxu0  ;;  %19128 = vmatmul.mubr.msk.f32.gmra.mrb[106].mxu0 %vm371_vm1, %v24157_v13  ;;  %19975 = vmatmul.mubr.msk.f32.gmra.mrb[8].mxu1 %vm371_vm1, %v24558_v57 }
 0x482   : > { %v20261_v1 = vadd.f32 %v24556_v9, %v5238_v27  ;;  %19130 = vmatprep.mubr.msk.f32.mxu0 %vm371_vm1, %v24163_v8  ;;  %19977 = vmatprep.mubr.msk.f32.mxu1 %vm371_vm1, %v24565_v23 }
 0x483   : > { %v5430_v10 = vmax.f32 %v20260_v25, 0.0 }
 0x484   : > { %v5429_v38 = vmax.f32 %v20261_v1, 0.0  ;;  %v18967_v18 = vpop.f32.mrb[66].mxu0  ;;  %v24583_v1 = vld [vmem:[#allocation4 + $0xdc] sm:$0xff] }
 0x485   : > { %v20262_v13 = vadd.f32 %v18967_v18, %v24556_v9  ;;  %19131 = vmatmul.mubr.msk.f32.gmra.mrb[108].mxu0 %vm371_vm1, %v24169_v56  ;;  %19978 = vmatmul.mubr.msk.f32.gmra.mrb[10].mxu1 %vm371_vm1, %v24572_v44  ;;  %v5248_v27 = vpop.f32.mrb[67].mxu0  ;;  %v24588_v44 = vld [vmem:[#allocation4 + $0xe4] sm:$0xff] }
 0x486   : > { %15476 = vrot.lane.b32.xlu1 %v5430_v10, %s21488_s14  ;;  %v20263_v8 = vadd.f32 %v24556_v9, %v5248_v27  ;;  %19133 = vmatprep.mubr.msk.f32.mxu0 %vm371_vm1, %v24175_v45 }
 0x487   : > { %v5432_v25 = vmax.f32 %v20262_v13, 0.0  ;;  %19980 = vmatprep.mubr.msk.f32.mxu1 %vm371_vm1, %v24583_v1  ;;  %15474 = vrot.lane.b32.xlu0 %v5429_v38, %s21488_s14  ;;  %v24599_v38 = vld [vmem:[#allocation4 + $0xf4] sm:$0xff] }
 0x488   : > { %v5431_v56 = vmax.f32 %v20263_v8, 0.0  ;;  %v18970_v18 = vpop.f32.mrb[68].mxu0  ;;  %v24604_v8 = vld [vmem:[#allocation4 + $0xfc] sm:$0xff] }
 0x489   : > { %v20264_v23 = vadd.f32 %v18970_v18, %v24556_v9  ;;  %19134 = vmatmul.mubr.msk.f32.gmra.mrb[110].mxu0 %vm371_vm1, %v24181_v51  ;;  %19981 = vmatmul.mubr.msk.f32.gmra.mrb[12].mxu1 %vm371_vm1, %v24588_v44  ;;  %v5258_v45 = vpop.f32.mrb[69].mxu0 }
 0x48a   : > { %15480 = vrot.lane.b32.xlu1 %v5432_v25, %s21488_s14  ;;  %v20265_v10 = vadd.f32 %v24556_v9, %v5258_v45  ;;  %19136 = vmatprep.mubr.msk.f32.mxu0 %vm371_vm1, %v24187_v49  ;;  %v24615_v25 = vld [vmem:[#allocation4 + $0x10c] sm:$0xff] }
 0x48b   : > { %v5434_v13 = vmax.f32 %v20264_v23, 0.0  ;;  %19983 = vmatprep.mubr.msk.f32.mxu1 %vm371_vm1, %v24599_v38  ;;  %15478 = vrot.lane.b32.xlu0 %v5431_v56, %s21488_s14 }
 0x48c   : > { %v5433_v51 = vmax.f32 %v20265_v10, 0.0  ;;  %v18973_v27 = vpop.f32.mrb[70].mxu0  ;;  %v24620_v10 = vld [vmem:[#allocation4 + $0x114] sm:$0xff] }
 0x48d   : > { %v20266_v18 = vadd.f32 %v18973_v27, %v24556_v9  ;;  %19137 = vmatmul.mubr.msk.f32.gmra.mrb[112].mxu0 %vm371_vm1, %v24193_v20  ;;  %19984 = vmatmul.mubr.msk.f32.gmra.mrb[14].mxu1 %vm371_vm1, %v24604_v8  ;;  %v5268_v49 = vpop.f32.mrb[71].mxu0 }
 0x48e   : > { %15484 = vrot.lane.b32.xlu1 %v5434_v13, %s21488_s14  ;;  %v20267_v23 = vadd.f32 %v24556_v9, %v5268_v49  ;;  %19139 = vmatprep.mubr.msk.f32.mxu0 %vm371_vm1, %v24199_v36 }
 0x48f   : > { %v5436_v56 = vmax.f32 %v20266_v18, 0.0  ;;  %19986 = vmatprep.mubr.msk.f32.mxu1 %vm371_vm1, %v24615_v25  ;;  %15482 = vrot.lane.b32.xlu0 %v5433_v51, %s21488_s14  ;;  %v24631_v51 = vld [vmem:[#allocation4 + $0x124] sm:$0xff] }
 0x490   : > { %v5435_v20 = vmax.f32 %v20267_v23, 0.0  ;;  %v18976_v45 = vpop.f32.mrb[72].mxu0  ;;  %v24636_v23 = vld [vmem:[#allocation4 + $0x12c] sm:$0xff] }
 0x491   : > { %v20268_v27 = vadd.f32 %v18976_v45, %v24556_v9  ;;  %19140 = vmatmul.mubr.msk.f32.gmra.mrb[114].mxu0 %vm371_vm1, %v24205_v42  ;;  %19987 = vmatmul.mubr.msk.f32.gmra.mrb[16].mxu1 %vm371_vm1, %v24620_v10  ;;  %v5278_v36 = vpop.f32.mrb[73].mxu0 }
 0x492   : > { %15488 = vrot.lane.b32.xlu1 %v5436_v56, %s21488_s14  ;;  %v20269_v13 = vadd.f32 %v24556_v9, %v5278_v36  ;;  %19142 = vmatprep.mubr.msk.f32.mxu0 %vm371_vm1, %v24211_v11 }
 0x493   : > { %v5438_v18 = vmax.f32 %v20268_v27, 0.0  ;;  %19989 = vmatprep.mubr.msk.f32.mxu1 %vm371_vm1, %v24631_v51  ;;  %15486 = vrot.lane.b32.xlu0 %v5435_v20, %s21488_s14  ;;  %v24647_v20 = vld [vmem:[#allocation4 + $0x13c] sm:$0xff] }
 0x494   : > { %v5437_v42 = vmax.f32 %v20269_v13, 0.0  ;;  %v18979_v49 = vpop.f32.mrb[74].mxu0  ;;  %v24652_v13 = vld [vmem:[#allocation4 + $0x144] sm:$0xff] }
 0x495   : > { %v20270_v45 = vadd.f32 %v18979_v49, %v24556_v9  ;;  %19143 = vmatmul.mubr.msk.f32.gmra.mrb[116].mxu0 %vm371_vm1, %v24217_v54  ;;  %19990 = vmatmul.mubr.msk.f32.gmra.mrb[18].mxu1 %vm371_vm1, %v24636_v23  ;;  %v5288_v11 = vpop.f32.mrb[75].mxu0 }
 0x496   : > { %15492 = vrot.lane.b32.xlu1 %v5438_v18, %s21488_s14  ;;  %v20271_v56 = vadd.f32 %v24556_v9, %v5288_v11  ;;  %19145 = vmatprep.mubr.msk.f32.mxu0 %vm371_vm1, %v24223_v0 }
 0x497   : > { %v5440_v27 = vmax.f32 %v20270_v45, 0.0  ;;  %19992 = vmatprep.mubr.msk.f32.mxu1 %vm371_vm1, %v24647_v20  ;;  %15490 = vrot.lane.b32.xlu0 %v5437_v42, %s21488_s14  ;;  %v24663_v42 = vld [vmem:[#allocation4 + $0x154] sm:$0xff] }
 0x498   : > { %v5439_v54 = vmax.f32 %v20271_v56, 0.0  ;;  %v18982_v36 = vpop.f32.mrb[76].mxu0  ;;  %v24668_v56 = vld [vmem:[#allocation4 + $0x15c] sm:$0xff] }
 0x499   : > { %v20272_v49 = vadd.f32 %v18982_v36, %v24556_v9  ;;  %19146 = vmatmul.mubr.msk.f32.gmra.mrb[118].mxu0 %vm371_vm1, %v24229_v33  ;;  %19993 = vmatmul.mubr.msk.f32.gmra.mrb[20].mxu1 %vm371_vm1, %v24652_v13  ;;  %v5298_v0 = vpop.f32.mrb[77].mxu0 }
 0x49a   : > { %15496 = vrot.lane.b32.xlu1 %v5440_v27, %s21488_s14  ;;  %v20273_v18 = vadd.f32 %v24556_v9, %v5298_v0  ;;  %19148 = vmatprep.mubr.msk.f32.mxu0 %vm371_vm1, %v24235_v7 }
 0x49b   : > { %v5442_v45 = vmax.f32 %v20272_v49, 0.0  ;;  %19995 = vmatprep.mubr.msk.f32.mxu1 %vm371_vm1, %v24663_v42  ;;  %15494 = vrot.lane.b32.xlu0 %v5439_v54, %s21488_s14  ;;  %v24679_v54 = vld [vmem:[#allocation4 + $0x16c] sm:$0xff] }
 0x49c   : > { %v5441_v33 = vmax.f32 %v20273_v18, 0.0  ;;  %v18985_v11 = vpop.f32.mrb[78].mxu0  ;;  %v24684_v18 = vld [vmem:[#allocation4 + $0x174] sm:$0xff] }
 0x49d   : > { %v20274_v36 = vadd.f32 %v18985_v11, %v24556_v9  ;;  %19149 = vmatmul.mubr.msk.f32.gmra.mrb[120].mxu0 %vm371_vm1, %v24241_v47  ;;  %19996 = vmatmul.mubr.msk.f32.gmra.mrb[22].mxu1 %vm371_vm1, %v24668_v56  ;;  %v5308_v7 = vpop.f32.mrb[79].mxu0  ;;  %v24686_v11 = vpop.permute.xlu0 %15730 }
 0x49e   : > { %15500 = vrot.lane.b32.xlu1 %v5442_v45, %s21488_s14  ;;  %v20275_v27 = vadd.f32 %v24556_v9, %v5308_v7  ;;  %19151 = vmatprep.mubr.msk.f32.mxu0 %vm371_vm1, %v24247_v26  ;;  %26064 = vst [vmem:[#allocation48_spill] sm:$0xff] %v24686_v11 }
 0x49f   : > { %v5444_v49 = vmax.f32 %v20274_v36, 0.0  ;;  %19998 = vmatprep.mubr.msk.f32.mxu1 %vm371_vm1, %v24679_v54  ;;  %15498 = vrot.lane.b32.xlu0 %v5441_v33, %s21488_s14  ;;  %v13095_v33 = vld [vmem:[#allocation4 + $0x184] sm:$0xff] }
 0x4a0   : > { %v5443_v47 = vmax.f32 %v20275_v27, 0.0  ;;  %v18988_v0 = vpop.f32.mrb[80].mxu0 }
 0x4a1   : > { %v20276_v45 = vadd.f32 %v18988_v0, %v24556_v9  ;;  %19152 = vmatmul.mubr.msk.f32.gmra.mrb[122].mxu0 %vm371_vm1, %v24253_v14  ;;  %19999 = vmatmul.mubr.msk.f32.gmra.mrb[24].mxu1 %vm371_vm1, %v24684_v18  ;;  %v5318_v26 = vpop.f32.mrb[81].mxu0  ;;  %v13096_v14 = vld [vmem:[#allocation4 + $0x18c] sm:$0xff] }
 0x4a2   : > { %15504 = vrot.lane.b32.xlu1 %v5444_v49, %s21488_s14  ;;  %v20277_v36 = vadd.f32 %v24556_v9, %v5318_v26  ;;  %19154 = vmatprep.mubr.msk.f32.mxu0 %vm371_vm1, %v24259_v29 }
 0x4a3   : > { %v5446_v7 = vmax.f32 %v20276_v45, 0.0  ;;  %20001 = vmatprep.mubr.msk.f32.mxu1 %vm371_vm1, %v13095_v33  ;;  %15502 = vrot.lane.b32.xlu0 %v5443_v47, %s21488_s14  ;;  %v13097_v45 = vld [vmem:[#allocation4 + $0x19c] sm:$0xff]  ;;  %v24707_v47 = vpop.permute.xlu0 %15734 }
 0x4a4   : > { %v5445_v27 = vmax.f32 %v20277_v36, 0.0  ;;  %v18991_v0 = vpop.f32.mrb[82].mxu0  ;;  %26065 = vst [vmem:[#allocation49_spill] sm:$0xff] %v24707_v47  ;;  %v6827_v36 = vld [vmem:[#allocation4 + $0x3] sm:$0xff]  ;;  %v6829_v47 = vld [vmem:[#allocation4 + $0x1b] sm:$0xff] }
 0x4a5   : > { %v20278_v11 = vadd.f32 %v18991_v0, %v24556_v9  ;;  %19155 = vmatmul.mubr.msk.f32.gmra.mrb[124].mxu0 %vm371_vm1, %v24265_v50  ;;  %20002 = vmatmul.mubr.msk.f32.gmra.mrb[26].mxu1 %vm371_vm1, %v13096_v14  ;;  %v5328_v49 = vpop.f32.mrb[83].mxu0  ;;  %v13098_v0 = vld [vmem:[#allocation4 + $0x1a4] sm:$0xff]  ;;  %v13099_v14 = vld [vmem:[#allocation4 + $0x1b4] sm:$0xff] }
 0x4a6   : > { %15508 = vrot.lane.b32.xlu1 %v5446_v7, %s21488_s14  ;;  %v20279_v29 = vadd.f32 %v24556_v9, %v5328_v49  ;;  %19157 = vmatprep.mubr.msk.f32.mxu0 %vm371_vm1, %v24271_v32  ;;  %v13100_v49 = vld [vmem:[#allocation4 + $0x1bc] sm:$0xff] }
 0x4a7   : > { %v5448_v26 = vmax.f32 %v20278_v11, 0.0  ;;  %20004 = vmatprep.mubr.msk.f32.mxu1 %vm371_vm1, %v13097_v45  ;;  %15506 = vrot.lane.b32.xlu0 %v5445_v27, %s21488_s14  ;;  %v6828_v27 = vld [vmem:[#allocation4 + $0xb] sm:$0xff] }
 0x4a8   : > { %v5447_v50 = vmax.f32 %v20279_v29, 0.0  ;;  %v18994_v33 = vpop.f32.mrb[84].mxu0 }
 0x4a9   : > { %v20280_v7 = vadd.f32 %v18994_v33, %v24556_v9  ;;  %19158 = vmatmul.mubr.msk.f32.gmra.mrb[126].mxu0 %vm371_vm1, %v24277_v34  ;;  %20005 = vmatmul.mubr.msk.f32.gmra.mrb[28].mxu1 %vm371_vm1, %v13098_v0  ;;  %v5338_v32 = vpop.f32.mrb[85].mxu0  ;;  %v24720_v34 = vpop.permute.xlu0 %15738 }
 0x4aa   : > { %15512 = vrot.lane.b32.xlu1 %v5448_v26, %s21488_s14  ;;  %v20281_v11 = vadd.f32 %v24556_v9, %v5338_v32  ;;  %19162 = vmatprep.mubr.msk.f32.mxu0 %vm371_vm1, %v6827_v36  ;;  %26066 = vst [vmem:[#allocation50_spill] sm:$0xff] %v24720_v34  ;;  %v24725_v36 = vld [vmem:[#allocation4 + $0x60] sm:$0xff] }
 0x4ab   : > { %v5450_v29 = vmax.f32 %v20280_v7, 0.0  ;;  %15510 = vrot.lane.b32.xlu0 %v5447_v50, %s21488_s14  ;;  %20007 = vmatprep.mubr.msk.f32.mxu1 %vm371_vm1, %v13099_v14  ;;  %v6830_v14 = vld [vmem:[#allocation4 + $0x23] sm:$0xff] }
 0x4ac   : > { %v5449_v45 = vmax.f32 %v20281_v11, 0.0  ;;  %v18997_v33 = vpop.f32.mrb[86].mxu0 }
 0x4ad   : > { %v20282_v0 = vadd.f32 %v18997_v33, %v24556_v9  ;;  %19163 = vmatmul.mubr.msk.f32.vlgmr.msra.gmra.mrb[96].mxu0 %vm371_vm1, %v6828_v27  ;;  %20008 = vmatmul.mubr.msk.f32.gmra.mrb[30].mxu1 %vm371_vm1, %v13100_v49  ;;  %v5348_v26 = vpop.f32.mrb[87].mxu0  ;;  %v24733_v27 = vld [vmem:[#allocation4 + $0x68] sm:$0xff]  ;;  %v24750_v33 = vld [vmem:[#allocation4 + $0x78] sm:$0xff] }
 0x4ae   : > { %15516 = vrot.lane.b32.xlu1 %v5450_v29, %s21488_s14  ;;  %v20283_v50 = vadd.f32 %v24556_v9, %v5348_v26  ;;  %20012 = vmatprep.mubr.msk.f32.mxu1 %vm371_vm1, %v24725_v36 }
 0x4af   : > { %v5452_v7 = vmax.f32 %v20282_v0, 0.0  ;;  %15514 = vrot.lane.b32.xlu0 %v5449_v45, %s21488_s14  ;;  %19165 = vmatprep.mubr.msk.f32.mxu0 %vm371_vm1, %v6829_v47  ;;  %v24744_v45 = vld [vmem:[%s25927_s5 + $0x58] sm:$0xf]  ;;  %v24752_v0 = vpop.permute.xlu0 %15742 }
 0x4b0   : > { %v5451_v32 = vmax.f32 %v20283_v50, 0.0  ;;  %v19000_v11 = vpop.f32.mrb[88].mxu0  ;;  %19211 = vmatpush3.msk.msra.mxu0 %vm468_vm0, %v24490_v28  ;;  %v6831_v47 = vld [vmem:[#allocation4 + $0x33] sm:$0xff]  ;;  %26067 = vst [vmem:[#allocation51_spill] sm:$0xff] %v24752_v0 }
 0x4b1   : > { %v20284_v49 = vadd.f32 %v19000_v11, %v24556_v9  ;;  %19166 = vmatmul.mubr.msk.f32.gmra.mrb[98].mxu0 %vm371_vm1, %v6830_v14  ;;  %20013 = vmatmul.mubr.msk.f32.vlgmr.msra.gmra.mrb[0].mxu1 %vm371_vm1, %v24733_v27  ;;  %v5358_v29 = vpop.f32.mrb[89].mxu0  ;;  %v24758_v11 = vld [vmem:[#allocation4 + $0x80] sm:$0xff]  ;;  %v24782_v0 = vld [vmem:[#allocation4 + $0x98] sm:$0xff] }
 0x4b2   : > { %20061 = vmatpush3.msk.msra.mxu1 %vm468_vm0, %v24502_v35  ;;  %15520 = vrot.lane.b32.xlu1 %v5452_v7, %s21488_s14  ;;  %v20285_v28 = vadd.f32 %v24556_v9, %v5358_v29  ;;  %v6832_v35 = vld [vmem:[#allocation4 + $0x3b] sm:$0xff]  ;;  %v24765_v7 = vld [vmem:[%s25927_s5 + $0x14] sm:$0xf] }
 0x4b3   : > { %v5454_v26 = vmax.f32 %v20284_v49, 0.0  ;;  %19168 = vmatprep.mubr.msk.f32.mxu0 %vm371_vm1, %v6831_v47  ;;  %20015 = vmatprep.mubr.msk.f32.mxu1 %vm371_vm1, %v24750_v33 }
 0x4b4   : > { %v5453_v50 = vmax.f32 %v20285_v28, 0.0  ;;  %15518 = vrot.lane.b32.xlu0 %v5451_v32, %s21488_s14  ;;  %v19003_v14 = vpop.f32.mrb[90].mxu0  ;;  %20110 = vmatprep.subr.msk.mxu1 %vm468_vm0, %v24744_v45  ;;  %v24775_v28 = vld [vmem:[#allocation4 + $0x90] sm:$0xff] }
 0x4b5   : > { %v20286_v49 = vadd.f32 %v19003_v14, %v24556_v9  ;;  %19169 = vmatmul.mubr.msk.f32.gmra.mrb[100].mxu0 %vm371_vm1, %v6832_v35  ;;  %20016 = vmatmul.mubr.msk.f32.gmra.mrb[2].mxu1 %vm371_vm1, %v24758_v11  ;;  %v5368_v32 = vpop.f32.mrb[91].mxu0 }
 0x4b6   : > { %15524 = vrot.lane.b32.xlu1 %v5454_v26, %s21488_s14  ;;  %v20287_v29 = vadd.f32 %v24556_v9, %v5368_v32  ;;  %19171 = vmatprep.mubr.msk.f32.mxu0 %vm371_vm1, %v24299_v24  ;;  %v24784_v26 = vpop.permute.xlu0 %15746 }
 0x4b7   : > { %v5456_v47 = vmax.f32 %v20286_v49, 0.0  ;;  %20018 = vmatprep.mubr.msk.f32.mxu1 %vm371_vm1, %v24775_v28  ;;  %19260 = vmatprep.subr.msk.mxu0 %vm468_vm0, %v24765_v7  ;;  %26068 = vst [vmem:[#allocation52_spill] sm:$0xff] %v24784_v26  ;;  %v24800_v26 = vld [vmem:[#allocation4 + $0xb0] sm:$0xff] }
 0x4b8   : > { %v5455_v14 = vmax.f32 %v20287_v29, 0.0  ;;  %15522 = vrot.lane.b32.xlu0 %v5453_v50, %s21488_s14  ;;  %v19006_v35 = vpop.f32.mrb[92].mxu0  ;;  %v24795_v50 = vld [vmem:[#allocation4 + $0xa8] sm:$0xff] }
 0x4b9   : > { %v20288_v32 = vadd.f32 %v19006_v35, %v24556_v9  ;;  %19172 = vmatmul.mubr.msk.f32.gmra.mrb[102].mxu0 %vm371_vm1, %v24311_v16  ;;  %20019 = vmatmul.mubr.msk.f32.gmra.mrb[4].mxu1 %vm371_vm1, %v24782_v0  ;;  %v5378_v24 = vpop.f32.mrb[93].mxu0 }
 0x4ba   : > { %15528 = vrot.lane.b32.xlu1 %v5456_v47, %s21488_s14  ;;  %v20289_v49 = vadd.f32 %v24556_v9, %v5378_v24  ;;  %19174 = vmatprep.mubr.msk.f32.mxu0 %vm371_vm1, %v24326_v61 }
 0x4bb   : > { %v5458_v29 = vmax.f32 %v20288_v32, 0.0  ;;  %20021 = vmatprep.mubr.msk.f32.mxu1 %vm371_vm1, %v24795_v50  ;;  %v24813_v32 = vpop.permute.xlu0 %15750 }
 0x4bc   : > { %v5457_v35 = vmax.f32 %v20289_v49, 0.0  ;;  %15526 = vrot.lane.b32.xlu0 %v5455_v14, %s21488_s14  ;;  %v19009_v16 = vpop.f32.mrb[94].mxu0  ;;  %v24811_v14 = vld [vmem:[#allocation4 + $0xc0] sm:$0xff]  ;;  %26069 = vst [vmem:[#allocation53_spill] sm:$0xff] %v24813_v32  ;;  %v24818_v49 = vld [vmem:[#allocation4 + $0xc8] sm:$0xff] }
 0x4bd   : > { %v20290_v34 = vadd.f32 %v19009_v16, %v24556_v9  ;;  %19175 = vmatmul.mubr.msk.f32.gmra.mrb[104].mxu0 %vm371_vm1, %v24332_v19  ;;  %20022 = vmatmul.mubr.msk.f32.gmra.mrb[6].mxu1 %vm371_vm1, %v24800_v26  ;;  %v5388_v61 = vpop.f32.mrb[95].mxu0  ;;  %v24900_v16 = vld [vmem:[#allocation4 + $0x158] sm:$0xff] }
 0x4be   : > { %15532 = vrot.lane.b32.xlu1 %v5458_v29, %s21488_s14  ;;  %v20291_v47 = vadd.f32 %v24556_v9, %v5388_v61  ;;  %19177 = vmatprep.mubr.msk.f32.mxu0 %vm371_vm1, %v24337_v41  ;;  %v24827_v41 = vld [vmem:[#allocation4 + $0xd8] sm:$0xff]  ;;  %v24832_v9 = vld [vmem:[#allocation4 + $0xe0] sm:$0xff]  ;;  %v24860_v29 = vld [vmem:[#allocation4 + $0x110] sm:$0xff] }
 0x4bf   : > { %v5460_v24 = vmax.f32 %v20290_v34, 0.0  ;;  %20024 = vmatprep.mubr.msk.f32.mxu1 %vm371_vm1, %v24811_v14  ;;  %v24834_v34 = vpop.permute.xlu0 %15754 }
 0x4c0   : > { %v5459_v19 = vmax.f32 %v20291_v47, 0.0  ;;  %15530 = vrot.lane.b32.xlu0 %v5457_v35, %s21488_s14  ;;  %26070 = vst [vmem:[#allocation54_spill] sm:$0xff] %v24834_v34  ;;  %v26086_v34 = vld [vmem:[#allocation45_spill] sm:$0xff] }
 0x4c1   : > { %19178 = vmatmul.mubr.msk.f32.gmra.mrb[106].mxu0 %vm371_vm1, %v24343_v2  ;;  %20025 = vmatmul.mubr.msk.f32.gmra.mrb[8].mxu1 %vm371_vm1, %v24818_v49  ;;  %v24840_v2 = vld [vmem:[#allocation4 + $0xf0] sm:$0xff] }
 0x4c2   : > { %15536 = vrot.lane.b32.xlu1 %v5460_v24, %s21488_s14  ;;  %19180 = vmatprep.mubr.msk.f32.mxu0 %vm371_vm1, %v24349_v60  ;;  %v24846_v60 = vld [vmem:[#allocation4 + $0xf8] sm:$0xff]  ;;  %v13487_v24 = vld [vmem:[#allocation4 + $0x1a0] sm:$0xff] }
 0x4c3   : > { %20027 = vmatprep.mubr.msk.f32.mxu1 %vm371_vm1, %v24827_v41 }
 0x4c4   : > { %15534 = vrot.lane.b32.xlu0 %v5459_v19, %s21488_s14  ;;  %v7217_v19 = vld [vmem:[#allocation4 + $0x4] sm:$0xff] }
 0x4c5   : > { %19181 = vmatmul.mubr.msk.f32.gmra.mrb[108].mxu0 %vm371_vm1, %v24355_v58  ;;  %20028 = vmatmul.mubr.msk.f32.gmra.mrb[10].mxu1 %vm371_vm1, %v24832_v9  ;;  %v24852_v58 = vld [vmem:[#allocation4 + $0x108] sm:$0xff] }
 0x4c6   : > { %19183 = vmatprep.mubr.msk.f32.mxu0 %vm371_vm1, %v24361_v59  ;;  %20030 = vmatprep.mubr.msk.f32.mxu1 %vm371_vm1, %v24840_v2  ;;  %v24858_v59 = vpop.permute.xlu0 %15758 }
 0x4c7   : > { %26071 = vst [vmem:[#allocation55_spill] sm:$0xff] %v24858_v59  ;;  %v26085_v59 = vld [vmem:[#allocation44_spill] sm:$0xff] }
 0x4c9   : > { %19184 = vmatmul.mubr.msk.f32.gmra.mrb[110].mxu0 %vm371_vm1, %v24367_v52  ;;  %20031 = vmatmul.mubr.msk.f32.gmra.mrb[12].mxu1 %vm371_vm1, %v24846_v60  ;;  %v24866_v52 = vld [vmem:[#allocation4 + $0x120] sm:$0xff] }
 0x4ca   : > { %19186 = vmatprep.mubr.msk.f32.mxu0 %vm371_vm1, %v24373_v40  ;;  %20033 = vmatprep.mubr.msk.f32.mxu1 %vm371_vm1, %v24852_v58  ;;  %v24872_v40 = vld [vmem:[#allocation4 + $0x128] sm:$0xff]  ;;  %v24874_v35 = vpop.permute.xlu0 %15762 }
 0x4cb   : > { %26072 = vst [vmem:[#allocation56_spill] sm:$0xff] %v24874_v35 }
 0x4cd   : > { %19187 = vmatmul.mubr.msk.f32.gmra.mrb[112].mxu0 %vm371_vm1, %v24379_v21  ;;  %20034 = vmatmul.mubr.msk.f32.gmra.mrb[14].mxu1 %vm371_vm1, %v24860_v29  ;;  %v24880_v21 = vld [vmem:[#allocation4 + $0x138] sm:$0xff] }
 0x4ce   : > { %19189 = vmatprep.mubr.msk.f32.mxu0 %vm371_vm1, %v24385_v46  ;;  %20036 = vmatprep.mubr.msk.f32.mxu1 %vm371_vm1, %v24866_v52  ;;  %v24886_v46 = vld [vmem:[#allocation4 + $0x140] sm:$0xff] }
 0x4d1   : > { %19190 = vmatmul.mubr.msk.f32.gmra.mrb[114].mxu0 %vm371_vm1, %v24391_v62  ;;  %20037 = vmatmul.mubr.msk.f32.gmra.mrb[16].mxu1 %vm371_vm1, %v24872_v40  ;;  %v24892_v62 = vld [vmem:[#allocation4 + $0x150] sm:$0xff] }
 0x4d2   : > { %19192 = vmatprep.mubr.msk.f32.mxu0 %vm371_vm1, %v24397_v5  ;;  %20039 = vmatprep.mubr.msk.f32.mxu1 %vm371_vm1, %v24880_v21  ;;  %v24898_v5 = vpop.permute.xlu0 %15766 }
 0x4d3   : > { %26073 = vst [vmem:[#allocation57_spill] sm:$0xff] %v24898_v5  ;;  %v26083_v5 = vld [vmem:[#allocation43_spill] sm:$0xff] }
 0x4d5   : > { %19193 = vmatmul.mubr.msk.f32.gmra.mrb[116].mxu0 %vm371_vm1, %v24403_v48  ;;  %20040 = vmatmul.mubr.msk.f32.gmra.mrb[18].mxu1 %vm371_vm1, %v24886_v46  ;;  %v24906_v48 = vld [vmem:[#allocation4 + $0x168] sm:$0xff] }
 0x4d6   : > { %19195 = vmatprep.mubr.msk.f32.mxu0 %vm371_vm1, %v24409_v15  ;;  %20042 = vmatprep.mubr.msk.f32.mxu1 %vm371_vm1, %v24892_v62  ;;  %v24912_v15 = vld [vmem:[#allocation4 + $0x170] sm:$0xff]  ;;  %v24914_v61 = vpop.permute.xlu0 %15770 }
 0x4d7   : > { %26074 = vst [vmem:[#allocation58_spill] sm:$0xff] %v24914_v61  ;;  %v13490_v61 = vld [vmem:[#allocation4 + $0x1c8] sm:$0xff] }
 0x4d9   : > { %19196 = vmatmul.mubr.msk.f32.gmra.mrb[118].mxu0 %vm371_vm1, %v24415_v22  ;;  %20043 = vmatmul.mubr.msk.f32.gmra.mrb[20].mxu1 %vm371_vm1, %v24900_v16  ;;  %v24920_v22 = vld [vmem:[#allocation4 + $0x180] sm:$0xff] }
 0x4da   : > { %19198 = vmatprep.mubr.msk.f32.mxu0 %vm371_vm1, %v24421_v3  ;;  %20045 = vmatprep.mubr.msk.f32.mxu1 %vm371_vm1, %v24906_v48  ;;  %v24926_v3 = vld [vmem:[#allocation4 + $0x188] sm:$0xff]  ;;  %v24935_v47 = vpop.permute.xlu0 %15774 }
 0x4db   : > { %26075 = vst [vmem:[#allocation59_spill] sm:$0xff] %v24935_v47  ;;  %v26082_v47 = vld [vmem:[#allocation42_spill] sm:$0xff] }
 0x4dd   : > { %19199 = vmatmul.mubr.msk.f32.gmra.mrb[120].mxu0 %vm371_vm1, %v24427_v37  ;;  %20046 = vmatmul.mubr.msk.f32.gmra.mrb[22].mxu1 %vm371_vm1, %v24912_v15  ;;  %v13486_v37 = vld [vmem:[#allocation4 + $0x198] sm:$0xff] }
 0x4de   : > { %19201 = vmatprep.mubr.msk.f32.mxu0 %vm371_vm1, %v24433_v6  ;;  %20048 = vmatprep.mubr.msk.f32.mxu1 %vm371_vm1, %v24920_v22  ;;  %v13488_v6 = vld [vmem:[#allocation4 + $0x1b0] sm:$0xff] }
 0x4e1   : > { %19202 = vmatmul.mubr.msk.f32.gmra.mrb[122].mxu0 %vm371_vm1, %v24439_v30  ;;  %20049 = vmatmul.mubr.msk.f32.gmra.mrb[24].mxu1 %vm371_vm1, %v24926_v3  ;;  %v13489_v30 = vld [vmem:[#allocation4 + $0x1b8] sm:$0xff] }
 0x4e2   : > { %19204 = vmatprep.mubr.msk.f32.mxu0 %vm371_vm1, %v24445_v31  ;;  %20051 = vmatprep.mubr.msk.f32.mxu1 %vm371_vm1, %v13486_v37  ;;  %v24943_v31 = vpop.permute.xlu0 %15778  ;;  %v13491_v37 = vld [vmem:[#allocation4 + $0x1d0] sm:$0xff] }
 0x4e3   : > { %26076 = vst [vmem:[#allocation60_spill] sm:$0xff] %v24943_v31 }
 0x4e5   : > { %19205 = vmatmul.mubr.msk.f32.gmra.mrb[124].mxu0 %vm371_vm1, %v24451_v55  ;;  %20052 = vmatmul.mubr.msk.f32.gmra.mrb[26].mxu1 %vm371_vm1, %v13487_v24  ;;  %v7218_v55 = vld [vmem:[#allocation4 + $0xc] sm:$0xff]  ;;  %v7219_v24 = vld [vmem:[#allocation4 + $0x1c] sm:$0xff] }
 0x4e6   : > { %19207 = vmatprep.mubr.msk.f32.mxu0 %vm371_vm1, %v24457_v53  ;;  %20054 = vmatprep.mubr.msk.f32.mxu1 %vm371_vm1, %v13488_v6  ;;  %v24952_v53 = vld [vmem:[#allocation4 + $0x61] sm:$0xff]  ;;  %v24957_v6 = vld [vmem:[%s25927_s5 + $0x18] sm:$0xf] }
 0x4e9   : > { %19208 = vmatmul.mubr.msk.f32.gmra.mrb[126].mxu0 %vm371_vm1, %v24463_v39  ;;  %20055 = vmatmul.mubr.msk.f32.gmra.mrb[28].mxu1 %vm371_vm1, %v13489_v30  ;;  %v7220_v39 = vld [vmem:[#allocation4 + $0x24] sm:$0xff] }
 0x4ea   : > { %19212 = vmatprep.mubr.msk.f32.mxu0 %vm371_vm1, %v7217_v19  ;;  %20057 = vmatprep.mubr.msk.f32.mxu1 %vm371_vm1, %v13490_v61  ;;  %v24962_v61 = vpop.permute.xlu0 %15782  ;;  %v24966_v30 = vld [vmem:[#allocation4 + $0x69] sm:$0xff]  ;;  %v24971_v19 = vld [vmem:[%s25927_s5 + $0x5c] sm:$0xf] }
 0x4eb   : > { %26077 = vst [vmem:[#allocation61_spill] sm:$0xff] %v24962_v61 }
 0x4ed   : > { %19213 = vmatmul.mubr.msk.f32.vlgmr.msra.gmra.mrb[96].mxu0 %vm371_vm1, %v7218_v55  ;;  %20058 = vmatmul.mubr.msk.f32.gmra.mrb[30].mxu1 %vm371_vm1, %v13491_v37  ;;  %v7221_v55 = vld [vmem:[#allocation4 + $0x34] sm:$0xff]  ;;  %v7222_v37 = vld [vmem:[#allocation4 + $0x3c] sm:$0xff] }
 0x4ee   : > { %20062 = vmatprep.mubr.msk.f32.mxu1 %vm371_vm1, %v24952_v53  ;;  %19215 = vmatprep.mubr.msk.f32.mxu0 %vm371_vm1, %v7219_v24  ;;  %v24987_v24 = vld [vmem:[#allocation4 + $0x81] sm:$0xff] }
 0x4ef   : > { %19261 = vmatpush3.msk.msra.mxu0 %vm468_vm0, %v24765_v7  ;;  %v24981_v7 = vld [vmem:[#allocation4 + $0x79] sm:$0xff] }
 0x4f0   : > { %19310 = vmatprep.subr.msk.mxu0 %vm468_vm0, %v24957_v6 }
 0x4f1   : > { %19216 = vmatmul.mubr.msk.f32.gmra.mrb[98].mxu0 %vm371_vm1, %v7220_v39  ;;  %20063 = vmatmul.mubr.msk.f32.vlgmr.msra.gmra.mrb[0].mxu1 %vm371_vm1, %v24966_v30  ;;  %v24989_v39 = vpop.permute.xlu0 %15786 }
 0x4f2   : > { %20111 = vmatpush3.msk.msra.mxu1 %vm468_vm0, %v24744_v45  ;;  %19218 = vmatprep.mubr.msk.f32.mxu0 %vm371_vm1, %v7221_v55  ;;  %26078 = vst [vmem:[#allocation62_spill] sm:$0xff] %v24989_v39  ;;  %v24994_v45 = vld [vmem:[#allocation4 + $0x91] sm:$0xff]  ;;  %v25000_v55 = vld [vmem:[#allocation4 + $0x99] sm:$0xff] }
 0x4f3   : > { %20065 = vmatprep.mubr.msk.f32.mxu1 %vm371_vm1, %v24981_v7  ;;  %20160 = vmatprep.subr.msk.mxu1 %vm468_vm0, %v24971_v19 }
 0x4f5   : > { %19219 = vmatmul.mubr.msk.f32.gmra.mrb[100].mxu0 %vm371_vm1, %v7222_v37  ;;  %20066 = vmatmul.mubr.msk.f32.gmra.mrb[2].mxu1 %vm371_vm1, %v24987_v24  ;;  %v25008_v37 = vld [vmem:[#allocation4 + $0xa9] sm:$0xff] }
 0x4f6   : > { %19221 = vmatprep.mubr.msk.f32.mxu0 %vm371_vm1, %v24485_v43  ;;  %20068 = vmatprep.mubr.msk.f32.mxu1 %vm371_vm1, %v24994_v45  ;;  %v25014_v43 = vld [vmem:[#allocation4 + $0xb1] sm:$0xff] }
 0x4f9   : > { %v25002_v61 = vpop.permute.xlu0 %15474  ;;  %19222 = vmatmul.mubr.msk.f32.gmra.mrb[102].mxu0 %vm371_vm1, %v24497_v12  ;;  %20069 = vmatmul.mubr.msk.f32.gmra.mrb[4].mxu1 %vm371_vm1, %v25000_v55  ;;  %v25022_v12 = vld [vmem:[#allocation4 + $0xc1] sm:$0xff] }
 0x4fa   : > { %26079 = vst [vmem:[#allocation63_spill] sm:$0xff] %v25002_v61  ;;  %19224 = vmatprep.mubr.msk.f32.mxu0 %vm371_vm1, %v24512_v17  ;;  %20071 = vmatprep.mubr.msk.f32.mxu1 %vm371_vm1, %v25008_v37  ;;  %v25028_v17 = vld [vmem:[#allocation4 + $0xc9] sm:$0xff]  ;;  %v7608_v61 = vld [vmem:[#allocation4 + $0x18] sm:$0xff] }
 0x4fd   : > { %v25016_v39 = vpop.permute.xlu0 %15478  ;;  %19225 = vmatmul.mubr.msk.f32.gmra.mrb[104].mxu0 %vm371_vm1, %v24518_v63  ;;  %20072 = vmatmul.mubr.msk.f32.gmra.mrb[6].mxu1 %vm371_vm1, %v25014_v43  ;;  %v25036_v63 = vld [vmem:[#allocation4 + $0xd9] sm:$0xff] }
 0x4fe   : > { %26080 = vst [vmem:[#allocation64_spill] sm:$0xff] %v25016_v39  ;;  %19227 = vmatprep.mubr.msk.f32.mxu0 %vm371_vm1, %v24523_v4  ;;  %20074 = vmatprep.mubr.msk.f32.mxu1 %vm371_vm1, %v25022_v12  ;;  %v25042_v4 = vld [vmem:[#allocation4 + $0xe1] sm:$0xff]  ;;  %v26090_v39 = vld [vmem:[#allocation47_spill] sm:$0xff] }
 0x501   : > { %v25030_v31 = vpop.permute.xlu0 %15482  ;;  %19228 = vmatmul.mubr.msk.f32.gmra.mrb[106].mxu0 %vm371_vm1, %v26082_v47  ;;  %20075 = vmatmul.mubr.msk.f32.gmra.mrb[8].mxu1 %vm371_vm1, %v25028_v17  ;;  %v25050_v47 = vld [vmem:[#allocation4 + $0xf1] sm:$0xff] }
 0x502   : > { %26081 = vst [vmem:[#allocation65_spill] sm:$0xff] %v25030_v31  ;;  %19230 = vmatprep.mubr.msk.f32.mxu0 %vm371_vm1, %v26083_v5  ;;  %20077 = vmatprep.mubr.msk.f32.mxu1 %vm371_vm1, %v25036_v63  ;;  %v25056_v5 = vld [vmem:[#allocation4 + $0xf9] sm:$0xff] }
 0x505   : > { %v25044_v35 = vpop.permute.xlu0 %15486  ;;  %19231 = vmatmul.mubr.msk.f32.gmra.mrb[108].mxu0 %vm371_vm1, %v26085_v59  ;;  %20078 = vmatmul.mubr.msk.f32.gmra.mrb[10].mxu1 %vm371_vm1, %v25042_v4  ;;  %v25064_v59 = vld [vmem:[#allocation4 + $0x109] sm:$0xff] }
 0x506   : > { %26084 = vst [vmem:[#allocation42_spill] sm:$0xff] %v25044_v35  ;;  %19233 = vmatprep.mubr.msk.f32.mxu0 %vm371_vm1, %v26086_v34  ;;  %20080 = vmatprep.mubr.msk.f32.mxu1 %vm371_vm1, %v25050_v47  ;;  %v26088_v35 = vld [vmem:[#allocation46_spill] sm:$0xff] }
 0x507   : > { %v25070_v34 = vld [vmem:[#allocation4 + $0x111] sm:$0xff] }
 0x509   : > { %v25058_v32 = vpop.permute.xlu0 %15490  ;;  %19234 = vmatmul.mubr.msk.f32.gmra.mrb[110].mxu0 %vm371_vm1, %v24558_v57  ;;  %20081 = vmatmul.mubr.msk.f32.gmra.mrb[12].mxu1 %vm371_vm1, %v25056_v5  ;;  %v25078_v57 = vld [vmem:[#allocation4 + $0x121] sm:$0xff] }
 0x50a   : > { %26087 = vst [vmem:[#allocation43_spill] sm:$0xff] %v25058_v32  ;;  %19236 = vmatprep.mubr.msk.f32.mxu0 %vm371_vm1, %v26088_v35  ;;  %20083 = vmatprep.mubr.msk.f32.mxu1 %vm371_vm1, %v25064_v59  ;;  %v25084_v35 = vld [vmem:[#allocation4 + $0x129] sm:$0xff] }
 0x50d   : > { %v25072_v31 = vpop.permute.xlu0 %15494  ;;  %19237 = vmatmul.mubr.msk.f32.gmra.mrb[112].mxu0 %vm371_vm1, %v26090_v39  ;;  %20084 = vmatmul.mubr.msk.f32.gmra.mrb[14].mxu1 %vm371_vm1, %v25070_v34  ;;  %v25092_v39 = vld [vmem:[#allocation4 + $0x139] sm:$0xff] }
 0x50e   : > { %26089 = vst [vmem:[#allocation44_spill] sm:$0xff] %v25072_v31  ;;  %19239 = vmatprep.mubr.msk.f32.mxu0 %vm371_vm1, %v24583_v1  ;;  %20086 = vmatprep.mubr.msk.f32.mxu1 %vm371_vm1, %v25078_v57  ;;  %v25098_v1 = vld [vmem:[#allocation4 + $0x141] sm:$0xff] }
 0x511   : > { %v25086_v32 = vpop.permute.xlu0 %15498  ;;  %19240 = vmatmul.mubr.msk.f32.gmra.mrb[114].mxu0 %vm371_vm1, %v24588_v44  ;;  %20087 = vmatmul.mubr.msk.f32.gmra.mrb[16].mxu1 %vm371_vm1, %v25084_v35  ;;  %v25106_v44 = vld [vmem:[#allocation4 + $0x151] sm:$0xff] }
 0x512   : > { %26091 = vst [vmem:[#allocation45_spill] sm:$0xff] %v25086_v32  ;;  %19242 = vmatprep.mubr.msk.f32.mxu0 %vm371_vm1, %v24599_v38  ;;  %20089 = vmatprep.mubr.msk.f32.mxu1 %vm371_vm1, %v25092_v39  ;;  %v25112_v38 = vld [vmem:[#allocation4 + $0x159] sm:$0xff] }
 0x515   : > { %v25100_v31 = vpop.permute.xlu0 %15502  ;;  %19243 = vmatmul.mubr.msk.f32.gmra.mrb[116].mxu0 %vm371_vm1, %v24604_v8  ;;  %20090 = vmatmul.mubr.msk.f32.gmra.mrb[18].mxu1 %vm371_vm1, %v25098_v1  ;;  %v25120_v8 = vld [vmem:[#allocation4 + $0x169] sm:$0xff] }
 0x516   : > { %26092 = vst [vmem:[#allocation46_spill] sm:$0xff] %v25100_v31  ;;  %19245 = vmatprep.mubr.msk.f32.mxu0 %vm371_vm1, %v24615_v25  ;;  %20092 = vmatprep.mubr.msk.f32.mxu1 %vm371_vm1, %v25106_v44  ;;  %v25126_v25 = vld [vmem:[#allocation4 + $0x171] sm:$0xff] }
 0x519   : > { %v25114_v32 = vpop.permute.xlu0 %15506  ;;  %19246 = vmatmul.mubr.msk.f32.gmra.mrb[118].mxu0 %vm371_vm1, %v24620_v10  ;;  %20093 = vmatmul.mubr.msk.f32.gmra.mrb[20].mxu1 %vm371_vm1, %v25112_v38  ;;  %v25134_v10 = vld [vmem:[#allocation4 + $0x181] sm:$0xff] }
 0x51a   : > { %26093 = vst [vmem:[#allocation47_spill] sm:$0xff] %v25114_v32  ;;  %19248 = vmatprep.mubr.msk.f32.mxu0 %vm371_vm1, %v24631_v51  ;;  %20095 = vmatprep.mubr.msk.f32.mxu1 %vm371_vm1, %v25120_v8  ;;  %v25140_v51 = vld [vmem:[#allocation4 + $0x189] sm:$0xff] }
 0x51b   : > { %26095 = vst [vmem:[#allocation67_spill] sm:$0xff] %v25140_v51 }
 0x51d   : > { %v25128_v31 = vpop.permute.xlu0 %15510  ;;  %19249 = vmatmul.mubr.msk.f32.gmra.mrb[120].mxu0 %vm371_vm1, %v24636_v23  ;;  %20096 = vmatmul.mubr.msk.f32.gmra.mrb[22].mxu1 %vm371_vm1, %v25126_v25  ;;  %v13876_v23 = vld [vmem:[#allocation4 + $0x199] sm:$0xff] }
 0x51e   : > { %26094 = vst [vmem:[#allocation66_spill] sm:$0xff] %v25128_v31  ;;  %19251 = vmatprep.mubr.msk.f32.mxu0 %vm371_vm1, %v24647_v20  ;;  %20098 = vmatprep.mubr.msk.f32.mxu1 %vm371_vm1, %v25134_v10  ;;  %v13878_v20 = vld [vmem:[#allocation4 + $0x1b1] sm:$0xff]  ;;  %v13877_v31 = vld [vmem:[#allocation4 + $0x1a1] sm:$0xff] }
 0x521   : > { %v25142_v32 = vpop.permute.xlu0 %15514  ;;  %19252 = vmatmul.mubr.msk.f32.gmra.mrb[122].mxu0 %vm371_vm1, %v24652_v13  ;;  %20099 = vmatmul.mubr.msk.f32.gmra.mrb[24].mxu1 %vm371_vm1, %v25140_v51  ;;  %v13879_v13 = vld [vmem:[#allocation4 + $0x1b9] sm:$0xff]  ;;  %v13880_v51 = vld [vmem:[#allocation4 + $0x1c9] sm:$0xff] }
 0x522   : > { %26096 = vst [vmem:[#allocation68_spill] sm:$0xff] %v25142_v32  ;;  %19254 = vmatprep.mubr.msk.f32.mxu0 %vm371_vm1, %v24663_v42  ;;  %20101 = vmatprep.mubr.msk.f32.mxu1 %vm371_vm1, %v13876_v23  ;;  %v14240_v23 = vld [vmem:[#allocation4 + $0x62] sm:$0xff] }
 0x525   : > { %19255 = vmatmul.mubr.msk.f32.gmra.mrb[124].mxu0 %vm371_vm1, %v24668_v56  ;;  %20102 = vmatmul.mubr.msk.f32.gmra.mrb[26].mxu1 %vm371_vm1, %v13877_v31  ;;  %v7609_v56 = vld [vmem:[#allocation4 + $0x20] sm:$0xff]  ;;  %v13881_v31 = vld [vmem:[#allocation4 + $0x1d1] sm:$0xff] }
 0x526   : > { %v25154_v32 = vpop.permute.xlu0 %15518  ;;  %19257 = vmatprep.mubr.msk.f32.mxu0 %vm371_vm1, %v24679_v54  ;;  %20104 = vmatprep.mubr.msk.f32.mxu1 %vm371_vm1, %v13878_v20  ;;  %v7610_v54 = vld [vmem:[#allocation4 + $0x30] sm:$0xff] }
 0x529   : > { %19258 = vmatmul.mubr.msk.f32.gmra.mrb[126].mxu0 %vm371_vm1, %v24684_v18  ;;  %20105 = vmatmul.mubr.msk.f32.gmra.mrb[28].mxu1 %vm371_vm1, %v13879_v13  ;;  %v7611_v18 = vld [vmem:[#allocation4 + $0x38] sm:$0xff]  ;;  %v7612_v13 = vld [vmem:[#allocation4 + $0x48] sm:$0xff] }
 0x52a   : > { %v25162_v42 = vpop.permute.xlu0 %15522  ;;  %19262 = vmatprep.mubr.msk.f32.mxu0 %vm371_vm1, %v7608_v61  ;;  %20107 = vmatprep.mubr.msk.f32.mxu1 %vm371_vm1, %v13880_v51  ;;  %v14241_v61 = vld [vmem:[#allocation4 + $0x6a] sm:$0xff]  ;;  %v25177_v51 = vld [vmem:[%s25927_s5 + $0x60] sm:$0xf] }
 0x52d   : > { %19263 = vmatmul.mubr.msk.f32.vlgmr.msra.gmra.mrb[96].mxu0 %vm371_vm1, %v7609_v56  ;;  %20108 = vmatmul.mubr.msk.f32.gmra.mrb[30].mxu1 %vm371_vm1, %v13881_v31  ;;  %v7613_v31 = vld [vmem:[#allocation4 + $0x50] sm:$0xff] }
 0x52e   : > { %v25168_v20 = vpop.permute.xlu0 %15526  ;;  %19265 = vmatprep.mubr.msk.f32.mxu0 %vm371_vm1, %v7610_v54  ;;  %20112 = vmatprep.mubr.msk.f32.mxu1 %vm371_vm1, %v14240_v23  ;;  %v14243_v54 = vld [vmem:[#allocation4 + $0x82] sm:$0xff]  ;;  %v14244_v23 = vld [vmem:[#allocation4 + $0x92] sm:$0xff] }
 0x52f   : > { %19311 = vmatpush3.msk.msra.mxu0 %vm468_vm0, %v24957_v6  ;;  %v14242_v6 = vld [vmem:[#allocation4 + $0x7a] sm:$0xff] }
 0x531   : > { %19266 = vmatmul.mubr.msk.f32.gmra.mrb[98].mxu0 %vm371_vm1, %v7611_v18  ;;  %20113 = vmatmul.mubr.msk.f32.vlgmr.msra.gmra.mrb[0].mxu1 %vm371_vm1, %v14241_v61 }
 0x532   : > { %v25181_v56 = vpop.permute.xlu0 %15530  ;;  %20161 = vmatpush3.msk.msra.mxu1 %vm468_vm0, %v24971_v19  ;;  %19268 = vmatprep.mubr.msk.f32.mxu0 %vm371_vm1, %v7612_v13  ;;  %v26097_v19 = vld [vmem:[#allocation38_spill] sm:$0xff]  ;;  %v14245_v13 = vld [vmem:[#allocation4 + $0x9a] sm:$0xff] }
 0x533   : > { %20115 = vmatprep.mubr.msk.f32.mxu1 %vm371_vm1, %v14242_v6  ;;  %20210 = vmatprep.subr.msk.mxu1 %vm468_vm0, %v25177_v51  ;;  %v14246_v6 = vld [vmem:[#allocation4 + $0xaa] sm:$0xff] }
 0x535   : > { %19269 = vmatmul.mubr.msk.f32.gmra.mrb[100].mxu0 %vm371_vm1, %v7613_v31  ;;  %20116 = vmatmul.mubr.msk.f32.gmra.mrb[2].mxu1 %vm371_vm1, %v14243_v54  ;;  %v14247_v31 = vld [vmem:[#allocation4 + $0xb2] sm:$0xff]  ;;  %v14267_v54 = vld [vmem:[#allocation4 + $0x1a2] sm:$0xff] }
 0x536   : > { %v15535_v18 = vpop.permute.xlu0 %15534  ;;  %19271 = vmatprep.mubr.msk.f32.mxu0 %vm371_vm1, %v24725_v36  ;;  %20118 = vmatprep.mubr.msk.f32.mxu1 %vm371_vm1, %v14244_v23  ;;  %v14248_v36 = vld [vmem:[#allocation4 + $0xc2] sm:$0xff]  ;;  %v14270_v23 = vld [vmem:[#allocation4 + $0x1ca] sm:$0xff] }
 0x537   : > { %v25196_v61 = vsel %vm15826_vm7, %v26097_v19, %v15535_v18  ;;  %v14630_v18 = vld [vmem:[#allocation4 + $0x63] sm:$0xff]  ;;  %v8001_v19 = vld [vmem:[#allocation4 + $0x39] sm:$0xff] }
 0x539   : > { %19272 = vmatmul.mubr.msk.f32.gmra.mrb[102].mxu0 %vm371_vm1, %v24733_v27  ;;  %20119 = vmatmul.mubr.msk.f32.gmra.mrb[4].mxu1 %vm371_vm1, %v14245_v13  ;;  %v14249_v27 = vld [vmem:[#allocation4 + $0xca] sm:$0xff] }
 0x53a   : > { %19274 = vmatprep.mubr.msk.f32.mxu0 %vm371_vm1, %v24750_v33  ;;  %20121 = vmatprep.mubr.msk.f32.mxu1 %vm371_vm1, %v14246_v6  ;;  %v14250_v33 = vld [vmem:[#allocation4 + $0xda] sm:$0xff]  ;;  %v8002_v13 = vld [vmem:[#allocation4 + $0x49] sm:$0xff] }
 0x53b   : > { %v14632_v6 = vld [vmem:[#allocation4 + $0x7b] sm:$0xff] }
 0x53d   : > { %19275 = vmatmul.mubr.msk.f32.gmra.mrb[104].mxu0 %vm371_vm1, %v24758_v11  ;;  %20122 = vmatmul.mubr.msk.f32.gmra.mrb[6].mxu1 %vm371_vm1, %v14247_v31  ;;  %v14251_v11 = vld [vmem:[#allocation4 + $0xe2] sm:$0xff]  ;;  %v8003_v31 = vld [vmem:[#allocation4 + $0x51] sm:$0xff] }
 0x53e   : > { %19277 = vmatprep.mubr.msk.f32.mxu0 %vm371_vm1, %v24775_v28  ;;  %20124 = vmatprep.mubr.msk.f32.mxu1 %vm371_vm1, %v14248_v36  ;;  %v14252_v28 = vld [vmem:[#allocation4 + $0xf2] sm:$0xff]  ;;  %v14633_v36 = vld [vmem:[#allocation4 + $0x83] sm:$0xff] }
 0x541   : > { %19278 = vmatmul.mubr.msk.f32.gmra.mrb[106].mxu0 %vm371_vm1, %v24782_v0  ;;  %20125 = vmatmul.mubr.msk.f32.gmra.mrb[8].mxu1 %vm371_vm1, %v14249_v27  ;;  %v14253_v0 = vld [vmem:[#allocation4 + $0xfa] sm:$0xff] }
 0x542   : > { %19280 = vmatprep.mubr.msk.f32.mxu0 %vm371_vm1, %v24795_v50  ;;  %20127 = vmatprep.mubr.msk.f32.mxu1 %vm371_vm1, %v14250_v33  ;;  %v14254_v50 = vld [vmem:[#allocation4 + $0x10a] sm:$0xff]  ;;  %v14634_v27 = vld [vmem:[#allocation4 + $0x93] sm:$0xff]  ;;  %v14635_v33 = vld [vmem:[#allocation4 + $0x9b] sm:$0xff] }
 0x545   : > { %19281 = vmatmul.mubr.msk.f32.gmra.mrb[108].mxu0 %vm371_vm1, %v24800_v26  ;;  %20128 = vmatmul.mubr.msk.f32.gmra.mrb[10].mxu1 %vm371_vm1, %v14251_v11  ;;  %v14255_v26 = vld [vmem:[#allocation4 + $0x112] sm:$0xff] }
 0x546   : > { %19283 = vmatprep.mubr.msk.f32.mxu0 %vm371_vm1, %v24811_v14  ;;  %20130 = vmatprep.mubr.msk.f32.mxu1 %vm371_vm1, %v14252_v28  ;;  %v14256_v14 = vld [vmem:[#allocation4 + $0x122] sm:$0xff]  ;;  %v14637_v11 = vld [vmem:[#allocation4 + $0xb3] sm:$0xff] }
 0x547   : > { %v14657_v28 = vld [vmem:[#allocation4 + $0x1a3] sm:$0xff] }
 0x549   : > { %19284 = vmatmul.mubr.msk.f32.gmra.mrb[110].mxu0 %vm371_vm1, %v24818_v49  ;;  %20131 = vmatmul.mubr.msk.f32.gmra.mrb[12].mxu1 %vm371_vm1, %v14253_v0  ;;  %v14257_v49 = vld [vmem:[#allocation4 + $0x12a] sm:$0xff]  ;;  %v26098_v0 = vld [vmem:[#allocation67_spill] sm:$0xff] }
 0x54a   : > { %19286 = vmatprep.mubr.msk.f32.mxu0 %vm371_vm1, %v24827_v41  ;;  %20133 = vmatprep.mubr.msk.f32.mxu1 %vm371_vm1, %v14254_v50  ;;  %v14258_v41 = vld [vmem:[#allocation4 + $0x13a] sm:$0xff]  ;;  %v15021_v50 = vld [vmem:[#allocation4 + $0x6c] sm:$0xff] }
 0x54d   : > { %19287 = vmatmul.mubr.msk.f32.gmra.mrb[112].mxu0 %vm371_vm1, %v24832_v9  ;;  %20134 = vmatmul.mubr.msk.f32.gmra.mrb[14].mxu1 %vm371_vm1, %v14255_v26  ;;  %v14259_v9 = vld [vmem:[#allocation4 + $0x142] sm:$0xff] }
 0x54e   : > { %19289 = vmatprep.mubr.msk.f32.mxu0 %vm371_vm1, %v24840_v2  ;;  %20136 = vmatprep.mubr.msk.f32.mxu1 %vm371_vm1, %v14256_v14  ;;  %v14260_v2 = vld [vmem:[#allocation4 + $0x152] sm:$0xff]  ;;  %v15023_v26 = vld [vmem:[#allocation4 + $0x84] sm:$0xff] }
 0x54f   : > { %v15024_v14 = vld [vmem:[#allocation4 + $0x94] sm:$0xff] }
 0x551   : > { %19290 = vmatmul.mubr.msk.f32.gmra.mrb[114].mxu0 %vm371_vm1, %v24846_v60  ;;  %20137 = vmatmul.mubr.msk.f32.gmra.mrb[16].mxu1 %vm371_vm1, %v14257_v49  ;;  %v14261_v60 = vld [vmem:[#allocation4 + $0x15a] sm:$0xff] }
 0x552   : > { %19292 = vmatprep.mubr.msk.f32.mxu0 %vm371_vm1, %v24852_v58  ;;  %20139 = vmatprep.mubr.msk.f32.mxu1 %vm371_vm1, %v14258_v41  ;;  %v14262_v58 = vld [vmem:[#allocation4 + $0x16a] sm:$0xff]  ;;  %v15025_v49 = vld [vmem:[#allocation4 + $0x9c] sm:$0xff] }
 0x553   : > { %v15026_v41 = vld [vmem:[#allocation4 + $0xac] sm:$0xff] }
 0x555   : > { %19293 = vmatmul.mubr.msk.f32.gmra.mrb[116].mxu0 %vm371_vm1, %v24860_v29  ;;  %20140 = vmatmul.mubr.msk.f32.gmra.mrb[18].mxu1 %vm371_vm1, %v14259_v9  ;;  %v14263_v29 = vld [vmem:[#allocation4 + $0x172] sm:$0xff] }
 0x556   : > { %19295 = vmatprep.mubr.msk.f32.mxu0 %vm371_vm1, %v24866_v52  ;;  %20142 = vmatprep.mubr.msk.f32.mxu1 %vm371_vm1, %v14260_v2  ;;  %v14264_v52 = vld [vmem:[#allocation4 + $0x182] sm:$0xff]  ;;  %v15027_v9 = vld [vmem:[#allocation4 + $0xb4] sm:$0xff] }
 0x557   : > { %v15028_v2 = vld [vmem:[#allocation4 + $0xc4] sm:$0xff] }
 0x559   : > { %19296 = vmatmul.mubr.msk.f32.gmra.mrb[118].mxu0 %vm371_vm1, %v24872_v40  ;;  %20143 = vmatmul.mubr.msk.f32.gmra.mrb[20].mxu1 %vm371_vm1, %v14261_v60  ;;  %v14265_v40 = vld [vmem:[#allocation4 + $0x18a] sm:$0xff] }
 0x55a   : > { %19298 = vmatprep.mubr.msk.f32.mxu0 %vm371_vm1, %v24880_v21  ;;  %20145 = vmatprep.mubr.msk.f32.mxu1 %vm371_vm1, %v14262_v58  ;;  %v14266_v21 = vld [vmem:[#allocation4 + $0x19a] sm:$0xff]  ;;  %v15029_v60 = vld [vmem:[#allocation4 + $0xcc] sm:$0xff] }
 0x55b   : > { %v15030_v58 = vld [vmem:[#allocation4 + $0xdc] sm:$0xff] }
 0x55d   : > { %19299 = vmatmul.mubr.msk.f32.gmra.mrb[120].mxu0 %vm371_vm1, %v24886_v46  ;;  %20146 = vmatmul.mubr.msk.f32.gmra.mrb[22].mxu1 %vm371_vm1, %v14263_v29  ;;  %v14268_v46 = vld [vmem:[#allocation4 + $0x1b2] sm:$0xff]  ;;  %v15031_v29 = vld [vmem:[#allocation4 + $0xe4] sm:$0xff] }
 0x55e   : > { %19301 = vmatprep.mubr.msk.f32.mxu0 %vm371_vm1, %v24892_v62  ;;  %20148 = vmatprep.mubr.msk.f32.mxu1 %vm371_vm1, %v14264_v52  ;;  %v14269_v62 = vld [vmem:[#allocation4 + $0x1ba] sm:$0xff] }
 0x55f   : > { %v15032_v52 = vld [vmem:[#allocation4 + $0xf4] sm:$0xff] }
 0x561   : > { %19302 = vmatmul.mubr.msk.f32.gmra.mrb[122].mxu0 %vm371_vm1, %v24900_v16  ;;  %20149 = vmatmul.mubr.msk.f32.gmra.mrb[24].mxu1 %vm371_vm1, %v14265_v40  ;;  %v7998_v16 = vld [vmem:[#allocation4 + $0x19] sm:$0xff] }
 0x562   : > { %19304 = vmatprep.mubr.msk.f32.mxu0 %vm371_vm1, %v24906_v48  ;;  %20151 = vmatprep.mubr.msk.f32.mxu1 %vm371_vm1, %v14266_v21  ;;  %v7999_v48 = vld [vmem:[#allocation4 + $0x21] sm:$0xff]  ;;  %v15034_v21 = vld [vmem:[#allocation4 + $0x10c] sm:$0xff] }
 0x563   : > { %v15033_v40 = vld [vmem:[#allocation4 + $0xfc] sm:$0xff] }
 0x565   : > { %19305 = vmatmul.mubr.msk.f32.gmra.mrb[124].mxu0 %vm371_vm1, %v24912_v15  ;;  %20152 = vmatmul.mubr.msk.f32.gmra.mrb[26].mxu1 %vm371_vm1, %v14267_v54  ;;  %v14271_v15 = vld [vmem:[#allocation4 + $0x1d2] sm:$0xff]  ;;  %v15036_v54 = vld [vmem:[#allocation4 + $0x124] sm:$0xff] }
 0x566   : > { %19307 = vmatprep.mubr.msk.f32.mxu0 %vm371_vm1, %v24920_v22  ;;  %20154 = vmatprep.mubr.msk.f32.mxu1 %vm371_vm1, %v14268_v46  ;;  %v8000_v22 = vld [vmem:[#allocation4 + $0x31] sm:$0xff] }
 0x567   : > { %v15035_v46 = vld [vmem:[#allocation4 + $0x114] sm:$0xff] }
 0x569   : > { %19308 = vmatmul.mubr.msk.f32.gmra.mrb[126].mxu0 %vm371_vm1, %v24926_v3  ;;  %20155 = vmatmul.mubr.msk.f32.gmra.mrb[28].mxu1 %vm371_vm1, %v14269_v62  ;;  %v14631_v3 = vld [vmem:[#allocation4 + $0x6b] sm:$0xff] }
 0x56a   : > { %19312 = vmatprep.mubr.msk.f32.mxu0 %vm371_vm1, %v7998_v16  ;;  %20157 = vmatprep.mubr.msk.f32.mxu1 %vm371_vm1, %v14270_v23  ;;  %v15037_v62 = vld [vmem:[#allocation4 + $0x12c] sm:$0xff]  ;;  %v15038_v16 = vld [vmem:[#allocation4 + $0x13c] sm:$0xff]  ;;  %v15039_v23 = vld [vmem:[#allocation4 + $0x144] sm:$0xff] }
 0x56d   : > { %19313 = vmatmul.mubr.msk.f32.vlgmr.msra.gmra.mrb[96].mxu0 %vm371_vm1, %v7999_v48  ;;  %20158 = vmatmul.mubr.msk.f32.gmra.mrb[30].mxu1 %vm371_vm1, %v14271_v15  ;;  %v15040_v48 = vld [vmem:[#allocation4 + $0x154] sm:$0xff]  ;;  %v15041_v15 = vld [vmem:[#allocation4 + $0x15c] sm:$0xff] }
 0x56e   : > { %19315 = vmatprep.mubr.msk.f32.mxu0 %vm371_vm1, %v8000_v22  ;;  %20162 = vmatprep.mubr.msk.f32.mxu1 %vm371_vm1, %v14630_v18  ;;  %v15042_v22 = vld [vmem:[#allocation4 + $0x16c] sm:$0xff]  ;;  %v15043_v18 = vld [vmem:[#allocation4 + $0x174] sm:$0xff] }
 0x571   : > { %19316 = vmatmul.mubr.msk.f32.gmra.mrb[98].mxu0 %vm371_vm1, %v8001_v19  ;;  %20163 = vmatmul.mubr.msk.f32.vlgmr.msra.gmra.mrb[0].mxu1 %vm371_vm1, %v14631_v3  ;;  %v15044_v19 = vld [vmem:[#allocation4 + $0x184] sm:$0xff]  ;;  %v15045_v3 = vld [vmem:[#allocation4 + $0x18c] sm:$0xff] }
 0x572   : > { %20211 = vmatpush3.msk.msra.mxu1 %vm468_vm0, %v25177_v51  ;;  %19318 = vmatprep.mubr.msk.f32.mxu0 %vm371_vm1, %v8002_v13  ;;  %v14636_v51 = vld [vmem:[#allocation4 + $0xab] sm:$0xff]  ;;  %v15046_v13 = vld [vmem:[#allocation4 + $0x19c] sm:$0xff] }
 0x573   : > { %20165 = vmatprep.mubr.msk.f32.mxu1 %vm371_vm1, %v14632_v6  ;;  %v15048_v6 = vld [vmem:[#allocation4 + $0x1b4] sm:$0xff] }
 0x575   : > { %19319 = vmatmul.mubr.msk.f32.gmra.mrb[100].mxu0 %vm371_vm1, %v8003_v31  ;;  %20166 = vmatmul.mubr.msk.f32.gmra.mrb[2].mxu1 %vm371_vm1, %v14633_v36  ;;  %v15047_v31 = vld [vmem:[#allocation4 + $0x1a4] sm:$0xff]  ;;  %v15049_v36 = vld [vmem:[#allocation4 + $0x1bc] sm:$0xff] }
 0x576   : > { %19321 = vmatprep.mubr.msk.f32.mxu0 %vm371_vm1, %v24952_v53  ;;  %20168 = vmatprep.mubr.msk.f32.mxu1 %vm371_vm1, %v14634_v27  ;;  %v14638_v53 = vld [vmem:[#allocation4 + $0xc3] sm:$0xff]  ;;  %v15050_v27 = vld [vmem:[#allocation4 + $0x1cc] sm:$0xff] }
 0x579   : > { %19322 = vmatmul.mubr.msk.f32.gmra.mrb[102].mxu0 %vm371_vm1, %v24966_v30  ;;  %20169 = vmatmul.mubr.msk.f32.gmra.mrb[4].mxu1 %vm371_vm1, %v14635_v33  ;;  %v14639_v30 = vld [vmem:[#allocation4 + $0xcb] sm:$0xff]  ;;  %v15051_v33 = vld [vmem:[#allocation4 + $0x1d4] sm:$0xff] }
 0x57a   : > { %19324 = vmatprep.mubr.msk.f32.mxu0 %vm371_vm1, %v24981_v7  ;;  %20171 = vmatprep.mubr.msk.f32.mxu1 %vm371_vm1, %v14636_v51  ;;  %v14640_v7 = vld [vmem:[#allocation4 + $0xdb] sm:$0xff] }
 0x57d   : > { %19325 = vmatmul.mubr.msk.f32.gmra.mrb[104].mxu0 %vm371_vm1, %v24987_v24  ;;  %20172 = vmatmul.mubr.msk.f32.gmra.mrb[6].mxu1 %vm371_vm1, %v14637_v11  ;;  %v14641_v24 = vld [vmem:[#allocation4 + $0xe3] sm:$0xff] }
 0x57e   : > { %19327 = vmatprep.mubr.msk.f32.mxu0 %vm371_vm1, %v24994_v45  ;;  %20174 = vmatprep.mubr.msk.f32.mxu1 %vm371_vm1, %v14638_v53  ;;  %v14642_v45 = vld [vmem:[#allocation4 + $0xf3] sm:$0xff] }
 0x581   : > { %19328 = vmatmul.mubr.msk.f32.gmra.mrb[106].mxu0 %vm371_vm1, %v25000_v55  ;;  %20175 = vmatmul.mubr.msk.f32.gmra.mrb[8].mxu1 %vm371_vm1, %v14639_v30  ;;  %v14643_v55 = vld [vmem:[#allocation4 + $0xfb] sm:$0xff]  ;;  %v25399_v30 = vpop.permute.xlu1 %15732 }
 0x582   : > { %19330 = vmatprep.mubr.msk.f32.mxu0 %vm371_vm1, %v25008_v37  ;;  %20177 = vmatprep.mubr.msk.f32.mxu1 %vm371_vm1, %v14640_v7  ;;  %v14644_v37 = vld [vmem:[#allocation4 + $0x10b] sm:$0xff] }
 0x585   : > { %19331 = vmatmul.mubr.msk.f32.gmra.mrb[108].mxu0 %vm371_vm1, %v25014_v43  ;;  %20178 = vmatmul.mubr.msk.f32.gmra.mrb[10].mxu1 %vm371_vm1, %v14641_v24  ;;  %v14645_v43 = vld [vmem:[#allocation4 + $0x113] sm:$0xff] }
 0x586   : > { %19333 = vmatprep.mubr.msk.f32.mxu0 %vm371_vm1, %v25022_v12  ;;  %20180 = vmatprep.mubr.msk.f32.mxu1 %vm371_vm1, %v14642_v45  ;;  %v14646_v12 = vld [vmem:[#allocation4 + $0x123] sm:$0xff] }
 0x589   : > { %19334 = vmatmul.mubr.msk.f32.gmra.mrb[110].mxu0 %vm371_vm1, %v25028_v17  ;;  %20181 = vmatmul.mubr.msk.f32.gmra.mrb[12].mxu1 %vm371_vm1, %v14643_v55  ;;  %v14647_v17 = vld [vmem:[#allocation4 + $0x12b] sm:$0xff]  ;;  %v25401_v55 = vpop.permute.xlu1 %15736 }
 0x58a   : > { %19336 = vmatprep.mubr.msk.f32.mxu0 %vm371_vm1, %v25036_v63  ;;  %20183 = vmatprep.mubr.msk.f32.mxu1 %vm371_vm1, %v14644_v37  ;;  %v14648_v63 = vld [vmem:[#allocation4 + $0x13b] sm:$0xff] }
 0x58d   : > { %19337 = vmatmul.mubr.msk.f32.gmra.mrb[112].mxu0 %vm371_vm1, %v25042_v4  ;;  %20184 = vmatmul.mubr.msk.f32.gmra.mrb[14].mxu1 %vm371_vm1, %v14645_v43  ;;  %v14649_v4 = vld [vmem:[#allocation4 + $0x143] sm:$0xff] }
 0x58e   : > { %19339 = vmatprep.mubr.msk.f32.mxu0 %vm371_vm1, %v25050_v47  ;;  %20186 = vmatprep.mubr.msk.f32.mxu1 %vm371_vm1, %v14646_v12  ;;  %v14650_v47 = vld [vmem:[#allocation4 + $0x153] sm:$0xff] }
 0x591   : > { %19340 = vmatmul.mubr.msk.f32.gmra.mrb[114].mxu0 %vm371_vm1, %v25056_v5  ;;  %20187 = vmatmul.mubr.msk.f32.gmra.mrb[16].mxu1 %vm371_vm1, %v14647_v17  ;;  %v14651_v5 = vld [vmem:[#allocation4 + $0x15b] sm:$0xff]  ;;  %v25409_v17 = vpop.permute.xlu1 %15740 }
 0x592   : > { %19342 = vmatprep.mubr.msk.f32.mxu0 %vm371_vm1, %v25064_v59  ;;  %20189 = vmatprep.mubr.msk.f32.mxu1 %vm371_vm1, %v14648_v63  ;;  %v14652_v59 = vld [vmem:[#allocation4 + $0x16b] sm:$0xff] }
 0x595   : > { %19343 = vmatmul.mubr.msk.f32.gmra.mrb[116].mxu0 %vm371_vm1, %v25070_v34  ;;  %20190 = vmatmul.mubr.msk.f32.gmra.mrb[18].mxu1 %vm371_vm1, %v14649_v4  ;;  %v14653_v34 = vld [vmem:[#allocation4 + $0x173] sm:$0xff] }
 0x596   : > { %19345 = vmatprep.mubr.msk.f32.mxu0 %vm371_vm1, %v25078_v57  ;;  %20192 = vmatprep.mubr.msk.f32.mxu1 %vm371_vm1, %v14650_v47  ;;  %v14654_v57 = vld [vmem:[#allocation4 + $0x183] sm:$0xff] }
 0x599   : > { %19346 = vmatmul.mubr.msk.f32.gmra.mrb[118].mxu0 %vm371_vm1, %v25084_v35  ;;  %20193 = vmatmul.mubr.msk.f32.gmra.mrb[20].mxu1 %vm371_vm1, %v14651_v5  ;;  %v14655_v35 = vld [vmem:[#allocation4 + $0x18b] sm:$0xff]  ;;  %v25417_v5 = vpop.permute.xlu1 %15744 }
 0x59a   : > { %19348 = vmatprep.mubr.msk.f32.mxu0 %vm371_vm1, %v25092_v39  ;;  %20195 = vmatprep.mubr.msk.f32.mxu1 %vm371_vm1, %v14652_v59  ;;  %v14656_v39 = vld [vmem:[#allocation4 + $0x19b] sm:$0xff] }
 0x59d   : > { %19349 = vmatmul.mubr.msk.f32.gmra.mrb[120].mxu0 %vm371_vm1, %v25098_v1  ;;  %20196 = vmatmul.mubr.msk.f32.gmra.mrb[22].mxu1 %vm371_vm1, %v14653_v34  ;;  %v14658_v1 = vld [vmem:[#allocation4 + $0x1b3] sm:$0xff] }
 0x59e   : > { %19351 = vmatprep.mubr.msk.f32.mxu0 %vm371_vm1, %v25106_v44  ;;  %20198 = vmatprep.mubr.msk.f32.mxu1 %vm371_vm1, %v14654_v57  ;;  %v14659_v44 = vld [vmem:[#allocation4 + $0x1bb] sm:$0xff] }
 0x5a1   : > { %19352 = vmatmul.mubr.msk.f32.gmra.mrb[122].mxu0 %vm371_vm1, %v25112_v38  ;;  %20199 = vmatmul.mubr.msk.f32.gmra.mrb[24].mxu1 %vm371_vm1, %v14655_v35  ;;  %v14660_v38 = vld [vmem:[#allocation4 + $0x1cb] sm:$0xff]  ;;  %v25425_v35 = vpop.permute.xlu1 %15748 }
 0x5a2   : > { %19354 = vmatprep.mubr.msk.f32.mxu0 %vm371_vm1, %v25120_v8  ;;  %20201 = vmatprep.mubr.msk.f32.mxu1 %vm371_vm1, %v14656_v39  ;;  %v14661_v8 = vld [vmem:[#allocation4 + $0x1d3] sm:$0xff] }
 0x5a5   : > { %19355 = vmatmul.mubr.msk.f32.gmra.mrb[124].mxu0 %vm371_vm1, %v25126_v25  ;;  %20202 = vmatmul.mubr.msk.f32.gmra.mrb[26].mxu1 %vm371_vm1, %v14657_v28  ;;  %v15020_v25 = vld [vmem:[#allocation4 + $0x64] sm:$0xff] }
 0x5a6   : > { %19357 = vmatprep.mubr.msk.f32.mxu0 %vm371_vm1, %v25134_v10  ;;  %20204 = vmatprep.mubr.msk.f32.mxu1 %vm371_vm1, %v14658_v1  ;;  %v15022_v10 = vld [vmem:[#allocation4 + $0x7c] sm:$0xff] }
 0x5a9   : > { %19358 = vmatmul.mubr.msk.f32.gmra.mrb[126].mxu0 %vm371_vm1, %v26098_v0  ;;  %20205 = vmatmul.mubr.msk.f32.gmra.mrb[28].mxu1 %vm371_vm1, %v14659_v44  ;;  %v25433_v44 = vpop.permute.xlu1 %15752 }
 0x5aa   : > { %20207 = vmatprep.mubr.msk.f32.mxu1 %vm371_vm1, %v14660_v38 }
 0x5ad   : > { %20208 = vmatmul.mubr.msk.f32.gmra.mrb[30].mxu1 %vm371_vm1, %v14661_v8 }
 0x5ae   : > { %20212 = vmatprep.mubr.msk.f32.mxu1 %vm371_vm1, %v15020_v25  ;;  %v25441_v25 = vpop.permute.xlu1 %15756 }
 0x5b1   : > { %20213 = vmatmul.mubr.msk.f32.vlgmr.msra.gmra.mrb[0].mxu1 %vm371_vm1, %v15021_v50 }
 0x5b2   : > { %20215 = vmatprep.mubr.msk.f32.mxu1 %vm371_vm1, %v15022_v10 }
 0x5b5   : > { %20216 = vmatmul.mubr.msk.f32.gmra.mrb[2].mxu1 %vm371_vm1, %v15023_v26 }
 0x5b6   : > { %20218 = vmatprep.mubr.msk.f32.mxu1 %vm371_vm1, %v15024_v14  ;;  %v25449_v14 = vpop.permute.xlu1 %15760 }
 0x5b9   : > { %20219 = vmatmul.mubr.msk.f32.gmra.mrb[4].mxu1 %vm371_vm1, %v15025_v49 }
 0x5ba   : > { %20221 = vmatprep.mubr.msk.f32.mxu1 %vm371_vm1, %v15026_v41 }
 0x5bd   : > { %20222 = vmatmul.mubr.msk.f32.gmra.mrb[6].mxu1 %vm371_vm1, %v15027_v9 }
 0x5be   : > { %20224 = vmatprep.mubr.msk.f32.mxu1 %vm371_vm1, %v15028_v2  ;;  %v25457_v2 = vpop.permute.xlu1 %15764 }
 0x5c1   : > { %20225 = vmatmul.mubr.msk.f32.gmra.mrb[8].mxu1 %vm371_vm1, %v15029_v60 }
 0x5c2   : > { %20227 = vmatprep.mubr.msk.f32.mxu1 %vm371_vm1, %v15030_v58 }
 0x5c5   : > { %20228 = vmatmul.mubr.msk.f32.gmra.mrb[10].mxu1 %vm371_vm1, %v15031_v29 }
 0x5c6   : > { %20230 = vmatprep.mubr.msk.f32.mxu1 %vm371_vm1, %v15032_v52  ;;  %v25465_v52 = vpop.permute.xlu1 %15768 }
 0x5c9   : > { %20231 = vmatmul.mubr.msk.f32.gmra.mrb[12].mxu1 %vm371_vm1, %v15033_v40 }
 0x5ca   : > { %20233 = vmatprep.mubr.msk.f32.mxu1 %vm371_vm1, %v15034_v21 }
 0x5cd   : > { %20234 = vmatmul.mubr.msk.f32.gmra.mrb[14].mxu1 %vm371_vm1, %v15035_v46  ;;  %v25474_v46 = vld [vmem:[%s25928_s6] ss:$0 sm:$0xff] }
 0x5ce   : > { %20236 = vmatprep.mubr.msk.f32.mxu1 %vm371_vm1, %v15036_v54  ;;  %v25476_v54 = vpop.permute.xlu1 %15772 }
 0x5d1   : > { %20237 = vmatmul.mubr.msk.f32.gmra.mrb[16].mxu1 %vm371_vm1, %v15037_v62 }
 0x5d2   : > { %20239 = vmatprep.mubr.msk.f32.mxu1 %vm371_vm1, %v15038_v16 }
 0x5d5   : > { %20240 = vmatmul.mubr.msk.f32.gmra.mrb[18].mxu1 %vm371_vm1, %v15039_v23 }
 0x5d6   : > { %20242 = vmatprep.mubr.msk.f32.mxu1 %vm371_vm1, %v15040_v48 }
 0x5d9   : > { %20243 = vmatmul.mubr.msk.f32.gmra.mrb[20].mxu1 %vm371_vm1, %v15041_v15 }
 0x5da   : > { %20245 = vmatprep.mubr.msk.f32.mxu1 %vm371_vm1, %v15042_v22 }
 0x5dd   : > { %20246 = vmatmul.mubr.msk.f32.gmra.mrb[22].mxu1 %vm371_vm1, %v15043_v18  ;;  %v25480_v18 = vpop.permute.xlu1 %15776 }
 0x5de   : > { %20248 = vmatprep.mubr.msk.f32.mxu1 %vm371_vm1, %v15044_v19 }
 0x5e1   : > { %20249 = vmatmul.mubr.msk.f32.gmra.mrb[24].mxu1 %vm371_vm1, %v15045_v3 }
 0x5e2   : > { %20251 = vmatprep.mubr.msk.f32.mxu1 %vm371_vm1, %v15046_v13 }
 0x5e5   : > { %20252 = vmatmul.mubr.msk.f32.gmra.mrb[26].mxu1 %vm371_vm1, %v15047_v31 }
 0x5e6   : > { %20254 = vmatprep.mubr.msk.f32.mxu1 %vm371_vm1, %v15048_v6 }
 0x5e9   : > { %20255 = vmatmul.mubr.msk.f32.gmra.mrb[28].mxu1 %vm371_vm1, %v15049_v36 }
 0x5ea   : > { %20257 = vmatprep.mubr.msk.f32.mxu1 %vm371_vm1, %v15050_v27 }
 0x5ed   : > { %20258 = vmatmul.mubr.msk.f32.gmra.mrb[30].mxu1 %vm371_vm1, %v15051_v33 }
 0x640   : > { %v19314_v51 = vpop.f32.mrb[96].mxu0 }
 0x641   : > { %v8197_v11 = vpop.f32.mrb[97].mxu0  ;;  %v20292_v62 = vadd.f32 %v19314_v51, %v25474_v46 }
 0x642   : > { %v20294_v16 = vadd.f32 %v25474_v46, %v8197_v11 }
 0x644   : > { %v19317_v53 = vpop.f32.mrb[98].mxu0 }
 0x645   : > { %v8207_v7 = vpop.f32.mrb[99].mxu0  ;;  %v20296_v19 = vadd.f32 %v19317_v53, %v25474_v46 }
 0x646   : > { %v20298_v13 = vadd.f32 %v25474_v46, %v8207_v7 }
 0x648   : > { %v19320_v24 = vpop.f32.mrb[100].mxu0 }
 0x649   : > { %v8217_v45 = vpop.f32.mrb[101].mxu0  ;;  %v20300_v51 = vadd.f32 %v19320_v24, %v25474_v46 }
 0x64c   : > { %v25403_v37 = vpop.f32.mrb[102].mxu0 }
 0x64d   : > { %v25405_v43 = vpop.f32.mrb[103].mxu0 }
 0x64e   : > { %v20306_v24 = vadd.f32 %v25474_v46, %v25405_v43 }
 0x650   : > { %v25407_v12 = vpop.f32.mrb[104].mxu0 }
 0x651   : > { %v25411_v63 = vpop.f32.mrb[105].mxu0 }
 0x654   : > { %v25413_v4 = vpop.f32.mrb[106].mxu0 }
 0x655   : > { %v25415_v47 = vpop.f32.mrb[107].mxu0 }
 0x658   : > { %v25419_v59 = vpop.f32.mrb[108].mxu0 }
 0x659   : > { %v25421_v34 = vpop.f32.mrb[109].mxu0 }
 0x65c   : > { %v25423_v57 = vpop.f32.mrb[110].mxu0 }
 0x65d   : > { %v25427_v39 = vpop.f32.mrb[111].mxu0 }
 0x660   : > { %v25429_v1 = vpop.f32.mrb[112].mxu0 }
 0x661   : > { %v25431_v28 = vpop.f32.mrb[113].mxu0 }
 0x664   : > { %v25435_v38 = vpop.f32.mrb[114].mxu0 }
 0x665   : > { %v25437_v0 = vpop.f32.mrb[115].mxu0 }
 0x668   : > { %v25439_v8 = vpop.f32.mrb[116].mxu0 }
 0x669   : > { %v25443_v50 = vpop.f32.mrb[117].mxu0 }
 0x66c   : > { %v25445_v10 = vpop.f32.mrb[118].mxu0 }
 0x66d   : > { %v25447_v26 = vpop.f32.mrb[119].mxu0 }
 0x670   : > { %v25451_v49 = vpop.f32.mrb[120].mxu0 }
 0x671   : > { %v25453_v41 = vpop.f32.mrb[121].mxu0 }
 0x674   : > { %v25455_v9 = vpop.f32.mrb[122].mxu0 }
 0x675   : > { %v25459_v60 = vpop.f32.mrb[123].mxu0 }
 0x678   : > { %v25461_v58 = vpop.f32.mrb[124].mxu0 }
 0x679   : > { %v25463_v29 = vpop.f32.mrb[125].mxu0 }
 0x67c   : > { %v25467_v40 = vpop.f32.mrb[126].mxu0 }
 0x67d   : > { %v25469_v21 = vpop.f32.mrb[127].mxu0 }
 0x684   : > { %v20214_v23 = vpop.f32.mrb[0].mxu1 }
 0x685   : > { %v20293_v48 = vadd.f32 %v20292_v62, %v20214_v23  ;;  %v15219_v15 = vpop.f32.mrb[1].mxu1  ;;  %v20302_v62 = vadd.f32 %v25474_v46, %v8217_v45  ;;  %v25488_v23 = vpop.permute.xlu1 %15780 }
 0x686   : > { %v20295_v22 = vadd.f32 %v20294_v16, %v15219_v15 }
 0x687   : > { %v15411_v3 = vmax.f32 %v20293_v48, 0.0 }
 0x688   : > { %v15410_v6 = vmax.f32 %v20295_v22, 0.0  ;;  %v20217_v31 = vpop.f32.mrb[2].mxu1  ;;  %v20304_v22 = vadd.f32 %v25403_v37, %v25474_v46  ;;  %v20310_v37 = vadd.f32 %v25474_v46, %v25411_v63 }
 0x689   : > { %v20297_v36 = vadd.f32 %v20296_v19, %v20217_v31  ;;  %v15229_v27 = vpop.f32.mrb[3].mxu1  ;;  %15604 = vrot.lane.b32.xlu1 %v15411_v3, %s21489_s22 }
 0x68a   : > { %v20299_v33 = vadd.f32 %v20298_v13, %v15229_v27  ;;  %15602 = vrot.lane.b32.xlu0 %v15410_v6, %s21489_s22  ;;  %v20308_v27 = vadd.f32 %v25407_v12, %v25474_v46  ;;  %v20314_v12 = vadd.f32 %v25474_v46, %v25415_v47 }
 0x68b   : > { %v15413_v11 = vmax.f32 %v20297_v36, 0.0  ;;  %v25498_v36 = vpop.permute.xlu1 %15784 }
 0x68c   : > { %v15412_v16 = vmax.f32 %v20299_v33, 0.0  ;;  %v20220_v53 = vpop.f32.mrb[4].mxu1 }
 0x68d   : > { %v20301_v7 = vadd.f32 %v20300_v51, %v20220_v53  ;;  %v15239_v48 = vpop.f32.mrb[5].mxu1  ;;  %15608 = vrot.lane.b32.xlu1 %v15413_v11, %s21489_s22  ;;  %v20312_v53 = vadd.f32 %v25413_v4, %v25474_v46  ;;  %v20318_v4 = vadd.f32 %v25474_v46, %v25421_v34 }
 0x68e   : > { %v20303_v15 = vadd.f32 %v20302_v62, %v15239_v48  ;;  %15606 = vrot.lane.b32.xlu0 %v15412_v16, %s21489_s22 }
 0x68f   : > { %v15415_v19 = vmax.f32 %v20301_v7, 0.0 }
 0x690   : > { %v15414_v3 = vmax.f32 %v20303_v15, 0.0  ;;  %v20223_v45 = vpop.f32.mrb[6].mxu1 }
 0x691   : > { %v20305_v13 = vadd.f32 %v20304_v22, %v20223_v45  ;;  %v15249_v6 = vpop.f32.mrb[7].mxu1  ;;  %15612 = vrot.lane.b32.xlu1 %v15415_v19, %s21489_s22  ;;  %v25510_v22 = vpop.permute.xlu1 %15788 }
 0x692   : > { %v20307_v31 = vadd.f32 %v20306_v24, %v15249_v6  ;;  %15610 = vrot.lane.b32.xlu0 %v15414_v3, %s21489_s22  ;;  %v20316_v3 = vadd.f32 %v25419_v59, %v25474_v46  ;;  %v20322_v59 = vadd.f32 %v25474_v46, %v25427_v39 }
 0x693   : > { %v15417_v33 = vmax.f32 %v20305_v13, 0.0 }
 0x694   : > { %v15416_v51 = vmax.f32 %v20307_v31, 0.0  ;;  %v20226_v43 = vpop.f32.mrb[8].mxu1 }
 0x695   : > { %v20309_v11 = vadd.f32 %v20308_v27, %v20226_v43  ;;  %v15259_v62 = vpop.f32.mrb[9].mxu1  ;;  %15616 = vrot.lane.b32.xlu1 %v15417_v33, %s21489_s22  ;;  %v25518_v6 = vpop.permute.xlu1 %15476 }
 0x696   : > { %v20311_v16 = vadd.f32 %v20310_v37, %v15259_v62  ;;  %15614 = vrot.lane.b32.xlu0 %v15416_v51, %s21489_s22  ;;  %v20320_v37 = vadd.f32 %v25423_v57, %v25474_v46  ;;  %v20326_v57 = vadd.f32 %v25474_v46, %v25431_v28 }
 0x697   : > { %v15419_v7 = vmax.f32 %v20309_v11, 0.0 }
 0x698   : > { %v15418_v48 = vmax.f32 %v20311_v16, 0.0  ;;  %v20229_v15 = vpop.f32.mrb[10].mxu1 }
 0x699   : > { %v20313_v63 = vadd.f32 %v20312_v53, %v20229_v15  ;;  %v15269_v19 = vpop.f32.mrb[11].mxu1  ;;  %15620 = vrot.lane.b32.xlu1 %v15419_v7, %s21489_s22  ;;  %v25528_v53 = vpop.permute.xlu1 %15480  ;;  %v20324_v7 = vadd.f32 %v25429_v1, %v25474_v46  ;;  %v20330_v1 = vadd.f32 %v25474_v46, %v25437_v0 }
 0x69a   : > { %v20315_v24 = vadd.f32 %v20314_v12, %v15269_v19  ;;  %15618 = vrot.lane.b32.xlu0 %v15418_v48, %s21489_s22 }
 0x69b   : > { %v15421_v45 = vmax.f32 %v20313_v63, 0.0 }
 0x69c   : > { %v15420_v13 = vmax.f32 %v20315_v24, 0.0  ;;  %v20232_v47 = vpop.f32.mrb[12].mxu1  ;;  %v20328_v24 = vadd.f32 %v25435_v38, %v25474_v46  ;;  %v20334_v38 = vadd.f32 %v25474_v46, %v25443_v50 }
 0x69d   : > { %v20317_v31 = vadd.f32 %v20316_v3, %v20232_v47  ;;  %v15279_v27 = vpop.f32.mrb[13].mxu1  ;;  %15624 = vrot.lane.b32.xlu1 %v15421_v45, %s21489_s22 }
 0x69e   : > { %v20319_v33 = vadd.f32 %v20318_v4, %v15279_v27  ;;  %15622 = vrot.lane.b32.xlu0 %v15420_v13, %s21489_s22  ;;  %v25540_v13 = vpop.permute.xlu1 %15484  ;;  %v20332_v27 = vadd.f32 %v25439_v8, %v25474_v46  ;;  %v20338_v8 = vadd.f32 %v25474_v46, %v25447_v26 }
 0x69f   : > { %v15423_v51 = vmax.f32 %v20317_v31, 0.0 }
 0x6a0   : > { %v15422_v43 = vmax.f32 %v20319_v33, 0.0  ;;  %v20235_v34 = vpop.f32.mrb[14].mxu1 }
 0x6a1   : > { %v20321_v11 = vadd.f32 %v20320_v37, %v20235_v34  ;;  %v15289_v62 = vpop.f32.mrb[15].mxu1  ;;  %15628 = vrot.lane.b32.xlu1 %v15423_v51, %s21489_s22 }
 0x6a2   : > { %v20323_v16 = vadd.f32 %v20322_v59, %v15289_v62  ;;  %15626 = vrot.lane.b32.xlu0 %v15422_v43, %s21489_s22  ;;  %v25550_v34 = vpop.permute.xlu1 %15488 }
 0x6a3   : > { %v15425_v12 = vmax.f32 %v20321_v11, 0.0  ;;  %v20336_v11 = vadd.f32 %v25445_v10, %v25474_v46  ;;  %v20342_v10 = vadd.f32 %v25474_v46, %v25453_v41 }
 0x6a4   : > { %v15424_v48 = vmax.f32 %v20323_v16, 0.0  ;;  %v20238_v39 = vpop.f32.mrb[16].mxu1 }
 0x6a5   : > { %v20325_v15 = vadd.f32 %v20324_v7, %v20238_v39  ;;  %v15299_v63 = vpop.f32.mrb[17].mxu1  ;;  %15632 = vrot.lane.b32.xlu1 %v15425_v12, %s21489_s22 }
 0x6a6   : > { %v20327_v19 = vadd.f32 %v20326_v57, %v15299_v63  ;;  %15630 = vrot.lane.b32.xlu0 %v15424_v48, %s21489_s22  ;;  %v20340_v48 = vadd.f32 %v25451_v49, %v25474_v46  ;;  %v20346_v49 = vadd.f32 %v25474_v46, %v25459_v60 }
 0x6a7   : > { %v15427_v3 = vmax.f32 %v20325_v15, 0.0 }
 0x6a8   : > { %v15426_v45 = vmax.f32 %v20327_v19, 0.0  ;;  %v20241_v4 = vpop.f32.mrb[18].mxu1  ;;  %v25562_v19 = vpop.permute.xlu1 %15492 }
 0x6a9   : > { %v20329_v28 = vadd.f32 %v20328_v24, %v20241_v4  ;;  %v15309_v47 = vpop.f32.mrb[19].mxu1  ;;  %15636 = vrot.lane.b32.xlu1 %v15427_v3, %s21489_s22 }
 0x6aa   : > { %v20331_v31 = vadd.f32 %v20330_v1, %v15309_v47  ;;  %15634 = vrot.lane.b32.xlu0 %v15426_v45, %s21489_s22  ;;  %v20344_v1 = vadd.f32 %v25455_v9, %v25474_v46  ;;  %v20350_v9 = vadd.f32 %v25474_v46, %v25463_v29 }
 0x6ab   : > { %v15429_v33 = vmax.f32 %v20329_v28, 0.0 }
 0x6ac   : > { %v15428_v37 = vmax.f32 %v20331_v31, 0.0  ;;  %v20244_v0 = vpop.f32.mrb[20].mxu1 }
 0x6ad   : > { %v20333_v51 = vadd.f32 %v20332_v27, %v20244_v0  ;;  %v15319_v59 = vpop.f32.mrb[21].mxu1  ;;  %15640 = vrot.lane.b32.xlu1 %v15429_v33, %s21489_s22  ;;  %v25572_v27 = vpop.permute.xlu1 %15496  ;;  %v20348_v33 = vadd.f32 %v25461_v58, %v25474_v46  ;;  %v20354_v58 = vadd.f32 %v25474_v46, %v25469_v21 }
 0x6ae   : > { %v20335_v43 = vadd.f32 %v20334_v38, %v15319_v59  ;;  %15638 = vrot.lane.b32.xlu0 %v15428_v37, %s21489_s22 }
 0x6af   : > { %v15431_v62 = vmax.f32 %v20333_v51, 0.0 }
 0x6b0   : > { %v15430_v16 = vmax.f32 %v20335_v43, 0.0  ;;  %v20247_v50 = vpop.f32.mrb[22].mxu1  ;;  %v20352_v43 = vadd.f32 %v25467_v40, %v25474_v46  ;;  %v26099_v40 = vld [vmem:[#allocation40_spill] sm:$0xff] }
 0x6b1   : > { %v20337_v7 = vadd.f32 %v20336_v11, %v20247_v50  ;;  %v15329_v12 = vpop.f32.mrb[23].mxu1  ;;  %15644 = vrot.lane.b32.xlu1 %v15431_v62, %s21489_s22  ;;  %v1693_v21 = vmax.f32 %v26099_v40, 0.0  ;;  %v26110_v40 = vld [vmem:[#allocation65_spill] sm:$0xff] }
 0x6b2   : > { %v20339_v57 = vadd.f32 %v20338_v8, %v15329_v12  ;;  %15642 = vrot.lane.b32.xlu0 %v15430_v16, %s21489_s22  ;;  %v25584_v16 = vpop.permute.xlu1 %15500 }
 0x6b3   : > { %v15433_v39 = vmax.f32 %v20337_v7, 0.0 }
 0x6b4   : > { %v15432_v15 = vmax.f32 %v20339_v57, 0.0  ;;  %v20250_v63 = vpop.f32.mrb[24].mxu1 }
 0x6b5   : > { %v20341_v26 = vadd.f32 %v20340_v48, %v20250_v63  ;;  %v15339_v24 = vpop.f32.mrb[25].mxu1  ;;  %15648 = vrot.lane.b32.xlu1 %v15433_v39, %s21489_s22  ;;  %v26100_v48 = vld [vmem:[#allocation41_spill] sm:$0xff] }
 0x6b6   : > { %v20343_v3 = vadd.f32 %v20342_v10, %v15339_v24  ;;  %15646 = vrot.lane.b32.xlu0 %v15432_v15, %s21489_s22  ;;  %v25591_v46 = vpop.permute.xlu1 %15504  ;;  %v1692_v39 = vmax.f32 %v26100_v48, 0.0 }
 0x6b7   : > { %v15435_v45 = vmax.f32 %v20341_v26, 0.0 }
 0x6b8   : > { %v15434_v4 = vmax.f32 %v20343_v3, 0.0  ;;  %v20253_v41 = vpop.f32.mrb[26].mxu1 }
 0x6b9   : > { %v20345_v28 = vadd.f32 %v20344_v1, %v20253_v41  ;;  %v15349_v47 = vpop.f32.mrb[27].mxu1  ;;  %15652 = vrot.lane.b32.xlu1 %v15435_v45, %s21489_s22 }
 0x6ba   : > { %v20347_v31 = vadd.f32 %v20346_v49, %v15349_v47  ;;  %15650 = vrot.lane.b32.xlu0 %v15434_v4, %s21489_s22  ;;  %v25596_v10 = vpop.permute.xlu1 %15508  ;;  %v26101_v49 = vld [vmem:[#allocation21_spill] sm:$0xff]  ;;  %v26103_v47 = vld [vmem:[#allocation19_spill] sm:$0xff] }
 0x6bb   : > { %v15437_v38 = vmax.f32 %v20345_v28, 0.0  ;;  %v15828_v4 = vsel %vm15826_vm7, %v26101_v49, %v25518_v6  ;;  %v26102_v28 = vld [vmem:[#allocation63_spill] sm:$0xff]  ;;  %v26104_v6 = vld [vmem:[#allocation48_spill] sm:$0xff] }
 0x6bc   : > { %v15436_v37 = vmax.f32 %v20347_v31, 0.0  ;;  %v20256_v60 = vpop.f32.mrb[28].mxu1  ;;  %v15827_v31 = vsel %vm15826_vm7, %v26103_v47, %v26102_v28  ;;  %v26113_v28 = vld [vmem:[#allocation11_spill] sm:$0xff] }
 0x6bd   : > { %v20349_v0 = vadd.f32 %v20348_v33, %v20256_v60  ;;  %v15359_v51 = vpop.f32.mrb[29].mxu1  ;;  %15656 = vrot.lane.b32.xlu1 %v15437_v38, %s21489_s22  ;;  %v15834_v47 = vsel %vm15826_vm7, %v26113_v28, %v25550_v34  ;;  %v26116_v34 = vld [vmem:[#allocation51_spill] sm:$0xff]  ;;  %v26126_v28 = vld [vmem:[#allocation45_spill] sm:$0xff] }
 0x6be   : > { %v20351_v59 = vadd.f32 %v20350_v9, %v15359_v51  ;;  %15654 = vrot.lane.b32.xlu0 %v15436_v37, %s21489_s22  ;;  %v25598_v15 = vpop.permute.xlu1 %15512 }
 0x6bf   : > { %v15439_v11 = vmax.f32 %v20349_v0, 0.0  ;;  %v26105_v0 = vld [vmem:[#allocation18_spill] sm:$0xff] }
 0x6c0   : > { %v15438_v62 = vmax.f32 %v20351_v59, 0.0  ;;  %v20259_v8 = vpop.f32.mrb[30].mxu1  ;;  %v15830_v51 = vsel %vm15826_vm7, %v26105_v0, %v25528_v53  ;;  %v26106_v59 = vld [vmem:[#allocation64_spill] sm:$0xff]  ;;  %v26108_v53 = vld [vmem:[#allocation49_spill] sm:$0xff] }
 0x6c1   : > { %v20353_v29 = vadd.f32 %v20352_v43, %v20259_v8  ;;  %v15369_v50 = vpop.f32.mrb[31].mxu1  ;;  %15660 = vrot.lane.b32.xlu1 %v15439_v11, %s21489_s22  ;;  %v26107_v43 = vld [vmem:[#allocation8_spill] sm:$0xff] }
 0x6c2   : > { %v20355_v7 = vadd.f32 %v20354_v58, %v15369_v50  ;;  %15658 = vrot.lane.b32.xlu0 %v15438_v62, %s21489_s22  ;;  %v25600_v63 = vpop.permute.xlu1 %15516  ;;  %v15829_v11 = vsel %vm15826_vm7, %v26107_v43, %v26106_v59  ;;  %v26118_v43 = vld [vmem:[#allocation43_spill] sm:$0xff] }
 0x6c3   : > { %v15441_v12 = vmax.f32 %v20353_v29, 0.0 }
 0x6c4   : > { %v15440_v57 = vmax.f32 %v20355_v7, 0.0  ;;  %v26109_v7 = vld [vmem:[#allocation20_spill] sm:$0xff] }
 0x6c5   : > { %15664 = vrot.lane.b32.xlu1 %v15441_v12, %s21489_s22  ;;  %v15832_v12 = vsel %vm15826_vm7, %v26109_v7, %v25540_v13  ;;  %v26112_v13 = vld [vmem:[#allocation50_spill] sm:$0xff] }
 0x6c6   : > { %15662 = vrot.lane.b32.xlu0 %v15440_v57, %s21489_s22  ;;  %v25602_v26 = vpop.permute.xlu1 %15520  ;;  %s21423_s22 = sshll.u32 %s21490_s21, 4  ;;  %s21424_s22 = int_to_ptr.vmem [resolvable:$false] %s21423_s22 }
 0x6c9   : > { %15792 = vrot.lane.b32.xlu1 %v1693_v21, %s21487_s17  ;;  %v26111_v21 = vld [vmem:[#allocation9_spill] sm:$0xff] }
 0x6ca   : > { %15790 = vrot.lane.b32.xlu0 %v1692_v39, %s21487_s17  ;;  %v25604_v24 = vpop.permute.xlu1 %15524  ;;  %s25625_s17 = scalar_lea.vmem [#allocation5], %s16038_s24  ;;  %v15831_v48 = vsel %vm15826_vm7, %v26111_v21, %v26110_v40  ;;  %v26123_v40 = vld [vmem:[#allocation14_spill] sm:$0xff]  ;;  %s21425_s24 = scalar_lea.vmem %s21424_s22, 8192 }
 0x6cb   : > { %s15972_s26 = sshll.u32 %s25625_s17, 4  ;;  %s25871_s26 = int_to_ptr.vmem [resolvable:$true] %s15972_s26 }
 0x6cc   : > { %s21419_s16 = scalar_lea.vmem %s25871_s26, 4096  ;;  %p21426_p0 = scmp.lt.s32.totalorder %s25871_s26, %s21424_s22 }
 0x6cd   : > { %p21420_p11 = scmp.ne.s32.totalorder %s25871_s26, %s21419_s16  ;;  %p21427_p1 = scmp.lt.s32.totalorder %s21425_s24, %s21419_s16 }
 0x6ce   : > { %v25606_v3 = vpop.permute.xlu1 %15528 }
 0x6cf   : > { %p21421_p12 = pnand %p21420_p11, %p21580_p5  ;;  %p21428_p2 = por %p21427_p1, %p21426_p0 }
 0x6d1   : > { %p21422_p13 = pneg %p21421_p12 }
 0x6d2   : > { %v25608_v1 = vpop.permute.xlu1 %15532 }
 0x6d3   : > { %p21429_p3 = pnand %p21428_p2, %p21422_p13 }
 0x6d6   : > { %v25611_v45 = vpop.permute.xlu1 %15536 }
 0x6fb   : > { %v15605_v41 = vpop.permute.xlu1 %15604 }
 0x6fc   : > { %v15861_v33 = vsel %vm15859_vm8, %v15828_v4, %v15605_v41  ;;  %v15603_v38 = vpop.permute.xlu0 %15602 }
 0x6fd   : > { %v15894_v9 = vsel %vm15892_vm9, %v15861_v33, %v25399_v30  ;;  %v15860_v37 = vsel %vm15859_vm8, %v15827_v31, %v15603_v38  ;;  %v26114_v33 = vld [vmem:[#allocation42_spill] sm:$0xff] }
 0x6fe   : > { %15927 = vst.msk [vmem:[%s25625_s17 + $0x8] sm:$0xff] %vm15925_vm10, %v15894_v9  ;;  %v15893_v60 = vsel %vm15892_vm9, %v15860_v37, %v26104_v6  ;;  %v26115_v38 = vld [vmem:[#allocation10_spill] sm:$0xff] }
 0x6ff   : > { %15926 = vst.msk [vmem:[%s25625_s17] sm:$0xff] %vm15925_vm10, %v15893_v60  ;;  %v15609_v30 = vpop.permute.xlu1 %15608  ;;  %v15833_v9 = vsel %vm15826_vm7, %v26115_v38, %v26114_v33 }
 0x700   : > { %v15863_v58 = vsel %vm15859_vm8, %v15830_v51, %v15609_v30  ;;  %v15607_v62 = vpop.permute.xlu0 %15606  ;;  %v26117_v51 = vld [vmem:[#allocation13_spill] sm:$0xff] }
 0x701   : > { %v15896_v8 = vsel %vm15892_vm9, %v15863_v58, %v25401_v55  ;;  %v15862_v29 = vsel %vm15859_vm8, %v15829_v11, %v15607_v62  ;;  %v15836_v30 = vsel %vm15826_vm7, %v26117_v51, %v25562_v19  ;;  %v26119_v11 = vld [vmem:[#allocation12_spill] sm:$0xff] }
 0x702   : > { %15929 = vst.msk [vmem:[%s25625_s17 + $0x18] sm:$0xff] %vm15925_vm10, %v15896_v8  ;;  %v15895_v50 = vsel %vm15892_vm9, %v15862_v29, %v26108_v53  ;;  %v15835_v58 = vsel %vm15826_vm7, %v26119_v11, %v26118_v43  ;;  %v26120_v19 = vld [vmem:[#allocation52_spill] sm:$0xff] }
 0x703   : > { %15928 = vst.msk [vmem:[%s25625_s17 + $0x10] sm:$0xff] %vm15925_vm10, %v15895_v50  ;;  %v15613_v57 = vpop.permute.xlu1 %15612  ;;  %v26121_v50 = vld [vmem:[#allocation15_spill] sm:$0xff] }
 0x704   : > { %v15865_v55 = vsel %vm15859_vm8, %v15832_v12, %v15613_v57  ;;  %v15611_v39 = vpop.permute.xlu0 %15610  ;;  %v15838_v7 = vsel %vm15826_vm7, %v26121_v50, %v25572_v27  ;;  %v26122_v57 = vld [vmem:[#allocation44_spill] sm:$0xff]  ;;  %v26124_v27 = vld [vmem:[#allocation53_spill] sm:$0xff] }
 0x705   : > { %v15898_v49 = vsel %vm15892_vm9, %v15865_v55, %v25409_v17  ;;  %v15864_v4 = vsel %vm15859_vm8, %v15831_v48, %v15611_v39  ;;  %v15837_v21 = vsel %vm15826_vm7, %v26123_v40, %v26122_v57  ;;  %v26137_v57 = vld [vmem:[#allocation27_spill] sm:$0xff] }
 0x706   : > { %15931 = vst.msk [vmem:[%s25625_s17 + $0x28] sm:$0xff] %vm15925_vm10, %v15898_v49  ;;  %v15897_v41 = vsel %vm15892_vm9, %v15864_v4, %v26112_v13  ;;  %v26125_v4 = vld [vmem:[#allocation16_spill] sm:$0xff]  ;;  %v15846_v40 = vsel %vm15826_vm7, %v26137_v57, %v25598_v15  ;;  %v26140_v15 = vld [vmem:[#allocation57_spill] sm:$0xff] }
 0x707   : > { %15930 = vst.msk [vmem:[%s25625_s17 + $0x20] sm:$0xff] %vm15925_vm10, %v15897_v41  ;;  %v15617_v31 = vpop.permute.xlu1 %15616  ;;  %v15840_v13 = vsel %vm15826_vm7, %v26125_v4, %v25584_v16  ;;  %v26128_v16 = vld [vmem:[#allocation54_spill] sm:$0xff]  ;;  %v26154_v57 = vld [vmem:[#allocation37_spill] sm:$0xff] }
 0x708   : > { %v15867_v17 = vsel %vm15859_vm8, %v15834_v47, %v15617_v31  ;;  %v15615_v37 = vpop.permute.xlu0 %15614  ;;  %v26127_v47 = vld [vmem:[#allocation22_spill] sm:$0xff] }
 0x709   : > { %v15900_v6 = vsel %vm15892_vm9, %v15867_v17, %v25417_v5  ;;  %v15866_v60 = vsel %vm15859_vm8, %v15833_v9, %v15615_v37  ;;  %v15839_v31 = vsel %vm15826_vm7, %v26127_v47, %v26126_v28  ;;  %v26129_v37 = vld [vmem:[#allocation23_spill] sm:$0xff]  ;;  %v26142_v47 = vld [vmem:[#allocation68_spill] sm:$0xff] }
 0x70a   : > { %15933 = vst.msk [vmem:[%s25625_s17 + $0x38] sm:$0xff] %vm15925_vm10, %v15900_v6  ;;  %v15899_v0 = vsel %vm15892_vm9, %v15866_v60, %v26116_v34  ;;  %v15842_v6 = vsel %vm15826_vm7, %v26129_v37, %v25591_v46  ;;  %v26130_v34 = vld [vmem:[#allocation46_spill] sm:$0xff]  ;;  %v26132_v46 = vld [vmem:[#allocation55_spill] sm:$0xff] }
 0x70b   : > { %15932 = vst.msk [vmem:[%s25625_s17 + $0x30] sm:$0xff] %vm15925_vm10, %v15899_v0  ;;  %v15621_v59 = vpop.permute.xlu1 %15620  ;;  %v26131_v0 = vld [vmem:[#allocation17_spill] sm:$0xff] }
 0x70c   : > { %v15869_v5 = vsel %vm15859_vm8, %v15836_v30, %v15621_v59  ;;  %v15619_v62 = vpop.permute.xlu0 %15618  ;;  %v15841_v51 = vsel %vm15826_vm7, %v26131_v0, %v26130_v34 }
 0x70d   : > { %v15902_v8 = vsel %vm15892_vm9, %v15869_v5, %v25425_v35  ;;  %v15868_v29 = vsel %vm15859_vm8, %v15835_v58, %v15619_v62  ;;  %v26133_v58 = vld [vmem:[#allocation25_spill] sm:$0xff] }
 0x70e   : > { %15935 = vst.msk [vmem:[%s25625_s17 + $0x48] sm:$0xff] %vm15925_vm10, %v15902_v8  ;;  %v15901_v53 = vsel %vm15892_vm9, %v15868_v29, %v26120_v19  ;;  %v15844_v5 = vsel %vm15826_vm7, %v26133_v58, %v25596_v10  ;;  %v26134_v8 = vld [vmem:[#allocation47_spill] sm:$0xff]  ;;  %v26135_v29 = vld [vmem:[#allocation24_spill] sm:$0xff] }
 0x70f   : > { %15934 = vst.msk [vmem:[%s25625_s17 + $0x40] sm:$0xff] %vm15925_vm10, %v15901_v53  ;;  %v15625_v12 = vpop.permute.xlu1 %15624  ;;  %v15843_v19 = vsel %vm15826_vm7, %v26135_v29, %v26134_v8  ;;  %v26136_v10 = vld [vmem:[#allocation56_spill] sm:$0xff]  ;;  %v26151_v29 = vld [vmem:[#allocation35_spill] sm:$0xff] }
 0x710   : > { %v15871_v35 = vsel %vm15859_vm8, %v15838_v7, %v15625_v12  ;;  %v15623_v48 = vpop.permute.xlu0 %15622 }
 0x711   : > { %v15904_v55 = vsel %vm15892_vm9, %v15871_v35, %v25433_v44  ;;  %v15870_v39 = vsel %vm15859_vm8, %v15837_v21, %v15623_v48  ;;  %v26138_v35 = vld [vmem:[#allocation66_spill] sm:$0xff] }
 0x712   : > { %15937 = vst.msk [vmem:[%s25625_s17 + $0x58] sm:$0xff] %vm15925_vm10, %v15904_v55  ;;  %v15903_v49 = vsel %vm15892_vm9, %v15870_v39, %v26124_v27  ;;  %v26139_v48 = vld [vmem:[#allocation26_spill] sm:$0xff] }
 0x713   : > { %15936 = vst.msk [vmem:[%s25625_s17 + $0x50] sm:$0xff] %vm15925_vm10, %v15903_v49  ;;  %v15629_v41 = vpop.permute.xlu1 %15628  ;;  %v15845_v55 = vsel %vm15826_vm7, %v26139_v48, %v26138_v35 }
 0x714   : > { %v15873_v44 = vsel %vm15859_vm8, %v15840_v13, %v15629_v41  ;;  %v15627_v33 = vpop.permute.xlu0 %15626  ;;  %v26141_v13 = vld [vmem:[#allocation29_spill] sm:$0xff] }
 0x715   : > { %v15906_v38 = vsel %vm15892_vm9, %v15873_v44, %v25441_v25  ;;  %v15872_v9 = vsel %vm15859_vm8, %v15839_v31, %v15627_v33  ;;  %v15848_v41 = vsel %vm15826_vm7, %v26141_v13, %v25600_v63  ;;  %v26143_v31 = vld [vmem:[#allocation28_spill] sm:$0xff]  ;;  %v26144_v63 = vld [vmem:[#allocation58_spill] sm:$0xff] }
 0x716   : > { %15939 = vst.msk [vmem:[%s25625_s17 + $0x68] sm:$0xff] %vm15925_vm10, %v15906_v38  ;;  %v15905_v17 = vsel %vm15892_vm9, %v15872_v9, %v26128_v16  ;;  %v15847_v44 = vsel %vm15826_vm7, %v26143_v31, %v26142_v47 }
 0x717   : > { %15938 = vst.msk [vmem:[%s25625_s17 + $0x60] sm:$0xff] %vm15925_vm10, %v15905_v17  ;;  %v15633_v60 = vpop.permute.xlu1 %15632  ;;  %v26145_v17 = vld [vmem:[#allocation31_spill] sm:$0xff] }
 0x718   : > { %v15875_v25 = vsel %vm15859_vm8, %v15842_v6, %v15633_v60  ;;  %v15631_v30 = vpop.permute.xlu0 %15630  ;;  %v15850_v37 = vsel %vm15826_vm7, %v26145_v17, %v25602_v26  ;;  %v26146_v60 = vld [vmem:[#allocation30_spill] sm:$0xff]  ;;  %v26147_v26 = vld [vmem:[#allocation59_spill] sm:$0xff] }
 0x719   : > { %v15908_v59 = vsel %vm15892_vm9, %v15875_v25, %v25449_v14  ;;  %v15874_v43 = vsel %vm15859_vm8, %v15841_v51, %v15631_v30  ;;  %v15849_v34 = vsel %vm15826_vm7, %v26146_v60, %v25154_v32 }
 0x71a   : > { %15941 = vst.msk [vmem:[%s25625_s17 + $0x78] sm:$0xff] %vm15925_vm10, %v15908_v59  ;;  %v15907_v11 = vsel %vm15892_vm9, %v15874_v43, %v26132_v46  ;;  %v26148_v59 = vld [vmem:[#allocation33_spill] sm:$0xff]  ;;  %v26149_v46 = vld [vmem:[#allocation32_spill] sm:$0xff] }
 0x71b   : > { %15940 = vst.msk [vmem:[%s25625_s17 + $0x70] sm:$0xff] %vm15925_vm10, %v15907_v11  ;;  %v15637_v62 = vpop.permute.xlu1 %15636  ;;  %v15852_v43 = vsel %vm15826_vm7, %v26148_v59, %v25604_v24  ;;  %v15851_v11 = vsel %vm15826_vm7, %v26149_v46, %v25162_v42  ;;  %v26150_v24 = vld [vmem:[#allocation60_spill] sm:$0xff] }
 0x71c   : > { %v15877_v14 = vsel %vm15859_vm8, %v15844_v5, %v15637_v62  ;;  %v15635_v53 = vpop.permute.xlu0 %15634 }
 0x71d   : > { %v15910_v50 = vsel %vm15892_vm9, %v15877_v14, %v25457_v2  ;;  %v15876_v7 = vsel %vm15859_vm8, %v15843_v19, %v15635_v53  ;;  %v15854_v19 = vsel %vm15826_vm7, %v26151_v29, %v25606_v3  ;;  %v26152_v14 = vld [vmem:[#allocation34_spill] sm:$0xff]  ;;  %v26153_v3 = vld [vmem:[#allocation61_spill] sm:$0xff] }
 0x71e   : > { %15943 = vst.msk [vmem:[%s25625_s17 + $0x88] sm:$0xff] %vm15925_vm10, %v15910_v50  ;;  %v15909_v12 = vsel %vm15892_vm9, %v15876_v7, %v26136_v10  ;;  %v15853_v53 = vsel %vm15826_vm7, %v26152_v14, %v25168_v20  ;;  %v15856_v20 = vsel %vm15826_vm7, %v26154_v57, %v25608_v1 }
 0x71f   : > { %15942 = vst.msk [vmem:[%s25625_s17 + $0x80] sm:$0xff] %vm15925_vm10, %v15909_v12  ;;  %v15641_v21 = vpop.permute.xlu1 %15640 }
 0x720   : > { %v15879_v2 = vsel %vm15859_vm8, %v15846_v40, %v15641_v21  ;;  %v15639_v39 = vpop.permute.xlu0 %15638  ;;  %v26155_v21 = vld [vmem:[#allocation36_spill] sm:$0xff] }
 0x721   : > { %v15912_v27 = vsel %vm15892_vm9, %v15879_v2, %v25465_v52  ;;  %v15878_v49 = vsel %vm15859_vm8, %v15845_v55, %v15639_v39  ;;  %v26156_v39 = vld [vmem:[#allocation62_spill] sm:$0xff] }
 0x722   : > { %15945 = vst.msk [vmem:[%s25625_s17 + $0x98] sm:$0xff] %vm15925_vm10, %v15912_v27  ;;  %v15911_v4 = vsel %vm15892_vm9, %v15878_v49, %v26140_v15 }
 0x723   : > { %15944 = vst.msk [vmem:[%s25625_s17 + $0x90] sm:$0xff] %vm15925_vm10, %v15911_v4  ;;  %v15645_v28 = vpop.permute.xlu1 %15644 }
 0x724   : > { %v15881_v52 = vsel %vm15859_vm8, %v15848_v41, %v15645_v28  ;;  %v15643_v33 = vpop.permute.xlu0 %15642 }
 0x725   : > { %v15914_v38 = vsel %vm15892_vm9, %v15881_v52, %v25476_v54  ;;  %v15880_v9 = vsel %vm15859_vm8, %v15847_v44, %v15643_v33 }
 0x726   : > { %15947 = vst.msk [vmem:[%s25625_s17 + $0xa8] sm:$0xff] %vm15925_vm10, %v15914_v38  ;;  %v15913_v16 = vsel %vm15892_vm9, %v15880_v9, %v26144_v63 }
 0x727   : > { %15946 = vst.msk [vmem:[%s25625_s17 + $0xa0] sm:$0xff] %vm15925_vm10, %v15913_v16  ;;  %v15649_v6 = vpop.permute.xlu1 %15648 }
 0x728   : > { %v15883_v54 = vsel %vm15859_vm8, %v15850_v37, %v15649_v6  ;;  %v15647_v0 = vpop.permute.xlu0 %15646 }
 0x729   : > { %v15916_v51 = vsel %vm15892_vm9, %v15883_v54, %v25480_v18  ;;  %v15882_v25 = vsel %vm15859_vm8, %v15849_v34, %v15647_v0 }
 0x72a   : > { %15949 = vst.msk [vmem:[%s25625_s17 + $0xb8] sm:$0xff] %vm15925_vm10, %v15916_v51  ;;  %v15915_v30 = vsel %vm15892_vm9, %v15882_v25, %v26147_v26 }
 0x72b   : > { %15948 = vst.msk [vmem:[%s25625_s17 + $0xb0] sm:$0xff] %vm15925_vm10, %v15915_v30  ;;  %v15653_v32 = vpop.permute.xlu1 %15652 }
 0x72c   : > { %v15885_v18 = vsel %vm15859_vm8, %v15852_v43, %v15653_v32  ;;  %v15651_v58 = vpop.permute.xlu0 %15650 }
 0x72d   : > { %v15918_v5 = vsel %vm15892_vm9, %v15885_v18, %v25488_v23  ;;  %v15884_v62 = vsel %vm15859_vm8, %v15851_v11, %v15651_v58 }
 0x72e   : > { %15951 = vst.msk [vmem:[%s25625_s17 + $0xc8] sm:$0xff] %vm15925_vm10, %v15918_v5  ;;  %v15917_v8 = vsel %vm15892_vm9, %v15884_v62, %v26150_v24 }
 0x72f   : > { %15950 = vst.msk [vmem:[%s25625_s17 + $0xc0] sm:$0xff] %vm15925_vm10, %v15917_v8  ;;  %v15657_v42 = vpop.permute.xlu1 %15656 }
 0x730   : > { %v15887_v23 = vsel %vm15859_vm8, %v15854_v19, %v15657_v42  ;;  %v15655_v50 = vpop.permute.xlu0 %15654 }
 0x731   : > { %v15920_v7 = vsel %vm15892_vm9, %v15887_v23, %v25498_v36  ;;  %v15886_v10 = vsel %vm15859_vm8, %v15853_v53, %v15655_v50  ;;  %v15855_v36 = vsel %vm15826_vm7, %v26155_v21, %v25181_v56 }
 0x732   : > { %15953 = vst.msk [vmem:[%s25625_s17 + $0xd8] sm:$0xff] %vm15925_vm10, %v15920_v7  ;;  %v15919_v12 = vsel %vm15892_vm9, %v15886_v10, %v26153_v3 }
 0x733   : > { %15952 = vst.msk [vmem:[%s25625_s17 + $0xd0] sm:$0xff] %vm15925_vm10, %v15919_v12  ;;  %v15661_v40 = vpop.permute.xlu1 %15660 }
 0x734   : > { %v15889_v35 = vsel %vm15859_vm8, %v15856_v20, %v15661_v40  ;;  %v15659_v48 = vpop.permute.xlu0 %15658 }
 0x735   : > { %v15922_v55 = vsel %vm15892_vm9, %v15889_v35, %v25510_v22  ;;  %v15888_v2 = vsel %vm15859_vm8, %v15855_v36, %v15659_v48  ;;  %v26157_v22 = vld [vmem:[#allocation39_spill] sm:$0xff] }
 0x736   : > { %15955 = vst.msk [vmem:[%s25625_s17 + $0xe8] sm:$0xff] %vm15925_vm10, %v15922_v55  ;;  %v15921_v1 = vsel %vm15892_vm9, %v15888_v2, %v26156_v39  ;;  %v15858_v15 = vsel %vm15826_vm7, %v26157_v22, %v25611_v45 }
 0x737   : > { %15954 = vst.msk [vmem:[%s25625_s17 + $0xe0] sm:$0xff] %vm15925_vm10, %v15921_v1  ;;  %v15665_v27 = vpop.permute.xlu1 %15664 }
 0x738   : > { %v15663_v56 = vpop.permute.xlu0 %15662  ;;  %v15891_v4 = vsel %vm15859_vm8, %v15858_v15, %v15665_v27 }
 0x739   : > { %v15890_v49 = vsel %vm15859_vm8, %v25196_v61, %v15663_v56 }
 0x73b   : > { %v15793_v13 = vpop.permute.xlu1 %15792 }
 0x73c   : > { %v15924_v41 = vsel %vm15892_vm9, %v15891_v4, %v15793_v13  ;;  %v15791_v28 = vpop.permute.xlu0 %15790 }
 0x73d   : > { %15957 = vst.msk [vmem:[%s25625_s17 + $0xf8] sm:$0xff] %vm15925_vm10, %v15924_v41  ;;  %v15923_v61 = vsel %vm15892_vm9, %v15890_v49, %v15791_v28 }
 0x73e   : > { %15956 = vst.msk [vmem:[%s25625_s17 + $0xf0] sm:$0xff] %vm15925_vm10, %v15923_v61 }
 0x73f   : > { %21432 = shalt.err (!%p21429_p3)
}
 0x740   : > { %s21433_s23 = scalar_lea.hbm %s25868_s29, 4096  ;;  %s21437_s27 = scalar_lea.hbm %s25931_s9, 8192 }
 0x741   : > { %p21434_p4 = scmp.ne.s32.totalorder %s25868_s29, %s21433_s23  ;;  %p21438_p9 = scmp.lt.u32.totalorder %s25868_s29, %s25931_s9 }
 0x742   : > { %p21439_p10 = scmp.lt.u32.totalorder %s21437_s27, %s21433_s23  ;;  %p21441_p12 = scmp.lt.u32.totalorder %s21433_s23, %s25868_s29 }
 0x743   : > { %p21435_p7 = pnand %p21434_p4, %p21580_p5 }
 0x744   : > { %p21440_p11 = por %p21439_p10, %p21438_p9 }
 0x745   : > { %p21436_p8 = pneg %p21435_p7 }
 0x746   : > { %p21442_p13 = por %p21441_p12, %p21440_p11 }
 0x748   : > { %p21443_p0 = pnand %p21442_p13, %p21436_p8 }
 0x74a   : > { %21446 = shalt.err (!%p21443_p0)
}
 0x74b   : > { %s21491_s16 = smov 128  }
 0x74c   : > { %21348 = dma.vmem_to_hbm [thread:$0]  (%p21580_p5), %s25871_s26, 4096, %s25868_s29, %s25880_s13, %s21491_s16, %s21491_s16, %s21488_s14  }
 0x74d PF: > { %p21354_p1 = scmp.ge.s32.totalorder %s21481_s12, 2  ;;  %s15987_s22 = sand.u32 1, %s21469_s30  }
 0x74e   : > { %s15988_s24 = scalar_lea.sflag [#allocation6], %s15987_s22 }
 0x74f   : > { %p21351_p2 = pnand %p21354_p1, %p21584_p6 }
 0x751   : > { %21464 = dma.done.wait (!%p21351_p2), %s15988_s24, 4096  }
 0x752   : > { %21466 = vsyncadd (!%p21351_p2), %s15988_s24, 4294963200  ;;  %p19_p3 = scmp.ge.s32.totalorder %s21567_s15, 4   ;;  %s26158_s30 = smov %s21473_s10 }
 0x753   : > { %s26159_s10 = smov %s21477_s11  ;;  %s26160_s11 = smov %s21578_s18 }
 0x754   : > { %s26161_s12 = smov %s21567_s15  ;;  %21 = sbr.rel (!%p19_p3) target bundleno = 3 (0x3), region = 131 }
 0x75b   :  { %15993 = vsyncpa [#allocation6], 1 }
 0x75c   :  { %15995 = vsyncpa [#allocation6 + $0x1], 1 }

</bundles_post_ra>
